<compile_context>
chip_gen: v7x
topology: tpu7x:2x2x1
jax: 0.10.0
libtpu: 0.0.40
codegen_flags: <defaults>
</compile_context>

<pallas_src>
import functools
import math

import jax
import jax.numpy as jnp
from jax.experimental import pallas as pl
from jax.experimental.pallas import tpu as pltpu  # noqa: F401  (kept per template)


# ----------------------------------------------------------------------------
# small helpers
# ----------------------------------------------------------------------------
def _bf16(x):
    return x.astype(jnp.bfloat16)


def _vspec(shape):
    nd = len(shape)
    return pl.BlockSpec(shape, lambda i, _nd=nd: (0,) * _nd)


def _cost(args, out_shape, flops, transcendentals=0):
    bytes_accessed = sum(math.prod(a.shape) * jnp.dtype(a.dtype).itemsize for a in args)
    bytes_accessed += math.prod(out_shape) * 4
    return pl.CostEstimate(flops=int(flops), transcendentals=int(transcendentals),
                           bytes_accessed=int(bytes_accessed))


def _call(kernel, args, out_shape, flops, transcendentals=0):
    """One grid=(1,) pallas_call with every array as a full-shape VMEM block."""
    return pl.pallas_call(
        kernel,
        out_shape=jax.ShapeDtypeStruct(out_shape, jnp.float32),
        grid=(1,),
        in_specs=[_vspec(a.shape) for a in args],
        out_specs=_vspec(out_shape),
        cost_estimate=_cost(args, out_shape, flops, transcendentals),
    )(*args)


# ----------------------------------------------------------------------------
# in-kernel building blocks (operate on values, everything stays in VMEM/vregs)
# ----------------------------------------------------------------------------
def _layer_norm(z, g, b, eps):
    mu = jnp.mean(z, axis=-1, keepdims=True)
    var = jnp.mean(jnp.square(z - mu), axis=-1, keepdims=True)
    return (z - mu) * jax.lax.rsqrt(var + eps) * g + b


def _tf_layer(h, mask, lw, *, B, T, nhead, eps):
    """Post-LN transformer encoder layer on a (B*T, D) activation block."""
    (wqkv, bqkv, wo, bo, ln1g, ln1b, wff1, bff1, wff2, bff2, ln2g, ln2b) = lw
    D = h.shape[-1]
    Dh = D // nhead
    scale = 1.0 / math.sqrt(Dh)

    # fused QKV projection (single lane-dense (BT, 3D) matmul)
    qkv = jnp.dot(_bf16(h), wqkv, preferred_element_type=jnp.float32) + bqkv
    q, k, v = qkv[:, :D], qkv[:, D:2 * D], qkv[:, 2 * D:]

    # scores for all (batch, head) pairs stacked along sublanes -> ONE softmax pass
    s_blocks = []
    for b in range(B):
        for hd in range(nhead):
            qs = _bf16(q[b * T:(b + 1) * T, hd * Dh:(hd + 1) * Dh])
            ks = _bf16(k[b * T:(b + 1) * T, hd * Dh:(hd + 1) * Dh])
            s = jax.lax.dot_general(qs, ks, (((1,), (1,)), ((), ())),
                                    preferred_element_type=jnp.float32)
            s_blocks.append(s * scale + mask[b])
    S = jnp.concatenate(s_blocks, axis=0)                      # (B*nhead*T, T)
    S = S - jnp.max(S, axis=-1, keepdims=True)
    P = jnp.exp(S)
    P = P * pl.reciprocal(jnp.sum(P, axis=-1, keepdims=True), approx=True)

    # P @ V folded straight into the O-projection (no lane-offset head concat)
    rows = []
    for b in range(B):
        acc = None
        for hd in range(nhead):
            r0 = (b * nhead + hd) * T
            pv = jnp.dot(_bf16(P[r0:r0 + T, :]),
                         _bf16(v[b * T:(b + 1) * T, hd * Dh:(hd + 1) * Dh]),
                         preferred_element_type=jnp.float32)            # (T, Dh)
            contrib = jnp.dot(_bf16(pv), wo[hd * Dh:(hd + 1) * Dh, :],
                              preferred_element_type=jnp.float32)       # (T, D)
            acc = contrib if acc is None else acc + contrib
        rows.append(acc)
    attn = jnp.concatenate(rows, axis=0) + bo                  # (BT, D)

    h1 = _layer_norm(h + attn, ln1g, ln1b, eps)
    ff = jnp.maximum(
        jnp.dot(_bf16(h1), wff1, preferred_element_type=jnp.float32) + bff1, 0.0)
    ff = jnp.dot(_bf16(ff), wff2, preferred_element_type=jnp.float32) + bff2
    return _layer_norm(h1 + ff, ln2g, ln2b, eps)


# ----------------------------------------------------------------------------
# kernels
# ----------------------------------------------------------------------------
def _img_encoder_kernel(cols_ref, w1_ref, b1_ref, w2_ref, b2_ref, wfc_ref, bfc_ref,
                        o_ref, *, N, P2, K2):
    """conv1(+relu) -> conv2(+relu) -> fc fully fused; conv2/fc are sums of
    sublane-aligned block matmuls on the VMEM-resident intermediates."""
    y1 = jnp.maximum(
        jnp.dot(_bf16(cols_ref[...]), w1_ref[...],
                preferred_element_type=jnp.float32) + b1_ref[...], 0.0)   # (K2*P2*N, C1)
    blk = P2 * N
    acc2 = jnp.zeros((blk, w2_ref.shape[-1]), jnp.float32)
    for t in range(K2):                                   # conv2 kernel offsets
        acc2 = acc2 + jnp.dot(_bf16(y1[t * blk:(t + 1) * blk, :]), w2_ref[t],
                              preferred_element_type=jnp.float32)
    y2 = jnp.maximum(acc2 + b2_ref[...], 0.0)             # (P2*N, C2)
    acc3 = jnp.zeros((N, wfc_ref.shape[-1]), jnp.float32)
    for s in range(P2):                                   # conv2 output positions
        acc3 = acc3 + jnp.dot(_bf16(y2[s * N:(s + 1) * N, :]), wfc_ref[s],
                              preferred_element_type=jnp.float32)
    o_ref[...] = acc3 + bfc_ref[...]


def _gripper_encoder_kernel(cols_ref, w1_ref, b1_ref, wfc_ref, bfc_ref, o_ref,
                            *, N, P1):
    y1 = jnp.maximum(
        jnp.dot(_bf16(cols_ref[...]), w1_ref[...],
                preferred_element_type=jnp.float32) + b1_ref[...], 0.0)   # (P1*N, C1)
    acc = jnp.zeros((N, wfc_ref.shape[-1]), jnp.float32)
    for s in range(P1):
        acc = acc + jnp.dot(_bf16(y1[s * N:(s + 1) * N, :]), wfc_ref[s],
                            preferred_element_type=jnp.float32)
    o_ref[...] = acc + bfc_ref[...]


def _encoder_branch_kernel(*refs, B, T, nhead, n_layers, eps):
    it = iter(refs)
    x_ref, pe_ref, m_ref, pool_ref, inw_ref, inb_ref = [next(it) for _ in range(6)]
    layer_refs = [[next(it) for _ in range(12)] for _ in range(n_layers)]
    hw_ref, hb_ref, o_ref = next(it), next(it), next(it)

    h = (jnp.dot(_bf16(x_ref[...]), inw_ref[...], preferred_element_type=jnp.float32)
         + inb_ref[...] + pe_ref[...])                                    # (BT, D)
    mask = m_ref[...]
    for lw in layer_refs:
        h = _tf_layer(h, mask, [r[...] for r in lw], B=B, T=T, nhead=nhead, eps=eps)
    pooled = jnp.dot(pool_ref[...], h, preferred_element_type=jnp.float32)  # (B, D)
    o_ref[...] = (jnp.dot(_bf16(pooled), hw_ref[...],
                          preferred_element_type=jnp.float32) + hb_ref[...])


def _decoder_branch_kernel(*refs, B, T, nhead, n_layers, eps):
    it = iter(refs)
    x_ref, pe_ref, m_ref, inw_ref, inb_ref = [next(it) for _ in range(5)]
    layer_refs = [[next(it) for _ in range(12)] for _ in range(n_layers)]
    hw_ref, hb_ref, o_ref = next(it), next(it), next(it)

    h = (jnp.dot(_bf16(x_ref[...]), inw_ref[...], preferred_element_type=jnp.float32)
         + inb_ref[...] + pe_ref[...])
    mask = m_ref[...]
    for lw in layer_refs:
        h = _tf_layer(h, mask, [r[...] for r in lw], B=B, T=T, nhead=nhead, eps=eps)
    o_ref[...] = (jnp.dot(_bf16(h), hw_ref[...],
                          preferred_element_type=jnp.float32) + hb_ref[...])


def _goal_prior_kernel(*refs, n_state, n_lang, n_prior):
    it = iter(refs)
    sg_ref, lg_ref, msk_ref = next(it), next(it), next(it)
    state_wb = [(next(it), next(it)) for _ in range(n_state)]
    lang_wb = [(next(it), next(it)) for _ in range(n_lang)]
    prior_wb = [(next(it), next(it)) for _ in range(n_prior)]
    o_ref = next(it)

    def run_mlp(x, wb):
        h = x
        for li, (w_ref, b_ref) in enumerate(wb):
            h = jnp.dot(_bf16(h), w_ref[...],
                        preferred_element_type=jnp.float32) + b_ref[...]
            if li < len(wb) - 1:
                h = jnp.maximum(h, 0.0)
        return h

    sg = run_mlp(sg_ref[...], state_wb)
    lg = run_mlp(lg_ref[...], lang_wb)
    m = msk_ref[...]                                   # (B, 1), 1.0 = language goal
    goal = m * lg + (1.0 - m) * sg
    pri = run_mlp(goal, prior_wb)
    o_ref[...] = jnp.concatenate([goal, pri], axis=-1)  # lane-dense single store


# ----------------------------------------------------------------------------
# wrappers (pure JAX glue + one pallas_call each)
# ----------------------------------------------------------------------------
def image_encoder_apply(p, x):
    """x: (N, 16, 16, 3) NHWC.  Single fused pallas_call for conv1->conv2->fc.
    The wrapper builds conv1 patches ordered so every later stage only needs
    contiguous, 8-aligned sublane blocks inside the kernel."""
    N = x.shape[0]
    blocks = []
    for i in range(3):                    # conv2 kernel offset (row)
        for j in range(3):                # conv2 kernel offset (col)
            for o in range(3):            # conv2 output row
                for q in range(3):        # conv2 output col
                    r1, c1 = 2 * o + i, 2 * q + j          # conv1 output pixel
                    patch = x[:, 2 * r1:2 * r1 + 3, 2 * c1:2 * c1 + 3, :]
                    blocks.append(patch.reshape(N, -1))
    cols = jnp.concatenate(blocks, axis=0)                 # (81*N, 27)

    w1 = _bf16(p["c1"]["w"].reshape(27, -1))
    b1 = p["c1"]["b"].reshape(1, -1)
    w2 = _bf16(p["c2"]["w"].reshape(9, 8, -1))             # (kernel offset, cin, cout)
    b2 = p["c2"]["b"].reshape(1, -1)
    wfc = _bf16(p["fc"]["w"].reshape(9, 16, -1))           # (spatial pos, cin, out)
    bfc = p["fc"]["b"].reshape(1, -1)
    out_dim = p["fc"]["w"].shape[1]
    flops = 2 * (cols.shape[0] * 27 * 8 + 9 * 9 * N * 8 * 16 + 9 * N * 16 * out_dim)
    return _call(functools.partial(_img_encoder_kernel, N=N, P2=9, K2=9),
                 [cols, w1, b1, w2, b2, wfc, bfc], (N, out_dim), flops)


def gripper_encoder_apply(p, x):
    """x: (N, 8, 8, 3) NHWC.  Single fused pallas_call for conv1->fc."""
    N = x.shape[0]
    blocks = []
    for o in range(3):
        for q in range(3):
            blocks.append(x[:, 2 * o:2 * o + 3, 2 * q:2 * q + 3, :].reshape(N, -1))
    cols = jnp.concatenate(blocks, axis=0)                 # (9*N, 27)
    w1 = _bf16(p["c1"]["w"].reshape(27, -1))
    b1 = p["c1"]["b"].reshape(1, -1)
    wfc = _bf16(p["fc"]["w"].reshape(9, 8, -1))
    bfc = p["fc"]["b"].reshape(1, -1)
    out_dim = p["fc"]["w"].shape[1]
    flops = 2 * (cols.shape[0] * 27 * 8 + 9 * N * 8 * out_dim)
    return _call(functools.partial(_gripper_encoder_kernel, N=N, P1=9),
                 [cols, w1, b1, wfc, bfc], (N, out_dim), flops)


def _layer_args(lp):
    D = lp["o"]["w"].shape[0]
    F = lp["ff1"]["w"].shape[1]
    return [
        _bf16(lp["qkv"]["w"]), lp["qkv"]["b"].reshape(1, 3 * D),
        _bf16(lp["o"]["w"]), lp["o"]["b"].reshape(1, D),
        lp["ln1_g"].reshape(1, D), lp["ln1_b"].reshape(1, D),
        _bf16(lp["ff1"]["w"]), lp["ff1"]["b"].reshape(1, F),
        _bf16(lp["ff2"]["w"]), lp["ff2"]["b"].reshape(1, D),
        lp["ln2_g"].reshape(1, D), lp["ln2_b"].reshape(1, D),
    ]


def _attn_mask(obs_length, B, T, causal):
    valid = jnp.arange(T)[None, :] < obs_length[:, None]             # (B, T)
    m = jnp.broadcast_to(
        jnp.where(valid[:, None, :], 0.0, -1e9).astype(jnp.float32), (B, T, T))
    if causal:
        c = jnp.where(jnp.arange(T)[:, None] >= jnp.arange(T)[None, :],
                      0.0, -1e9).astype(jnp.float32)
        m = jnp.minimum(m, c[None])
    return m, valid


def _branch_flops(BT, Din, D, F, T, n_layers, out_rows, Nout):
    per_layer = 2 * BT * (4 * D * D + 2 * D * F) + 4 * BT * T * D
    return 2 * BT * Din * D + n_layers * per_layer + 2 * out_rows * D * Nout


def encoder_branch_apply(tp, head, x, obs_length, *, nhead, eps=1e-5):
    """in_proj + PE + transformer layer(s) + masked mean-pool + output projection,
    all in ONE pallas_call.  x: (B, T, Din) -> (B, Nout)."""
    B, T, Din = x.shape
    D = tp["in_proj"]["w"].shape[1]
    F = tp["layers"][0]["ff1"]["w"].shape[1]
    BT = B * T
    Nout = head["w"].shape[1]
    n_layers = len(tp["layers"])

    mask, valid = _attn_mask(obs_length, B, T, causal=False)
    pe = jnp.tile(tp["pe"][:T], (B, 1))
    inv_len = 1.0 / jnp.maximum(obs_length.astype(jnp.float32), 1.0)
    rows = valid.astype(jnp.float32) * inv_len[:, None]              # (B, T)
    poolmat = (jnp.eye(B, dtype=jnp.float32)[:, :, None] * rows[None, :, :]
               ).reshape(B, BT)                                      # masked mean-pool matrix

    args = [x.reshape(BT, Din), pe, mask, poolmat,
            _bf16(tp["in_proj"]["w"]), tp["in_proj"]["b"].reshape(1, D)]
    for lp in tp["layers"]:
        args += _layer_args(lp)
    args += [_bf16(head["w"]), head["b"].reshape(1, Nout)]

    flops = _branch_flops(BT, Din, D, F, T, n_layers, B, Nout)
    transc = n_layers * B * nhead * T * T
    return _call(functools.partial(_encoder_branch_kernel, B=B, T=T, nhead=nhead,
                                   n_layers=n_layers, eps=eps),
                 args, (B, Nout), flops, transc)


def decoder_branch_apply(tp, head, x, obs_length, *, nhead, eps=1e-5):
    """in_proj + PE + causal transformer layer(s) + fused action head, ONE pallas_call.
    x: (B, T, Din) -> (B*T, Nout)."""
    B, T, Din = x.shape
    D = tp["in_proj"]["w"].shape[1]
    F = tp["layers"][0]["ff1"]["w"].shape[1]
    BT = B * T
    Nout = head["w"].shape[1]
    n_layers = len(tp["layers"])

    mask, _ = _attn_mask(obs_length, B, T, causal=True)
    pe = jnp.tile(tp["pe"][:T], (B, 1))

    args = [x.reshape(BT, Din), pe, mask,
            _bf16(tp["in_proj"]["w"]), tp["in_proj"]["b"].reshape(1, D)]
    for lp in tp["layers"]:
        args += _layer_args(lp)
    args += [_bf16(head["w"]), head["b"].reshape(1, Nout)]

    flops = _branch_flops(BT, Din, D, F, T, n_layers, BT, Nout)
    transc = n_layers * B * nhead * T * T
    return _call(functools.partial(_decoder_branch_kernel, B=B, T=T, nhead=nhead,
                                   n_layers=n_layers, eps=eps),
                 args, (BT, Nout), flops, transc)


def goal_prior_apply(params, start, goal_states, instr, mask_bool):
    """state-goal MLP + lang-goal MLP + mask-select + prior MLP in ONE pallas_call."""
    B = start.shape[0]
    sg_in = jnp.concatenate([start, goal_states], axis=-1)
    lg_in = jnp.concatenate([start, instr], axis=-1)
    maskf = mask_bool.astype(jnp.float32).reshape(B, 1)

    args = [sg_in, lg_in, maskf]
    mlps = (params["state_encoder"], params["lang_encoder"], params["prior"])
    for layers in mlps:
        for lyr in layers:
            args += [_bf16(lyr["w"]), lyr["b"].reshape(1, -1)]
    goal_dim = params["state_encoder"][-1]["w"].shape[1]
    prior_dim = params["prior"][-1]["w"].shape[1]
    flops = 2 * B * sum(l["w"].shape[0] * l["w"].shape[1] for mlp in mlps for l in mlp)

    out = _call(functools.partial(_goal_prior_kernel,
                                  n_state=len(params["state_encoder"]),
                                  n_lang=len(params["lang_encoder"]),
                                  n_prior=len(params["prior"])),
                args, (B, goal_dim + prior_dim), flops)
    return out[:, :goal_dim], out[:, goal_dim:]


# ----------------------------------------------------------------------------
# parameter init (deterministic, synthetic)
# ----------------------------------------------------------------------------
class KeyGen:
    def __init__(self, key):
        self.key = key

    def __call__(self):
        self.key, k = jax.random.split(self.key)
        return k


def dense_params(kg, d_in, d_out, scale=0.02):
    return {"w": scale * jax.random.normal(kg(), (d_in, d_out), jnp.float32),
            "b": jnp.zeros((d_out,), jnp.float32)}


def mlp_params(kg, d_in, d_hidden, d_out, n_layers):
    layers = [dense_params(kg, d_in, d_hidden)]
    for _ in range(n_layers - 1):
        layers.append(dense_params(kg, d_hidden, d_hidden))
    layers.append(dense_params(kg, d_hidden, d_out))
    return layers


def conv_params(kg, kh, kw, cin, cout, scale=0.05):
    return {"w": scale * jax.random.normal(kg(), (kh, kw, cin, cout), jnp.float32),
            "b": jnp.zeros((cout,), jnp.float32)}


def image_encoder_params(kg, out_dim):
    return {"c1": conv_params(kg, 3, 3, 3, 8),
            "c2": conv_params(kg, 3, 3, 8, 16),
            "fc": dense_params(kg, 3 * 3 * 16, out_dim)}


def gripper_encoder_params(kg, out_dim):
    return {"c1": conv_params(kg, 3, 3, 3, 8),
            "fc": dense_params(kg, 3 * 3 * 8, out_dim)}


def sinusoidal_pe(T, D):
    pos = jnp.arange(T, dtype=jnp.float32)[:, None]
    idx = jnp.arange(0, D, 2, dtype=jnp.float32)
    div = jnp.exp(-jnp.log(10000.0) * idx / D)
    pe = jnp.zeros((T, D), jnp.float32)
    pe = pe.at[:, 0::2].set(jnp.sin(pos * div))
    pe = pe.at[:, 1::2].set(jnp.cos(pos * div))
    return pe


def transformer_layer_params(kg, d_model, d_ff):
    return {
        "qkv": dense_params(kg, d_model, 3 * d_model),
        "o": dense_params(kg, d_model, d_model),
        "ff1": dense_params(kg, d_model, d_ff),
        "ff2": dense_params(kg, d_ff, d_model),
        "ln1_g": jnp.ones((d_model,), jnp.float32),
        "ln1_b": jnp.zeros((d_model,), jnp.float32),
        "ln2_g": jnp.ones((d_model,), jnp.float32),
        "ln2_b": jnp.zeros((d_model,), jnp.float32),
    }


def trajectory_transformer_params(kg, d_in, d_model, d_ff, num_layers, context_len):
    return {
        "in_proj": dense_params(kg, d_in, d_model),
        "pe": sinusoidal_pe(context_len, d_model),
        "layers": [transformer_layer_params(kg, d_model, d_ff) for _ in range(num_layers)],
    }


CONFIG = {
    "action_dim": 4,
    "latent_dim": 8,
    "lang_dim": 16,
    "n_dist": 3,
    "obs_dim": 32,
    "gripper_obs_dim": 16,
    "encoder": {"input_dim": 32, "nhead": 2, "hidden_dim": 64, "num_layers": 1,
                "dropout": 0.0, "context_length": 8, "use_positional_encodings": True},
    "goal_encoder": {"hidden_dimension": 32, "output_dimension": 16, "n_layers": 2},
    "prior": {"hidden_dim": 32, "num_layers": 2},
    "decoder": {"input_dim": 32, "nhead": 2, "hidden_dim": 64, "num_layers": 1,
                "dropout": 0.0, "context_length": 8, "use_positional_encodings": True},
}


def init_params(key, cfg):
    kg = KeyGen(key)
    enc_in = cfg["obs_dim"] + cfg["gripper_obs_dim"]
    goal_dim = cfg["goal_encoder"]["output_dimension"]
    dec_in = cfg["latent_dim"] + enc_in + goal_dim
    adim = cfg["action_dim"] * cfg["n_dist"]
    return {
        "img_encoder": image_encoder_params(kg, cfg["obs_dim"]),
        "gripper_encoder": gripper_encoder_params(kg, cfg["gripper_obs_dim"]),
        "traj_encoder": trajectory_transformer_params(
            kg, enc_in, cfg["encoder"]["input_dim"], cfg["encoder"]["hidden_dim"],
            cfg["encoder"]["num_layers"], cfg["encoder"]["context_length"]),
        "encoder_output": dense_params(kg, cfg["encoder"]["input_dim"],
                                       cfg["latent_dim"] * 2),
        "lang_encoder": mlp_params(kg, enc_in + cfg["lang_dim"],
                                   cfg["goal_encoder"]["hidden_dimension"], goal_dim,
                                   cfg["goal_encoder"]["n_layers"]),
        "state_encoder": mlp_params(kg, enc_in * 2,
                                    cfg["goal_encoder"]["hidden_dimension"], goal_dim,
                                    cfg["goal_encoder"]["n_layers"]),
        "prior": mlp_params(kg, goal_dim, cfg["prior"]["hidden_dim"],
                            cfg["latent_dim"] * 2, cfg["prior"]["num_layers"]),
        "traj_decoder": trajectory_transformer_params(
            kg, dec_in, cfg["decoder"]["input_dim"], cfg["decoder"]["hidden_dim"],
            cfg["decoder"]["num_layers"], cfg["decoder"]["context_length"]),
        # three decoder heads fused into one lane-dense (D, 3*adim) matmul
        "dec_heads": dense_params(kg, cfg["decoder"]["input_dim"], 3 * adim),
    }


# ----------------------------------------------------------------------------
# MCIL forward
# ----------------------------------------------------------------------------
def mcil_forward(params, data, sample_key, cfg):
    B, T = data["img_obs"].shape[:2]
    L = cfg["latent_dim"]
    adim = cfg["action_dim"] * cfg["n_dist"]

    # ---- _build_obs_encoder : two fused vision-encoder kernels ----
    img = data["img_obs"].reshape((B * T,) + data["img_obs"].shape[2:])
    grip = data["gripper_obs"].reshape((B * T,) + data["gripper_obs"].shape[2:])
    img_enc = image_encoder_apply(params["img_encoder"], img).reshape(B, T, -1)
    grip_enc = gripper_encoder_apply(params["gripper_encoder"], grip).reshape(B, T, -1)
    encoder_obs = jnp.concatenate([img_enc, grip_enc], axis=-1)           # (B, T, 48)

    # ---- encode (variational posterior) : ONE fused kernel ----
    enc = encoder_branch_apply(params["traj_encoder"], params["encoder_output"],
                               encoder_obs, data["obs_length"],
                               nhead=cfg["encoder"]["nhead"])             # (B, 2L)
    var_mean = enc[:, :L]
    var_cov_diag = jax.nn.softplus(enc[:, L:])
    var_cov = jax.vmap(jnp.diag)(var_cov_diag)                            # get_cov

    # ---- encode_goals + get_prior : ONE fused kernel ----
    start = encoder_obs[:, 0]
    goal_states = encoder_obs[jnp.arange(B), data["obs_length"] - 1]
    instr = data["instructions"].astype(jnp.float32)[:, 0]                # squeeze(1)
    goal_emb, pri = goal_prior_apply(params, start, goal_states, instr, data["mask"])
    prior_mean = pri[:, :L]
    prior_cov_diag = jax.nn.softplus(pri[:, L:])
    prior_cov = jax.vmap(jnp.diag)(prior_cov_diag)

    # ---- sample_latents (reparameterized MVN with diagonal covariance) ----
    eps = jax.random.normal(sample_key, var_mean.shape, jnp.float32)
    latents = var_mean + jnp.sqrt(var_cov_diag) * eps

    # ---- decode : ONE fused kernel (transformer + action heads) ----
    lat_rep = jnp.broadcast_to(latents[:, None, :], (B, T, L))
    goal_rep = jnp.broadcast_to(goal_emb[:, None, :], (B, T, goal_emb.shape[-1]))
    dec_in = jnp.concatenate([encoder_obs, lat_rep, goal_rep], axis=-1)   # (B, T, 72)
    heads = decoder_branch_apply(params["traj_decoder"], params["dec_heads"],
                                 dec_in, data["obs_length"],
                                 nhead=cfg["decoder"]["nhead"])           # (B*T, 3*adim)
    log_mixt_probs = heads[:, :adim].reshape(B, T, adim)
    means = heads[:, adim:2 * adim].reshape(B, T, adim)
    log_scales = heads[:, 2 * adim:].reshape(B, T, adim)
    actions = (log_mixt_probs, means, log_scales)
    return actions, (var_mean, var_cov), (prior_mean, prior_cov)


if __name__ == "__main__":
    key = jax.random.PRNGKey(0)
    k_params, k_img, k_grip, k_instr, k_sample = jax.random.split(key, 5)

    B, T = 2, 8
    data = {
        "img_obs": jax.random.normal(k_img, (B, T, 16, 16, 3), jnp.float32),
        "gripper_obs": jax.random.normal(k_grip, (B, T, 8, 8, 3), jnp.float32),
        "instructions": jax.random.normal(k_instr, (B, 1, CONFIG["lang_dim"]), jnp.float32),
        "obs_length": jnp.array([8, 6], jnp.int32),
        "mask": jnp.array([True, False]),
    }

    params = init_params(k_params, CONFIG)
    fwd = jax.jit(functools.partial(mcil_forward, cfg=CONFIG))
    out = fwd(params, data, k_sample)
    out = jax.tree_util.tree_map(jax.block_until_ready, out)

    (log_mixt, means, log_scales), (vm, vc), (pm, pc) = out
    adim = CONFIG["action_dim"] * CONFIG["n_dist"]
    L = CONFIG["latent_dim"]
    assert means.shape == (B, T, adim)
    assert log_mixt.shape == means.shape and log_scales.shape == means.shape
    assert vm.shape == (B, L) and vc.shape == (B, L, L)
    assert pm.shape == (B, L) and pc.shape == (B, L, L)
    assert all(bool(jnp.all(jnp.isfinite(x))) for x in (log_mixt, means, log_scales, vm, pm))
    print("KERNEL_OK")
</pallas_src>

<mosaic_0001>
module attributes {stable_mosaic.version = 11 : i64} {
  func.func @_img_encoder_kernel(%arg0: i32, %arg1: memref<1296x27xf32, #tpu.memory_space<vmem>>, %arg2: memref<27x8xbf16, #tpu.memory_space<vmem>>, %arg3: memref<1x8xf32, #tpu.memory_space<vmem>>, %arg4: memref<9x8x16xbf16, #tpu.memory_space<vmem>>, %arg5: memref<1x16xf32, #tpu.memory_space<vmem>>, %arg6: memref<9x16x32xbf16, #tpu.memory_space<vmem>>, %arg7: memref<1x32xf32, #tpu.memory_space<vmem>>, %arg8: memref<16x32xf32, #tpu.memory_space<vmem>>) attributes {dimension_semantics = [#tpu.dimension_semantics<arbitrary>], iteration_bounds = array<i64: 1>, scalar_prefetch = 0 : i64, scratch_operands = 0 : i64, tpu.core_type = #tpu.core_type<tc>, window_params = [{pipeline_mode = #tpu.pipeline_mode<synchronous>, transform_indices = @transform_0, window_bounds = array<i64: 1296, 27>}, {pipeline_mode = #tpu.pipeline_mode<synchronous>, transform_indices = @transform_1, window_bounds = array<i64: 27, 8>}, {pipeline_mode = #tpu.pipeline_mode<synchronous>, transform_indices = @transform_2, window_bounds = array<i64: 1, 8>}, {pipeline_mode = #tpu.pipeline_mode<synchronous>, transform_indices = @transform_3, window_bounds = array<i64: 9, 8, 16>}, {pipeline_mode = #tpu.pipeline_mode<synchronous>, transform_indices = @transform_4, window_bounds = array<i64: 1, 16>}, {pipeline_mode = #tpu.pipeline_mode<synchronous>, transform_indices = @transform_5, window_bounds = array<i64: 9, 16, 32>}, {pipeline_mode = #tpu.pipeline_mode<synchronous>, transform_indices = @transform_6, window_bounds = array<i64: 1, 32>}, {pipeline_mode = #tpu.pipeline_mode<synchronous>, transform_indices = @transform_7, window_bounds = array<i64: 16, 32>}]} {
    %c0 = arith.constant 0 : index
    %c0_0 = arith.constant 0 : index
    %0 = vector.load %arg1[%c0, %c0_0] : memref<1296x27xf32, #tpu.memory_space<vmem>>, vector<1296x27xf32>
    %1 = arith.truncf %0 : vector<1296x27xf32> to vector<1296x27xbf16>
    %c0_1 = arith.constant 0 : index
    %c0_2 = arith.constant 0 : index
    %2 = vector.load %arg2[%c0_1, %c0_2] : memref<27x8xbf16, #tpu.memory_space<vmem>>, vector<27x8xbf16>
    %cst = arith.constant dense<0.000000e+00> : vector<1296x8xf32>
    %3 = tpu.matmul %1, %2, %cst {dimension_numbers = #tpu.dot_dimension_numbers<[1], [0], [0], [1], [0, 0, 1, 1], [], []>} : vector<1296x27xbf16>, vector<27x8xbf16>, vector<1296x8xf32> -> vector<1296x8xf32>
    %c0_3 = arith.constant 0 : index
    %c0_4 = arith.constant 0 : index
    %4 = vector.load %arg3[%c0_3, %c0_4] : memref<1x8xf32, #tpu.memory_space<vmem>>, vector<1x8xf32>
    %5 = vector.broadcast %4 : vector<1x8xf32> to vector<1296x8xf32>
    %6 = arith.addf %3, %5 : vector<1296x8xf32>
    %cst_5 = arith.constant 0.000000e+00 : f32
    %7 = vector.broadcast %cst_5 : f32 to vector<1296x8xf32>
    %8 = arith.maximumf %6, %7 : vector<1296x8xf32>
    %cst_6 = arith.constant 0.000000e+00 : f32
    %9 = vector.broadcast %cst_6 : f32 to vector<144x16xf32>
    %10 = vector.extract_strided_slice %8 {offsets = [0, 0], sizes = [144, 8], strides = [1, 1]} : vector<1296x8xf32> to vector<144x8xf32>
    %11 = arith.truncf %10 : vector<144x8xf32> to vector<144x8xbf16>
    %c0_7 = arith.constant 0 : index
    %c0_8 = arith.constant 0 : index
    %c0_9 = arith.constant 0 : index
    %12 = vector.load %arg4[%c0_7, %c0_8, %c0_9] : memref<9x8x16xbf16, #tpu.memory_space<vmem>>, vector<1x8x16xbf16>
    %13 = vector.shape_cast %12 : vector<1x8x16xbf16> to vector<8x16xbf16>
    %cst_10 = arith.constant dense<0.000000e+00> : vector<144x16xf32>
    %14 = tpu.matmul %11, %13, %cst_10 {dimension_numbers = #tpu.dot_dimension_numbers<[1], [0], [0], [1], [0, 0, 1, 1], [], []>} : vector<144x8xbf16>, vector<8x16xbf16>, vector<144x16xf32> -> vector<144x16xf32>
    %15 = arith.addf %9, %14 : vector<144x16xf32>
    %16 = vector.extract_strided_slice %8 {offsets = [144, 0], sizes = [144, 8], strides = [1, 1]} : vector<1296x8xf32> to vector<144x8xf32>
    %17 = arith.truncf %16 : vector<144x8xf32> to vector<144x8xbf16>
    %c1 = arith.constant 1 : index
    %c0_11 = arith.constant 0 : index
    %c0_12 = arith.constant 0 : index
    %18 = vector.load %arg4[%c1, %c0_11, %c0_12] : memref<9x8x16xbf16, #tpu.memory_space<vmem>>, vector<1x8x16xbf16>
    %19 = vector.shape_cast %18 : vector<1x8x16xbf16> to vector<8x16xbf16>
    %cst_13 = arith.constant dense<0.000000e+00> : vector<144x16xf32>
    %20 = tpu.matmul %17, %19, %cst_13 {dimension_numbers = #tpu.dot_dimension_numbers<[1], [0], [0], [1], [0, 0, 1, 1], [], []>} : vector<144x8xbf16>, vector<8x16xbf16>, vector<144x16xf32> -> vector<144x16xf32>
    %21 = arith.addf %15, %20 : vector<144x16xf32>
    %22 = vector.extract_strided_slice %8 {offsets = [288, 0], sizes = [144, 8], strides = [1, 1]} : vector<1296x8xf32> to vector<144x8xf32>
    %23 = arith.truncf %22 : vector<144x8xf32> to vector<144x8xbf16>
    %c2 = arith.constant 2 : index
    %c0_14 = arith.constant 0 : index
    %c0_15 = arith.constant 0 : index
    %24 = vector.load %arg4[%c2, %c0_14, %c0_15] : memref<9x8x16xbf16, #tpu.memory_space<vmem>>, vector<1x8x16xbf16>
    %25 = vector.shape_cast %24 : vector<1x8x16xbf16> to vector<8x16xbf16>
    %cst_16 = arith.constant dense<0.000000e+00> : vector<144x16xf32>
    %26 = tpu.matmul %23, %25, %cst_16 {dimension_numbers = #tpu.dot_dimension_numbers<[1], [0], [0], [1], [0, 0, 1, 1], [], []>} : vector<144x8xbf16>, vector<8x16xbf16>, vector<144x16xf32> -> vector<144x16xf32>
    %27 = arith.addf %21, %26 : vector<144x16xf32>
    %28 = vector.extract_strided_slice %8 {offsets = [432, 0], sizes = [144, 8], strides = [1, 1]} : vector<1296x8xf32> to vector<144x8xf32>
    %29 = arith.truncf %28 : vector<144x8xf32> to vector<144x8xbf16>
    %c3 = arith.constant 3 : index
    %c0_17 = arith.constant 0 : index
    %c0_18 = arith.constant 0 : index
    %30 = vector.load %arg4[%c3, %c0_17, %c0_18] : memref<9x8x16xbf16, #tpu.memory_space<vmem>>, vector<1x8x16xbf16>
    %31 = vector.shape_cast %30 : vector<1x8x16xbf16> to vector<8x16xbf16>
    %cst_19 = arith.constant dense<0.000000e+00> : vector<144x16xf32>
    %32 = tpu.matmul %29, %31, %cst_19 {dimension_numbers = #tpu.dot_dimension_numbers<[1], [0], [0], [1], [0, 0, 1, 1], [], []>} : vector<144x8xbf16>, vector<8x16xbf16>, vector<144x16xf32> -> vector<144x16xf32>
    %33 = arith.addf %27, %32 : vector<144x16xf32>
    %34 = vector.extract_strided_slice %8 {offsets = [576, 0], sizes = [144, 8], strides = [1, 1]} : vector<1296x8xf32> to vector<144x8xf32>
    %35 = arith.truncf %34 : vector<144x8xf32> to vector<144x8xbf16>
    %c4 = arith.constant 4 : index
    %c0_20 = arith.constant 0 : index
    %c0_21 = arith.constant 0 : index
    %36 = vector.load %arg4[%c4, %c0_20, %c0_21] : memref<9x8x16xbf16, #tpu.memory_space<vmem>>, vector<1x8x16xbf16>
    %37 = vector.shape_cast %36 : vector<1x8x16xbf16> to vector<8x16xbf16>
    %cst_22 = arith.constant dense<0.000000e+00> : vector<144x16xf32>
    %38 = tpu.matmul %35, %37, %cst_22 {dimension_numbers = #tpu.dot_dimension_numbers<[1], [0], [0], [1], [0, 0, 1, 1], [], []>} : vector<144x8xbf16>, vector<8x16xbf16>, vector<144x16xf32> -> vector<144x16xf32>
    %39 = arith.addf %33, %38 : vector<144x16xf32>
    %40 = vector.extract_strided_slice %8 {offsets = [720, 0], sizes = [144, 8], strides = [1, 1]} : vector<1296x8xf32> to vector<144x8xf32>
    %41 = arith.truncf %40 : vector<144x8xf32> to vector<144x8xbf16>
    %c5 = arith.constant 5 : index
    %c0_23 = arith.constant 0 : index
    %c0_24 = arith.constant 0 : index
    %42 = vector.load %arg4[%c5, %c0_23, %c0_24] : memref<9x8x16xbf16, #tpu.memory_space<vmem>>, vector<1x8x16xbf16>
    %43 = vector.shape_cast %42 : vector<1x8x16xbf16> to vector<8x16xbf16>
    %cst_25 = arith.constant dense<0.000000e+00> : vector<144x16xf32>
    %44 = tpu.matmul %41, %43, %cst_25 {dimension_numbers = #tpu.dot_dimension_numbers<[1], [0], [0], [1], [0, 0, 1, 1], [], []>} : vector<144x8xbf16>, vector<8x16xbf16>, vector<144x16xf32> -> vector<144x16xf32>
    %45 = arith.addf %39, %44 : vector<144x16xf32>
    %46 = vector.extract_strided_slice %8 {offsets = [864, 0], sizes = [144, 8], strides = [1, 1]} : vector<1296x8xf32> to vector<144x8xf32>
    %47 = arith.truncf %46 : vector<144x8xf32> to vector<144x8xbf16>
    %c6 = arith.constant 6 : index
    %c0_26 = arith.constant 0 : index
    %c0_27 = arith.constant 0 : index
    %48 = vector.load %arg4[%c6, %c0_26, %c0_27] : memref<9x8x16xbf16, #tpu.memory_space<vmem>>, vector<1x8x16xbf16>
    %49 = vector.shape_cast %48 : vector<1x8x16xbf16> to vector<8x16xbf16>
    %cst_28 = arith.constant dense<0.000000e+00> : vector<144x16xf32>
    %50 = tpu.matmul %47, %49, %cst_28 {dimension_numbers = #tpu.dot_dimension_numbers<[1], [0], [0], [1], [0, 0, 1, 1], [], []>} : vector<144x8xbf16>, vector<8x16xbf16>, vector<144x16xf32> -> vector<144x16xf32>
    %51 = arith.addf %45, %50 : vector<144x16xf32>
    %52 = vector.extract_strided_slice %8 {offsets = [1008, 0], sizes = [144, 8], strides = [1, 1]} : vector<1296x8xf32> to vector<144x8xf32>
    %53 = arith.truncf %52 : vector<144x8xf32> to vector<144x8xbf16>
    %c7 = arith.constant 7 : index
    %c0_29 = arith.constant 0 : index
    %c0_30 = arith.constant 0 : index
    %54 = vector.load %arg4[%c7, %c0_29, %c0_30] : memref<9x8x16xbf16, #tpu.memory_space<vmem>>, vector<1x8x16xbf16>
    %55 = vector.shape_cast %54 : vector<1x8x16xbf16> to vector<8x16xbf16>
    %cst_31 = arith.constant dense<0.000000e+00> : vector<144x16xf32>
    %56 = tpu.matmul %53, %55, %cst_31 {dimension_numbers = #tpu.dot_dimension_numbers<[1], [0], [0], [1], [0, 0, 1, 1], [], []>} : vector<144x8xbf16>, vector<8x16xbf16>, vector<144x16xf32> -> vector<144x16xf32>
    %57 = arith.addf %51, %56 : vector<144x16xf32>
    %58 = vector.extract_strided_slice %8 {offsets = [1152, 0], sizes = [144, 8], strides = [1, 1]} : vector<1296x8xf32> to vector<144x8xf32>
    %59 = arith.truncf %58 : vector<144x8xf32> to vector<144x8xbf16>
    %c8 = arith.constant 8 : index
    %c0_32 = arith.constant 0 : index
    %c0_33 = arith.constant 0 : index
    %60 = vector.load %arg4[%c8, %c0_32, %c0_33] : memref<9x8x16xbf16, #tpu.memory_space<vmem>>, vector<1x8x16xbf16>
    %61 = vector.shape_cast %60 : vector<1x8x16xbf16> to vector<8x16xbf16>
    %cst_34 = arith.constant dense<0.000000e+00> : vector<144x16xf32>
    %62 = tpu.matmul %59, %61, %cst_34 {dimension_numbers = #tpu.dot_dimension_numbers<[1], [0], [0], [1], [0, 0, 1, 1], [], []>} : vector<144x8xbf16>, vector<8x16xbf16>, vector<144x16xf32> -> vector<144x16xf32>
    %63 = arith.addf %57, %62 : vector<144x16xf32>
    %c0_35 = arith.constant 0 : index
    %c0_36 = arith.constant 0 : index
    %64 = vector.load %arg5[%c0_35, %c0_36] : memref<1x16xf32, #tpu.memory_space<vmem>>, vector<1x16xf32>
    %65 = vector.broadcast %64 : vector<1x16xf32> to vector<144x16xf32>
    %66 = arith.addf %63, %65 : vector<144x16xf32>
    %cst_37 = arith.constant 0.000000e+00 : f32
    %67 = vector.broadcast %cst_37 : f32 to vector<144x16xf32>
    %68 = arith.maximumf %66, %67 : vector<144x16xf32>
    %cst_38 = arith.constant 0.000000e+00 : f32
    %69 = vector.broadcast %cst_38 : f32 to vector<16x32xf32>
    %70 = vector.extract_strided_slice %68 {offsets = [0, 0], sizes = [16, 16], strides = [1, 1]} : vector<144x16xf32> to vector<16x16xf32>
    %71 = arith.truncf %70 : vector<16x16xf32> to vector<16x16xbf16>
    %c0_39 = arith.constant 0 : index
    %c0_40 = arith.constant 0 : index
    %c0_41 = arith.constant 0 : index
    %72 = vector.load %arg6[%c0_39, %c0_40, %c0_41] : memref<9x16x32xbf16, #tpu.memory_space<vmem>>, vector<1x16x32xbf16>
    %73 = vector.shape_cast %72 : vector<1x16x32xbf16> to vector<16x32xbf16>
    %cst_42 = arith.constant dense<0.000000e+00> : vector<16x32xf32>
    %74 = tpu.matmul %71, %73, %cst_42 {dimension_numbers = #tpu.dot_dimension_numbers<[1], [0], [0], [1], [0, 0, 1, 1], [], []>} : vector<16x16xbf16>, vector<16x32xbf16>, vector<16x32xf32> -> vector<16x32xf32>
    %75 = arith.addf %69, %74 : vector<16x32xf32>
    %76 = vector.extract_strided_slice %68 {offsets = [16, 0], sizes = [16, 16], strides = [1, 1]} : vector<144x16xf32> to vector<16x16xf32>
    %77 = arith.truncf %76 : vector<16x16xf32> to vector<16x16xbf16>
    %c1_43 = arith.constant 1 : index
    %c0_44 = arith.constant 0 : index
    %c0_45 = arith.constant 0 : index
    %78 = vector.load %arg6[%c1_43, %c0_44, %c0_45] : memref<9x16x32xbf16, #tpu.memory_space<vmem>>, vector<1x16x32xbf16>
    %79 = vector.shape_cast %78 : vector<1x16x32xbf16> to vector<16x32xbf16>
    %cst_46 = arith.constant dense<0.000000e+00> : vector<16x32xf32>
    %80 = tpu.matmul %77, %79, %cst_46 {dimension_numbers = #tpu.dot_dimension_numbers<[1], [0], [0], [1], [0, 0, 1, 1], [], []>} : vector<16x16xbf16>, vector<16x32xbf16>, vector<16x32xf32> -> vector<16x32xf32>
    %81 = arith.addf %75, %80 : vector<16x32xf32>
    %82 = vector.extract_strided_slice %68 {offsets = [32, 0], sizes = [16, 16], strides = [1, 1]} : vector<144x16xf32> to vector<16x16xf32>
    %83 = arith.truncf %82 : vector<16x16xf32> to vector<16x16xbf16>
    %c2_47 = arith.constant 2 : index
    %c0_48 = arith.constant 0 : index
    %c0_49 = arith.constant 0 : index
    %84 = vector.load %arg6[%c2_47, %c0_48, %c0_49] : memref<9x16x32xbf16, #tpu.memory_space<vmem>>, vector<1x16x32xbf16>
    %85 = vector.shape_cast %84 : vector<1x16x32xbf16> to vector<16x32xbf16>
    %cst_50 = arith.constant dense<0.000000e+00> : vector<16x32xf32>
    %86 = tpu.matmul %83, %85, %cst_50 {dimension_numbers = #tpu.dot_dimension_numbers<[1], [0], [0], [1], [0, 0, 1, 1], [], []>} : vector<16x16xbf16>, vector<16x32xbf16>, vector<16x32xf32> -> vector<16x32xf32>
    %87 = arith.addf %81, %86 : vector<16x32xf32>
    %88 = vector.extract_strided_slice %68 {offsets = [48, 0], sizes = [16, 16], strides = [1, 1]} : vector<144x16xf32> to vector<16x16xf32>
    %89 = arith.truncf %88 : vector<16x16xf32> to vector<16x16xbf16>
    %c3_51 = arith.constant 3 : index
    %c0_52 = arith.constant 0 : index
    %c0_53 = arith.constant 0 : index
    %90 = vector.load %arg6[%c3_51, %c0_52, %c0_53] : memref<9x16x32xbf16, #tpu.memory_space<vmem>>, vector<1x16x32xbf16>
    %91 = vector.shape_cast %90 : vector<1x16x32xbf16> to vector<16x32xbf16>
    %cst_54 = arith.constant dense<0.000000e+00> : vector<16x32xf32>
    %92 = tpu.matmul %89, %91, %cst_54 {dimension_numbers = #tpu.dot_dimension_numbers<[1], [0], [0], [1], [0, 0, 1, 1], [], []>} : vector<16x16xbf16>, vector<16x32xbf16>, vector<16x32xf32> -> vector<16x32xf32>
    %93 = arith.addf %87, %92 : vector<16x32xf32>
    %94 = vector.extract_strided_slice %68 {offsets = [64, 0], sizes = [16, 16], strides = [1, 1]} : vector<144x16xf32> to vector<16x16xf32>
    %95 = arith.truncf %94 : vector<16x16xf32> to vector<16x16xbf16>
    %c4_55 = arith.constant 4 : index
    %c0_56 = arith.constant 0 : index
    %c0_57 = arith.constant 0 : index
    %96 = vector.load %arg6[%c4_55, %c0_56, %c0_57] : memref<9x16x32xbf16, #tpu.memory_space<vmem>>, vector<1x16x32xbf16>
    %97 = vector.shape_cast %96 : vector<1x16x32xbf16> to vector<16x32xbf16>
    %cst_58 = arith.constant dense<0.000000e+00> : vector<16x32xf32>
    %98 = tpu.matmul %95, %97, %cst_58 {dimension_numbers = #tpu.dot_dimension_numbers<[1], [0], [0], [1], [0, 0, 1, 1], [], []>} : vector<16x16xbf16>, vector<16x32xbf16>, vector<16x32xf32> -> vector<16x32xf32>
    %99 = arith.addf %93, %98 : vector<16x32xf32>
    %100 = vector.extract_strided_slice %68 {offsets = [80, 0], sizes = [16, 16], strides = [1, 1]} : vector<144x16xf32> to vector<16x16xf32>
    %101 = arith.truncf %100 : vector<16x16xf32> to vector<16x16xbf16>
    %c5_59 = arith.constant 5 : index
    %c0_60 = arith.constant 0 : index
    %c0_61 = arith.constant 0 : index
    %102 = vector.load %arg6[%c5_59, %c0_60, %c0_61] : memref<9x16x32xbf16, #tpu.memory_space<vmem>>, vector<1x16x32xbf16>
    %103 = vector.shape_cast %102 : vector<1x16x32xbf16> to vector<16x32xbf16>
    %cst_62 = arith.constant dense<0.000000e+00> : vector<16x32xf32>
    %104 = tpu.matmul %101, %103, %cst_62 {dimension_numbers = #tpu.dot_dimension_numbers<[1], [0], [0], [1], [0, 0, 1, 1], [], []>} : vector<16x16xbf16>, vector<16x32xbf16>, vector<16x32xf32> -> vector<16x32xf32>
    %105 = arith.addf %99, %104 : vector<16x32xf32>
    %106 = vector.extract_strided_slice %68 {offsets = [96, 0], sizes = [16, 16], strides = [1, 1]} : vector<144x16xf32> to vector<16x16xf32>
    %107 = arith.truncf %106 : vector<16x16xf32> to vector<16x16xbf16>
    %c6_63 = arith.constant 6 : index
    %c0_64 = arith.constant 0 : index
    %c0_65 = arith.constant 0 : index
    %108 = vector.load %arg6[%c6_63, %c0_64, %c0_65] : memref<9x16x32xbf16, #tpu.memory_space<vmem>>, vector<1x16x32xbf16>
    %109 = vector.shape_cast %108 : vector<1x16x32xbf16> to vector<16x32xbf16>
    %cst_66 = arith.constant dense<0.000000e+00> : vector<16x32xf32>
    %110 = tpu.matmul %107, %109, %cst_66 {dimension_numbers = #tpu.dot_dimension_numbers<[1], [0], [0], [1], [0, 0, 1, 1], [], []>} : vector<16x16xbf16>, vector<16x32xbf16>, vector<16x32xf32> -> vector<16x32xf32>
    %111 = arith.addf %105, %110 : vector<16x32xf32>
    %112 = vector.extract_strided_slice %68 {offsets = [112, 0], sizes = [16, 16], strides = [1, 1]} : vector<144x16xf32> to vector<16x16xf32>
    %113 = arith.truncf %112 : vector<16x16xf32> to vector<16x16xbf16>
    %c7_67 = arith.constant 7 : index
    %c0_68 = arith.constant 0 : index
    %c0_69 = arith.constant 0 : index
    %114 = vector.load %arg6[%c7_67, %c0_68, %c0_69] : memref<9x16x32xbf16, #tpu.memory_space<vmem>>, vector<1x16x32xbf16>
    %115 = vector.shape_cast %114 : vector<1x16x32xbf16> to vector<16x32xbf16>
    %cst_70 = arith.constant dense<0.000000e+00> : vector<16x32xf32>
    %116 = tpu.matmul %113, %115, %cst_70 {dimension_numbers = #tpu.dot_dimension_numbers<[1], [0], [0], [1], [0, 0, 1, 1], [], []>} : vector<16x16xbf16>, vector<16x32xbf16>, vector<16x32xf32> -> vector<16x32xf32>
    %117 = arith.addf %111, %116 : vector<16x32xf32>
    %118 = vector.extract_strided_slice %68 {offsets = [128, 0], sizes = [16, 16], strides = [1, 1]} : vector<144x16xf32> to vector<16x16xf32>
    %119 = arith.truncf %118 : vector<16x16xf32> to vector<16x16xbf16>
    %c8_71 = arith.constant 8 : index
    %c0_72 = arith.constant 0 : index
    %c0_73 = arith.constant 0 : index
    %120 = vector.load %arg6[%c8_71, %c0_72, %c0_73] : memref<9x16x32xbf16, #tpu.memory_space<vmem>>, vector<1x16x32xbf16>
    %121 = vector.shape_cast %120 : vector<1x16x32xbf16> to vector<16x32xbf16>
    %cst_74 = arith.constant dense<0.000000e+00> : vector<16x32xf32>
    %122 = tpu.matmul %119, %121, %cst_74 {dimension_numbers = #tpu.dot_dimension_numbers<[1], [0], [0], [1], [0, 0, 1, 1], [], []>} : vector<16x16xbf16>, vector<16x32xbf16>, vector<16x32xf32> -> vector<16x32xf32>
    %123 = arith.addf %117, %122 : vector<16x32xf32>
    %c0_75 = arith.constant 0 : index
    %c0_76 = arith.constant 0 : index
    %124 = vector.load %arg7[%c0_75, %c0_76] : memref<1x32xf32, #tpu.memory_space<vmem>>, vector<1x32xf32>
    %125 = vector.broadcast %124 : vector<1x32xf32> to vector<16x32xf32>
    %126 = arith.addf %123, %125 : vector<16x32xf32>
    %c0_77 = arith.constant 0 : index
    %c0_78 = arith.constant 0 : index
    %127 = vector.load %arg8[%c0_77, %c0_78] : memref<16x32xf32, #tpu.memory_space<vmem>>, vector<16x32xf32>
    tpu.vector_store %arg8[%c0_77, %c0_78], %126 {strides = array<i32>} : memref<16x32xf32, #tpu.memory_space<vmem>>, vector<16x32xf32>,
    return
  }
  func.func @transform_0(%arg0: i32) -> (i32, i32) {
    %c0_i32 = arith.constant 0 : i32
    %c0_i32_0 = arith.constant 0 : i32
    %c0_i32_1 = arith.constant 0 : i32
    return %c0_i32, %c0_i32_0 : i32, i32
  }
  func.func @transform_1(%arg0: i32) -> (i32, i32) {
    %c0_i32 = arith.constant 0 : i32
    %c0_i32_0 = arith.constant 0 : i32
    %c0_i32_1 = arith.constant 0 : i32
    return %c0_i32, %c0_i32_0 : i32, i32
  }
  func.func @transform_2(%arg0: i32) -> (i32, i32) {
    %c0_i32 = arith.constant 0 : i32
    %c0_i32_0 = arith.constant 0 : i32
    %c0_i32_1 = arith.constant 0 : i32
    return %c0_i32, %c0_i32_0 : i32, i32
  }
  func.func @transform_3(%arg0: i32) -> (i32, i32, i32) {
    %c0_i32 = arith.constant 0 : i32
    %c0_i32_0 = arith.constant 0 : i32
    %c0_i32_1 = arith.constant 0 : i32
    %c0_i32_2 = arith.constant 0 : i32
    return %c0_i32, %c0_i32_0, %c0_i32_1 : i32, i32, i32
  }
  func.func @transform_4(%arg0: i32) -> (i32, i32) {
    %c0_i32 = arith.constant 0 : i32
    %c0_i32_0 = arith.constant 0 : i32
    %c0_i32_1 = arith.constant 0 : i32
    return %c0_i32, %c0_i32_0 : i32, i32
  }
  func.func @transform_5(%arg0: i32) -> (i32, i32, i32) {
    %c0_i32 = arith.constant 0 : i32
    %c0_i32_0 = arith.constant 0 : i32
    %c0_i32_1 = arith.constant 0 : i32
    %c0_i32_2 = arith.constant 0 : i32
    return %c0_i32, %c0_i32_0, %c0_i32_1 : i32, i32, i32
  }
  func.func @transform_6(%arg0: i32) -> (i32, i32) {
    %c0_i32 = arith.constant 0 : i32
    %c0_i32_0 = arith.constant 0 : i32
    %c0_i32_1 = arith.constant 0 : i32
    return %c0_i32, %c0_i32_0 : i32, i32
  }
  func.func @transform_7(%arg0: i32) -> (i32, i32) {
    %c0_i32 = arith.constant 0 : i32
    %c0_i32_0 = arith.constant 0 : i32
    %c0_i32_1 = arith.constant 0 : i32
    return %c0_i32, %c0_i32_0 : i32, i32
  }
}

module attributes {stable_mosaic.version = 11 : i64} {
  func.func @_gripper_encoder_kernel(%arg0: i32, %arg1: memref<144x27xf32, #tpu.memory_space<vmem>>, %arg2: memref<27x8xbf16, #tpu.memory_space<vmem>>, %arg3: memref<1x8xf32, #tpu.memory_space<vmem>>, %arg4: memref<9x8x16xbf16, #tpu.memory_space<vmem>>, %arg5: memref<1x16xf32, #tpu.memory_space<vmem>>, %arg6: memref<16x16xf32, #tpu.memory_space<vmem>>) attributes {dimension_semantics = [#tpu.dimension_semantics<arbitrary>], iteration_bounds = array<i64: 1>, scalar_prefetch = 0 : i64, scratch_operands = 0 : i64, tpu.core_type = #tpu.core_type<tc>, window_params = [{pipeline_mode = #tpu.pipeline_mode<synchronous>, transform_indices = @transform_0, window_bounds = array<i64: 144, 27>}, {pipeline_mode = #tpu.pipeline_mode<synchronous>, transform_indices = @transform_1, window_bounds = array<i64: 27, 8>}, {pipeline_mode = #tpu.pipeline_mode<synchronous>, transform_indices = @transform_2, window_bounds = array<i64: 1, 8>}, {pipeline_mode = #tpu.pipeline_mode<synchronous>, transform_indices = @transform_3, window_bounds = array<i64: 9, 8, 16>}, {pipeline_mode = #tpu.pipeline_mode<synchronous>, transform_indices = @transform_4, window_bounds = array<i64: 1, 16>}, {pipeline_mode = #tpu.pipeline_mode<synchronous>, transform_indices = @transform_5, window_bounds = array<i64: 16, 16>}]} {
    %c0 = arith.constant 0 : index
    %c0_0 = arith.constant 0 : index
    %0 = vector.load %arg1[%c0, %c0_0] : memref<144x27xf32, #tpu.memory_space<vmem>>, vector<144x27xf32>
    %1 = arith.truncf %0 : vector<144x27xf32> to vector<144x27xbf16>
    %c0_1 = arith.constant 0 : index
    %c0_2 = arith.constant 0 : index
    %2 = vector.load %arg2[%c0_1, %c0_2] : memref<27x8xbf16, #tpu.memory_space<vmem>>, vector<27x8xbf16>
    %cst = arith.constant dense<0.000000e+00> : vector<144x8xf32>
    %3 = tpu.matmul %1, %2, %cst {dimension_numbers = #tpu.dot_dimension_numbers<[1], [0], [0], [1], [0, 0, 1, 1], [], []>} : vector<144x27xbf16>, vector<27x8xbf16>, vector<144x8xf32> -> vector<144x8xf32>
    %c0_3 = arith.constant 0 : index
    %c0_4 = arith.constant 0 : index
    %4 = vector.load %arg3[%c0_3, %c0_4] : memref<1x8xf32, #tpu.memory_space<vmem>>, vector<1x8xf32>
    %5 = vector.broadcast %4 : vector<1x8xf32> to vector<144x8xf32>
    %6 = arith.addf %3, %5 : vector<144x8xf32>
    %cst_5 = arith.constant 0.000000e+00 : f32
    %7 = vector.broadcast %cst_5 : f32 to vector<144x8xf32>
    %8 = arith.maximumf %6, %7 : vector<144x8xf32>
    %cst_6 = arith.constant 0.000000e+00 : f32
    %9 = vector.broadcast %cst_6 : f32 to vector<16x16xf32>
    %10 = vector.extract_strided_slice %8 {offsets = [0, 0], sizes = [16, 8], strides = [1, 1]} : vector<144x8xf32> to vector<16x8xf32>
    %11 = arith.truncf %10 : vector<16x8xf32> to vector<16x8xbf16>
    %c0_7 = arith.constant 0 : index
    %c0_8 = arith.constant 0 : index
    %c0_9 = arith.constant 0 : index
    %12 = vector.load %arg4[%c0_7, %c0_8, %c0_9] : memref<9x8x16xbf16, #tpu.memory_space<vmem>>, vector<1x8x16xbf16>
    %13 = vector.shape_cast %12 : vector<1x8x16xbf16> to vector<8x16xbf16>
    %cst_10 = arith.constant dense<0.000000e+00> : vector<16x16xf32>
    %14 = tpu.matmul %11, %13, %cst_10 {dimension_numbers = #tpu.dot_dimension_numbers<[1], [0], [0], [1], [0, 0, 1, 1], [], []>} : vector<16x8xbf16>, vector<8x16xbf16>, vector<16x16xf32> -> vector<16x16xf32>
    %15 = arith.addf %9, %14 : vector<16x16xf32>
    %16 = vector.extract_strided_slice %8 {offsets = [16, 0], sizes = [16, 8], strides = [1, 1]} : vector<144x8xf32> to vector<16x8xf32>
    %17 = arith.truncf %16 : vector<16x8xf32> to vector<16x8xbf16>
    %c1 = arith.constant 1 : index
    %c0_11 = arith.constant 0 : index
    %c0_12 = arith.constant 0 : index
    %18 = vector.load %arg4[%c1, %c0_11, %c0_12] : memref<9x8x16xbf16, #tpu.memory_space<vmem>>, vector<1x8x16xbf16>
    %19 = vector.shape_cast %18 : vector<1x8x16xbf16> to vector<8x16xbf16>
    %cst_13 = arith.constant dense<0.000000e+00> : vector<16x16xf32>
    %20 = tpu.matmul %17, %19, %cst_13 {dimension_numbers = #tpu.dot_dimension_numbers<[1], [0], [0], [1], [0, 0, 1, 1], [], []>} : vector<16x8xbf16>, vector<8x16xbf16>, vector<16x16xf32> -> vector<16x16xf32>
    %21 = arith.addf %15, %20 : vector<16x16xf32>
    %22 = vector.extract_strided_slice %8 {offsets = [32, 0], sizes = [16, 8], strides = [1, 1]} : vector<144x8xf32> to vector<16x8xf32>
    %23 = arith.truncf %22 : vector<16x8xf32> to vector<16x8xbf16>
    %c2 = arith.constant 2 : index
    %c0_14 = arith.constant 0 : index
    %c0_15 = arith.constant 0 : index
    %24 = vector.load %arg4[%c2, %c0_14, %c0_15] : memref<9x8x16xbf16, #tpu.memory_space<vmem>>, vector<1x8x16xbf16>
    %25 = vector.shape_cast %24 : vector<1x8x16xbf16> to vector<8x16xbf16>
    %cst_16 = arith.constant dense<0.000000e+00> : vector<16x16xf32>
    %26 = tpu.matmul %23, %25, %cst_16 {dimension_numbers = #tpu.dot_dimension_numbers<[1], [0], [0], [1], [0, 0, 1, 1], [], []>} : vector<16x8xbf16>, vector<8x16xbf16>, vector<16x16xf32> -> vector<16x16xf32>
    %27 = arith.addf %21, %26 : vector<16x16xf32>
    %28 = vector.extract_strided_slice %8 {offsets = [48, 0], sizes = [16, 8], strides = [1, 1]} : vector<144x8xf32> to vector<16x8xf32>
    %29 = arith.truncf %28 : vector<16x8xf32> to vector<16x8xbf16>
    %c3 = arith.constant 3 : index
    %c0_17 = arith.constant 0 : index
    %c0_18 = arith.constant 0 : index
    %30 = vector.load %arg4[%c3, %c0_17, %c0_18] : memref<9x8x16xbf16, #tpu.memory_space<vmem>>, vector<1x8x16xbf16>
    %31 = vector.shape_cast %30 : vector<1x8x16xbf16> to vector<8x16xbf16>
    %cst_19 = arith.constant dense<0.000000e+00> : vector<16x16xf32>
    %32 = tpu.matmul %29, %31, %cst_19 {dimension_numbers = #tpu.dot_dimension_numbers<[1], [0], [0], [1], [0, 0, 1, 1], [], []>} : vector<16x8xbf16>, vector<8x16xbf16>, vector<16x16xf32> -> vector<16x16xf32>
    %33 = arith.addf %27, %32 : vector<16x16xf32>
    %34 = vector.extract_strided_slice %8 {offsets = [64, 0], sizes = [16, 8], strides = [1, 1]} : vector<144x8xf32> to vector<16x8xf32>
    %35 = arith.truncf %34 : vector<16x8xf32> to vector<16x8xbf16>
    %c4 = arith.constant 4 : index
    %c0_20 = arith.constant 0 : index
    %c0_21 = arith.constant 0 : index
    %36 = vector.load %arg4[%c4, %c0_20, %c0_21] : memref<9x8x16xbf16, #tpu.memory_space<vmem>>, vector<1x8x16xbf16>
    %37 = vector.shape_cast %36 : vector<1x8x16xbf16> to vector<8x16xbf16>
    %cst_22 = arith.constant dense<0.000000e+00> : vector<16x16xf32>
    %38 = tpu.matmul %35, %37, %cst_22 {dimension_numbers = #tpu.dot_dimension_numbers<[1], [0], [0], [1], [0, 0, 1, 1], [], []>} : vector<16x8xbf16>, vector<8x16xbf16>, vector<16x16xf32> -> vector<16x16xf32>
    %39 = arith.addf %33, %38 : vector<16x16xf32>
    %40 = vector.extract_strided_slice %8 {offsets = [80, 0], sizes = [16, 8], strides = [1, 1]} : vector<144x8xf32> to vector<16x8xf32>
    %41 = arith.truncf %40 : vector<16x8xf32> to vector<16x8xbf16>
    %c5 = arith.constant 5 : index
    %c0_23 = arith.constant 0 : index
    %c0_24 = arith.constant 0 : index
    %42 = vector.load %arg4[%c5, %c0_23, %c0_24] : memref<9x8x16xbf16, #tpu.memory_space<vmem>>, vector<1x8x16xbf16>
    %43 = vector.shape_cast %42 : vector<1x8x16xbf16> to vector<8x16xbf16>
    %cst_25 = arith.constant dense<0.000000e+00> : vector<16x16xf32>
    %44 = tpu.matmul %41, %43, %cst_25 {dimension_numbers = #tpu.dot_dimension_numbers<[1], [0], [0], [1], [0, 0, 1, 1], [], []>} : vector<16x8xbf16>, vector<8x16xbf16>, vector<16x16xf32> -> vector<16x16xf32>
    %45 = arith.addf %39, %44 : vector<16x16xf32>
    %46 = vector.extract_strided_slice %8 {offsets = [96, 0], sizes = [16, 8], strides = [1, 1]} : vector<144x8xf32> to vector<16x8xf32>
    %47 = arith.truncf %46 : vector<16x8xf32> to vector<16x8xbf16>
    %c6 = arith.constant 6 : index
    %c0_26 = arith.constant 0 : index
    %c0_27 = arith.constant 0 : index
    %48 = vector.load %arg4[%c6, %c0_26, %c0_27] : memref<9x8x16xbf16, #tpu.memory_space<vmem>>, vector<1x8x16xbf16>
    %49 = vector.shape_cast %48 : vector<1x8x16xbf16> to vector<8x16xbf16>
    %cst_28 = arith.constant dense<0.000000e+00> : vector<16x16xf32>
    %50 = tpu.matmul %47, %49, %cst_28 {dimension_numbers = #tpu.dot_dimension_numbers<[1], [0], [0], [1], [0, 0, 1, 1], [], []>} : vector<16x8xbf16>, vector<8x16xbf16>, vector<16x16xf32> -> vector<16x16xf32>
    %51 = arith.addf %45, %50 : vector<16x16xf32>
    %52 = vector.extract_strided_slice %8 {offsets = [112, 0], sizes = [16, 8], strides = [1, 1]} : vector<144x8xf32> to vector<16x8xf32>
    %53 = arith.truncf %52 : vector<16x8xf32> to vector<16x8xbf16>
    %c7 = arith.constant 7 : index
    %c0_29 = arith.constant 0 : index
    %c0_30 = arith.constant 0 : index
    %54 = vector.load %arg4[%c7, %c0_29, %c0_30] : memref<9x8x16xbf16, #tpu.memory_space<vmem>>, vector<1x8x16xbf16>
    %55 = vector.shape_cast %54 : vector<1x8x16xbf16> to vector<8x16xbf16>
    %cst_31 = arith.constant dense<0.000000e+00> : vector<16x16xf32>
    %56 = tpu.matmul %53, %55, %cst_31 {dimension_numbers = #tpu.dot_dimension_numbers<[1], [0], [0], [1], [0, 0, 1, 1], [], []>} : vector<16x8xbf16>, vector<8x16xbf16>, vector<16x16xf32> -> vector<16x16xf32>
    %57 = arith.addf %51, %56 : vector<16x16xf32>
    %58 = vector.extract_strided_slice %8 {offsets = [128, 0], sizes = [16, 8], strides = [1, 1]} : vector<144x8xf32> to vector<16x8xf32>
    %59 = arith.truncf %58 : vector<16x8xf32> to vector<16x8xbf16>
    %c8 = arith.constant 8 : index
    %c0_32 = arith.constant 0 : index
    %c0_33 = arith.constant 0 : index
    %60 = vector.load %arg4[%c8, %c0_32, %c0_33] : memref<9x8x16xbf16, #tpu.memory_space<vmem>>, vector<1x8x16xbf16>
    %61 = vector.shape_cast %60 : vector<1x8x16xbf16> to vector<8x16xbf16>
    %cst_34 = arith.constant dense<0.000000e+00> : vector<16x16xf32>
    %62 = tpu.matmul %59, %61, %cst_34 {dimension_numbers = #tpu.dot_dimension_numbers<[1], [0], [0], [1], [0, 0, 1, 1], [], []>} : vector<16x8xbf16>, vector<8x16xbf16>, vector<16x16xf32> -> vector<16x16xf32>
    %63 = arith.addf %57, %62 : vector<16x16xf32>
    %c0_35 = arith.constant 0 : index
    %c0_36 = arith.constant 0 : index
    %64 = vector.load %arg5[%c0_35, %c0_36] : memref<1x16xf32, #tpu.memory_space<vmem>>, vector<1x16xf32>
    %65 = vector.broadcast %64 : vector<1x16xf32> to vector<16x16xf32>
    %66 = arith.addf %63, %65 : vector<16x16xf32>
    %c0_37 = arith.constant 0 : index
    %c0_38 = arith.constant 0 : index
    %67 = vector.load %arg6[%c0_37, %c0_38] : memref<16x16xf32, #tpu.memory_space<vmem>>, vector<16x16xf32>
    tpu.vector_store %arg6[%c0_37, %c0_38], %66 {strides = array<i32>} : memref<16x16xf32, #tpu.memory_space<vmem>>, vector<16x16xf32>,
    return
  }
  func.func @transform_0(%arg0: i32) -> (i32, i32) {
    %c0_i32 = arith.constant 0 : i32
    %c0_i32_0 = arith.constant 0 : i32
    %c0_i32_1 = arith.constant 0 : i32
    return %c0_i32, %c0_i32_0 : i32, i32
  }
  func.func @transform_1(%arg0: i32) -> (i32, i32) {
    %c0_i32 = arith.constant 0 : i32
    %c0_i32_0 = arith.constant 0 : i32
    %c0_i32_1 = arith.constant 0 : i32
    return %c0_i32, %c0_i32_0 : i32, i32
  }
  func.func @transform_2(%arg0: i32) -> (i32, i32) {
    %c0_i32 = arith.constant 0 : i32
    %c0_i32_0 = arith.constant 0 : i32
    %c0_i32_1 = arith.constant 0 : i32
    return %c0_i32, %c0_i32_0 : i32, i32
  }
  func.func @transform_3(%arg0: i32) -> (i32, i32, i32) {
    %c0_i32 = arith.constant 0 : i32
    %c0_i32_0 = arith.constant 0 : i32
    %c0_i32_1 = arith.constant 0 : i32
    %c0_i32_2 = arith.constant 0 : i32
    return %c0_i32, %c0_i32_0, %c0_i32_1 : i32, i32, i32
  }
  func.func @transform_4(%arg0: i32) -> (i32, i32) {
    %c0_i32 = arith.constant 0 : i32
    %c0_i32_0 = arith.constant 0 : i32
    %c0_i32_1 = arith.constant 0 : i32
    return %c0_i32, %c0_i32_0 : i32, i32
  }
  func.func @transform_5(%arg0: i32) -> (i32, i32) {
    %c0_i32 = arith.constant 0 : i32
    %c0_i32_0 = arith.constant 0 : i32
    %c0_i32_1 = arith.constant 0 : i32
    return %c0_i32, %c0_i32_0 : i32, i32
  }
}

module attributes {stable_mosaic.version = 11 : i64} {
  func.func @_encoder_branch_kernel(%arg0: i32, %arg1: memref<16x48xf32, #tpu.memory_space<vmem>>, %arg2: memref<16x32xf32, #tpu.memory_space<vmem>>, %arg3: memref<2x8x8xf32, #tpu.memory_space<vmem>>, %arg4: memref<2x16xf32, #tpu.memory_space<vmem>>, %arg5: memref<48x32xbf16, #tpu.memory_space<vmem>>, %arg6: memref<1x32xf32, #tpu.memory_space<vmem>>, %arg7: memref<32x96xbf16, #tpu.memory_space<vmem>>, %arg8: memref<1x96xf32, #tpu.memory_space<vmem>>, %arg9: memref<32x32xbf16, #tpu.memory_space<vmem>>, %arg10: memref<1x32xf32, #tpu.memory_space<vmem>>, %arg11: memref<1x32xf32, #tpu.memory_space<vmem>>, %arg12: memref<1x32xf32, #tpu.memory_space<vmem>>, %arg13: memref<32x64xbf16, #tpu.memory_space<vmem>>, %arg14: memref<1x64xf32, #tpu.memory_space<vmem>>, %arg15: memref<64x32xbf16, #tpu.memory_space<vmem>>, %arg16: memref<1x32xf32, #tpu.memory_space<vmem>>, %arg17: memref<1x32xf32, #tpu.memory_space<vmem>>, %arg18: memref<1x32xf32, #tpu.memory_space<vmem>>, %arg19: memref<32x16xbf16, #tpu.memory_space<vmem>>, %arg20: memref<1x16xf32, #tpu.memory_space<vmem>>, %arg21: memref<2x16xf32, #tpu.memory_space<vmem>>) attributes {dimension_semantics = [#tpu.dimension_semantics<arbitrary>], iteration_bounds = array<i64: 1>, scalar_prefetch = 0 : i64, scratch_operands = 0 : i64, tpu.core_type = #tpu.core_type<tc>, window_params = [{pipeline_mode = #tpu.pipeline_mode<synchronous>, transform_indices = @transform_0, window_bounds = array<i64: 16, 48>}, {pipeline_mode = #tpu.pipeline_mode<synchronous>, transform_indices = @transform_1, window_bounds = array<i64: 16, 32>}, {pipeline_mode = #tpu.pipeline_mode<synchronous>, transform_indices = @transform_2, window_bounds = array<i64: 2, 8, 8>}, {pipeline_mode = #tpu.pipeline_mode<synchronous>, transform_indices = @transform_3, window_bounds = array<i64: 2, 16>}, {pipeline_mode = #tpu.pipeline_mode<synchronous>, transform_indices = @transform_4, window_bounds = array<i64: 48, 32>}, {pipeline_mode = #tpu.pipeline_mode<synchronous>, transform_indices = @transform_5, window_bounds = array<i64: 1, 32>}, {pipeline_mode = #tpu.pipeline_mode<synchronous>, transform_indices = @transform_6, window_bounds = array<i64: 32, 96>}, {pipeline_mode = #tpu.pipeline_mode<synchronous>, transform_indices = @transform_7, window_bounds = array<i64: 1, 96>}, {pipeline_mode = #tpu.pipeline_mode<synchronous>, transform_indices = @transform_8, window_bounds = array<i64: 32, 32>}, {pipeline_mode = #tpu.pipeline_mode<synchronous>, transform_indices = @transform_9, window_bounds = array<i64: 1, 32>}, {pipeline_mode = #tpu.pipeline_mode<synchronous>, transform_indices = @transform_10, window_bounds = array<i64: 1, 32>}, {pipeline_mode = #tpu.pipeline_mode<synchronous>, transform_indices = @transform_11, window_bounds = array<i64: 1, 32>}, {pipeline_mode = #tpu.pipeline_mode<synchronous>, transform_indices = @transform_12, window_bounds = array<i64: 32, 64>}, {pipeline_mode = #tpu.pipeline_mode<synchronous>, transform_indices = @transform_13, window_bounds = array<i64: 1, 64>}, {pipeline_mode = #tpu.pipeline_mode<synchronous>, transform_indices = @transform_14, window_bounds = array<i64: 64, 32>}, {pipeline_mode = #tpu.pipeline_mode<synchronous>, transform_indices = @transform_15, window_bounds = array<i64: 1, 32>}, {pipeline_mode = #tpu.pipeline_mode<synchronous>, transform_indices = @transform_16, window_bounds = array<i64: 1, 32>}, {pipeline_mode = #tpu.pipeline_mode<synchronous>, transform_indices = @transform_17, window_bounds = array<i64: 1, 32>}, {pipeline_mode = #tpu.pipeline_mode<synchronous>, transform_indices = @transform_18, window_bounds = array<i64: 32, 16>}, {pipeline_mode = #tpu.pipeline_mode<synchronous>, transform_indices = @transform_19, window_bounds = array<i64: 1, 16>}, {pipeline_mode = #tpu.pipeline_mode<synchronous>, transform_indices = @transform_20, window_bounds = array<i64: 2, 16>}]} {
    %c0 = arith.constant 0 : index
    %c0_0 = arith.constant 0 : index
    %0 = vector.load %arg1[%c0, %c0_0] : memref<16x48xf32, #tpu.memory_space<vmem>>, vector<16x48xf32>
    %1 = arith.truncf %0 : vector<16x48xf32> to vector<16x48xbf16>
    %c0_1 = arith.constant 0 : index
    %c0_2 = arith.constant 0 : index
    %2 = vector.load %arg5[%c0_1, %c0_2] : memref<48x32xbf16, #tpu.memory_space<vmem>>, vector<48x32xbf16>
    %cst = arith.constant dense<0.000000e+00> : vector<16x32xf32>
    %3 = tpu.matmul %1, %2, %cst {dimension_numbers = #tpu.dot_dimension_numbers<[1], [0], [0], [1], [0, 0, 1, 1], [], []>} : vector<16x48xbf16>, vector<48x32xbf16>, vector<16x32xf32> -> vector<16x32xf32>
    %c0_3 = arith.constant 0 : index
    %c0_4 = arith.constant 0 : index
    %4 = vector.load %arg6[%c0_3, %c0_4] : memref<1x32xf32, #tpu.memory_space<vmem>>, vector<1x32xf32>
    %5 = vector.broadcast %4 : vector<1x32xf32> to vector<16x32xf32>
    %6 = arith.addf %3, %5 : vector<16x32xf32>
    %c0_5 = arith.constant 0 : index
    %c0_6 = arith.constant 0 : index
    %7 = vector.load %arg2[%c0_5, %c0_6] : memref<16x32xf32, #tpu.memory_space<vmem>>, vector<16x32xf32>
    %8 = arith.addf %6, %7 : vector<16x32xf32>
    %c0_7 = arith.constant 0 : index
    %c0_8 = arith.constant 0 : index
    %c0_9 = arith.constant 0 : index
    %9 = vector.load %arg3[%c0_7, %c0_8, %c0_9] : memref<2x8x8xf32, #tpu.memory_space<vmem>>, vector<2x8x8xf32>
    %c0_10 = arith.constant 0 : index
    %c0_11 = arith.constant 0 : index
    %10 = vector.load %arg7[%c0_10, %c0_11] : memref<32x96xbf16, #tpu.memory_space<vmem>>, vector<32x96xbf16>
    %c0_12 = arith.constant 0 : index
    %c0_13 = arith.constant 0 : index
    %11 = vector.load %arg8[%c0_12, %c0_13] : memref<1x96xf32, #tpu.memory_space<vmem>>, vector<1x96xf32>
    %c0_14 = arith.constant 0 : index
    %c0_15 = arith.constant 0 : index
    %12 = vector.load %arg9[%c0_14, %c0_15] : memref<32x32xbf16, #tpu.memory_space<vmem>>, vector<32x32xbf16>
    %c0_16 = arith.constant 0 : index
    %c0_17 = arith.constant 0 : index
    %13 = vector.load %arg10[%c0_16, %c0_17] : memref<1x32xf32, #tpu.memory_space<vmem>>, vector<1x32xf32>
    %c0_18 = arith.constant 0 : index
    %c0_19 = arith.constant 0 : index
    %14 = vector.load %arg11[%c0_18, %c0_19] : memref<1x32xf32, #tpu.memory_space<vmem>>, vector<1x32xf32>
    %c0_20 = arith.constant 0 : index
    %c0_21 = arith.constant 0 : index
    %15 = vector.load %arg12[%c0_20, %c0_21] : memref<1x32xf32, #tpu.memory_space<vmem>>, vector<1x32xf32>
    %c0_22 = arith.constant 0 : index
    %c0_23 = arith.constant 0 : index
    %16 = vector.load %arg13[%c0_22, %c0_23] : memref<32x64xbf16, #tpu.memory_space<vmem>>, vector<32x64xbf16>
    %c0_24 = arith.constant 0 : index
    %c0_25 = arith.constant 0 : index
    %17 = vector.load %arg14[%c0_24, %c0_25] : memref<1x64xf32, #tpu.memory_space<vmem>>, vector<1x64xf32>
    %c0_26 = arith.constant 0 : index
    %c0_27 = arith.constant 0 : index
    %18 = vector.load %arg15[%c0_26, %c0_27] : memref<64x32xbf16, #tpu.memory_space<vmem>>, vector<64x32xbf16>
    %c0_28 = arith.constant 0 : index
    %c0_29 = arith.constant 0 : index
    %19 = vector.load %arg16[%c0_28, %c0_29] : memref<1x32xf32, #tpu.memory_space<vmem>>, vector<1x32xf32>
    %c0_30 = arith.constant 0 : index
    %c0_31 = arith.constant 0 : index
    %20 = vector.load %arg17[%c0_30, %c0_31] : memref<1x32xf32, #tpu.memory_space<vmem>>, vector<1x32xf32>
    %c0_32 = arith.constant 0 : index
    %c0_33 = arith.constant 0 : index
    %21 = vector.load %arg18[%c0_32, %c0_33] : memref<1x32xf32, #tpu.memory_space<vmem>>, vector<1x32xf32>
    %22 = arith.truncf %8 : vector<16x32xf32> to vector<16x32xbf16>
    %cst_34 = arith.constant dense<0.000000e+00> : vector<16x96xf32>
    %23 = tpu.matmul %22, %10, %cst_34 {dimension_numbers = #tpu.dot_dimension_numbers<[1], [0], [0], [1], [0, 0, 1, 1], [], []>} : vector<16x32xbf16>, vector<32x96xbf16>, vector<16x96xf32> -> vector<16x96xf32>
    %24 = vector.broadcast %11 : vector<1x96xf32> to vector<16x96xf32>
    %25 = arith.addf %23, %24 : vector<16x96xf32>
    %26 = vector.extract_strided_slice %25 {offsets = [0, 0], sizes = [16, 32], strides = [1, 1]} : vector<16x96xf32> to vector<16x32xf32>
    %27 = vector.extract_strided_slice %25 {offsets = [0, 32], sizes = [16, 32], strides = [1, 1]} : vector<16x96xf32> to vector<16x32xf32>
    %28 = vector.extract_strided_slice %25 {offsets = [0, 64], sizes = [16, 32], strides = [1, 1]} : vector<16x96xf32> to vector<16x32xf32>
    %29 = vector.extract_strided_slice %26 {offsets = [0, 0], sizes = [8, 16], strides = [1, 1]} : vector<16x32xf32> to vector<8x16xf32>
    %30 = arith.truncf %29 : vector<8x16xf32> to vector<8x16xbf16>
    %31 = vector.extract_strided_slice %27 {offsets = [0, 0], sizes = [8, 16], strides = [1, 1]} : vector<16x32xf32> to vector<8x16xf32>
    %32 = arith.truncf %31 : vector<8x16xf32> to vector<8x16xbf16>
    %cst_35 = arith.constant dense<0.000000e+00> : vector<8x8xf32>
    %33 = tpu.matmul %30, %32, %cst_35 {dimension_numbers = #tpu.dot_dimension_numbers<[1], [1], [0], [0], [0, 0, 1, 0], [], []>} : vector<8x16xbf16>, vector<8x16xbf16>, vector<8x8xf32> -> vector<8x8xf32>
    %cst_36 = arith.constant 2.500000e-01 : f32
    %34 = vector.broadcast %cst_36 : f32 to vector<8x8xf32>
    %35 = arith.mulf %33, %34 : vector<8x8xf32>
    %36 = vector.extract_strided_slice %9 {offsets = [0, 0, 0], sizes = [1, 8, 8], strides = [1, 1, 1]} : vector<2x8x8xf32> to vector<1x8x8xf32>
    %37 = vector.shape_cast %36 : vector<1x8x8xf32> to vector<8x8xf32>
    %38 = arith.addf %35, %37 : vector<8x8xf32>
    %39 = vector.extract_strided_slice %26 {offsets = [0, 16], sizes = [8, 16], strides = [1, 1]} : vector<16x32xf32> to vector<8x16xf32>
    %40 = arith.truncf %39 : vector<8x16xf32> to vector<8x16xbf16>
    %41 = vector.extract_strided_slice %27 {offsets = [0, 16], sizes = [8, 16], strides = [1, 1]} : vector<16x32xf32> to vector<8x16xf32>
    %42 = arith.truncf %41 : vector<8x16xf32> to vector<8x16xbf16>
    %cst_37 = arith.constant dense<0.000000e+00> : vector<8x8xf32>
    %43 = tpu.matmul %40, %42, %cst_37 {dimension_numbers = #tpu.dot_dimension_numbers<[1], [1], [0], [0], [0, 0, 1, 0], [], []>} : vector<8x16xbf16>, vector<8x16xbf16>, vector<8x8xf32> -> vector<8x8xf32>
    %cst_38 = arith.constant 2.500000e-01 : f32
    %44 = vector.broadcast %cst_38 : f32 to vector<8x8xf32>
    %45 = arith.mulf %43, %44 : vector<8x8xf32>
    %46 = vector.extract_strided_slice %9 {offsets = [0, 0, 0], sizes = [1, 8, 8], strides = [1, 1, 1]} : vector<2x8x8xf32> to vector<1x8x8xf32>
    %47 = vector.shape_cast %46 : vector<1x8x8xf32> to vector<8x8xf32>
    %48 = arith.addf %45, %47 : vector<8x8xf32>
    %49 = vector.extract_strided_slice %26 {offsets = [8, 0], sizes = [8, 16], strides = [1, 1]} : vector<16x32xf32> to vector<8x16xf32>
    %50 = arith.truncf %49 : vector<8x16xf32> to vector<8x16xbf16>
    %51 = vector.extract_strided_slice %27 {offsets = [8, 0], sizes = [8, 16], strides = [1, 1]} : vector<16x32xf32> to vector<8x16xf32>
    %52 = arith.truncf %51 : vector<8x16xf32> to vector<8x16xbf16>
    %cst_39 = arith.constant dense<0.000000e+00> : vector<8x8xf32>
    %53 = tpu.matmul %50, %52, %cst_39 {dimension_numbers = #tpu.dot_dimension_numbers<[1], [1], [0], [0], [0, 0, 1, 0], [], []>} : vector<8x16xbf16>, vector<8x16xbf16>, vector<8x8xf32> -> vector<8x8xf32>
    %cst_40 = arith.constant 2.500000e-01 : f32
    %54 = vector.broadcast %cst_40 : f32 to vector<8x8xf32>
    %55 = arith.mulf %53, %54 : vector<8x8xf32>
    %56 = vector.extract_strided_slice %9 {offsets = [1, 0, 0], sizes = [1, 8, 8], strides = [1, 1, 1]} : vector<2x8x8xf32> to vector<1x8x8xf32>
    %57 = vector.shape_cast %56 : vector<1x8x8xf32> to vector<8x8xf32>
    %58 = arith.addf %55, %57 : vector<8x8xf32>
    %59 = vector.extract_strided_slice %26 {offsets = [8, 16], sizes = [8, 16], strides = [1, 1]} : vector<16x32xf32> to vector<8x16xf32>
    %60 = arith.truncf %59 : vector<8x16xf32> to vector<8x16xbf16>
    %61 = vector.extract_strided_slice %27 {offsets = [8, 16], sizes = [8, 16], strides = [1, 1]} : vector<16x32xf32> to vector<8x16xf32>
    %62 = arith.truncf %61 : vector<8x16xf32> to vector<8x16xbf16>
    %cst_41 = arith.constant dense<0.000000e+00> : vector<8x8xf32>
    %63 = tpu.matmul %60, %62, %cst_41 {dimension_numbers = #tpu.dot_dimension_numbers<[1], [1], [0], [0], [0, 0, 1, 0], [], []>} : vector<8x16xbf16>, vector<8x16xbf16>, vector<8x8xf32> -> vector<8x8xf32>
    %cst_42 = arith.constant 2.500000e-01 : f32
    %64 = vector.broadcast %cst_42 : f32 to vector<8x8xf32>
    %65 = arith.mulf %63, %64 : vector<8x8xf32>
    %66 = vector.extract_strided_slice %9 {offsets = [1, 0, 0], sizes = [1, 8, 8], strides = [1, 1, 1]} : vector<2x8x8xf32> to vector<1x8x8xf32>
    %67 = vector.shape_cast %66 : vector<1x8x8xf32> to vector<8x8xf32>
    %68 = arith.addf %65, %67 : vector<8x8xf32>
    %69 = tpu.concatenate %38, %48, %58, %68 in 0 : vector<8x8xf32>, vector<8x8xf32>, vector<8x8xf32>, vector<8x8xf32> -> vector<32x8xf32>
    %cst_43 = arith.constant dense<0xFF800000> : vector<32xf32>
    %70 = vector.multi_reduction <maximumf>, %69, %cst_43 [1] : vector<32x8xf32> to vector<32xf32>
    %71 = vector.shape_cast %70 : vector<32xf32> to vector<32x1xf32>
    %72 = vector.broadcast %71 : vector<32x1xf32> to vector<32x8xf32>
    %73 = arith.subf %69, %72 : vector<32x8xf32>
    %74 = math.exp %73 : vector<32x8xf32>
    %cst_44 = arith.constant dense<0.000000e+00> : vector<32xf32>
    %75 = vector.multi_reduction <add>, %74, %cst_44 [1] : vector<32x8xf32> to vector<32xf32>
    %76 = vector.shape_cast %75 : vector<32xf32> to vector<32x1xf32>
    %77 = tpu.reciprocal %76 {approx = true} : vector<32x1xf32> -> vector<32x1xf32>
    %78 = vector.broadcast %77 : vector<32x1xf32> to vector<32x8xf32>
    %79 = arith.mulf %74, %78 : vector<32x8xf32>
    %80 = vector.extract_strided_slice %79 {offsets = [0, 0], sizes = [8, 8], strides = [1, 1]} : vector<32x8xf32> to vector<8x8xf32>
    %81 = arith.truncf %80 : vector<8x8xf32> to vector<8x8xbf16>
    %82 = vector.extract_strided_slice %28 {offsets = [0, 0], sizes = [8, 16], strides = [1, 1]} : vector<16x32xf32> to vector<8x16xf32>
    %83 = arith.truncf %82 : vector<8x16xf32> to vector<8x16xbf16>
    %cst_45 = arith.constant dense<0.000000e+00> : vector<8x16xf32>
    %84 = tpu.matmul %81, %83, %cst_45 {dimension_numbers = #tpu.dot_dimension_numbers<[1], [0], [0], [1], [0, 0, 1, 1], [], []>} : vector<8x8xbf16>, vector<8x16xbf16>, vector<8x16xf32> -> vector<8x16xf32>
    %85 = arith.truncf %84 : vector<8x16xf32> to vector<8x16xbf16>
    %86 = vector.extract_strided_slice %12 {offsets = [0, 0], sizes = [16, 32], strides = [1, 1]} : vector<32x32xbf16> to vector<16x32xbf16>
    %cst_46 = arith.constant dense<0.000000e+00> : vector<8x32xf32>
    %87 = tpu.matmul %85, %86, %cst_46 {dimension_numbers = #tpu.dot_dimension_numbers<[1], [0], [0], [1], [0, 0, 1, 1], [], []>} : vector<8x16xbf16>, vector<16x32xbf16>, vector<8x32xf32> -> vector<8x32xf32>
    %88 = vector.extract_strided_slice %79 {offsets = [8, 0], sizes = [8, 8], strides = [1, 1]} : vector<32x8xf32> to vector<8x8xf32>
    %89 = arith.truncf %88 : vector<8x8xf32> to vector<8x8xbf16>
    %90 = vector.extract_strided_slice %28 {offsets = [0, 16], sizes = [8, 16], strides = [1, 1]} : vector<16x32xf32> to vector<8x16xf32>
    %91 = arith.truncf %90 : vector<8x16xf32> to vector<8x16xbf16>
    %cst_47 = arith.constant dense<0.000000e+00> : vector<8x16xf32>
    %92 = tpu.matmul %89, %91, %cst_47 {dimension_numbers = #tpu.dot_dimension_numbers<[1], [0], [0], [1], [0, 0, 1, 1], [], []>} : vector<8x8xbf16>, vector<8x16xbf16>, vector<8x16xf32> -> vector<8x16xf32>
    %93 = arith.truncf %92 : vector<8x16xf32> to vector<8x16xbf16>
    %94 = vector.extract_strided_slice %12 {offsets = [16, 0], sizes = [16, 32], strides = [1, 1]} : vector<32x32xbf16> to vector<16x32xbf16>
    %cst_48 = arith.constant dense<0.000000e+00> : vector<8x32xf32>
    %95 = tpu.matmul %93, %94, %cst_48 {dimension_numbers = #tpu.dot_dimension_numbers<[1], [0], [0], [1], [0, 0, 1, 1], [], []>} : vector<8x16xbf16>, vector<16x32xbf16>, vector<8x32xf32> -> vector<8x32xf32>
    %96 = arith.addf %87, %95 : vector<8x32xf32>
    %97 = vector.extract_strided_slice %79 {offsets = [16, 0], sizes = [8, 8], strides = [1, 1]} : vector<32x8xf32> to vector<8x8xf32>
    %98 = arith.truncf %97 : vector<8x8xf32> to vector<8x8xbf16>
    %99 = vector.extract_strided_slice %28 {offsets = [8, 0], sizes = [8, 16], strides = [1, 1]} : vector<16x32xf32> to vector<8x16xf32>
    %100 = arith.truncf %99 : vector<8x16xf32> to vector<8x16xbf16>
    %cst_49 = arith.constant dense<0.000000e+00> : vector<8x16xf32>
    %101 = tpu.matmul %98, %100, %cst_49 {dimension_numbers = #tpu.dot_dimension_numbers<[1], [0], [0], [1], [0, 0, 1, 1], [], []>} : vector<8x8xbf16>, vector<8x16xbf16>, vector<8x16xf32> -> vector<8x16xf32>
    %102 = arith.truncf %101 : vector<8x16xf32> to vector<8x16xbf16>
    %103 = vector.extract_strided_slice %12 {offsets = [0, 0], sizes = [16, 32], strides = [1, 1]} : vector<32x32xbf16> to vector<16x32xbf16>
    %cst_50 = arith.constant dense<0.000000e+00> : vector<8x32xf32>
    %104 = tpu.matmul %102, %103, %cst_50 {dimension_numbers = #tpu.dot_dimension_numbers<[1], [0], [0], [1], [0, 0, 1, 1], [], []>} : vector<8x16xbf16>, vector<16x32xbf16>, vector<8x32xf32> -> vector<8x32xf32>
    %105 = vector.extract_strided_slice %79 {offsets = [24, 0], sizes = [8, 8], strides = [1, 1]} : vector<32x8xf32> to vector<8x8xf32>
    %106 = arith.truncf %105 : vector<8x8xf32> to vector<8x8xbf16>
    %107 = vector.extract_strided_slice %28 {offsets = [8, 16], sizes = [8, 16], strides = [1, 1]} : vector<16x32xf32> to vector<8x16xf32>
    %108 = arith.truncf %107 : vector<8x16xf32> to vector<8x16xbf16>
    %cst_51 = arith.constant dense<0.000000e+00> : vector<8x16xf32>
    %109 = tpu.matmul %106, %108, %cst_51 {dimension_numbers = #tpu.dot_dimension_numbers<[1], [0], [0], [1], [0, 0, 1, 1], [], []>} : vector<8x8xbf16>, vector<8x16xbf16>, vector<8x16xf32> -> vector<8x16xf32>
    %110 = arith.truncf %109 : vector<8x16xf32> to vector<8x16xbf16>
    %111 = vector.extract_strided_slice %12 {offsets = [16, 0], sizes = [16, 32], strides = [1, 1]} : vector<32x32xbf16> to vector<16x32xbf16>
    %cst_52 = arith.constant dense<0.000000e+00> : vector<8x32xf32>
    %112 = tpu.matmul %110, %111, %cst_52 {dimension_numbers = #tpu.dot_dimension_numbers<[1], [0], [0], [1], [0, 0, 1, 1], [], []>} : vector<8x16xbf16>, vector<16x32xbf16>, vector<8x32xf32> -> vector<8x32xf32>
    %113 = arith.addf %104, %112 : vector<8x32xf32>
    %114 = tpu.concatenate %96, %113 in 0 : vector<8x32xf32>, vector<8x32xf32> -> vector<16x32xf32>
    %115 = vector.broadcast %13 : vector<1x32xf32> to vector<16x32xf32>
    %116 = arith.addf %114, %115 : vector<16x32xf32>
    %117 = arith.addf %8, %116 : vector<16x32xf32>
    %cst_53 = arith.constant dense<0.000000e+00> : vector<16xf32>
    %118 = vector.multi_reduction <add>, %117, %cst_53 [1] : vector<16x32xf32> to vector<16xf32>
    %119 = vector.shape_cast %118 : vector<16xf32> to vector<16x1xf32>
    %cst_54 = arith.constant 3.200000e+01 : f32
    %120 = vector.broadcast %cst_54 : f32 to vector<16x1xf32>
    %121 = arith.divf %119, %120 : vector<16x1xf32>
    %122 = vector.broadcast %121 : vector<16x1xf32> to vector<16x32xf32>
    %123 = arith.subf %117, %122 : vector<16x32xf32>
    %124 = arith.mulf %123, %123 : vector<16x32xf32>
    %cst_55 = arith.constant dense<0.000000e+00> : vector<16xf32>
    %125 = vector.multi_reduction <add>, %124, %cst_55 [1] : vector<16x32xf32> to vector<16xf32>
    %126 = vector.shape_cast %125 : vector<16xf32> to vector<16x1xf32>
    %cst_56 = arith.constant 3.200000e+01 : f32
    %127 = vector.broadcast %cst_56 : f32 to vector<16x1xf32>
    %128 = arith.divf %126, %127 : vector<16x1xf32>
    %129 = vector.broadcast %121 : vector<16x1xf32> to vector<16x32xf32>
    %130 = arith.subf %117, %129 : vector<16x32xf32>
    %cst_57 = arith.constant 9.99999974E-6 : f32
    %131 = vector.broadcast %cst_57 : f32 to vector<16x1xf32>
    %132 = arith.addf %128, %131 : vector<16x1xf32>
    %133 = math.rsqrt %132 : vector<16x1xf32>
    %134 = vector.broadcast %133 : vector<16x1xf32> to vector<16x32xf32>
    %135 = arith.mulf %130, %134 : vector<16x32xf32>
    %136 = vector.broadcast %14 : vector<1x32xf32> to vector<16x32xf32>
    %137 = arith.mulf %135, %136 : vector<16x32xf32>
    %138 = vector.broadcast %15 : vector<1x32xf32> to vector<16x32xf32>
    %139 = arith.addf %137, %138 : vector<16x32xf32>
    %140 = arith.truncf %139 : vector<16x32xf32> to vector<16x32xbf16>
    %cst_58 = arith.constant dense<0.000000e+00> : vector<16x64xf32>
    %141 = tpu.matmul %140, %16, %cst_58 {dimension_numbers = #tpu.dot_dimension_numbers<[1], [0], [0], [1], [0, 0, 1, 1], [], []>} : vector<16x32xbf16>, vector<32x64xbf16>, vector<16x64xf32> -> vector<16x64xf32>
    %142 = vector.broadcast %17 : vector<1x64xf32> to vector<16x64xf32>
    %143 = arith.addf %141, %142 : vector<16x64xf32>
    %cst_59 = arith.constant 0.000000e+00 : f32
    %144 = vector.broadcast %cst_59 : f32 to vector<16x64xf32>
    %145 = arith.maximumf %143, %144 : vector<16x64xf32>
    %146 = arith.truncf %145 : vector<16x64xf32> to vector<16x64xbf16>
    %cst_60 = arith.constant dense<0.000000e+00> : vector<16x32xf32>
    %147 = tpu.matmul %146, %18, %cst_60 {dimension_numbers = #tpu.dot_dimension_numbers<[1], [0], [0], [1], [0, 0, 1, 1], [], []>} : vector<16x64xbf16>, vector<64x32xbf16>, vector<16x32xf32> -> vector<16x32xf32>
    %148 = vector.broadcast %19 : vector<1x32xf32> to vector<16x32xf32>
    %149 = arith.addf %147, %148 : vector<16x32xf32>
    %150 = arith.addf %139, %149 : vector<16x32xf32>
    %cst_61 = arith.constant dense<0.000000e+00> : vector<16xf32>
    %151 = vector.multi_reduction <add>, %150, %cst_61 [1] : vector<16x32xf32> to vector<16xf32>
    %152 = vector.shape_cast %151 : vector<16xf32> to vector<16x1xf32>
    %cst_62 = arith.constant 3.200000e+01 : f32
    %153 = vector.broadcast %cst_62 : f32 to vector<16x1xf32>
    %154 = arith.divf %152, %153 : vector<16x1xf32>
    %155 = vector.broadcast %154 : vector<16x1xf32> to vector<16x32xf32>
    %156 = arith.subf %150, %155 : vector<16x32xf32>
    %157 = arith.mulf %156, %156 : vector<16x32xf32>
    %cst_63 = arith.constant dense<0.000000e+00> : vector<16xf32>
    %158 = vector.multi_reduction <add>, %157, %cst_63 [1] : vector<16x32xf32> to vector<16xf32>
    %159 = vector.shape_cast %158 : vector<16xf32> to vector<16x1xf32>
    %cst_64 = arith.constant 3.200000e+01 : f32
    %160 = vector.broadcast %cst_64 : f32 to vector<16x1xf32>
    %161 = arith.divf %159, %160 : vector<16x1xf32>
    %162 = vector.broadcast %154 : vector<16x1xf32> to vector<16x32xf32>
    %163 = arith.subf %150, %162 : vector<16x32xf32>
    %cst_65 = arith.constant 9.99999974E-6 : f32
    %164 = vector.broadcast %cst_65 : f32 to vector<16x1xf32>
    %165 = arith.addf %161, %164 : vector<16x1xf32>
    %166 = math.rsqrt %165 : vector<16x1xf32>
    %167 = vector.broadcast %166 : vector<16x1xf32> to vector<16x32xf32>
    %168 = arith.mulf %163, %167 : vector<16x32xf32>
    %169 = vector.broadcast %20 : vector<1x32xf32> to vector<16x32xf32>
    %170 = arith.mulf %168, %169 : vector<16x32xf32>
    %171 = vector.broadcast %21 : vector<1x32xf32> to vector<16x32xf32>
    %172 = arith.addf %170, %171 : vector<16x32xf32>
    %c0_66 = arith.constant 0 : index
    %c0_67 = arith.constant 0 : index
    %173 = vector.load %arg4[%c0_66, %c0_67] : memref<2x16xf32, #tpu.memory_space<vmem>>, vector<2x16xf32>
    %cst_68 = arith.constant dense<0.000000e+00> : vector<2x32xf32>
    %174 = tpu.matmul %173, %172, %cst_68 {dimension_numbers = #tpu.dot_dimension_numbers<[1], [0], [0], [1], [0, 0, 1, 1], [], []>} : vector<2x16xf32>, vector<16x32xf32>, vector<2x32xf32> -> vector<2x32xf32>
    %175 = arith.truncf %174 : vector<2x32xf32> to vector<2x32xbf16>
    %c0_69 = arith.constant 0 : index
    %c0_70 = arith.constant 0 : index
    %176 = vector.load %arg19[%c0_69, %c0_70] : memref<32x16xbf16, #tpu.memory_space<vmem>>, vector<32x16xbf16>
    %cst_71 = arith.constant dense<0.000000e+00> : vector<2x16xf32>
    %177 = tpu.matmul %175, %176, %cst_71 {dimension_numbers = #tpu.dot_dimension_numbers<[1], [0], [0], [1], [0, 0, 1, 1], [], []>} : vector<2x32xbf16>, vector<32x16xbf16>, vector<2x16xf32> -> vector<2x16xf32>
    %c0_72 = arith.constant 0 : index
    %c0_73 = arith.constant 0 : index
    %178 = vector.load %arg20[%c0_72, %c0_73] : memref<1x16xf32, #tpu.memory_space<vmem>>, vector<1x16xf32>
    %179 = vector.broadcast %178 : vector<1x16xf32> to vector<2x16xf32>
    %180 = arith.addf %177, %179 : vector<2x16xf32>
    %c0_74 = arith.constant 0 : index
    %c0_75 = arith.constant 0 : index
    %181 = vector.load %arg21[%c0_74, %c0_75] : memref<2x16xf32, #tpu.memory_space<vmem>>, vector<2x16xf32>
    tpu.vector_store %arg21[%c0_74, %c0_75], %180 {strides = array<i32>} : memref<2x16xf32, #tpu.memory_space<vmem>>, vector<2x16xf32>,
    return
  }
  func.func @transform_0(%arg0: i32) -> (i32, i32) {
    %c0_i32 = arith.constant 0 : i32
    %c0_i32_0 = arith.constant 0 : i32
    %c0_i32_1 = arith.constant 0 : i32
    return %c0_i32, %c0_i32_0 : i32, i32
  }
  func.func @transform_1(%arg0: i32) -> (i32, i32) {
    %c0_i32 = arith.constant 0 : i32
    %c0_i32_0 = arith.constant 0 : i32
    %c0_i32_1 = arith.constant 0 : i32
    return %c0_i32, %c0_i32_0 : i32, i32
  }
  func.func @transform_2(%arg0: i32) -> (i32, i32, i32) {
    %c0_i32 = arith.constant 0 : i32
    %c0_i32_0 = arith.constant 0 : i32
    %c0_i32_1 = arith.constant 0 : i32
    %c0_i32_2 = arith.constant 0 : i32
    return %c0_i32, %c0_i32_0, %c0_i32_1 : i32, i32, i32
  }
  func.func @transform_3(%arg0: i32) -> (i32, i32) {
    %c0_i32 = arith.constant 0 : i32
    %c0_i32_0 = arith.constant 0 : i32
    %c0_i32_1 = arith.constant 0 : i32
    return %c0_i32, %c0_i32_0 : i32, i32
  }
  func.func @transform_4(%arg0: i32) -> (i32, i32) {
    %c0_i32 = arith.constant 0 : i32
    %c0_i32_0 = arith.constant 0 : i32
    %c0_i32_1 = arith.constant 0 : i32
    return %c0_i32, %c0_i32_0 : i32, i32
  }
  func.func @transform_5(%arg0: i32) -> (i32, i32) {
    %c0_i32 = arith.constant 0 : i32
    %c0_i32_0 = arith.constant 0 : i32
    %c0_i32_1 = arith.constant 0 : i32
    return %c0_i32, %c0_i32_0 : i32, i32
  }
  func.func @transform_6(%arg0: i32) -> (i32, i32) {
    %c0_i32 = arith.constant 0 : i32
    %c0_i32_0 = arith.constant 0 : i32
    %c0_i32_1 = arith.constant 0 : i32
    return %c0_i32, %c0_i32_0 : i32, i32
  }
  func.func @transform_7(%arg0: i32) -> (i32, i32) {
    %c0_i32 = arith.constant 0 : i32
    %c0_i32_0 = arith.constant 0 : i32
    %c0_i32_1 = arith.constant 0 : i32
    return %c0_i32, %c0_i32_0 : i32, i32
  }
  func.func @transform_8(%arg0: i32) -> (i32, i32) {
    %c0_i32 = arith.constant 0 : i32
    %c0_i32_0 = arith.constant 0 : i32
    %c0_i32_1 = arith.constant 0 : i32
    return %c0_i32, %c0_i32_0 : i32, i32
  }
  func.func @transform_9(%arg0: i32) -> (i32, i32) {
    %c0_i32 = arith.constant 0 : i32
    %c0_i32_0 = arith.constant 0 : i32
    %c0_i32_1 = arith.constant 0 : i32
    return %c0_i32, %c0_i32_0 : i32, i32
  }
  func.func @transform_10(%arg0: i32) -> (i32, i32) {
    %c0_i32 = arith.constant 0 : i32
    %c0_i32_0 = arith.constant 0 : i32
    %c0_i32_1 = arith.constant 0 : i32
    return %c0_i32, %c0_i32_0 : i32, i32
  }
  func.func @transform_11(%arg0: i32) -> (i32, i32) {
    %c0_i32 = arith.constant 0 : i32
    %c0_i32_0 = arith.constant 0 : i32
    %c0_i32_1 = arith.constant 0 : i32
    return %c0_i32, %c0_i32_0 : i32, i32
  }
  func.func @transform_12(%arg0: i32) -> (i32, i32) {
    %c0_i32 = arith.constant 0 : i32
    %c0_i32_0 = arith.constant 0 : i32
    %c0_i32_1 = arith.constant 0 : i32
    return %c0_i32, %c0_i32_0 : i32, i32
  }
  func.func @transform_13(%arg0: i32) -> (i32, i32) {
    %c0_i32 = arith.constant 0 : i32
    %c0_i32_0 = arith.constant 0 : i32
    %c0_i32_1 = arith.constant 0 : i32
    return %c0_i32, %c0_i32_0 : i32, i32
  }
  func.func @transform_14(%arg0: i32) -> (i32, i32) {
    %c0_i32 = arith.constant 0 : i32
    %c0_i32_0 = arith.constant 0 : i32
    %c0_i32_1 = arith.constant 0 : i32
    return %c0_i32, %c0_i32_0 : i32, i32
  }
  func.func @transform_15(%arg0: i32) -> (i32, i32) {
    %c0_i32 = arith.constant 0 : i32
    %c0_i32_0 = arith.constant 0 : i32
    %c0_i32_1 = arith.constant 0 : i32
    return %c0_i32, %c0_i32_0 : i32, i32
  }
  func.func @transform_16(%arg0: i32) -> (i32, i32) {
    %c0_i32 = arith.constant 0 : i32
    %c0_i32_0 = arith.constant 0 : i32
    %c0_i32_1 = arith.constant 0 : i32
    return %c0_i32, %c0_i32_0 : i32, i32
  }
  func.func @transform_17(%arg0: i32) -> (i32, i32) {
    %c0_i32 = arith.constant 0 : i32
    %c0_i32_0 = arith.constant 0 : i32
    %c0_i32_1 = arith.constant 0 : i32
    return %c0_i32, %c0_i32_0 : i32, i32
  }
  func.func @transform_18(%arg0: i32) -> (i32, i32) {
    %c0_i32 = arith.constant 0 : i32
    %c0_i32_0 = arith.constant 0 : i32
    %c0_i32_1 = arith.constant 0 : i32
    return %c0_i32, %c0_i32_0 : i32, i32
  }
  func.func @transform_19(%arg0: i32) -> (i32, i32) {
    %c0_i32 = arith.constant 0 : i32
    %c0_i32_0 = arith.constant 0 : i32
    %c0_i32_1 = arith.constant 0 : i32
    return %c0_i32, %c0_i32_0 : i32, i32
  }
  func.func @transform_20(%arg0: i32) -> (i32, i32) {
    %c0_i32 = arith.constant 0 : i32
    %c0_i32_0 = arith.constant 0 : i32
    %c0_i32_1 = arith.constant 0 : i32
    return %c0_i32, %c0_i32_0 : i32, i32
  }
}

module attributes {stable_mosaic.version = 11 : i64} {
  func.func @_goal_prior_kernel(%arg0: i32, %arg1: memref<2x96xf32, #tpu.memory_space<vmem>>, %arg2: memref<2x64xf32, #tpu.memory_space<vmem>>, %arg3: memref<2x1xf32, #tpu.memory_space<vmem>>, %arg4: memref<96x32xbf16, #tpu.memory_space<vmem>>, %arg5: memref<1x32xf32, #tpu.memory_space<vmem>>, %arg6: memref<32x32xbf16, #tpu.memory_space<vmem>>, %arg7: memref<1x32xf32, #tpu.memory_space<vmem>>, %arg8: memref<32x16xbf16, #tpu.memory_space<vmem>>, %arg9: memref<1x16xf32, #tpu.memory_space<vmem>>, %arg10: memref<64x32xbf16, #tpu.memory_space<vmem>>, %arg11: memref<1x32xf32, #tpu.memory_space<vmem>>, %arg12: memref<32x32xbf16, #tpu.memory_space<vmem>>, %arg13: memref<1x32xf32, #tpu.memory_space<vmem>>, %arg14: memref<32x16xbf16, #tpu.memory_space<vmem>>, %arg15: memref<1x16xf32, #tpu.memory_space<vmem>>, %arg16: memref<16x32xbf16, #tpu.memory_space<vmem>>, %arg17: memref<1x32xf32, #tpu.memory_space<vmem>>, %arg18: memref<32x32xbf16, #tpu.memory_space<vmem>>, %arg19: memref<1x32xf32, #tpu.memory_space<vmem>>, %arg20: memref<32x16xbf16, #tpu.memory_space<vmem>>, %arg21: memref<1x16xf32, #tpu.memory_space<vmem>>, %arg22: memref<2x32xf32, #tpu.memory_space<vmem>>) attributes {dimension_semantics = [#tpu.dimension_semantics<arbitrary>], iteration_bounds = array<i64: 1>, scalar_prefetch = 0 : i64, scratch_operands = 0 : i64, tpu.core_type = #tpu.core_type<tc>, window_params = [{pipeline_mode = #tpu.pipeline_mode<synchronous>, transform_indices = @transform_0, window_bounds = array<i64: 2, 96>}, {pipeline_mode = #tpu.pipeline_mode<synchronous>, transform_indices = @transform_1, window_bounds = array<i64: 2, 64>}, {pipeline_mode = #tpu.pipeline_mode<synchronous>, transform_indices = @transform_2, window_bounds = array<i64: 2, 1>}, {pipeline_mode = #tpu.pipeline_mode<synchronous>, transform_indices = @transform_3, window_bounds = array<i64: 96, 32>}, {pipeline_mode = #tpu.pipeline_mode<synchronous>, transform_indices = @transform_4, window_bounds = array<i64: 1, 32>}, {pipeline_mode = #tpu.pipeline_mode<synchronous>, transform_indices = @transform_5, window_bounds = array<i64: 32, 32>}, {pipeline_mode = #tpu.pipeline_mode<synchronous>, transform_indices = @transform_6, window_bounds = array<i64: 1, 32>}, {pipeline_mode = #tpu.pipeline_mode<synchronous>, transform_indices = @transform_7, window_bounds = array<i64: 32, 16>}, {pipeline_mode = #tpu.pipeline_mode<synchronous>, transform_indices = @transform_8, window_bounds = array<i64: 1, 16>}, {pipeline_mode = #tpu.pipeline_mode<synchronous>, transform_indices = @transform_9, window_bounds = array<i64: 64, 32>}, {pipeline_mode = #tpu.pipeline_mode<synchronous>, transform_indices = @transform_10, window_bounds = array<i64: 1, 32>}, {pipeline_mode = #tpu.pipeline_mode<synchronous>, transform_indices = @transform_11, window_bounds = array<i64: 32, 32>}, {pipeline_mode = #tpu.pipeline_mode<synchronous>, transform_indices = @transform_12, window_bounds = array<i64: 1, 32>}, {pipeline_mode = #tpu.pipeline_mode<synchronous>, transform_indices = @transform_13, window_bounds = array<i64: 32, 16>}, {pipeline_mode = #tpu.pipeline_mode<synchronous>, transform_indices = @transform_14, window_bounds = array<i64: 1, 16>}, {pipeline_mode = #tpu.pipeline_mode<synchronous>, transform_indices = @transform_15, window_bounds = array<i64: 16, 32>}, {pipeline_mode = #tpu.pipeline_mode<synchronous>, transform_indices = @transform_16, window_bounds = array<i64: 1, 32>}, {pipeline_mode = #tpu.pipeline_mode<synchronous>, transform_indices = @transform_17, window_bounds = array<i64: 32, 32>}, {pipeline_mode = #tpu.pipeline_mode<synchronous>, transform_indices = @transform_18, window_bounds = array<i64: 1, 32>}, {pipeline_mode = #tpu.pipeline_mode<synchronous>, transform_indices = @transform_19, window_bounds = array<i64: 32, 16>}, {pipeline_mode = #tpu.pipeline_mode<synchronous>, transform_indices = @transform_20, window_bounds = array<i64: 1, 16>}, {pipeline_mode = #tpu.pipeline_mode<synchronous>, transform_indices = @transform_21, window_bounds = array<i64: 2, 32>}]} {
    %c0 = arith.constant 0 : index
    %c0_0 = arith.constant 0 : index
    %0 = vector.load %arg1[%c0, %c0_0] : memref<2x96xf32, #tpu.memory_space<vmem>>, vector<2x96xf32>
    %1 = arith.truncf %0 : vector<2x96xf32> to vector<2x96xbf16>
    %c0_1 = arith.constant 0 : index
    %c0_2 = arith.constant 0 : index
    %2 = vector.load %arg4[%c0_1, %c0_2] : memref<96x32xbf16, #tpu.memory_space<vmem>>, vector<96x32xbf16>
    %cst = arith.constant dense<0.000000e+00> : vector<2x32xf32>
    %3 = tpu.matmul %1, %2, %cst {dimension_numbers = #tpu.dot_dimension_numbers<[1], [0], [0], [1], [0, 0, 1, 1], [], []>} : vector<2x96xbf16>, vector<96x32xbf16>, vector<2x32xf32> -> vector<2x32xf32>
    %c0_3 = arith.constant 0 : index
    %c0_4 = arith.constant 0 : index
    %4 = vector.load %arg5[%c0_3, %c0_4] : memref<1x32xf32, #tpu.memory_space<vmem>>, vector<1x32xf32>
    %5 = vector.broadcast %4 : vector<1x32xf32> to vector<2x32xf32>
    %6 = arith.addf %3, %5 : vector<2x32xf32>
    %cst_5 = arith.constant 0.000000e+00 : f32
    %7 = vector.broadcast %cst_5 : f32 to vector<2x32xf32>
    %8 = arith.maximumf %6, %7 : vector<2x32xf32>
    %9 = arith.truncf %8 : vector<2x32xf32> to vector<2x32xbf16>
    %c0_6 = arith.constant 0 : index
    %c0_7 = arith.constant 0 : index
    %10 = vector.load %arg6[%c0_6, %c0_7] : memref<32x32xbf16, #tpu.memory_space<vmem>>, vector<32x32xbf16>
    %cst_8 = arith.constant dense<0.000000e+00> : vector<2x32xf32>
    %11 = tpu.matmul %9, %10, %cst_8 {dimension_numbers = #tpu.dot_dimension_numbers<[1], [0], [0], [1], [0, 0, 1, 1], [], []>} : vector<2x32xbf16>, vector<32x32xbf16>, vector<2x32xf32> -> vector<2x32xf32>
    %c0_9 = arith.constant 0 : index
    %c0_10 = arith.constant 0 : index
    %12 = vector.load %arg7[%c0_9, %c0_10] : memref<1x32xf32, #tpu.memory_space<vmem>>, vector<1x32xf32>
    %13 = vector.broadcast %12 : vector<1x32xf32> to vector<2x32xf32>
    %14 = arith.addf %11, %13 : vector<2x32xf32>
    %cst_11 = arith.constant 0.000000e+00 : f32
    %15 = vector.broadcast %cst_11 : f32 to vector<2x32xf32>
    %16 = arith.maximumf %14, %15 : vector<2x32xf32>
    %17 = arith.truncf %16 : vector<2x32xf32> to vector<2x32xbf16>
    %c0_12 = arith.constant 0 : index
    %c0_13 = arith.constant 0 : index
    %18 = vector.load %arg8[%c0_12, %c0_13] : memref<32x16xbf16, #tpu.memory_space<vmem>>, vector<32x16xbf16>
    %cst_14 = arith.constant dense<0.000000e+00> : vector<2x16xf32>
    %19 = tpu.matmul %17, %18, %cst_14 {dimension_numbers = #tpu.dot_dimension_numbers<[1], [0], [0], [1], [0, 0, 1, 1], [], []>} : vector<2x32xbf16>, vector<32x16xbf16>, vector<2x16xf32> -> vector<2x16xf32>
    %c0_15 = arith.constant 0 : index
    %c0_16 = arith.constant 0 : index
    %20 = vector.load %arg9[%c0_15, %c0_16] : memref<1x16xf32, #tpu.memory_space<vmem>>, vector<1x16xf32>
    %21 = vector.broadcast %20 : vector<1x16xf32> to vector<2x16xf32>
    %22 = arith.addf %19, %21 : vector<2x16xf32>
    %c0_17 = arith.constant 0 : index
    %c0_18 = arith.constant 0 : index
    %23 = vector.load %arg2[%c0_17, %c0_18] : memref<2x64xf32, #tpu.memory_space<vmem>>, vector<2x64xf32>
    %24 = arith.truncf %23 : vector<2x64xf32> to vector<2x64xbf16>
    %c0_19 = arith.constant 0 : index
    %c0_20 = arith.constant 0 : index
    %25 = vector.load %arg10[%c0_19, %c0_20] : memref<64x32xbf16, #tpu.memory_space<vmem>>, vector<64x32xbf16>
    %cst_21 = arith.constant dense<0.000000e+00> : vector<2x32xf32>
    %26 = tpu.matmul %24, %25, %cst_21 {dimension_numbers = #tpu.dot_dimension_numbers<[1], [0], [0], [1], [0, 0, 1, 1], [], []>} : vector<2x64xbf16>, vector<64x32xbf16>, vector<2x32xf32> -> vector<2x32xf32>
    %c0_22 = arith.constant 0 : index
    %c0_23 = arith.constant 0 : index
    %27 = vector.load %arg11[%c0_22, %c0_23] : memref<1x32xf32, #tpu.memory_space<vmem>>, vector<1x32xf32>
    %28 = vector.broadcast %27 : vector<1x32xf32> to vector<2x32xf32>
    %29 = arith.addf %26, %28 : vector<2x32xf32>
    %cst_24 = arith.constant 0.000000e+00 : f32
    %30 = vector.broadcast %cst_24 : f32 to vector<2x32xf32>
    %31 = arith.maximumf %29, %30 : vector<2x32xf32>
    %32 = arith.truncf %31 : vector<2x32xf32> to vector<2x32xbf16>
    %c0_25 = arith.constant 0 : index
    %c0_26 = arith.constant 0 : index
    %33 = vector.load %arg12[%c0_25, %c0_26] : memref<32x32xbf16, #tpu.memory_space<vmem>>, vector<32x32xbf16>
    %cst_27 = arith.constant dense<0.000000e+00> : vector<2x32xf32>
    %34 = tpu.matmul %32, %33, %cst_27 {dimension_numbers = #tpu.dot_dimension_numbers<[1], [0], [0], [1], [0, 0, 1, 1], [], []>} : vector<2x32xbf16>, vector<32x32xbf16>, vector<2x32xf32> -> vector<2x32xf32>
    %c0_28 = arith.constant 0 : index
    %c0_29 = arith.constant 0 : index
    %35 = vector.load %arg13[%c0_28, %c0_29] : memref<1x32xf32, #tpu.memory_space<vmem>>, vector<1x32xf32>
    %36 = vector.broadcast %35 : vector<1x32xf32> to vector<2x32xf32>
    %37 = arith.addf %34, %36 : vector<2x32xf32>
    %cst_30 = arith.constant 0.000000e+00 : f32
    %38 = vector.broadcast %cst_30 : f32 to vector<2x32xf32>
    %39 = arith.maximumf %37, %38 : vector<2x32xf32>
    %40 = arith.truncf %39 : vector<2x32xf32> to vector<2x32xbf16>
    %c0_31 = arith.constant 0 : index
    %c0_32 = arith.constant 0 : index
    %41 = vector.load %arg14[%c0_31, %c0_32] : memref<32x16xbf16, #tpu.memory_space<vmem>>, vector<32x16xbf16>
    %cst_33 = arith.constant dense<0.000000e+00> : vector<2x16xf32>
    %42 = tpu.matmul %40, %41, %cst_33 {dimension_numbers = #tpu.dot_dimension_numbers<[1], [0], [0], [1], [0, 0, 1, 1], [], []>} : vector<2x32xbf16>, vector<32x16xbf16>, vector<2x16xf32> -> vector<2x16xf32>
    %c0_34 = arith.constant 0 : index
    %c0_35 = arith.constant 0 : index
    %43 = vector.load %arg15[%c0_34, %c0_35] : memref<1x16xf32, #tpu.memory_space<vmem>>, vector<1x16xf32>
    %44 = vector.broadcast %43 : vector<1x16xf32> to vector<2x16xf32>
    %45 = arith.addf %42, %44 : vector<2x16xf32>
    %c0_36 = arith.constant 0 : index
    %c0_37 = arith.constant 0 : index
    %46 = vector.load %arg3[%c0_36, %c0_37] : memref<2x1xf32, #tpu.memory_space<vmem>>, vector<2x1xf32>
    %47 = vector.broadcast %46 : vector<2x1xf32> to vector<2x16xf32>
    %48 = arith.mulf %47, %45 : vector<2x16xf32>
    %cst_38 = arith.constant 1.000000e+00 : f32
    %49 = vector.broadcast %cst_38 : f32 to vector<2x1xf32>
    %50 = arith.subf %49, %46 : vector<2x1xf32>
    %51 = vector.broadcast %50 : vector<2x1xf32> to vector<2x16xf32>
    %52 = arith.mulf %51, %22 : vector<2x16xf32>
    %53 = arith.addf %48, %52 : vector<2x16xf32>
    %54 = arith.truncf %53 : vector<2x16xf32> to vector<2x16xbf16>
    %c0_39 = arith.constant 0 : index
    %c0_40 = arith.constant 0 : index
    %55 = vector.load %arg16[%c0_39, %c0_40] : memref<16x32xbf16, #tpu.memory_space<vmem>>, vector<16x32xbf16>
    %cst_41 = arith.constant dense<0.000000e+00> : vector<2x32xf32>
    %56 = tpu.matmul %54, %55, %cst_41 {dimension_numbers = #tpu.dot_dimension_numbers<[1], [0], [0], [1], [0, 0, 1, 1], [], []>} : vector<2x16xbf16>, vector<16x32xbf16>, vector<2x32xf32> -> vector<2x32xf32>
    %c0_42 = arith.constant 0 : index
    %c0_43 = arith.constant 0 : index
    %57 = vector.load %arg17[%c0_42, %c0_43] : memref<1x32xf32, #tpu.memory_space<vmem>>, vector<1x32xf32>
    %58 = vector.broadcast %57 : vector<1x32xf32> to vector<2x32xf32>
    %59 = arith.addf %56, %58 : vector<2x32xf32>
    %cst_44 = arith.constant 0.000000e+00 : f32
    %60 = vector.broadcast %cst_44 : f32 to vector<2x32xf32>
    %61 = arith.maximumf %59, %60 : vector<2x32xf32>
    %62 = arith.truncf %61 : vector<2x32xf32> to vector<2x32xbf16>
    %c0_45 = arith.constant 0 : index
    %c0_46 = arith.constant 0 : index
    %63 = vector.load %arg18[%c0_45, %c0_46] : memref<32x32xbf16, #tpu.memory_space<vmem>>, vector<32x32xbf16>
    %cst_47 = arith.constant dense<0.000000e+00> : vector<2x32xf32>
    %64 = tpu.matmul %62, %63, %cst_47 {dimension_numbers = #tpu.dot_dimension_numbers<[1], [0], [0], [1], [0, 0, 1, 1], [], []>} : vector<2x32xbf16>, vector<32x32xbf16>, vector<2x32xf32> -> vector<2x32xf32>
    %c0_48 = arith.constant 0 : index
    %c0_49 = arith.constant 0 : index
    %65 = vector.load %arg19[%c0_48, %c0_49] : memref<1x32xf32, #tpu.memory_space<vmem>>, vector<1x32xf32>
    %66 = vector.broadcast %65 : vector<1x32xf32> to vector<2x32xf32>
    %67 = arith.addf %64, %66 : vector<2x32xf32>
    %cst_50 = arith.constant 0.000000e+00 : f32
    %68 = vector.broadcast %cst_50 : f32 to vector<2x32xf32>
    %69 = arith.maximumf %67, %68 : vector<2x32xf32>
    %70 = arith.truncf %69 : vector<2x32xf32> to vector<2x32xbf16>
    %c0_51 = arith.constant 0 : index
    %c0_52 = arith.constant 0 : index
    %71 = vector.load %arg20[%c0_51, %c0_52] : memref<32x16xbf16, #tpu.memory_space<vmem>>, vector<32x16xbf16>
    %cst_53 = arith.constant dense<0.000000e+00> : vector<2x16xf32>
    %72 = tpu.matmul %70, %71, %cst_53 {dimension_numbers = #tpu.dot_dimension_numbers<[1], [0], [0], [1], [0, 0, 1, 1], [], []>} : vector<2x32xbf16>, vector<32x16xbf16>, vector<2x16xf32> -> vector<2x16xf32>
    %c0_54 = arith.constant 0 : index
    %c0_55 = arith.constant 0 : index
    %73 = vector.load %arg21[%c0_54, %c0_55] : memref<1x16xf32, #tpu.memory_space<vmem>>, vector<1x16xf32>
    %74 = vector.broadcast %73 : vector<1x16xf32> to vector<2x16xf32>
    %75 = arith.addf %72, %74 : vector<2x16xf32>
    %76 = tpu.concatenate %53, %75 in 1 : vector<2x16xf32>, vector<2x16xf32> -> vector<2x32xf32>
    %c0_56 = arith.constant 0 : index
    %c0_57 = arith.constant 0 : index
    %77 = vector.load %arg22[%c0_56, %c0_57] : memref<2x32xf32, #tpu.memory_space<vmem>>, vector<2x32xf32>
    tpu.vector_store %arg22[%c0_56, %c0_57], %76 {strides = array<i32>} : memref<2x32xf32, #tpu.memory_space<vmem>>, vector<2x32xf32>,
    return
  }
  func.func @transform_0(%arg0: i32) -> (i32, i32) {
    %c0_i32 = arith.constant 0 : i32
    %c0_i32_0 = arith.constant 0 : i32
    %c0_i32_1 = arith.constant 0 : i32
    return %c0_i32, %c0_i32_0 : i32, i32
  }
  func.func @transform_1(%arg0: i32) -> (i32, i32) {
    %c0_i32 = arith.constant 0 : i32
    %c0_i32_0 = arith.constant 0 : i32
    %c0_i32_1 = arith.constant 0 : i32
    return %c0_i32, %c0_i32_0 : i32, i32
  }
  func.func @transform_2(%arg0: i32) -> (i32, i32) {
    %c0_i32 = arith.constant 0 : i32
    %c0_i32_0 = arith.constant 0 : i32
    %c0_i32_1 = arith.constant 0 : i32
    return %c0_i32, %c0_i32_0 : i32, i32
  }
  func.func @transform_3(%arg0: i32) -> (i32, i32) {
    %c0_i32 = arith.constant 0 : i32
    %c0_i32_0 = arith.constant 0 : i32
    %c0_i32_1 = arith.constant 0 : i32
    return %c0_i32, %c0_i32_0 : i32, i32
  }
  func.func @transform_4(%arg0: i32) -> (i32, i32) {
    %c0_i32 = arith.constant 0 : i32
    %c0_i32_0 = arith.constant 0 : i32
    %c0_i32_1 = arith.constant 0 : i32
    return %c0_i32, %c0_i32_0 : i32, i32
  }
  func.func @transform_5(%arg0: i32) -> (i32, i32) {
    %c0_i32 = arith.constant 0 : i32
    %c0_i32_0 = arith.constant 0 : i32
    %c0_i32_1 = arith.constant 0 : i32
    return %c0_i32, %c0_i32_0 : i32, i32
  }
  func.func @transform_6(%arg0: i32) -> (i32, i32) {
    %c0_i32 = arith.constant 0 : i32
    %c0_i32_0 = arith.constant 0 : i32
    %c0_i32_1 = arith.constant 0 : i32
    return %c0_i32, %c0_i32_0 : i32, i32
  }
  func.func @transform_7(%arg0: i32) -> (i32, i32) {
    %c0_i32 = arith.constant 0 : i32
    %c0_i32_0 = arith.constant 0 : i32
    %c0_i32_1 = arith.constant 0 : i32
    return %c0_i32, %c0_i32_0 : i32, i32
  }
  func.func @transform_8(%arg0: i32) -> (i32, i32) {
    %c0_i32 = arith.constant 0 : i32
    %c0_i32_0 = arith.constant 0 : i32
    %c0_i32_1 = arith.constant 0 : i32
    return %c0_i32, %c0_i32_0 : i32, i32
  }
  func.func @transform_9(%arg0: i32) -> (i32, i32) {
    %c0_i32 = arith.constant 0 : i32
    %c0_i32_0 = arith.constant 0 : i32
    %c0_i32_1 = arith.constant 0 : i32
    return %c0_i32, %c0_i32_0 : i32, i32
  }
  func.func @transform_10(%arg0: i32) -> (i32, i32) {
    %c0_i32 = arith.constant 0 : i32
    %c0_i32_0 = arith.constant 0 : i32
    %c0_i32_1 = arith.constant 0 : i32
    return %c0_i32, %c0_i32_0 : i32, i32
  }
  func.func @transform_11(%arg0: i32) -> (i32, i32) {
    %c0_i32 = arith.constant 0 : i32
    %c0_i32_0 = arith.constant 0 : i32
    %c0_i32_1 = arith.constant 0 : i32
    return %c0_i32, %c0_i32_0 : i32, i32
  }
  func.func @transform_12(%arg0: i32) -> (i32, i32) {
    %c0_i32 = arith.constant 0 : i32
    %c0_i32_0 = arith.constant 0 : i32
    %c0_i32_1 = arith.constant 0 : i32
    return %c0_i32, %c0_i32_0 : i32, i32
  }
  func.func @transform_13(%arg0: i32) -> (i32, i32) {
    %c0_i32 = arith.constant 0 : i32
    %c0_i32_0 = arith.constant 0 : i32
    %c0_i32_1 = arith.constant 0 : i32
    return %c0_i32, %c0_i32_0 : i32, i32
  }
  func.func @transform_14(%arg0: i32) -> (i32, i32) {
    %c0_i32 = arith.constant 0 : i32
    %c0_i32_0 = arith.constant 0 : i32
    %c0_i32_1 = arith.constant 0 : i32
    return %c0_i32, %c0_i32_0 : i32, i32
  }
  func.func @transform_15(%arg0: i32) -> (i32, i32) {
    %c0_i32 = arith.constant 0 : i32
    %c0_i32_0 = arith.constant 0 : i32
    %c0_i32_1 = arith.constant 0 : i32
    return %c0_i32, %c0_i32_0 : i32, i32
  }
  func.func @transform_16(%arg0: i32) -> (i32, i32) {
    %c0_i32 = arith.constant 0 : i32
    %c0_i32_0 = arith.constant 0 : i32
    %c0_i32_1 = arith.constant 0 : i32
    return %c0_i32, %c0_i32_0 : i32, i32
  }
  func.func @transform_17(%arg0: i32) -> (i32, i32) {
    %c0_i32 = arith.constant 0 : i32
    %c0_i32_0 = arith.constant 0 : i32
    %c0_i32_1 = arith.constant 0 : i32
    return %c0_i32, %c0_i32_0 : i32, i32
  }
  func.func @transform_18(%arg0: i32) -> (i32, i32) {
    %c0_i32 = arith.constant 0 : i32
    %c0_i32_0 = arith.constant 0 : i32
    %c0_i32_1 = arith.constant 0 : i32
    return %c0_i32, %c0_i32_0 : i32, i32
  }
  func.func @transform_19(%arg0: i32) -> (i32, i32) {
    %c0_i32 = arith.constant 0 : i32
    %c0_i32_0 = arith.constant 0 : i32
    %c0_i32_1 = arith.constant 0 : i32
    return %c0_i32, %c0_i32_0 : i32, i32
  }
  func.func @transform_20(%arg0: i32) -> (i32, i32) {
    %c0_i32 = arith.constant 0 : i32
    %c0_i32_0 = arith.constant 0 : i32
    %c0_i32_1 = arith.constant 0 : i32
    return %c0_i32, %c0_i32_0 : i32, i32
  }
  func.func @transform_21(%arg0: i32) -> (i32, i32) {
    %c0_i32 = arith.constant 0 : i32
    %c0_i32_0 = arith.constant 0 : i32
    %c0_i32_1 = arith.constant 0 : i32
    return %c0_i32, %c0_i32_0 : i32, i32
  }
}

module attributes {stable_mosaic.version = 11 : i64} {
  func.func @_decoder_branch_kernel(%arg0: i32, %arg1: memref<16x72xf32, #tpu.memory_space<vmem>>, %arg2: memref<16x32xf32, #tpu.memory_space<vmem>>, %arg3: memref<2x8x8xf32, #tpu.memory_space<vmem>>, %arg4: memref<72x32xbf16, #tpu.memory_space<vmem>>, %arg5: memref<1x32xf32, #tpu.memory_space<vmem>>, %arg6: memref<32x96xbf16, #tpu.memory_space<vmem>>, %arg7: memref<1x96xf32, #tpu.memory_space<vmem>>, %arg8: memref<32x32xbf16, #tpu.memory_space<vmem>>, %arg9: memref<1x32xf32, #tpu.memory_space<vmem>>, %arg10: memref<1x32xf32, #tpu.memory_space<vmem>>, %arg11: memref<1x32xf32, #tpu.memory_space<vmem>>, %arg12: memref<32x64xbf16, #tpu.memory_space<vmem>>, %arg13: memref<1x64xf32, #tpu.memory_space<vmem>>, %arg14: memref<64x32xbf16, #tpu.memory_space<vmem>>, %arg15: memref<1x32xf32, #tpu.memory_space<vmem>>, %arg16: memref<1x32xf32, #tpu.memory_space<vmem>>, %arg17: memref<1x32xf32, #tpu.memory_space<vmem>>, %arg18: memref<32x36xbf16, #tpu.memory_space<vmem>>, %arg19: memref<1x36xf32, #tpu.memory_space<vmem>>, %arg20: memref<16x36xf32, #tpu.memory_space<vmem>>) attributes {dimension_semantics = [#tpu.dimension_semantics<arbitrary>], iteration_bounds = array<i64: 1>, scalar_prefetch = 0 : i64, scratch_operands = 0 : i64, tpu.core_type = #tpu.core_type<tc>, window_params = [{pipeline_mode = #tpu.pipeline_mode<synchronous>, transform_indices = @transform_0, window_bounds = array<i64: 16, 72>}, {pipeline_mode = #tpu.pipeline_mode<synchronous>, transform_indices = @transform_1, window_bounds = array<i64: 16, 32>}, {pipeline_mode = #tpu.pipeline_mode<synchronous>, transform_indices = @transform_2, window_bounds = array<i64: 2, 8, 8>}, {pipeline_mode = #tpu.pipeline_mode<synchronous>, transform_indices = @transform_3, window_bounds = array<i64: 72, 32>}, {pipeline_mode = #tpu.pipeline_mode<synchronous>, transform_indices = @transform_4, window_bounds = array<i64: 1, 32>}, {pipeline_mode = #tpu.pipeline_mode<synchronous>, transform_indices = @transform_5, window_bounds = array<i64: 32, 96>}, {pipeline_mode = #tpu.pipeline_mode<synchronous>, transform_indices = @transform_6, window_bounds = array<i64: 1, 96>}, {pipeline_mode = #tpu.pipeline_mode<synchronous>, transform_indices = @transform_7, window_bounds = array<i64: 32, 32>}, {pipeline_mode = #tpu.pipeline_mode<synchronous>, transform_indices = @transform_8, window_bounds = array<i64: 1, 32>}, {pipeline_mode = #tpu.pipeline_mode<synchronous>, transform_indices = @transform_9, window_bounds = array<i64: 1, 32>}, {pipeline_mode = #tpu.pipeline_mode<synchronous>, transform_indices = @transform_10, window_bounds = array<i64: 1, 32>}, {pipeline_mode = #tpu.pipeline_mode<synchronous>, transform_indices = @transform_11, window_bounds = array<i64: 32, 64>}, {pipeline_mode = #tpu.pipeline_mode<synchronous>, transform_indices = @transform_12, window_bounds = array<i64: 1, 64>}, {pipeline_mode = #tpu.pipeline_mode<synchronous>, transform_indices = @transform_13, window_bounds = array<i64: 64, 32>}, {pipeline_mode = #tpu.pipeline_mode<synchronous>, transform_indices = @transform_14, window_bounds = array<i64: 1, 32>}, {pipeline_mode = #tpu.pipeline_mode<synchronous>, transform_indices = @transform_15, window_bounds = array<i64: 1, 32>}, {pipeline_mode = #tpu.pipeline_mode<synchronous>, transform_indices = @transform_16, window_bounds = array<i64: 1, 32>}, {pipeline_mode = #tpu.pipeline_mode<synchronous>, transform_indices = @transform_17, window_bounds = array<i64: 32, 36>}, {pipeline_mode = #tpu.pipeline_mode<synchronous>, transform_indices = @transform_18, window_bounds = array<i64: 1, 36>}, {pipeline_mode = #tpu.pipeline_mode<synchronous>, transform_indices = @transform_19, window_bounds = array<i64: 16, 36>}]} {
    %c0 = arith.constant 0 : index
    %c0_0 = arith.constant 0 : index
    %0 = vector.load %arg1[%c0, %c0_0] : memref<16x72xf32, #tpu.memory_space<vmem>>, vector<16x72xf32>
    %1 = arith.truncf %0 : vector<16x72xf32> to vector<16x72xbf16>
    %c0_1 = arith.constant 0 : index
    %c0_2 = arith.constant 0 : index
    %2 = vector.load %arg4[%c0_1, %c0_2] : memref<72x32xbf16, #tpu.memory_space<vmem>>, vector<72x32xbf16>
    %cst = arith.constant dense<0.000000e+00> : vector<16x32xf32>
    %3 = tpu.matmul %1, %2, %cst {dimension_numbers = #tpu.dot_dimension_numbers<[1], [0], [0], [1], [0, 0, 1, 1], [], []>} : vector<16x72xbf16>, vector<72x32xbf16>, vector<16x32xf32> -> vector<16x32xf32>
    %c0_3 = arith.constant 0 : index
    %c0_4 = arith.constant 0 : index
    %4 = vector.load %arg5[%c0_3, %c0_4] : memref<1x32xf32, #tpu.memory_space<vmem>>, vector<1x32xf32>
    %5 = vector.broadcast %4 : vector<1x32xf32> to vector<16x32xf32>
    %6 = arith.addf %3, %5 : vector<16x32xf32>
    %c0_5 = arith.constant 0 : index
    %c0_6 = arith.constant 0 : index
    %7 = vector.load %arg2[%c0_5, %c0_6] : memref<16x32xf32, #tpu.memory_space<vmem>>, vector<16x32xf32>
    %8 = arith.addf %6, %7 : vector<16x32xf32>
    %c0_7 = arith.constant 0 : index
    %c0_8 = arith.constant 0 : index
    %c0_9 = arith.constant 0 : index
    %9 = vector.load %arg3[%c0_7, %c0_8, %c0_9] : memref<2x8x8xf32, #tpu.memory_space<vmem>>, vector<2x8x8xf32>
    %c0_10 = arith.constant 0 : index
    %c0_11 = arith.constant 0 : index
    %10 = vector.load %arg6[%c0_10, %c0_11] : memref<32x96xbf16, #tpu.memory_space<vmem>>, vector<32x96xbf16>
    %c0_12 = arith.constant 0 : index
    %c0_13 = arith.constant 0 : index
    %11 = vector.load %arg7[%c0_12, %c0_13] : memref<1x96xf32, #tpu.memory_space<vmem>>, vector<1x96xf32>
    %c0_14 = arith.constant 0 : index
    %c0_15 = arith.constant 0 : index
    %12 = vector.load %arg8[%c0_14, %c0_15] : memref<32x32xbf16, #tpu.memory_space<vmem>>, vector<32x32xbf16>
    %c0_16 = arith.constant 0 : index
    %c0_17 = arith.constant 0 : index
    %13 = vector.load %arg9[%c0_16, %c0_17] : memref<1x32xf32, #tpu.memory_space<vmem>>, vector<1x32xf32>
    %c0_18 = arith.constant 0 : index
    %c0_19 = arith.constant 0 : index
    %14 = vector.load %arg10[%c0_18, %c0_19] : memref<1x32xf32, #tpu.memory_space<vmem>>, vector<1x32xf32>
    %c0_20 = arith.constant 0 : index
    %c0_21 = arith.constant 0 : index
    %15 = vector.load %arg11[%c0_20, %c0_21] : memref<1x32xf32, #tpu.memory_space<vmem>>, vector<1x32xf32>
    %c0_22 = arith.constant 0 : index
    %c0_23 = arith.constant 0 : index
    %16 = vector.load %arg12[%c0_22, %c0_23] : memref<32x64xbf16, #tpu.memory_space<vmem>>, vector<32x64xbf16>
    %c0_24 = arith.constant 0 : index
    %c0_25 = arith.constant 0 : index
    %17 = vector.load %arg13[%c0_24, %c0_25] : memref<1x64xf32, #tpu.memory_space<vmem>>, vector<1x64xf32>
    %c0_26 = arith.constant 0 : index
    %c0_27 = arith.constant 0 : index
    %18 = vector.load %arg14[%c0_26, %c0_27] : memref<64x32xbf16, #tpu.memory_space<vmem>>, vector<64x32xbf16>
    %c0_28 = arith.constant 0 : index
    %c0_29 = arith.constant 0 : index
    %19 = vector.load %arg15[%c0_28, %c0_29] : memref<1x32xf32, #tpu.memory_space<vmem>>, vector<1x32xf32>
    %c0_30 = arith.constant 0 : index
    %c0_31 = arith.constant 0 : index
    %20 = vector.load %arg16[%c0_30, %c0_31] : memref<1x32xf32, #tpu.memory_space<vmem>>, vector<1x32xf32>
    %c0_32 = arith.constant 0 : index
    %c0_33 = arith.constant 0 : index
    %21 = vector.load %arg17[%c0_32, %c0_33] : memref<1x32xf32, #tpu.memory_space<vmem>>, vector<1x32xf32>
    %22 = arith.truncf %8 : vector<16x32xf32> to vector<16x32xbf16>
    %cst_34 = arith.constant dense<0.000000e+00> : vector<16x96xf32>
    %23 = tpu.matmul %22, %10, %cst_34 {dimension_numbers = #tpu.dot_dimension_numbers<[1], [0], [0], [1], [0, 0, 1, 1], [], []>} : vector<16x32xbf16>, vector<32x96xbf16>, vector<16x96xf32> -> vector<16x96xf32>
    %24 = vector.broadcast %11 : vector<1x96xf32> to vector<16x96xf32>
    %25 = arith.addf %23, %24 : vector<16x96xf32>
    %26 = vector.extract_strided_slice %25 {offsets = [0, 0], sizes = [16, 32], strides = [1, 1]} : vector<16x96xf32> to vector<16x32xf32>
    %27 = vector.extract_strided_slice %25 {offsets = [0, 32], sizes = [16, 32], strides = [1, 1]} : vector<16x96xf32> to vector<16x32xf32>
    %28 = vector.extract_strided_slice %25 {offsets = [0, 64], sizes = [16, 32], strides = [1, 1]} : vector<16x96xf32> to vector<16x32xf32>
    %29 = vector.extract_strided_slice %26 {offsets = [0, 0], sizes = [8, 16], strides = [1, 1]} : vector<16x32xf32> to vector<8x16xf32>
    %30 = arith.truncf %29 : vector<8x16xf32> to vector<8x16xbf16>
    %31 = vector.extract_strided_slice %27 {offsets = [0, 0], sizes = [8, 16], strides = [1, 1]} : vector<16x32xf32> to vector<8x16xf32>
    %32 = arith.truncf %31 : vector<8x16xf32> to vector<8x16xbf16>
    %cst_35 = arith.constant dense<0.000000e+00> : vector<8x8xf32>
    %33 = tpu.matmul %30, %32, %cst_35 {dimension_numbers = #tpu.dot_dimension_numbers<[1], [1], [0], [0], [0, 0, 1, 0], [], []>} : vector<8x16xbf16>, vector<8x16xbf16>, vector<8x8xf32> -> vector<8x8xf32>
    %cst_36 = arith.constant 2.500000e-01 : f32
    %34 = vector.broadcast %cst_36 : f32 to vector<8x8xf32>
    %35 = arith.mulf %33, %34 : vector<8x8xf32>
    %36 = vector.extract_strided_slice %9 {offsets = [0, 0, 0], sizes = [1, 8, 8], strides = [1, 1, 1]} : vector<2x8x8xf32> to vector<1x8x8xf32>
    %37 = vector.shape_cast %36 : vector<1x8x8xf32> to vector<8x8xf32>
    %38 = arith.addf %35, %37 : vector<8x8xf32>
    %39 = vector.extract_strided_slice %26 {offsets = [0, 16], sizes = [8, 16], strides = [1, 1]} : vector<16x32xf32> to vector<8x16xf32>
    %40 = arith.truncf %39 : vector<8x16xf32> to vector<8x16xbf16>
    %41 = vector.extract_strided_slice %27 {offsets = [0, 16], sizes = [8, 16], strides = [1, 1]} : vector<16x32xf32> to vector<8x16xf32>
    %42 = arith.truncf %41 : vector<8x16xf32> to vector<8x16xbf16>
    %cst_37 = arith.constant dense<0.000000e+00> : vector<8x8xf32>
    %43 = tpu.matmul %40, %42, %cst_37 {dimension_numbers = #tpu.dot_dimension_numbers<[1], [1], [0], [0], [0, 0, 1, 0], [], []>} : vector<8x16xbf16>, vector<8x16xbf16>, vector<8x8xf32> -> vector<8x8xf32>
    %cst_38 = arith.constant 2.500000e-01 : f32
    %44 = vector.broadcast %cst_38 : f32 to vector<8x8xf32>
    %45 = arith.mulf %43, %44 : vector<8x8xf32>
    %46 = vector.extract_strided_slice %9 {offsets = [0, 0, 0], sizes = [1, 8, 8], strides = [1, 1, 1]} : vector<2x8x8xf32> to vector<1x8x8xf32>
    %47 = vector.shape_cast %46 : vector<1x8x8xf32> to vector<8x8xf32>
    %48 = arith.addf %45, %47 : vector<8x8xf32>
    %49 = vector.extract_strided_slice %26 {offsets = [8, 0], sizes = [8, 16], strides = [1, 1]} : vector<16x32xf32> to vector<8x16xf32>
    %50 = arith.truncf %49 : vector<8x16xf32> to vector<8x16xbf16>
    %51 = vector.extract_strided_slice %27 {offsets = [8, 0], sizes = [8, 16], strides = [1, 1]} : vector<16x32xf32> to vector<8x16xf32>
    %52 = arith.truncf %51 : vector<8x16xf32> to vector<8x16xbf16>
    %cst_39 = arith.constant dense<0.000000e+00> : vector<8x8xf32>
    %53 = tpu.matmul %50, %52, %cst_39 {dimension_numbers = #tpu.dot_dimension_numbers<[1], [1], [0], [0], [0, 0, 1, 0], [], []>} : vector<8x16xbf16>, vector<8x16xbf16>, vector<8x8xf32> -> vector<8x8xf32>
    %cst_40 = arith.constant 2.500000e-01 : f32
    %54 = vector.broadcast %cst_40 : f32 to vector<8x8xf32>
    %55 = arith.mulf %53, %54 : vector<8x8xf32>
    %56 = vector.extract_strided_slice %9 {offsets = [1, 0, 0], sizes = [1, 8, 8], strides = [1, 1, 1]} : vector<2x8x8xf32> to vector<1x8x8xf32>
    %57 = vector.shape_cast %56 : vector<1x8x8xf32> to vector<8x8xf32>
    %58 = arith.addf %55, %57 : vector<8x8xf32>
    %59 = vector.extract_strided_slice %26 {offsets = [8, 16], sizes = [8, 16], strides = [1, 1]} : vector<16x32xf32> to vector<8x16xf32>
    %60 = arith.truncf %59 : vector<8x16xf32> to vector<8x16xbf16>
    %61 = vector.extract_strided_slice %27 {offsets = [8, 16], sizes = [8, 16], strides = [1, 1]} : vector<16x32xf32> to vector<8x16xf32>
    %62 = arith.truncf %61 : vector<8x16xf32> to vector<8x16xbf16>
    %cst_41 = arith.constant dense<0.000000e+00> : vector<8x8xf32>
    %63 = tpu.matmul %60, %62, %cst_41 {dimension_numbers = #tpu.dot_dimension_numbers<[1], [1], [0], [0], [0, 0, 1, 0], [], []>} : vector<8x16xbf16>, vector<8x16xbf16>, vector<8x8xf32> -> vector<8x8xf32>
    %cst_42 = arith.constant 2.500000e-01 : f32
    %64 = vector.broadcast %cst_42 : f32 to vector<8x8xf32>
    %65 = arith.mulf %63, %64 : vector<8x8xf32>
    %66 = vector.extract_strided_slice %9 {offsets = [1, 0, 0], sizes = [1, 8, 8], strides = [1, 1, 1]} : vector<2x8x8xf32> to vector<1x8x8xf32>
    %67 = vector.shape_cast %66 : vector<1x8x8xf32> to vector<8x8xf32>
    %68 = arith.addf %65, %67 : vector<8x8xf32>
    %69 = tpu.concatenate %38, %48, %58, %68 in 0 : vector<8x8xf32>, vector<8x8xf32>, vector<8x8xf32>, vector<8x8xf32> -> vector<32x8xf32>
    %cst_43 = arith.constant dense<0xFF800000> : vector<32xf32>
    %70 = vector.multi_reduction <maximumf>, %69, %cst_43 [1] : vector<32x8xf32> to vector<32xf32>
    %71 = vector.shape_cast %70 : vector<32xf32> to vector<32x1xf32>
    %72 = vector.broadcast %71 : vector<32x1xf32> to vector<32x8xf32>
    %73 = arith.subf %69, %72 : vector<32x8xf32>
    %74 = math.exp %73 : vector<32x8xf32>
    %cst_44 = arith.constant dense<0.000000e+00> : vector<32xf32>
    %75 = vector.multi_reduction <add>, %74, %cst_44 [1] : vector<32x8xf32> to vector<32xf32>
    %76 = vector.shape_cast %75 : vector<32xf32> to vector<32x1xf32>
    %77 = tpu.reciprocal %76 {approx = true} : vector<32x1xf32> -> vector<32x1xf32>
    %78 = vector.broadcast %77 : vector<32x1xf32> to vector<32x8xf32>
    %79 = arith.mulf %74, %78 : vector<32x8xf32>
    %80 = vector.extract_strided_slice %79 {offsets = [0, 0], sizes = [8, 8], strides = [1, 1]} : vector<32x8xf32> to vector<8x8xf32>
    %81 = arith.truncf %80 : vector<8x8xf32> to vector<8x8xbf16>
    %82 = vector.extract_strided_slice %28 {offsets = [0, 0], sizes = [8, 16], strides = [1, 1]} : vector<16x32xf32> to vector<8x16xf32>
    %83 = arith.truncf %82 : vector<8x16xf32> to vector<8x16xbf16>
    %cst_45 = arith.constant dense<0.000000e+00> : vector<8x16xf32>
    %84 = tpu.matmul %81, %83, %cst_45 {dimension_numbers = #tpu.dot_dimension_numbers<[1], [0], [0], [1], [0, 0, 1, 1], [], []>} : vector<8x8xbf16>, vector<8x16xbf16>, vector<8x16xf32> -> vector<8x16xf32>
    %85 = arith.truncf %84 : vector<8x16xf32> to vector<8x16xbf16>
    %86 = vector.extract_strided_slice %12 {offsets = [0, 0], sizes = [16, 32], strides = [1, 1]} : vector<32x32xbf16> to vector<16x32xbf16>
    %cst_46 = arith.constant dense<0.000000e+00> : vector<8x32xf32>
    %87 = tpu.matmul %85, %86, %cst_46 {dimension_numbers = #tpu.dot_dimension_numbers<[1], [0], [0], [1], [0, 0, 1, 1], [], []>} : vector<8x16xbf16>, vector<16x32xbf16>, vector<8x32xf32> -> vector<8x32xf32>
    %88 = vector.extract_strided_slice %79 {offsets = [8, 0], sizes = [8, 8], strides = [1, 1]} : vector<32x8xf32> to vector<8x8xf32>
    %89 = arith.truncf %88 : vector<8x8xf32> to vector<8x8xbf16>
    %90 = vector.extract_strided_slice %28 {offsets = [0, 16], sizes = [8, 16], strides = [1, 1]} : vector<16x32xf32> to vector<8x16xf32>
    %91 = arith.truncf %90 : vector<8x16xf32> to vector<8x16xbf16>
    %cst_47 = arith.constant dense<0.000000e+00> : vector<8x16xf32>
    %92 = tpu.matmul %89, %91, %cst_47 {dimension_numbers = #tpu.dot_dimension_numbers<[1], [0], [0], [1], [0, 0, 1, 1], [], []>} : vector<8x8xbf16>, vector<8x16xbf16>, vector<8x16xf32> -> vector<8x16xf32>
    %93 = arith.truncf %92 : vector<8x16xf32> to vector<8x16xbf16>
    %94 = vector.extract_strided_slice %12 {offsets = [16, 0], sizes = [16, 32], strides = [1, 1]} : vector<32x32xbf16> to vector<16x32xbf16>
    %cst_48 = arith.constant dense<0.000000e+00> : vector<8x32xf32>
    %95 = tpu.matmul %93, %94, %cst_48 {dimension_numbers = #tpu.dot_dimension_numbers<[1], [0], [0], [1], [0, 0, 1, 1], [], []>} : vector<8x16xbf16>, vector<16x32xbf16>, vector<8x32xf32> -> vector<8x32xf32>
    %96 = arith.addf %87, %95 : vector<8x32xf32>
    %97 = vector.extract_strided_slice %79 {offsets = [16, 0], sizes = [8, 8], strides = [1, 1]} : vector<32x8xf32> to vector<8x8xf32>
    %98 = arith.truncf %97 : vector<8x8xf32> to vector<8x8xbf16>
    %99 = vector.extract_strided_slice %28 {offsets = [8, 0], sizes = [8, 16], strides = [1, 1]} : vector<16x32xf32> to vector<8x16xf32>
    %100 = arith.truncf %99 : vector<8x16xf32> to vector<8x16xbf16>
    %cst_49 = arith.constant dense<0.000000e+00> : vector<8x16xf32>
    %101 = tpu.matmul %98, %100, %cst_49 {dimension_numbers = #tpu.dot_dimension_numbers<[1], [0], [0], [1], [0, 0, 1, 1], [], []>} : vector<8x8xbf16>, vector<8x16xbf16>, vector<8x16xf32> -> vector<8x16xf32>
    %102 = arith.truncf %101 : vector<8x16xf32> to vector<8x16xbf16>
    %103 = vector.extract_strided_slice %12 {offsets = [0, 0], sizes = [16, 32], strides = [1, 1]} : vector<32x32xbf16> to vector<16x32xbf16>
    %cst_50 = arith.constant dense<0.000000e+00> : vector<8x32xf32>
    %104 = tpu.matmul %102, %103, %cst_50 {dimension_numbers = #tpu.dot_dimension_numbers<[1], [0], [0], [1], [0, 0, 1, 1], [], []>} : vector<8x16xbf16>, vector<16x32xbf16>, vector<8x32xf32> -> vector<8x32xf32>
    %105 = vector.extract_strided_slice %79 {offsets = [24, 0], sizes = [8, 8], strides = [1, 1]} : vector<32x8xf32> to vector<8x8xf32>
    %106 = arith.truncf %105 : vector<8x8xf32> to vector<8x8xbf16>
    %107 = vector.extract_strided_slice %28 {offsets = [8, 16], sizes = [8, 16], strides = [1, 1]} : vector<16x32xf32> to vector<8x16xf32>
    %108 = arith.truncf %107 : vector<8x16xf32> to vector<8x16xbf16>
    %cst_51 = arith.constant dense<0.000000e+00> : vector<8x16xf32>
    %109 = tpu.matmul %106, %108, %cst_51 {dimension_numbers = #tpu.dot_dimension_numbers<[1], [0], [0], [1], [0, 0, 1, 1], [], []>} : vector<8x8xbf16>, vector<8x16xbf16>, vector<8x16xf32> -> vector<8x16xf32>
    %110 = arith.truncf %109 : vector<8x16xf32> to vector<8x16xbf16>
    %111 = vector.extract_strided_slice %12 {offsets = [16, 0], sizes = [16, 32], strides = [1, 1]} : vector<32x32xbf16> to vector<16x32xbf16>
    %cst_52 = arith.constant dense<0.000000e+00> : vector<8x32xf32>
    %112 = tpu.matmul %110, %111, %cst_52 {dimension_numbers = #tpu.dot_dimension_numbers<[1], [0], [0], [1], [0, 0, 1, 1], [], []>} : vector<8x16xbf16>, vector<16x32xbf16>, vector<8x32xf32> -> vector<8x32xf32>
    %113 = arith.addf %104, %112 : vector<8x32xf32>
    %114 = tpu.concatenate %96, %113 in 0 : vector<8x32xf32>, vector<8x32xf32> -> vector<16x32xf32>
    %115 = vector.broadcast %13 : vector<1x32xf32> to vector<16x32xf32>
    %116 = arith.addf %114, %115 : vector<16x32xf32>
    %117 = arith.addf %8, %116 : vector<16x32xf32>
    %cst_53 = arith.constant dense<0.000000e+00> : vector<16xf32>
    %118 = vector.multi_reduction <add>, %117, %cst_53 [1] : vector<16x32xf32> to vector<16xf32>
    %119 = vector.shape_cast %118 : vector<16xf32> to vector<16x1xf32>
    %cst_54 = arith.constant 3.200000e+01 : f32
    %120 = vector.broadcast %cst_54 : f32 to vector<16x1xf32>
    %121 = arith.divf %119, %120 : vector<16x1xf32>
    %122 = vector.broadcast %121 : vector<16x1xf32> to vector<16x32xf32>
    %123 = arith.subf %117, %122 : vector<16x32xf32>
    %124 = arith.mulf %123, %123 : vector<16x32xf32>
    %cst_55 = arith.constant dense<0.000000e+00> : vector<16xf32>
    %125 = vector.multi_reduction <add>, %124, %cst_55 [1] : vector<16x32xf32> to vector<16xf32>
    %126 = vector.shape_cast %125 : vector<16xf32> to vector<16x1xf32>
    %cst_56 = arith.constant 3.200000e+01 : f32
    %127 = vector.broadcast %cst_56 : f32 to vector<16x1xf32>
    %128 = arith.divf %126, %127 : vector<16x1xf32>
    %129 = vector.broadcast %121 : vector<16x1xf32> to vector<16x32xf32>
    %130 = arith.subf %117, %129 : vector<16x32xf32>
    %cst_57 = arith.constant 9.99999974E-6 : f32
    %131 = vector.broadcast %cst_57 : f32 to vector<16x1xf32>
    %132 = arith.addf %128, %131 : vector<16x1xf32>
    %133 = math.rsqrt %132 : vector<16x1xf32>
    %134 = vector.broadcast %133 : vector<16x1xf32> to vector<16x32xf32>
    %135 = arith.mulf %130, %134 : vector<16x32xf32>
    %136 = vector.broadcast %14 : vector<1x32xf32> to vector<16x32xf32>
    %137 = arith.mulf %135, %136 : vector<16x32xf32>
    %138 = vector.broadcast %15 : vector<1x32xf32> to vector<16x32xf32>
    %139 = arith.addf %137, %138 : vector<16x32xf32>
    %140 = arith.truncf %139 : vector<16x32xf32> to vector<16x32xbf16>
    %cst_58 = arith.constant dense<0.000000e+00> : vector<16x64xf32>
    %141 = tpu.matmul %140, %16, %cst_58 {dimension_numbers = #tpu.dot_dimension_numbers<[1], [0], [0], [1], [0, 0, 1, 1], [], []>} : vector<16x32xbf16>, vector<32x64xbf16>, vector<16x64xf32> -> vector<16x64xf32>
    %142 = vector.broadcast %17 : vector<1x64xf32> to vector<16x64xf32>
    %143 = arith.addf %141, %142 : vector<16x64xf32>
    %cst_59 = arith.constant 0.000000e+00 : f32
    %144 = vector.broadcast %cst_59 : f32 to vector<16x64xf32>
    %145 = arith.maximumf %143, %144 : vector<16x64xf32>
    %146 = arith.truncf %145 : vector<16x64xf32> to vector<16x64xbf16>
    %cst_60 = arith.constant dense<0.000000e+00> : vector<16x32xf32>
    %147 = tpu.matmul %146, %18, %cst_60 {dimension_numbers = #tpu.dot_dimension_numbers<[1], [0], [0], [1], [0, 0, 1, 1], [], []>} : vector<16x64xbf16>, vector<64x32xbf16>, vector<16x32xf32> -> vector<16x32xf32>
    %148 = vector.broadcast %19 : vector<1x32xf32> to vector<16x32xf32>
    %149 = arith.addf %147, %148 : vector<16x32xf32>
    %150 = arith.addf %139, %149 : vector<16x32xf32>
    %cst_61 = arith.constant dense<0.000000e+00> : vector<16xf32>
    %151 = vector.multi_reduction <add>, %150, %cst_61 [1] : vector<16x32xf32> to vector<16xf32>
    %152 = vector.shape_cast %151 : vector<16xf32> to vector<16x1xf32>
    %cst_62 = arith.constant 3.200000e+01 : f32
    %153 = vector.broadcast %cst_62 : f32 to vector<16x1xf32>
    %154 = arith.divf %152, %153 : vector<16x1xf32>
    %155 = vector.broadcast %154 : vector<16x1xf32> to vector<16x32xf32>
    %156 = arith.subf %150, %155 : vector<16x32xf32>
    %157 = arith.mulf %156, %156 : vector<16x32xf32>
    %cst_63 = arith.constant dense<0.000000e+00> : vector<16xf32>
    %158 = vector.multi_reduction <add>, %157, %cst_63 [1] : vector<16x32xf32> to vector<16xf32>
    %159 = vector.shape_cast %158 : vector<16xf32> to vector<16x1xf32>
    %cst_64 = arith.constant 3.200000e+01 : f32
    %160 = vector.broadcast %cst_64 : f32 to vector<16x1xf32>
    %161 = arith.divf %159, %160 : vector<16x1xf32>
    %162 = vector.broadcast %154 : vector<16x1xf32> to vector<16x32xf32>
    %163 = arith.subf %150, %162 : vector<16x32xf32>
    %cst_65 = arith.constant 9.99999974E-6 : f32
    %164 = vector.broadcast %cst_65 : f32 to vector<16x1xf32>
    %165 = arith.addf %161, %164 : vector<16x1xf32>
    %166 = math.rsqrt %165 : vector<16x1xf32>
    %167 = vector.broadcast %166 : vector<16x1xf32> to vector<16x32xf32>
    %168 = arith.mulf %163, %167 : vector<16x32xf32>
    %169 = vector.broadcast %20 : vector<1x32xf32> to vector<16x32xf32>
    %170 = arith.mulf %168, %169 : vector<16x32xf32>
    %171 = vector.broadcast %21 : vector<1x32xf32> to vector<16x32xf32>
    %172 = arith.addf %170, %171 : vector<16x32xf32>
    %173 = arith.truncf %172 : vector<16x32xf32> to vector<16x32xbf16>
    %c0_66 = arith.constant 0 : index
    %c0_67 = arith.constant 0 : index
    %174 = vector.load %arg18[%c0_66, %c0_67] : memref<32x36xbf16, #tpu.memory_space<vmem>>, vector<32x36xbf16>
    %cst_68 = arith.constant dense<0.000000e+00> : vector<16x36xf32>
    %175 = tpu.matmul %173, %174, %cst_68 {dimension_numbers = #tpu.dot_dimension_numbers<[1], [0], [0], [1], [0, 0, 1, 1], [], []>} : vector<16x32xbf16>, vector<32x36xbf16>, vector<16x36xf32> -> vector<16x36xf32>
    %c0_69 = arith.constant 0 : index
    %c0_70 = arith.constant 0 : index
    %176 = vector.load %arg19[%c0_69, %c0_70] : memref<1x36xf32, #tpu.memory_space<vmem>>, vector<1x36xf32>
    %177 = vector.broadcast %176 : vector<1x36xf32> to vector<16x36xf32>
    %178 = arith.addf %175, %177 : vector<16x36xf32>
    %c0_71 = arith.constant 0 : index
    %c0_72 = arith.constant 0 : index
    %179 = vector.load %arg20[%c0_71, %c0_72] : memref<16x36xf32, #tpu.memory_space<vmem>>, vector<16x36xf32>
    tpu.vector_store %arg20[%c0_71, %c0_72], %178 {strides = array<i32>} : memref<16x36xf32, #tpu.memory_space<vmem>>, vector<16x36xf32>,
    return
  }
  func.func @transform_0(%arg0: i32) -> (i32, i32) {
    %c0_i32 = arith.constant 0 : i32
    %c0_i32_0 = arith.constant 0 : i32
    %c0_i32_1 = arith.constant 0 : i32
    return %c0_i32, %c0_i32_0 : i32, i32
  }
  func.func @transform_1(%arg0: i32) -> (i32, i32) {
    %c0_i32 = arith.constant 0 : i32
    %c0_i32_0 = arith.constant 0 : i32
    %c0_i32_1 = arith.constant 0 : i32
    return %c0_i32, %c0_i32_0 : i32, i32
  }
  func.func @transform_2(%arg0: i32) -> (i32, i32, i32) {
    %c0_i32 = arith.constant 0 : i32
    %c0_i32_0 = arith.constant 0 : i32
    %c0_i32_1 = arith.constant 0 : i32
    %c0_i32_2 = arith.constant 0 : i32
    return %c0_i32, %c0_i32_0, %c0_i32_1 : i32, i32, i32
  }
  func.func @transform_3(%arg0: i32) -> (i32, i32) {
    %c0_i32 = arith.constant 0 : i32
    %c0_i32_0 = arith.constant 0 : i32
    %c0_i32_1 = arith.constant 0 : i32
    return %c0_i32, %c0_i32_0 : i32, i32
  }
  func.func @transform_4(%arg0: i32) -> (i32, i32) {
    %c0_i32 = arith.constant 0 : i32
    %c0_i32_0 = arith.constant 0 : i32
    %c0_i32_1 = arith.constant 0 : i32
    return %c0_i32, %c0_i32_0 : i32, i32
  }
  func.func @transform_5(%arg0: i32) -> (i32, i32) {
    %c0_i32 = arith.constant 0 : i32
    %c0_i32_0 = arith.constant 0 : i32
    %c0_i32_1 = arith.constant 0 : i32
    return %c0_i32, %c0_i32_0 : i32, i32
  }
  func.func @transform_6(%arg0: i32) -> (i32, i32) {
    %c0_i32 = arith.constant 0 : i32
    %c0_i32_0 = arith.constant 0 : i32
    %c0_i32_1 = arith.constant 0 : i32
    return %c0_i32, %c0_i32_0 : i32, i32
  }
  func.func @transform_7(%arg0: i32) -> (i32, i32) {
    %c0_i32 = arith.constant 0 : i32
    %c0_i32_0 = arith.constant 0 : i32
    %c0_i32_1 = arith.constant 0 : i32
    return %c0_i32, %c0_i32_0 : i32, i32
  }
  func.func @transform_8(%arg0: i32) -> (i32, i32) {
    %c0_i32 = arith.constant 0 : i32
    %c0_i32_0 = arith.constant 0 : i32
    %c0_i32_1 = arith.constant 0 : i32
    return %c0_i32, %c0_i32_0 : i32, i32
  }
  func.func @transform_9(%arg0: i32) -> (i32, i32) {
    %c0_i32 = arith.constant 0 : i32
    %c0_i32_0 = arith.constant 0 : i32
    %c0_i32_1 = arith.constant 0 : i32
    return %c0_i32, %c0_i32_0 : i32, i32
  }
  func.func @transform_10(%arg0: i32) -> (i32, i32) {
    %c0_i32 = arith.constant 0 : i32
    %c0_i32_0 = arith.constant 0 : i32
    %c0_i32_1 = arith.constant 0 : i32
    return %c0_i32, %c0_i32_0 : i32, i32
  }
  func.func @transform_11(%arg0: i32) -> (i32, i32) {
    %c0_i32 = arith.constant 0 : i32
    %c0_i32_0 = arith.constant 0 : i32
    %c0_i32_1 = arith.constant 0 : i32
    return %c0_i32, %c0_i32_0 : i32, i32
  }
  func.func @transform_12(%arg0: i32) -> (i32, i32) {
    %c0_i32 = arith.constant 0 : i32
    %c0_i32_0 = arith.constant 0 : i32
    %c0_i32_1 = arith.constant 0 : i32
    return %c0_i32, %c0_i32_0 : i32, i32
  }
  func.func @transform_13(%arg0: i32) -> (i32, i32) {
    %c0_i32 = arith.constant 0 : i32
    %c0_i32_0 = arith.constant 0 : i32
    %c0_i32_1 = arith.constant 0 : i32
    return %c0_i32, %c0_i32_0 : i32, i32
  }
  func.func @transform_14(%arg0: i32) -> (i32, i32) {
    %c0_i32 = arith.constant 0 : i32
    %c0_i32_0 = arith.constant 0 : i32
    %c0_i32_1 = arith.constant 0 : i32
    return %c0_i32, %c0_i32_0 : i32, i32
  }
  func.func @transform_15(%arg0: i32) -> (i32, i32) {
    %c0_i32 = arith.constant 0 : i32
    %c0_i32_0 = arith.constant 0 : i32
    %c0_i32_1 = arith.constant 0 : i32
    return %c0_i32, %c0_i32_0 : i32, i32
  }
  func.func @transform_16(%arg0: i32) -> (i32, i32) {
    %c0_i32 = arith.constant 0 : i32
    %c0_i32_0 = arith.constant 0 : i32
    %c0_i32_1 = arith.constant 0 : i32
    return %c0_i32, %c0_i32_0 : i32, i32
  }
  func.func @transform_17(%arg0: i32) -> (i32, i32) {
    %c0_i32 = arith.constant 0 : i32
    %c0_i32_0 = arith.constant 0 : i32
    %c0_i32_1 = arith.constant 0 : i32
    return %c0_i32, %c0_i32_0 : i32, i32
  }
  func.func @transform_18(%arg0: i32) -> (i32, i32) {
    %c0_i32 = arith.constant 0 : i32
    %c0_i32_0 = arith.constant 0 : i32
    %c0_i32_1 = arith.constant 0 : i32
    return %c0_i32, %c0_i32_0 : i32, i32
  }
  func.func @transform_19(%arg0: i32) -> (i32, i32) {
    %c0_i32 = arith.constant 0 : i32
    %c0_i32_0 = arith.constant 0 : i32
    %c0_i32_1 = arith.constant 0 : i32
    return %c0_i32, %c0_i32_0 : i32, i32
  }
}

</mosaic_0001>

<bundles_post_ra>
// kernel: mcil_forward.5
= control target key start
LH: loop header
LB: loop body
LE: loop exit
PB: predicated region body
PF: predicated region fallthrough
CT: control target
= control target key end

     0   :  { %vm536_vm0 = vcmask 1044480   ;;  %vm537_vm1 = vcmask 1045504   ;;  %v4526_v0 = vmov 0.0   ;;  %v4527_v2 = vmov 65535   ;;  %s6442_s1 = inlined_call_operand.vmem [shape: bf16[27,8], index: 1, kind: input, shape index: {}]   ;;  %s6443_s0 = inlined_call_operand.vmem [shape: f32[1296,27], index: 0, kind: input, shape index: {}]   ;;  %s6444_s3 = inlined_call_operand.vmem [shape: bf16[9,8,16], index: 3, kind: input, shape index: {}]   ;;  %s6445_s2 = inlined_call_operand.vmem [shape: f32[1,8], index: 2, kind: input, shape index: {}]   ;;  %s6446_s5 = inlined_call_operand.vmem [shape: bf16[9,16,32], index: 5, kind: input, shape index: {}]   ;;  %s6447_s4 = inlined_call_operand.vmem [shape: f32[1,16], index: 4, kind: input, shape index: {}]   ;;  %s6448_s6 = inlined_call_operand.vmem [shape: f32[1,32], index: 6, kind: input, shape index: {}]   ;;  %s6449_s7 = inlined_call_operand.vmem [shape: f32[16,32], index: 7, kind: output, shape index: {}]  }
   0x1   :  { %3786 = vmatprep.subr.bf16.mxu0 %v4526_v0  ;;  %v4513_v1 = vld [vmem:[%s6442_s1] sm:$0xff]   ;;  %v538_v3 = vsel %vm536_vm0, 4294967295, %v4527_v2  ;;  %4114 = vmatprep.subr.bf16.mxu1 %v4526_v0  ;;  %v4514_v4 = vld [vmem:[%s6442_s1 + $0x8] sm:$0x3f]   ;;  %vm4528_vm2 = vmmov 0   ;;  %vm292_vm3 = vcmask 220160  }
   0x2   :  { %3787 = vmatpush3.bf16.msra.mxu0 %v4513_v1  ;;  %v539_v5 = vsel %vm537_vm1, %v538_v3, 0  ;;  %v27_v6 = vld [vmem:[%s6443_s0] sm:$0xff]  ;;  %v28_v7 = vld [vmem:[%s6443_s0 + $0x8] sm:$0xff]  ;;  %3790 = vmatprep.mubr.msk.bf16.mxu0 %vm4528_vm2, %v4526_v0  ;;  %v29_v10 = vld [vmem:[%s6443_s0 + $0x10] sm:$0xff]  ;;  %vm1435_vm4 = vcmask 1043456   ;;  %vm1407_vm5 = vcmask 64512  }
   0x3   :  { %3788 = vmatprep.subr.bf16.mxu0 %v4526_v0  ;;  %v541_v8 = vand.u32 %v4514_v4, %v539_v5  ;;  %4116 = vmatprep.mubr.msk.bf16.mxu1 %vm4528_vm2, %v4526_v0  ;;  %v189_v9 = vpack.c.bf16 %v28_v7, %v27_v6  ;;  %v30_v11 = vld [vmem:[%s6443_s0 + $0x18] sm:$0xff]  ;;  %v31_v13 = vld [vmem:[%s6443_s0 + $0x20] sm:$0xff]  ;;  %v32_v14 = vld [vmem:[%s6443_s0 + $0x28] sm:$0xff]  ;;  %vm2883_vm6 = vcmask 130048   ;;  %vm3379_vm7 = vcmask 261120  }
   0x4   :  { %v190_v12 = vpack.c.bf16 %v30_v11, %v29_v10  ;;  %v191_v15 = vpack.c.bf16 %v32_v14, %v31_v13  ;;  %v33_v16 = vld [vmem:[%s6443_s0 + $0x30] sm:$0xff]  ;;  %v34_v17 = vld [vmem:[%s6443_s0 + $0x38] sm:$0xff]  ;;  %v35_v19 = vld [vmem:[%s6443_s0 + $0x40] sm:$0xff] }
   0x5   :  { %v192_v18 = vpack.c.bf16 %v34_v17, %v33_v16  ;;  %v36_v20 = vld [vmem:[%s6443_s0 + $0x48] sm:$0xff]  ;;  %v37_v22 = vld [vmem:[%s6443_s0 + $0x50] sm:$0xff]  ;;  %v38_v23 = vld [vmem:[%s6443_s0 + $0x58] sm:$0xff] }
   0x6   :  { %3789 = vmatpush3.bf16.msra.mxu0 %v541_v8  ;;  %v193_v21 = vpack.c.bf16 %v36_v20, %v35_v19  ;;  %v194_v24 = vpack.c.bf16 %v38_v23, %v37_v22  ;;  %v39_v25 = vld [vmem:[%s6443_s0 + $0x60] sm:$0xff]  ;;  %v40_v26 = vld [vmem:[%s6443_s0 + $0x68] sm:$0xff]  ;;  %v41_v28 = vld [vmem:[%s6443_s0 + $0x70] sm:$0xff] }
   0x7   :  { %4462 = vmatprep.subr.bf16.mxu0 %v4526_v0  ;;  %v195_v27 = vpack.c.bf16 %v40_v26, %v39_v25  ;;  %v42_v29 = vld [vmem:[%s6443_s0 + $0x78] sm:$0xff]  ;;  %v43_v31 = vld [vmem:[%s6443_s0 + $0x80] sm:$0xff]  ;;  %v44_v32 = vld [vmem:[%s6443_s0 + $0x88] sm:$0xff] }
   0x8   :  { %v196_v30 = vpack.c.bf16 %v42_v29, %v41_v28  ;;  %v197_v33 = vpack.c.bf16 %v44_v32, %v43_v31  ;;  %v45_v34 = vld [vmem:[%s6443_s0 + $0x90] sm:$0xff]  ;;  %v46_v35 = vld [vmem:[%s6443_s0 + $0x98] sm:$0xff]  ;;  %v47_v37 = vld [vmem:[%s6443_s0 + $0xa0] sm:$0xff] }
   0x9   :  { %3791 = vmatmul.mubr.msk.bf16.vlgmr.msra.gmra.mrb[0].mxu0 %vm292_vm3, %v189_v9  ;;  %v198_v36 = vpack.c.bf16 %v46_v35, %v45_v34  ;;  %v48_v38 = vld [vmem:[%s6443_s0 + $0xa8] sm:$0xff]  ;;  %v49_v40 = vld [vmem:[%s6443_s0 + $0xb0] sm:$0xff]  ;;  %v50_v41 = vld [vmem:[%s6443_s0 + $0xb8] sm:$0xff] }
   0xa   :  { %3794 = vmatprep.mubr.msk.bf16.mxu0 %vm4528_vm2, %v4526_v0  ;;  %v199_v39 = vpack.c.bf16 %v48_v38, %v47_v37  ;;  %v200_v42 = vpack.c.bf16 %v50_v41, %v49_v40  ;;  %v51_v43 = vld [vmem:[%s6443_s0 + $0xc0] sm:$0xff]  ;;  %v52_v44 = vld [vmem:[%s6443_s0 + $0xc8] sm:$0xff]  ;;  %v53_v46 = vld [vmem:[%s6443_s0 + $0xd0] sm:$0xff] }
   0xb   :  { %v201_v45 = vpack.c.bf16 %v52_v44, %v51_v43  ;;  %v54_v47 = vld [vmem:[%s6443_s0 + $0xd8] sm:$0xff]  ;;  %v55_v49 = vld [vmem:[%s6443_s0 + $0xe0] sm:$0xff]  ;;  %v56_v50 = vld [vmem:[%s6443_s0 + $0xe8] sm:$0xff] }
   0xc   :  { %v202_v48 = vpack.c.bf16 %v54_v47, %v53_v46  ;;  %v203_v51 = vpack.c.bf16 %v56_v50, %v55_v49  ;;  %v57_v52 = vld [vmem:[%s6443_s0 + $0xf0] sm:$0xff]  ;;  %v58_v53 = vld [vmem:[%s6443_s0 + $0xf8] sm:$0xff]  ;;  %v59_v55 = vld [vmem:[%s6443_s0 + $0x100] sm:$0xff] }
   0xd   :  { %v204_v54 = vpack.c.bf16 %v58_v53, %v57_v52  ;;  %v60_v56 = vld [vmem:[%s6443_s0 + $0x108] sm:$0xff]  ;;  %v61_v58 = vld [vmem:[%s6443_s0 + $0x110] sm:$0xff]  ;;  %v62_v59 = vld [vmem:[%s6443_s0 + $0x118] sm:$0xff] }
   0xe   :  { %v205_v57 = vpack.c.bf16 %v60_v56, %v59_v55  ;;  %v206_v60 = vpack.c.bf16 %v62_v59, %v61_v58  ;;  %v63_v61 = vld [vmem:[%s6443_s0 + $0x120] sm:$0xff]  ;;  %v64_v62 = vld [vmem:[%s6443_s0 + $0x128] sm:$0xff]  ;;  %v65_v1 = vld [vmem:[%s6443_s0 + $0x130] sm:$0xff] }
   0xf   :  { %v207_v63 = vpack.c.bf16 %v64_v62, %v63_v61  ;;  %v66_v2 = vld [vmem:[%s6443_s0 + $0x138] sm:$0xff]  ;;  %v67_v4 = vld [vmem:[%s6443_s0 + $0x140] sm:$0xff]  ;;  %v68_v5 = vld [vmem:[%s6443_s0 + $0x148] sm:$0xff] }
  0x10   :  { %v208_v3 = vpack.c.bf16 %v66_v2, %v65_v1  ;;  %v209_v6 = vpack.c.bf16 %v68_v5, %v67_v4  ;;  %v3470_v7 = vld [vmem:[%s6444_s3 + $0x4] sm:$0xf]  ;;  %v69_v9 = vld [vmem:[%s6443_s0 + $0x150] sm:$0xff]  ;;  %v70_v10 = vld [vmem:[%s6443_s0 + $0x158] sm:$0xff] }
  0x11   :  { %3795 = vmatmul.mubr.msk.bf16.gmra.mrb[4].mxu0 %vm292_vm3, %v190_v12  ;;  %v1437_v8 = vsel %vm1435_vm4, %v3470_v7, 0  ;;  %v210_v11 = vpack.c.bf16 %v70_v10, %v69_v9  ;;  %v71_v12 = vld [vmem:[%s6443_s0 + $0x160] sm:$0xff]  ;;  %v72_v13 = vld [vmem:[%s6443_s0 + $0x168] sm:$0xff]  ;;  %v74_v16 = vld [vmem:[%s6443_s0 + $0x178] sm:$0xff] }
  0x12   :  { %3798 = vmatprep.mubr.msk.bf16.mxu0 %vm4528_vm2, %v4526_v0  ;;  %4115 = vmatpush3.bf16.msra.mxu1 %v1437_v8  ;;  %v211_v14 = vpack.c.bf16 %v72_v13, %v71_v12  ;;  %v76_v19 = vld [vmem:[%s6443_s0 + $0x188] sm:$0xff]  ;;  %v78_v22 = vld [vmem:[%s6443_s0 + $0x198] sm:$0xff]  ;;  %v81_v28 = vld [vmem:[%s6443_s0 + $0x1b0] sm:$0xff] }
  0x13   :  { %4152 = vmatprep.subr.bf16.mxu1 %v4526_v0  ;;  %v80_v25 = vld [vmem:[%s6443_s0 + $0x1a8] sm:$0xff]  ;;  %v82_v29 = vld [vmem:[%s6443_s0 + $0x1b8] sm:$0xff]  ;;  %v89_v12 = vld [vmem:[%s6443_s0 + $0x1f0] sm:$0xff] }
  0x14   :  { %v84_v40 = vld [vmem:[%s6443_s0 + $0x1c8] sm:$0xff]  ;;  %v86_v52 = vld [vmem:[%s6443_s0 + $0x1d8] sm:$0xff] }
  0x15   :  { %v88_v1 = vld [vmem:[%s6443_s0 + $0x1e8] sm:$0xff]  ;;  %v90_v13 = vld [vmem:[%s6443_s0 + $0x1f8] sm:$0xff] }
  0x19   :  { %3799 = vmatmul.mubr.msk.bf16.gmra.mrb[8].mxu0 %vm292_vm3, %v191_v15  ;;  %v73_v15 = vld [vmem:[%s6443_s0 + $0x170] sm:$0xff] }
  0x1a   :  { %3802 = vmatprep.mubr.msk.bf16.mxu0 %vm4528_vm2, %v4526_v0  ;;  %v212_v17 = vpack.c.bf16 %v74_v16, %v73_v15 }
  0x21   :  { %3803 = vmatmul.mubr.msk.bf16.gmra.mrb[12].mxu0 %vm292_vm3, %v192_v18  ;;  %v75_v18 = vld [vmem:[%s6443_s0 + $0x180] sm:$0xff] }
  0x22   :  { %3806 = vmatprep.mubr.msk.bf16.mxu0 %vm4528_vm2, %v4526_v0  ;;  %v213_v20 = vpack.c.bf16 %v76_v19, %v75_v18  ;;  %v220_v18 = vpack.c.bf16 %v90_v13, %v89_v12  ;;  %v99_v13 = vld [vmem:[%s6443_s0 + $0x240] sm:$0xff] }
  0x29   :  { %3807 = vmatmul.mubr.msk.bf16.gmra.mrb[16].mxu0 %vm292_vm3, %v193_v21  ;;  %v77_v21 = vld [vmem:[%s6443_s0 + $0x190] sm:$0xff] }
  0x2a   :  { %3810 = vmatprep.mubr.msk.bf16.mxu0 %vm4528_vm2, %v4526_v0  ;;  %v214_v23 = vpack.c.bf16 %v78_v22, %v77_v21 }
  0x31   :  { %3811 = vmatmul.mubr.msk.bf16.gmra.mrb[20].mxu0 %vm292_vm3, %v194_v24  ;;  %v79_v24 = vld [vmem:[%s6443_s0 + $0x1a0] sm:$0xff] }
  0x32   :  { %3814 = vmatprep.mubr.msk.bf16.mxu0 %vm4528_vm2, %v4526_v0  ;;  %v215_v26 = vpack.c.bf16 %v80_v25, %v79_v24  ;;  %v91_v24 = vld [vmem:[%s6443_s0 + $0x200] sm:$0xff]  ;;  %v92_v25 = vld [vmem:[%s6443_s0 + $0x208] sm:$0xff] }
  0x39   :  { %3815 = vmatmul.mubr.msk.bf16.gmra.mrb[24].mxu0 %vm292_vm3, %v195_v27  ;;  %v4832_v27 = vld [vmem:[%s6445_s2] ss:$0 sm:$0xff] }
  0x3a   :  { %3818 = vmatprep.mubr.msk.bf16.mxu0 %vm4528_vm2, %v4526_v0 }
  0x41   :  { %3819 = vmatmul.mubr.msk.bf16.gmra.mrb[28].mxu0 %vm292_vm3, %v196_v30 }
  0x42   :  { %3822 = vmatprep.mubr.msk.bf16.mxu0 %vm4528_vm2, %v4526_v0 }
  0x49   :  { %3823 = vmatmul.mubr.msk.bf16.gmra.mrb[32].mxu0 %vm292_vm3, %v197_v33  ;;  %v216_v33 = vpack.c.bf16 %v82_v29, %v81_v28 }
  0x4a   :  { %3826 = vmatprep.mubr.msk.bf16.mxu0 %vm4528_vm2, %v4526_v0 }
  0x51   :  { %3827 = vmatmul.mubr.msk.bf16.gmra.mrb[36].mxu0 %vm292_vm3, %v198_v36 }
  0x52   :  { %3830 = vmatprep.mubr.msk.bf16.mxu0 %vm4528_vm2, %v4526_v0 }
  0x59   :  { %3831 = vmatmul.mubr.msk.bf16.gmra.mrb[40].mxu0 %vm292_vm3, %v199_v39  ;;  %v83_v39 = vld [vmem:[%s6443_s0 + $0x1c0] sm:$0xff] }
  0x5a   :  { %3834 = vmatprep.mubr.msk.bf16.mxu0 %vm4528_vm2, %v4526_v0 }
  0x61   :  { %3835 = vmatmul.mubr.msk.bf16.gmra.mrb[44].mxu0 %vm292_vm3, %v200_v42 }
  0x62   :  { %3838 = vmatprep.mubr.msk.bf16.mxu0 %vm4528_vm2, %v4526_v0 }
  0x69   :  { %3839 = vmatmul.mubr.msk.bf16.gmra.mrb[48].mxu0 %vm292_vm3, %v201_v45  ;;  %v217_v45 = vpack.c.bf16 %v84_v40, %v83_v39 }
  0x6a   :  { %3842 = vmatprep.mubr.msk.bf16.mxu0 %vm4528_vm2, %v4526_v0 }
  0x71   :  { %3843 = vmatmul.mubr.msk.bf16.gmra.mrb[52].mxu0 %vm292_vm3, %v202_v48 }
  0x72   :  { %3846 = vmatprep.mubr.msk.bf16.mxu0 %vm4528_vm2, %v4526_v0 }
  0x79   :  { %3847 = vmatmul.mubr.msk.bf16.gmra.mrb[56].mxu0 %vm292_vm3, %v203_v51  ;;  %v85_v51 = vld [vmem:[%s6443_s0 + $0x1d0] sm:$0xff] }
  0x7a   :  { %3850 = vmatprep.mubr.msk.bf16.mxu0 %vm4528_vm2, %v4526_v0 }
  0x81   :  { %3851 = vmatmul.mubr.msk.bf16.gmra.mrb[60].mxu0 %vm292_vm3, %v204_v54 }
  0x82   :  { %3854 = vmatprep.mubr.msk.bf16.mxu0 %vm4528_vm2, %v4526_v0 }
  0x89   :  { %3855 = vmatmul.mubr.msk.bf16.gmra.mrb[64].mxu0 %vm292_vm3, %v205_v57  ;;  %v218_v57 = vpack.c.bf16 %v86_v52, %v85_v51  ;;  %v96_v51 = vld [vmem:[%s6443_s0 + $0x228] sm:$0xff] }
  0x8a   :  { %3858 = vmatprep.mubr.msk.bf16.mxu0 %vm4528_vm2, %v4526_v0 }
  0x91   :  { %3859 = vmatmul.mubr.msk.bf16.gmra.mrb[68].mxu0 %vm292_vm3, %v206_v60 }
  0x92   :  { %3862 = vmatprep.mubr.msk.bf16.mxu0 %vm4528_vm2, %v4526_v0 }
  0x99   :  { %3863 = vmatmul.mubr.msk.bf16.gmra.mrb[72].mxu0 %vm292_vm3, %v207_v63  ;;  %v87_v63 = vld [vmem:[%s6443_s0 + $0x1e0] sm:$0xff] }
  0x9a   :  { %3866 = vmatprep.mubr.msk.bf16.mxu0 %vm4528_vm2, %v4526_v0 }
  0xa1   :  { %3867 = vmatmul.mubr.msk.bf16.gmra.mrb[76].mxu0 %vm292_vm3, %v208_v3 }
  0xa2   :  { %3870 = vmatprep.mubr.msk.bf16.mxu0 %vm4528_vm2, %v4526_v0 }
  0xa9   :  { %3871 = vmatmul.mubr.msk.bf16.gmra.mrb[80].mxu0 %vm292_vm3, %v209_v6  ;;  %v219_v6 = vpack.c.bf16 %v88_v1, %v87_v63  ;;  %v97_v63 = vld [vmem:[%s6443_s0 + $0x230] sm:$0xff]  ;;  %v98_v1 = vld [vmem:[%s6443_s0 + $0x238] sm:$0xff] }
  0xaa   :  { %3874 = vmatprep.mubr.msk.bf16.mxu0 %vm4528_vm2, %v4526_v0 }
  0xb1   :  { %3875 = vmatmul.mubr.msk.bf16.gmra.mrb[84].mxu0 %vm292_vm3, %v210_v11 }
  0xb2   :  { %3878 = vmatprep.mubr.msk.bf16.mxu0 %vm4528_vm2, %v4526_v0 }
  0xb9   :  { %3879 = vmatmul.mubr.msk.bf16.gmra.mrb[88].mxu0 %vm292_vm3, %v211_v14 }
  0xba   :  { %3882 = vmatprep.mubr.msk.bf16.mxu0 %vm4528_vm2, %v4526_v0 }
  0xc1   :  { %3883 = vmatmul.mubr.msk.bf16.gmra.mrb[92].mxu0 %vm292_vm3, %v212_v17 }
  0xc2   :  { %3886 = vmatprep.mubr.msk.bf16.mxu0 %vm4528_vm2, %v4526_v0 }
  0xc9   :  { %3887 = vmatmul.mubr.msk.bf16.gmra.mrb[96].mxu0 %vm292_vm3, %v213_v20 }
  0xca   :  { %3890 = vmatprep.mubr.msk.bf16.mxu0 %vm4528_vm2, %v4526_v0 }
  0xd1   :  { %3891 = vmatmul.mubr.msk.bf16.gmra.mrb[100].mxu0 %vm292_vm3, %v214_v23 }
  0xd2   :  { %3894 = vmatprep.mubr.msk.bf16.mxu0 %vm4528_vm2, %v4526_v0 }
  0xd9   :  { %3895 = vmatmul.mubr.msk.bf16.gmra.mrb[104].mxu0 %vm292_vm3, %v215_v26 }
  0xda   :  { %3898 = vmatprep.mubr.msk.bf16.mxu0 %vm4528_vm2, %v4526_v0 }
  0xdc   :  { %v577_v30 = vpop.f32.mrb[0].mxu0 }
  0xdd   :  { %v578_v31 = vadd.f32 %v4832_v27, %v577_v30  ;;  %v3792_v32 = vpop.f32.mrb[1].mxu0 }
  0xde   :  { %v580_v34 = vpop.f32.mrb[2].mxu0 }
  0xdf   :  { %v581_v35 = vadd.f32 %v4832_v27, %v580_v34  ;;  %v3793_v36 = vpop.f32.mrb[3].mxu0  ;;  %v1224_v37 = vmax.f32 %v578_v31, 0.0  ;;  %v221_v31 = vpack.c.bf16 %v92_v25, %v91_v24  ;;  %v1395_v24 = vld [vmem:[%s6444_s3] sm:$0xf] }
  0xe1   :  { %v1225_v38 = vmax.f32 %v581_v35, 0.0  ;;  %3899 = vmatmul.mubr.msk.bf16.gmra.mrb[108].mxu0 %vm292_vm3, %v216_v33 }
  0xe2   :  { %3902 = vmatprep.mubr.msk.bf16.mxu0 %vm4528_vm2, %v4526_v0 }
  0xe3   :  { %v4853_v41 = vpack.c.bf16 %v1225_v38, %v1224_v37  ;;  %v93_v37 = vld [vmem:[%s6443_s0 + $0x210] sm:$0xff]  ;;  %v94_v38 = vld [vmem:[%s6443_s0 + $0x218] sm:$0xff] }
  0xe4   :  { %v585_v42 = vpop.f32.mrb[4].mxu0 }
  0xe5   :  { %v586_v43 = vadd.f32 %v4832_v27, %v585_v42  ;;  %v3796_v44 = vpop.f32.mrb[5].mxu0 }
  0xe6   :  { %v588_v46 = vpop.f32.mrb[6].mxu0  ;;  %v222_v44 = vpack.c.bf16 %v94_v38, %v93_v37 }
  0xe7   :  { %v589_v47 = vadd.f32 %v4832_v27, %v588_v46  ;;  %v3797_v48 = vpop.f32.mrb[7].mxu0  ;;  %v1226_v49 = vmax.f32 %v586_v43, 0.0 }
  0xe9   :  { %v1227_v50 = vmax.f32 %v589_v47, 0.0  ;;  %3903 = vmatmul.mubr.msk.bf16.gmra.mrb[112].mxu0 %vm292_vm3, %v217_v45 }
  0xea   :  { %3906 = vmatprep.mubr.msk.bf16.mxu0 %vm4528_vm2, %v4526_v0 }
  0xeb   :  { %v4866_v53 = vpack.c.bf16 %v1227_v50, %v1226_v49  ;;  %v95_v50 = vld [vmem:[%s6443_s0 + $0x220] sm:$0xff] }
  0xec   :  { %v593_v54 = vpop.f32.mrb[8].mxu0 }
  0xed   :  { %v594_v55 = vadd.f32 %v4832_v27, %v593_v54  ;;  %v3800_v56 = vpop.f32.mrb[9].mxu0 }
  0xee   :  { %v596_v58 = vpop.f32.mrb[10].mxu0 }
  0xef   :  { %v597_v59 = vadd.f32 %v4832_v27, %v596_v58  ;;  %v3801_v60 = vpop.f32.mrb[11].mxu0  ;;  %v1228_v61 = vmax.f32 %v594_v55, 0.0 }
  0xf1   :  { %v1229_v62 = vmax.f32 %v597_v59, 0.0  ;;  %3907 = vmatmul.mubr.msk.bf16.gmra.mrb[116].mxu0 %vm292_vm3, %v218_v57  ;;  %v223_v57 = vpack.c.bf16 %v96_v51, %v95_v50 }
  0xf2   :  { %3910 = vmatprep.mubr.msk.bf16.mxu0 %vm4528_vm2, %v4526_v0 }
  0xf3   :  { %v4879_v2 = vpack.c.bf16 %v1229_v62, %v1228_v61 }
  0xf4   :  { %v601_v3 = vpop.f32.mrb[12].mxu0 }
  0xf5   :  { %v602_v4 = vadd.f32 %v4832_v27, %v601_v3  ;;  %v3804_v5 = vpop.f32.mrb[13].mxu0 }
  0xf6   :  { %v604_v7 = vpop.f32.mrb[14].mxu0 }
  0xf7   :  { %v605_v8 = vadd.f32 %v4832_v27, %v604_v7  ;;  %v3805_v9 = vpop.f32.mrb[15].mxu0  ;;  %v1230_v10 = vmax.f32 %v602_v4, 0.0  ;;  %v224_v7 = vpack.c.bf16 %v98_v1, %v97_v63 }
  0xf9   :  { %v1231_v11 = vmax.f32 %v605_v8, 0.0  ;;  %3911 = vmatmul.mubr.msk.bf16.gmra.mrb[120].mxu0 %vm292_vm3, %v219_v6 }
  0xfa   :  { %3914 = vmatprep.mubr.msk.bf16.mxu0 %vm4528_vm2, %v4526_v0 }
  0xfb   :  { %v4892_v14 = vpack.c.bf16 %v1231_v11, %v1230_v10 }
  0xfc   :  { %v609_v15 = vpop.f32.mrb[16].mxu0 }
  0xfd   :  { %v610_v16 = vadd.f32 %v4832_v27, %v609_v15  ;;  %v3808_v17 = vpop.f32.mrb[17].mxu0  ;;  %v100_v15 = vld [vmem:[%s6443_s0 + $0x248] sm:$0xff] }
  0xfe   :  { %v612_v19 = vpop.f32.mrb[18].mxu0 }
  0xff   :  { %v613_v20 = vadd.f32 %v4832_v27, %v612_v19  ;;  %v3809_v21 = vpop.f32.mrb[19].mxu0  ;;  %v1232_v22 = vmax.f32 %v610_v16, 0.0 }
 0x101   :  { %v1233_v23 = vmax.f32 %v613_v20, 0.0  ;;  %3915 = vmatmul.mubr.msk.bf16.gmra.mrb[124].mxu0 %vm292_vm3, %v220_v18  ;;  %v225_v20 = vpack.c.bf16 %v100_v15, %v99_v13 }
 0x102   :  { %3918 = vmatprep.mubr.msk.bf16.mxu0 %vm4528_vm2, %v4526_v0 }
 0x103   :  { %v4905_v26 = vpack.c.bf16 %v1233_v23, %v1232_v22 }
 0x104   :  { %v617_v28 = vpop.f32.mrb[20].mxu0 }
 0x105   :  { %v618_v29 = vadd.f32 %v4832_v27, %v617_v28  ;;  %v3812_v30 = vpop.f32.mrb[21].mxu0 }
 0x106   :  { %v620_v32 = vpop.f32.mrb[22].mxu0  ;;  %v102_v30 = vld [vmem:[%s6443_s0 + $0x258] sm:$0xff] }
 0x107   :  { %v621_v33 = vadd.f32 %v4832_v27, %v620_v32  ;;  %v3813_v34 = vpop.f32.mrb[23].mxu0  ;;  %v1234_v35 = vmax.f32 %v618_v29, 0.0  ;;  %v101_v29 = vld [vmem:[%s6443_s0 + $0x250] sm:$0xff]  ;;  %v1572_v32 = vsel %vm1435_vm4, %v1395_v24, 0  ;;  %v110_v24 = vld [vmem:[%s6443_s0 + $0x298] sm:$0xff] }
 0x109   :  { %v1235_v36 = vmax.f32 %v621_v33, 0.0  ;;  %3919 = vmatmul.mubr.msk.bf16.gmra.mrb[128].mxu0 %vm292_vm3, %v221_v31 }
 0x10a   :  { %3922 = vmatprep.mubr.msk.bf16.mxu0 %vm4528_vm2, %v4526_v0 }
 0x10b   :  { %v4918_v39 = vpack.c.bf16 %v1235_v36, %v1234_v35  ;;  %v226_v36 = vpack.c.bf16 %v102_v30, %v101_v29 }
 0x10c   :  { %v625_v40 = vpop.f32.mrb[24].mxu0 }
 0x10d   :  { %v626_v42 = vadd.f32 %v4832_v27, %v625_v40  ;;  %v3816_v43 = vpop.f32.mrb[25].mxu0 }
 0x10e   :  { %v628_v45 = vpop.f32.mrb[26].mxu0 }
 0x10f   :  { %v629_v46 = vadd.f32 %v4832_v27, %v628_v45  ;;  %v3817_v47 = vpop.f32.mrb[27].mxu0  ;;  %v1236_v48 = vmax.f32 %v626_v42, 0.0  ;;  %v104_v45 = vld [vmem:[%s6443_s0 + $0x268] sm:$0xff] }
 0x111   :  { %v1237_v49 = vmax.f32 %v629_v46, 0.0  ;;  %3923 = vmatmul.mubr.msk.bf16.gmra.mrb[132].mxu0 %vm292_vm3, %v222_v44  ;;  %v103_v44 = vld [vmem:[%s6443_s0 + $0x260] sm:$0xff] }
 0x112   :  { %3926 = vmatprep.mubr.msk.bf16.mxu0 %vm4528_vm2, %v4526_v0  ;;  %v227_v50 = vpack.c.bf16 %v104_v45, %v103_v44 }
 0x113   :  { %v4931_v52 = vpack.c.bf16 %v1237_v49, %v1236_v48 }
 0x114   :  { %v633_v54 = vpop.f32.mrb[28].mxu0 }
 0x115   :  { %v634_v55 = vadd.f32 %v4832_v27, %v633_v54  ;;  %v3820_v56 = vpop.f32.mrb[29].mxu0 }
 0x116   :  { %v636_v58 = vpop.f32.mrb[30].mxu0 }
 0x117   :  { %v637_v59 = vadd.f32 %v4832_v27, %v636_v58  ;;  %v3821_v60 = vpop.f32.mrb[31].mxu0  ;;  %v1238_v61 = vmax.f32 %v634_v55, 0.0  ;;  %v105_v58 = vld [vmem:[%s6443_s0 + $0x270] sm:$0xff] }
 0x119   :  { %v1239_v62 = vmax.f32 %v637_v59, 0.0  ;;  %3927 = vmatmul.mubr.msk.bf16.gmra.mrb[136].mxu0 %vm292_vm3, %v223_v57  ;;  %v106_v59 = vld [vmem:[%s6443_s0 + $0x278] sm:$0xff] }
 0x11a   :  { %3930 = vmatprep.mubr.msk.bf16.mxu0 %vm4528_vm2, %v4526_v0  ;;  %v228_v1 = vpack.c.bf16 %v106_v59, %v105_v58 }
 0x11b   :  { %v4944_v3 = vpack.c.bf16 %v1239_v62, %v1238_v61 }
 0x11c   :  { %v641_v4 = vpop.f32.mrb[32].mxu0 }
 0x11d   :  { %v642_v5 = vadd.f32 %v4832_v27, %v641_v4  ;;  %v3824_v6 = vpop.f32.mrb[33].mxu0 }
 0x11e   :  { %v644_v8 = vpop.f32.mrb[34].mxu0 }
 0x11f   :  { %v645_v9 = vadd.f32 %v4832_v27, %v644_v8  ;;  %v3825_v10 = vpop.f32.mrb[35].mxu0  ;;  %v1240_v11 = vmax.f32 %v642_v5, 0.0 }
 0x120   :  { %v108_v10 = vld [vmem:[%s6443_s0 + $0x288] sm:$0xff] }
 0x121   :  { %v1241_v12 = vmax.f32 %v645_v9, 0.0  ;;  %3931 = vmatmul.mubr.msk.bf16.gmra.mrb[140].mxu0 %vm292_vm3, %v224_v7  ;;  %v107_v9 = vld [vmem:[%s6443_s0 + $0x280] sm:$0xff] }
 0x122   :  { %3934 = vmatprep.mubr.msk.bf16.mxu0 %vm4528_vm2, %v4526_v0 }
 0x123   :  { %v4957_v16 = vpack.c.bf16 %v1241_v12, %v1240_v11 }
 0x124   :  { %v649_v17 = vpop.f32.mrb[36].mxu0 }
 0x125   :  { %v650_v18 = vadd.f32 %v4832_v27, %v649_v17  ;;  %v3828_v19 = vpop.f32.mrb[37].mxu0  ;;  %v229_v17 = vpack.c.bf16 %v108_v10, %v107_v9 }
 0x126   :  { %v652_v21 = vpop.f32.mrb[38].mxu0 }
 0x127   :  { %v653_v22 = vadd.f32 %v4832_v27, %v652_v21  ;;  %v3829_v23 = vpop.f32.mrb[39].mxu0  ;;  %v1242_v25 = vmax.f32 %v650_v18, 0.0 }
 0x128   :  { %v109_v23 = vld [vmem:[%s6443_s0 + $0x290] sm:$0xff] }
 0x129   :  { %v1243_v28 = vmax.f32 %v653_v22, 0.0  ;;  %3935 = vmatmul.mubr.msk.bf16.gmra.mrb[144].mxu0 %vm292_vm3, %v225_v20 }
 0x12a   :  { %3938 = vmatprep.mubr.msk.bf16.mxu0 %vm4528_vm2, %v4526_v0 }
 0x12b   :  { %v1396_v31 = vpack.c.bf16 %v1243_v28, %v1242_v25 }
 0x12c   :  { %v657_v33 = vpop.f32.mrb[40].mxu0 }
 0x12d   :  { %v658_v34 = vadd.f32 %v4832_v27, %v657_v33  ;;  %v3832_v35 = vpop.f32.mrb[41].mxu0  ;;  %4117 = vmatmul.mubr.msk.bf16.vlgmr.msra.gmra.mrb[0].mxu1 %vm1407_vm5, %v1396_v31  ;;  %v230_v31 = vpack.c.bf16 %v110_v24, %v109_v23 }
 0x12e   :  { %4153 = vmatpush3.bf16.msra.mxu1 %v1572_v32  ;;  %v660_v37 = vpop.f32.mrb[42].mxu0  ;;  %4120 = vmatprep.mubr.msk.bf16.mxu1 %vm4528_vm2, %v4526_v0 }
 0x12f   :  { %v661_v38 = vadd.f32 %v4832_v27, %v660_v37  ;;  %v3833_v40 = vpop.f32.mrb[43].mxu0  ;;  %4190 = vmatprep.subr.bf16.mxu1 %v4526_v0  ;;  %v1244_v42 = vmax.f32 %v658_v34, 0.0  ;;  %v111_v37 = vld [vmem:[%s6443_s0 + $0x2a0] sm:$0xff] }
 0x131   :  { %v1245_v43 = vmax.f32 %v661_v38, 0.0  ;;  %3939 = vmatmul.mubr.msk.bf16.gmra.mrb[148].mxu0 %vm292_vm3, %v226_v36  ;;  %v112_v38 = vld [vmem:[%s6443_s0 + $0x2a8] sm:$0xff] }
 0x132   :  { %3942 = vmatprep.mubr.msk.bf16.mxu0 %vm4528_vm2, %v4526_v0  ;;  %v231_v45 = vpack.c.bf16 %v112_v38, %v111_v37 }
 0x133   :  { %v1397_v46 = vpack.c.bf16 %v1245_v43, %v1244_v42 }
 0x134   :  { %v665_v47 = vpop.f32.mrb[44].mxu0 }
 0x135   :  { %v666_v48 = vadd.f32 %v4832_v27, %v665_v47  ;;  %v3836_v49 = vpop.f32.mrb[45].mxu0  ;;  %4121 = vmatmul.mubr.msk.bf16.gmra.mrb[4].mxu1 %vm1407_vm5, %v1397_v46 }
 0x136   :  { %v668_v51 = vpop.f32.mrb[46].mxu0  ;;  %4124 = vmatprep.mubr.msk.bf16.mxu1 %vm4528_vm2, %v4526_v0 }
 0x137   :  { %v669_v54 = vadd.f32 %v4832_v27, %v668_v51  ;;  %v3837_v55 = vpop.f32.mrb[47].mxu0  ;;  %v1246_v56 = vmax.f32 %v666_v48, 0.0  ;;  %v113_v51 = vld [vmem:[%s6443_s0 + $0x2b0] sm:$0xff] }
 0x139   :  { %v1247_v57 = vmax.f32 %v669_v54, 0.0  ;;  %3943 = vmatmul.mubr.msk.bf16.gmra.mrb[152].mxu0 %vm292_vm3, %v227_v50  ;;  %v114_v54 = vld [vmem:[%s6443_s0 + $0x2b8] sm:$0xff] }
 0x13a   :  { %3946 = vmatprep.mubr.msk.bf16.mxu0 %vm4528_vm2, %v4526_v0  ;;  %v232_v59 = vpack.c.bf16 %v114_v54, %v113_v51 }
 0x13b   :  { %v1398_v60 = vpack.c.bf16 %v1247_v57, %v1246_v56 }
 0x13c   :  { %v673_v61 = vpop.f32.mrb[48].mxu0 }
 0x13d   :  { %v674_v62 = vadd.f32 %v4832_v27, %v673_v61  ;;  %v3840_v63 = vpop.f32.mrb[49].mxu0  ;;  %4125 = vmatmul.mubr.msk.bf16.gmra.mrb[8].mxu1 %vm1407_vm5, %v1398_v60 }
 0x13e   :  { %v676_v4 = vpop.f32.mrb[50].mxu0  ;;  %4128 = vmatprep.mubr.msk.bf16.mxu1 %vm4528_vm2, %v4526_v0 }
 0x13f   :  { %v677_v5 = vadd.f32 %v4832_v27, %v676_v4  ;;  %v3841_v6 = vpop.f32.mrb[51].mxu0  ;;  %v1248_v7 = vmax.f32 %v674_v62, 0.0  ;;  %v115_v4 = vld [vmem:[%s6443_s0 + $0x2c0] sm:$0xff] }
 0x141   :  { %v1249_v8 = vmax.f32 %v677_v5, 0.0  ;;  %3947 = vmatmul.mubr.msk.bf16.gmra.mrb[156].mxu0 %vm292_vm3, %v228_v1  ;;  %v116_v5 = vld [vmem:[%s6443_s0 + $0x2c8] sm:$0xff] }
 0x142   :  { %3950 = vmatprep.mubr.msk.bf16.mxu0 %vm4528_vm2, %v4526_v0  ;;  %v233_v10 = vpack.c.bf16 %v116_v5, %v115_v4 }
 0x143   :  { %v1399_v11 = vpack.c.bf16 %v1249_v8, %v1248_v7 }
 0x144   :  { %v681_v12 = vpop.f32.mrb[52].mxu0 }
 0x145   :  { %v682_v13 = vadd.f32 %v4832_v27, %v681_v12  ;;  %v3844_v15 = vpop.f32.mrb[53].mxu0  ;;  %4129 = vmatmul.mubr.msk.bf16.gmra.mrb[12].mxu1 %vm1407_vm5, %v1399_v11  ;;  %v4515_v12 = vld [vmem:[%s6446_s5] sm:$0xff]  }
 0x146   :  { %v684_v18 = vpop.f32.mrb[54].mxu0  ;;  %4132 = vmatprep.mubr.msk.bf16.mxu1 %vm4528_vm2, %v4526_v0  ;;  %4463 = vmatpush3.bf16.msra.mxu0 %v4515_v12  ;;  %v126_v12 = vld [vmem:[%s6443_s0 + $0x318] sm:$0xff] }
 0x147   :  { %v685_v19 = vadd.f32 %v4832_v27, %v684_v18  ;;  %v3845_v20 = vpop.f32.mrb[55].mxu0  ;;  %v1250_v21 = vmax.f32 %v682_v13, 0.0  ;;  %v118_v18 = vld [vmem:[%s6443_s0 + $0x2d8] sm:$0xff]  ;;  %4474 = vmatprep.subr.bf16.mxu0 %v4526_v0 }
 0x149   :  { %v1251_v22 = vmax.f32 %v685_v19, 0.0  ;;  %3951 = vmatmul.mubr.msk.bf16.gmra.mrb[160].mxu0 %vm292_vm3, %v229_v17  ;;  %v117_v17 = vld [vmem:[%s6443_s0 + $0x2d0] sm:$0xff] }
 0x14a   :  { %3954 = vmatprep.mubr.msk.bf16.mxu0 %vm4528_vm2, %v4526_v0 }
 0x14b   :  { %v1400_v25 = vpack.c.bf16 %v1251_v22, %v1250_v21 }
 0x14c   :  { %v689_v28 = vpop.f32.mrb[56].mxu0 }
 0x14d   :  { %v690_v29 = vadd.f32 %v4832_v27, %v689_v28  ;;  %v3848_v30 = vpop.f32.mrb[57].mxu0  ;;  %4133 = vmatmul.mubr.msk.bf16.gmra.mrb[16].mxu1 %vm1407_vm5, %v1400_v25  ;;  %v234_v25 = vpack.c.bf16 %v118_v18, %v117_v17 }
 0x14e   :  { %v692_v32 = vpop.f32.mrb[58].mxu0  ;;  %4136 = vmatprep.mubr.msk.bf16.mxu1 %vm4528_vm2, %v4526_v0 }
 0x14f   :  { %v693_v33 = vadd.f32 %v4832_v27, %v692_v32  ;;  %v3849_v34 = vpop.f32.mrb[59].mxu0  ;;  %v1252_v35 = vmax.f32 %v690_v29, 0.0  ;;  %v3489_v32 = vld [vmem:[%s6444_s3 + $0x8] sm:$0xf] }
 0x150   :  { %v119_v34 = vld [vmem:[%s6443_s0 + $0x2e0] sm:$0xff] }
 0x151   :  { %v1253_v36 = vmax.f32 %v693_v33, 0.0  ;;  %3955 = vmatmul.mubr.msk.bf16.gmra.mrb[164].mxu0 %vm292_vm3, %v230_v31 }
 0x152   :  { %3958 = vmatprep.mubr.msk.bf16.mxu0 %vm4528_vm2, %v4526_v0 }
 0x153   :  { %v1401_v40 = vpack.c.bf16 %v1253_v36, %v1252_v35  ;;  %v120_v35 = vld [vmem:[%s6443_s0 + $0x2e8] sm:$0xff]  ;;  %v1718_v36 = vsel %vm1435_vm4, %v3489_v32, 0 }
 0x154   :  { %v697_v42 = vpop.f32.mrb[60].mxu0 }
 0x155   :  { %v698_v43 = vadd.f32 %v4832_v27, %v697_v42  ;;  %v3852_v44 = vpop.f32.mrb[61].mxu0  ;;  %4137 = vmatmul.mubr.msk.bf16.gmra.mrb[20].mxu1 %vm1407_vm5, %v1401_v40 }
 0x156   :  { %v700_v46 = vpop.f32.mrb[62].mxu0  ;;  %4140 = vmatprep.mubr.msk.bf16.mxu1 %vm4528_vm2, %v4526_v0 }
 0x157   :  { %v701_v47 = vadd.f32 %v4832_v27, %v700_v46  ;;  %v3853_v48 = vpop.f32.mrb[63].mxu0  ;;  %v1254_v49 = vmax.f32 %v698_v43, 0.0  ;;  %v235_v43 = vpack.c.bf16 %v120_v35, %v119_v34 }
 0x159   :  { %v1255_v50 = vmax.f32 %v701_v47, 0.0  ;;  %3959 = vmatmul.mubr.msk.bf16.gmra.mrb[168].mxu0 %vm292_vm3, %v231_v45 }
 0x15a   :  { %3962 = vmatprep.mubr.msk.bf16.mxu0 %vm4528_vm2, %v4526_v0 }
 0x15b   :  { %v1402_v55 = vpack.c.bf16 %v1255_v50, %v1254_v49  ;;  %v122_v49 = vld [vmem:[%s6443_s0 + $0x2f8] sm:$0xff] }
 0x15c   :  { %v705_v56 = vpop.f32.mrb[64].mxu0 }
 0x15d   :  { %v706_v57 = vadd.f32 %v4832_v27, %v705_v56  ;;  %v3856_v58 = vpop.f32.mrb[65].mxu0  ;;  %4141 = vmatmul.mubr.msk.bf16.gmra.mrb[24].mxu1 %vm1407_vm5, %v1402_v55 }
 0x15e   :  { %v708_v60 = vpop.f32.mrb[66].mxu0  ;;  %4144 = vmatprep.mubr.msk.bf16.mxu1 %vm4528_vm2, %v4526_v0 }
 0x15f   :  { %v709_v61 = vadd.f32 %v4832_v27, %v708_v60  ;;  %v3857_v62 = vpop.f32.mrb[67].mxu0  ;;  %v1256_v63 = vmax.f32 %v706_v57, 0.0 }
 0x160   :  { %v124_v62 = vld [vmem:[%s6443_s0 + $0x308] sm:$0xff] }
 0x161   :  { %v1257_v1 = vmax.f32 %v709_v61, 0.0  ;;  %3963 = vmatmul.mubr.msk.bf16.gmra.mrb[172].mxu0 %vm292_vm3, %v232_v59 }
 0x162   :  { %3966 = vmatprep.mubr.msk.bf16.mxu0 %vm4528_vm2, %v4526_v0 }
 0x163   :  { %v1403_v6 = vpack.c.bf16 %v1257_v1, %v1256_v63 }
 0x164   :  { %v713_v7 = vpop.f32.mrb[68].mxu0 }
 0x165   :  { %v714_v8 = vadd.f32 %v4832_v27, %v713_v7  ;;  %v3860_v9 = vpop.f32.mrb[69].mxu0  ;;  %4145 = vmatmul.mubr.msk.bf16.gmra.mrb[28].mxu1 %vm1407_vm5, %v1403_v6 }
 0x166   :  { %v716_v11 = vpop.f32.mrb[70].mxu0  ;;  %4148 = vmatprep.mubr.msk.bf16.mxu1 %vm4528_vm2, %v4526_v0 }
 0x167   :  { %v717_v13 = vadd.f32 %v4832_v27, %v716_v11  ;;  %v3861_v15 = vpop.f32.mrb[71].mxu0  ;;  %v1258_v19 = vmax.f32 %v714_v8, 0.0 }
 0x169   :  { %v1259_v20 = vmax.f32 %v717_v13, 0.0  ;;  %3967 = vmatmul.mubr.msk.bf16.gmra.mrb[176].mxu0 %vm292_vm3, %v233_v10 }
 0x16a   :  { %3970 = vmatprep.mubr.msk.bf16.mxu0 %vm4528_vm2, %v4526_v0 }
 0x16b   :  { %v1404_v21 = vpack.c.bf16 %v1259_v20, %v1258_v19 }
 0x16c   :  { %v721_v22 = vpop.f32.mrb[72].mxu0 }
 0x16d   :  { %4149 = vmatmul.mubr.msk.bf16.gmra.mrb[32].mxu1 %vm1407_vm5, %v1404_v21  ;;  %v722_v23 = vadd.f32 %v4832_v27, %v721_v22  ;;  %v3864_v24 = vpop.f32.mrb[73].mxu0 }
 0x16e   :  { %4154 = vmatprep.mubr.msk.bf16.mxu1 %vm4528_vm2, %v4526_v0  ;;  %v724_v28 = vpop.f32.mrb[74].mxu0 }
 0x16f   :  { %v1260_v29 = vmax.f32 %v722_v23, 0.0  ;;  %v725_v30 = vadd.f32 %v4832_v27, %v724_v28  ;;  %v3865_v31 = vpop.f32.mrb[75].mxu0 }
 0x171   :  { %v1261_v33 = vmax.f32 %v725_v30, 0.0  ;;  %3971 = vmatmul.mubr.msk.bf16.gmra.mrb[180].mxu0 %vm292_vm3, %v234_v25  ;;  %v128_v25 = vld [vmem:[%s6443_s0 + $0x328] sm:$0xff] }
 0x172   :  { %3974 = vmatprep.mubr.msk.bf16.mxu0 %vm4528_vm2, %v4526_v0 }
 0x173   :  { %v5109_v37 = vpack.c.bf16 %v1261_v33, %v1260_v29 }
 0x174   :  { %v729_v38 = vpop.f32.mrb[76].mxu0 }
 0x175   :  { %4155 = vmatmul.mubr.msk.bf16.vlgmr.msra.gmra.mrb[36].mxu1 %vm1407_vm5, %v4853_v41  ;;  %v730_v40 = vadd.f32 %v4832_v27, %v729_v38  ;;  %v3868_v42 = vpop.f32.mrb[77].mxu0  ;;  %v121_v41 = vld [vmem:[%s6443_s0 + $0x2f0] sm:$0xff] }
 0x176   :  { %4191 = vmatpush3.bf16.msra.mxu1 %v1718_v36  ;;  %4158 = vmatprep.mubr.msk.bf16.mxu1 %vm4528_vm2, %v4526_v0  ;;  %v732_v44 = vpop.f32.mrb[78].mxu0  ;;  %v236_v56 = vpack.c.bf16 %v122_v49, %v121_v41 }
 0x177   :  { %v1262_v45 = vmax.f32 %v730_v40, 0.0  ;;  %v733_v46 = vadd.f32 %v4832_v27, %v732_v44  ;;  %v3869_v47 = vpop.f32.mrb[79].mxu0  ;;  %4228 = vmatprep.subr.bf16.mxu1 %v4526_v0  ;;  %v130_v40 = vld [vmem:[%s6443_s0 + $0x338] sm:$0xff] }
 0x179   :  { %v1263_v48 = vmax.f32 %v733_v46, 0.0  ;;  %3975 = vmatmul.mubr.msk.bf16.gmra.mrb[184].mxu0 %vm292_vm3, %v235_v43 }
 0x17a   :  { %3978 = vmatprep.mubr.msk.bf16.mxu0 %vm4528_vm2, %v4526_v0 }
 0x17b   :  { %v5127_v50 = vpack.c.bf16 %v1263_v48, %v1262_v45 }
 0x17c   :  { %v737_v51 = vpop.f32.mrb[80].mxu0 }
 0x17d   :  { %4159 = vmatmul.mubr.msk.bf16.gmra.mrb[40].mxu1 %vm1407_vm5, %v4866_v53  ;;  %v738_v54 = vadd.f32 %v4832_v27, %v737_v51  ;;  %v3872_v55 = vpop.f32.mrb[81].mxu0  ;;  %v123_v53 = vld [vmem:[%s6443_s0 + $0x300] sm:$0xff] }
 0x17e   :  { %4162 = vmatprep.mubr.msk.bf16.mxu1 %vm4528_vm2, %v4526_v0  ;;  %v740_v57 = vpop.f32.mrb[82].mxu0  ;;  %v237_v6 = vpack.c.bf16 %v124_v62, %v123_v53 }
 0x17f   :  { %v1264_v58 = vmax.f32 %v738_v54, 0.0  ;;  %v741_v59 = vadd.f32 %v4832_v27, %v740_v57  ;;  %v3873_v60 = vpop.f32.mrb[83].mxu0  ;;  %v132_v54 = vld [vmem:[%s6443_s0 + $0x348] sm:$0xff] }
 0x181   :  { %v1265_v61 = vmax.f32 %v741_v59, 0.0  ;;  %3979 = vmatmul.mubr.msk.bf16.gmra.mrb[188].mxu0 %vm292_vm3, %v236_v56 }
 0x182   :  { %3982 = vmatprep.mubr.msk.bf16.mxu0 %vm4528_vm2, %v4526_v0 }
 0x183   :  { %v5144_v63 = vpack.c.bf16 %v1265_v61, %v1264_v58 }
 0x184   :  { %v745_v1 = vpop.f32.mrb[84].mxu0 }
 0x185   :  { %4163 = vmatmul.mubr.msk.bf16.gmra.mrb[44].mxu1 %vm1407_vm5, %v4879_v2  ;;  %v746_v4 = vadd.f32 %v4832_v27, %v745_v1  ;;  %v3876_v5 = vpop.f32.mrb[85].mxu0  ;;  %v125_v2 = vld [vmem:[%s6443_s0 + $0x310] sm:$0xff] }
 0x186   :  { %4166 = vmatprep.mubr.msk.bf16.mxu1 %vm4528_vm2, %v4526_v0  ;;  %v748_v7 = vpop.f32.mrb[86].mxu0  ;;  %v238_v19 = vpack.c.bf16 %v126_v12, %v125_v2 }
 0x187   :  { %v1266_v8 = vmax.f32 %v746_v4, 0.0  ;;  %v749_v9 = vadd.f32 %v4832_v27, %v748_v7  ;;  %v3877_v10 = vpop.f32.mrb[87].mxu0  ;;  %v134_v4 = vld [vmem:[%s6443_s0 + $0x358] sm:$0xff] }
 0x189   :  { %v1267_v11 = vmax.f32 %v749_v9, 0.0  ;;  %3983 = vmatmul.mubr.msk.bf16.gmra.mrb[192].mxu0 %vm292_vm3, %v237_v6 }
 0x18a   :  { %3986 = vmatprep.mubr.msk.bf16.mxu0 %vm4528_vm2, %v4526_v0 }
 0x18b   :  { %v5161_v13 = vpack.c.bf16 %v1267_v11, %v1266_v8 }
 0x18c   :  { %v753_v15 = vpop.f32.mrb[88].mxu0 }
 0x18d   :  { %4167 = vmatmul.mubr.msk.bf16.gmra.mrb[48].mxu1 %vm1407_vm5, %v4892_v14  ;;  %v754_v17 = vadd.f32 %v4832_v27, %v753_v15  ;;  %v3880_v18 = vpop.f32.mrb[89].mxu0  ;;  %v127_v14 = vld [vmem:[%s6443_s0 + $0x320] sm:$0xff] }
 0x18e   :  { %4170 = vmatprep.mubr.msk.bf16.mxu1 %vm4528_vm2, %v4526_v0  ;;  %v756_v20 = vpop.f32.mrb[90].mxu0  ;;  %v239_v32 = vpack.c.bf16 %v128_v25, %v127_v14 }
 0x18f   :  { %v1268_v21 = vmax.f32 %v754_v17, 0.0  ;;  %v757_v22 = vadd.f32 %v4832_v27, %v756_v20  ;;  %v3881_v23 = vpop.f32.mrb[91].mxu0  ;;  %v136_v17 = vld [vmem:[%s6443_s0 + $0x368] sm:$0xff] }
 0x191   :  { %v1269_v24 = vmax.f32 %v757_v22, 0.0  ;;  %3987 = vmatmul.mubr.msk.bf16.gmra.mrb[196].mxu0 %vm292_vm3, %v238_v19 }
 0x192   :  { %3990 = vmatprep.mubr.msk.bf16.mxu0 %vm4528_vm2, %v4526_v0 }
 0x193   :  { %v5178_v28 = vpack.c.bf16 %v1269_v24, %v1268_v21 }
 0x194   :  { %v761_v29 = vpop.f32.mrb[92].mxu0 }
 0x195   :  { %4171 = vmatmul.mubr.msk.bf16.gmra.mrb[52].mxu1 %vm1407_vm5, %v4905_v26  ;;  %v762_v30 = vadd.f32 %v4832_v27, %v761_v29  ;;  %v3884_v31 = vpop.f32.mrb[93].mxu0  ;;  %v129_v26 = vld [vmem:[%s6443_s0 + $0x330] sm:$0xff]  ;;  %v3499_v29 = vld [vmem:[%s6444_s3 + $0xc] sm:$0xf] }
 0x196   :  { %4174 = vmatprep.mubr.msk.bf16.mxu1 %vm4528_vm2, %v4526_v0  ;;  %v764_v33 = vpop.f32.mrb[94].mxu0  ;;  %v240_v46 = vpack.c.bf16 %v130_v40, %v129_v26  ;;  %v138_v31 = vld [vmem:[%s6443_s0 + $0x378] sm:$0xff] }
 0x197   :  { %v1270_v34 = vmax.f32 %v762_v30, 0.0  ;;  %v765_v35 = vadd.f32 %v4832_v27, %v764_v33  ;;  %v3885_v36 = vpop.f32.mrb[95].mxu0 }
 0x199   :  { %v1271_v38 = vmax.f32 %v765_v35, 0.0  ;;  %3991 = vmatmul.mubr.msk.bf16.gmra.mrb[200].mxu0 %vm292_vm3, %v239_v32  ;;  %v1882_v32 = vsel %vm1435_vm4, %v3499_v29, 0 }
 0x19a   :  { %3994 = vmatprep.mubr.msk.bf16.mxu0 %vm4528_vm2, %v4526_v0 }
 0x19b   :  { %v5195_v42 = vpack.c.bf16 %v1271_v38, %v1270_v34 }
 0x19c   :  { %v769_v43 = vpop.f32.mrb[96].mxu0 }
 0x19d   :  { %4175 = vmatmul.mubr.msk.bf16.gmra.mrb[56].mxu1 %vm1407_vm5, %v4918_v39  ;;  %v770_v44 = vadd.f32 %v4832_v27, %v769_v43  ;;  %v3888_v45 = vpop.f32.mrb[97].mxu0  ;;  %v131_v39 = vld [vmem:[%s6443_s0 + $0x340] sm:$0xff] }
 0x19e   :  { %4178 = vmatprep.mubr.msk.bf16.mxu1 %vm4528_vm2, %v4526_v0  ;;  %v772_v47 = vpop.f32.mrb[98].mxu0  ;;  %v241_v59 = vpack.c.bf16 %v132_v54, %v131_v39 }
 0x19f   :  { %v1272_v48 = vmax.f32 %v770_v44, 0.0  ;;  %v773_v41 = vadd.f32 %v4832_v27, %v772_v47  ;;  %v3889_v49 = vpop.f32.mrb[99].mxu0 }
 0x1a1   :  { %v1273_v51 = vmax.f32 %v773_v41, 0.0  ;;  %3995 = vmatmul.mubr.msk.bf16.gmra.mrb[204].mxu0 %vm292_vm3, %v240_v46  ;;  %v140_v46 = vld [vmem:[%s6443_s0 + $0x388] sm:$0xff] }
 0x1a2   :  { %3998 = vmatprep.mubr.msk.bf16.mxu0 %vm4528_vm2, %v4526_v0 }
 0x1a3   :  { %v5212_v55 = vpack.c.bf16 %v1273_v51, %v1272_v48 }
 0x1a4   :  { %v777_v56 = vpop.f32.mrb[100].mxu0 }
 0x1a5   :  { %4179 = vmatmul.mubr.msk.bf16.gmra.mrb[60].mxu1 %vm1407_vm5, %v4931_v52  ;;  %v778_v57 = vadd.f32 %v4832_v27, %v777_v56  ;;  %v3892_v58 = vpop.f32.mrb[101].mxu0  ;;  %v133_v52 = vld [vmem:[%s6443_s0 + $0x350] sm:$0xff] }
 0x1a6   :  { %4182 = vmatprep.mubr.msk.bf16.mxu1 %vm4528_vm2, %v4526_v0  ;;  %v780_v60 = vpop.f32.mrb[102].mxu0  ;;  %v242_v9 = vpack.c.bf16 %v134_v4, %v133_v52 }
 0x1a7   :  { %v1274_v61 = vmax.f32 %v778_v57, 0.0  ;;  %v781_v53 = vadd.f32 %v4832_v27, %v780_v60  ;;  %v3893_v62 = vpop.f32.mrb[103].mxu0 }
 0x1a9   :  { %v1275_v1 = vmax.f32 %v781_v53, 0.0  ;;  %3999 = vmatmul.mubr.msk.bf16.gmra.mrb[208].mxu0 %vm292_vm3, %v241_v59  ;;  %v142_v59 = vld [vmem:[%s6443_s0 + $0x398] sm:$0xff] }
 0x1aa   :  { %4002 = vmatprep.mubr.msk.bf16.mxu0 %vm4528_vm2, %v4526_v0 }
 0x1ab   :  { %v5229_v5 = vpack.c.bf16 %v1275_v1, %v1274_v61 }
 0x1ac   :  { %v785_v6 = vpop.f32.mrb[104].mxu0 }
 0x1ad   :  { %4183 = vmatmul.mubr.msk.bf16.gmra.mrb[64].mxu1 %vm1407_vm5, %v4944_v3  ;;  %v786_v7 = vadd.f32 %v4832_v27, %v785_v6  ;;  %v3896_v8 = vpop.f32.mrb[105].mxu0  ;;  %v135_v3 = vld [vmem:[%s6443_s0 + $0x360] sm:$0xff] }
 0x1ae   :  { %4186 = vmatprep.mubr.msk.bf16.mxu1 %vm4528_vm2, %v4526_v0  ;;  %v788_v10 = vpop.f32.mrb[106].mxu0  ;;  %v243_v22 = vpack.c.bf16 %v136_v17, %v135_v3 }
 0x1af   :  { %v1276_v11 = vmax.f32 %v786_v7, 0.0  ;;  %v789_v2 = vadd.f32 %v4832_v27, %v788_v10  ;;  %v3897_v12 = vpop.f32.mrb[107].mxu0 }
 0x1b1   :  { %v1277_v15 = vmax.f32 %v789_v2, 0.0  ;;  %4003 = vmatmul.mubr.msk.bf16.gmra.mrb[212].mxu0 %vm292_vm3, %v242_v9  ;;  %v144_v9 = vld [vmem:[%s6443_s0 + $0x3a8] sm:$0xff] }
 0x1b2   :  { %4006 = vmatprep.mubr.msk.bf16.mxu0 %vm4528_vm2, %v4526_v0 }
 0x1b3   :  { %v5246_v18 = vpack.c.bf16 %v1277_v15, %v1276_v11 }
 0x1b4   :  { %v793_v19 = vpop.f32.mrb[108].mxu0 }
 0x1b5   :  { %4187 = vmatmul.mubr.msk.bf16.gmra.mrb[68].mxu1 %vm1407_vm5, %v4957_v16  ;;  %v794_v20 = vadd.f32 %v4832_v27, %v793_v19  ;;  %v3900_v21 = vpop.f32.mrb[109].mxu0  ;;  %v137_v16 = vld [vmem:[%s6443_s0 + $0x370] sm:$0xff] }
 0x1b6   :  { %4192 = vmatprep.mubr.msk.bf16.mxu1 %vm4528_vm2, %v4526_v0  ;;  %v796_v23 = vpop.f32.mrb[110].mxu0  ;;  %v244_v38 = vpack.c.bf16 %v138_v31, %v137_v16 }
 0x1b7   :  { %v1278_v24 = vmax.f32 %v794_v20, 0.0  ;;  %v797_v14 = vadd.f32 %v4832_v27, %v796_v23  ;;  %v3901_v25 = vpop.f32.mrb[111].mxu0 }
 0x1b9   :  { %v1279_v30 = vmax.f32 %v797_v14, 0.0  ;;  %4007 = vmatmul.mubr.msk.bf16.gmra.mrb[216].mxu0 %vm292_vm3, %v243_v22  ;;  %v146_v22 = vld [vmem:[%s6443_s0 + $0x3b8] sm:$0xff] }
 0x1ba   :  { %4010 = vmatprep.mubr.msk.bf16.mxu0 %vm4528_vm2, %v4526_v0 }
 0x1bb   :  { %v5267_v33 = vpack.c.bf16 %v1279_v30, %v1278_v24 }
 0x1bc   :  { %v801_v34 = vpop.f32.mrb[112].mxu0 }
 0x1bd   :  { %4193 = vmatmul.mubr.msk.bf16.vlgmr.msra.gmra.mrb[72].mxu1 %vm1407_vm5, %v5109_v37  ;;  %v802_v35 = vadd.f32 %v4832_v27, %v801_v34  ;;  %v3904_v36 = vpop.f32.mrb[113].mxu0  ;;  %v139_v37 = vld [vmem:[%s6443_s0 + $0x380] sm:$0xff] }
 0x1be   :  { %4229 = vmatpush3.bf16.msra.mxu1 %v1882_v32  ;;  %4196 = vmatprep.mubr.msk.bf16.mxu1 %vm4528_vm2, %v4526_v0  ;;  %v804_v26 = vpop.f32.mrb[114].mxu0  ;;  %v245_v51 = vpack.c.bf16 %v140_v46, %v139_v37 }
 0x1bf   :  { %v1280_v40 = vmax.f32 %v802_v35, 0.0  ;;  %v805_v43 = vadd.f32 %v4832_v27, %v804_v26  ;;  %v3905_v44 = vpop.f32.mrb[115].mxu0  ;;  %4266 = vmatprep.subr.bf16.mxu1 %v4526_v0  ;;  %v148_v35 = vld [vmem:[%s6443_s0 + $0x3c8] sm:$0xff] }
 0x1c1   :  { %v1281_v45 = vmax.f32 %v805_v43, 0.0  ;;  %4011 = vmatmul.mubr.msk.bf16.gmra.mrb[220].mxu0 %vm292_vm3, %v244_v38 }
 0x1c2   :  { %4014 = vmatprep.mubr.msk.bf16.mxu0 %vm4528_vm2, %v4526_v0 }
 0x1c3   :  { %v5285_v47 = vpack.c.bf16 %v1281_v45, %v1280_v40 }
 0x1c4   :  { %v809_v48 = vpop.f32.mrb[116].mxu0 }
 0x1c5   :  { %4197 = vmatmul.mubr.msk.bf16.gmra.mrb[76].mxu1 %vm1407_vm5, %v5127_v50  ;;  %v810_v41 = vadd.f32 %v4832_v27, %v809_v48  ;;  %v3908_v49 = vpop.f32.mrb[117].mxu0  ;;  %v141_v50 = vld [vmem:[%s6443_s0 + $0x390] sm:$0xff] }
 0x1c6   :  { %4200 = vmatprep.mubr.msk.bf16.mxu1 %vm4528_vm2, %v4526_v0  ;;  %v812_v39 = vpop.f32.mrb[118].mxu0  ;;  %v246_v1 = vpack.c.bf16 %v142_v59, %v141_v50 }
 0x1c7   :  { %v1282_v54 = vmax.f32 %v810_v41, 0.0  ;;  %v813_v56 = vadd.f32 %v4832_v27, %v812_v39  ;;  %v3909_v57 = vpop.f32.mrb[119].mxu0  ;;  %v150_v41 = vld [vmem:[%s6443_s0 + $0x3d8] sm:$0xff] }
 0x1c9   :  { %v1283_v58 = vmax.f32 %v813_v56, 0.0  ;;  %4015 = vmatmul.mubr.msk.bf16.gmra.mrb[224].mxu0 %vm292_vm3, %v245_v51 }
 0x1ca   :  { %4018 = vmatprep.mubr.msk.bf16.mxu0 %vm4528_vm2, %v4526_v0 }
 0x1cb   :  { %v5302_v60 = vpack.c.bf16 %v1283_v58, %v1282_v54 }
 0x1cc   :  { %v817_v61 = vpop.f32.mrb[120].mxu0 }
 0x1cd   :  { %4201 = vmatmul.mubr.msk.bf16.gmra.mrb[80].mxu1 %vm1407_vm5, %v5144_v63  ;;  %v818_v53 = vadd.f32 %v4832_v27, %v817_v61  ;;  %v3912_v62 = vpop.f32.mrb[121].mxu0  ;;  %v143_v63 = vld [vmem:[%s6443_s0 + $0x3a0] sm:$0xff] }
 0x1ce   :  { %4204 = vmatprep.mubr.msk.bf16.mxu1 %vm4528_vm2, %v4526_v0  ;;  %v820_v52 = vpop.f32.mrb[122].mxu0  ;;  %v247_v15 = vpack.c.bf16 %v144_v9, %v143_v63 }
 0x1cf   :  { %v1284_v4 = vmax.f32 %v818_v53, 0.0  ;;  %v821_v6 = vadd.f32 %v4832_v27, %v820_v52  ;;  %v3913_v7 = vpop.f32.mrb[123].mxu0  ;;  %v5326_v27 = vld [vmem:[%s6445_s2] ss:$0 sm:$0xff]  ;;  %v152_v53 = vld [vmem:[%s6443_s0 + $0x3e8] sm:$0xff] }
 0x1d1   :  { %v1285_v8 = vmax.f32 %v821_v6, 0.0  ;;  %4019 = vmatmul.mubr.msk.bf16.gmra.mrb[228].mxu0 %vm292_vm3, %v246_v1 }
 0x1d2   :  { %4022 = vmatprep.mubr.msk.bf16.mxu0 %vm4528_vm2, %v4526_v0 }
 0x1d3   :  { %v5319_v10 = vpack.c.bf16 %v1285_v8, %v1284_v4 }
 0x1d4   :  { %v825_v11 = vpop.f32.mrb[124].mxu0 }
 0x1d5   :  { %4205 = vmatmul.mubr.msk.bf16.gmra.mrb[84].mxu1 %vm1407_vm5, %v5161_v13  ;;  %v826_v2 = vadd.f32 %v5326_v27, %v825_v11  ;;  %v3916_v12 = vpop.f32.mrb[125].mxu0  ;;  %v145_v13 = vld [vmem:[%s6443_s0 + $0x3b0] sm:$0xff] }
 0x1d6   :  { %4208 = vmatprep.mubr.msk.bf16.mxu1 %vm4528_vm2, %v4526_v0  ;;  %v828_v3 = vpop.f32.mrb[126].mxu0  ;;  %v248_v29 = vpack.c.bf16 %v146_v22, %v145_v13 }
 0x1d7   :  { %v1286_v17 = vmax.f32 %v826_v2, 0.0  ;;  %v829_v19 = vadd.f32 %v5326_v27, %v828_v3  ;;  %v3917_v20 = vpop.f32.mrb[127].mxu0  ;;  %v154_v2 = vld [vmem:[%s6443_s0 + $0x3f8] sm:$0xff] }
 0x1d9   :  { %v1287_v21 = vmax.f32 %v829_v19, 0.0  ;;  %4023 = vmatmul.mubr.msk.bf16.gmra.mrb[232].mxu0 %vm292_vm3, %v247_v15 }
 0x1da   :  { %4026 = vmatprep.mubr.msk.bf16.mxu0 %vm4528_vm2, %v4526_v0 }
 0x1db   :  { %v5341_v23 = vpack.c.bf16 %v1287_v21, %v1286_v17 }
 0x1dc   :  { %v833_v24 = vpop.f32.mrb[128].mxu0 }
 0x1dd   :  { %4209 = vmatmul.mubr.msk.bf16.gmra.mrb[88].mxu1 %vm1407_vm5, %v5178_v28  ;;  %v834_v14 = vadd.f32 %v5326_v27, %v833_v24  ;;  %v3920_v25 = vpop.f32.mrb[129].mxu0  ;;  %v147_v28 = vld [vmem:[%s6443_s0 + $0x3c0] sm:$0xff] }
 0x1de   :  { %4212 = vmatprep.mubr.msk.bf16.mxu1 %vm4528_vm2, %v4526_v0  ;;  %v836_v30 = vpop.f32.mrb[130].mxu0  ;;  %v249_v43 = vpack.c.bf16 %v148_v35, %v147_v28 }
 0x1df   :  { %v1288_v16 = vmax.f32 %v834_v14, 0.0  ;;  %v837_v31 = vadd.f32 %v5326_v27, %v836_v30  ;;  %v3921_v32 = vpop.f32.mrb[131].mxu0  ;;  %v3509_v14 = vld [vmem:[%s6444_s3 + $0x10] sm:$0xf]  ;;  %v155_v30 = vld [vmem:[%s6443_s0 + $0x400] sm:$0xff] }
 0x1e0   :  { %v2046_v32 = vsel %vm1435_vm4, %v3509_v14, 0 }
 0x1e1   :  { %v1289_v34 = vmax.f32 %v837_v31, 0.0  ;;  %4027 = vmatmul.mubr.msk.bf16.gmra.mrb[236].mxu0 %vm292_vm3, %v248_v29 }
 0x1e2   :  { %4030 = vmatprep.mubr.msk.bf16.mxu0 %vm4528_vm2, %v4526_v0 }
 0x1e3   :  { %v5358_v36 = vpack.c.bf16 %v1289_v34, %v1288_v16  ;;  %v156_v16 = vld [vmem:[%s6443_s0 + $0x408] sm:$0xff] }
 0x1e4   :  { %v841_v38 = vpop.f32.mrb[132].mxu0 }
 0x1e5   :  { %4213 = vmatmul.mubr.msk.bf16.gmra.mrb[92].mxu1 %vm1407_vm5, %v5195_v42  ;;  %v842_v26 = vadd.f32 %v5326_v27, %v841_v38  ;;  %v3924_v40 = vpop.f32.mrb[133].mxu0  ;;  %v149_v42 = vld [vmem:[%s6443_s0 + $0x3d0] sm:$0xff] }
 0x1e6   :  { %4216 = vmatprep.mubr.msk.bf16.mxu1 %vm4528_vm2, %v4526_v0  ;;  %v844_v44 = vpop.f32.mrb[134].mxu0  ;;  %v250_v56 = vpack.c.bf16 %v150_v41, %v149_v42  ;;  %v157_v42 = vld [vmem:[%s6443_s0 + $0x410] sm:$0xff]  ;;  %v158_v41 = vld [vmem:[%s6443_s0 + $0x418] sm:$0xff] }
 0x1e7   :  { %v1290_v45 = vmax.f32 %v842_v26, 0.0  ;;  %v845_v37 = vadd.f32 %v5326_v27, %v844_v44  ;;  %v3925_v46 = vpop.f32.mrb[135].mxu0  ;;  %v253_v26 = vpack.c.bf16 %v156_v16, %v155_v30 }
 0x1e9   :  { %v1291_v48 = vmax.f32 %v845_v37, 0.0  ;;  %4031 = vmatmul.mubr.msk.bf16.gmra.mrb[240].mxu0 %vm292_vm3, %v249_v43 }
 0x1ea   :  { %4034 = vmatprep.mubr.msk.bf16.mxu0 %vm4528_vm2, %v4526_v0 }
 0x1eb   :  { %v5375_v49 = vpack.c.bf16 %v1291_v48, %v1290_v45 }
 0x1ec   :  { %v849_v51 = vpop.f32.mrb[136].mxu0 }
 0x1ed   :  { %4217 = vmatmul.mubr.msk.bf16.gmra.mrb[96].mxu1 %vm1407_vm5, %v5212_v55  ;;  %v850_v39 = vadd.f32 %v5326_v27, %v849_v51  ;;  %v3928_v54 = vpop.f32.mrb[137].mxu0  ;;  %v151_v55 = vld [vmem:[%s6443_s0 + $0x3e0] sm:$0xff] }
 0x1ee   :  { %4220 = vmatprep.mubr.msk.bf16.mxu1 %vm4528_vm2, %v4526_v0  ;;  %v852_v57 = vpop.f32.mrb[138].mxu0  ;;  %v251_v6 = vpack.c.bf16 %v152_v53, %v151_v55 }
 0x1ef   :  { %v1292_v58 = vmax.f32 %v850_v39, 0.0  ;;  %v853_v50 = vadd.f32 %v5326_v27, %v852_v57  ;;  %v3929_v59 = vpop.f32.mrb[139].mxu0 }
 0x1f1   :  { %v1293_v61 = vmax.f32 %v853_v50, 0.0  ;;  %4035 = vmatmul.mubr.msk.bf16.gmra.mrb[244].mxu0 %vm292_vm3, %v250_v56 }
 0x1f2   :  { %4038 = vmatprep.mubr.msk.bf16.mxu0 %vm4528_vm2, %v4526_v0 }
 0x1f3   :  { %v5392_v62 = vpack.c.bf16 %v1293_v61, %v1292_v58  ;;  %v254_v58 = vpack.c.bf16 %v158_v41, %v157_v42 }
 0x1f4   :  { %v857_v1 = vpop.f32.mrb[140].mxu0 }
 0x1f5   :  { %4221 = vmatmul.mubr.msk.bf16.gmra.mrb[100].mxu1 %vm1407_vm5, %v5229_v5  ;;  %v858_v52 = vadd.f32 %v5326_v27, %v857_v1  ;;  %v3932_v4 = vpop.f32.mrb[141].mxu0  ;;  %v153_v5 = vld [vmem:[%s6443_s0 + $0x3f0] sm:$0xff] }
 0x1f6   :  { %4224 = vmatprep.mubr.msk.bf16.mxu1 %vm4528_vm2, %v4526_v0  ;;  %v860_v7 = vpop.f32.mrb[142].mxu0  ;;  %v252_v19 = vpack.c.bf16 %v154_v2, %v153_v5 }
 0x1f7   :  { %v1294_v8 = vmax.f32 %v858_v52, 0.0  ;;  %v861_v63 = vadd.f32 %v5326_v27, %v860_v7  ;;  %v3933_v9 = vpop.f32.mrb[143].mxu0 }
 0x1f9   :  { %v1295_v11 = vmax.f32 %v861_v63, 0.0  ;;  %4039 = vmatmul.mubr.msk.bf16.gmra.mrb[248].mxu0 %vm292_vm3, %v251_v6  ;;  %v160_v6 = vld [vmem:[%s6443_s0 + $0x428] sm:$0xff] }
 0x1fa   :  { %4042 = vmatprep.mubr.msk.bf16.mxu0 %vm4528_vm2, %v4526_v0 }
 0x1fb   :  { %v5409_v12 = vpack.c.bf16 %v1295_v11, %v1294_v8 }
 0x1fc   :  { %v865_v15 = vpop.f32.mrb[144].mxu0 }
 0x1fd   :  { %4225 = vmatmul.mubr.msk.bf16.gmra.mrb[104].mxu1 %vm1407_vm5, %v5246_v18  ;;  %v866_v3 = vadd.f32 %v5326_v27, %v865_v15  ;;  %v3936_v17 = vpop.f32.mrb[145].mxu0 }
 0x1fe   :  { %4230 = vmatprep.mubr.msk.bf16.mxu1 %vm4528_vm2, %v4526_v0  ;;  %v868_v20 = vpop.f32.mrb[146].mxu0 }
 0x1ff   :  { %v1296_v21 = vmax.f32 %v866_v3, 0.0  ;;  %v869_v13 = vadd.f32 %v5326_v27, %v868_v20  ;;  %v3937_v22 = vpop.f32.mrb[147].mxu0 }
 0x200   :  { %v5417_v24 = vpop.f32.mrb[0].mxu1  ;;  %v162_v22 = vld [vmem:[%s6443_s0 + $0x438] sm:$0xff] }
 0x201   :  { %v4118_v25 = vpop.f32.mrb[1].mxu1  ;;  %v1297_v18 = vmax.f32 %v869_v13, 0.0  ;;  %4043 = vmatmul.mubr.msk.bf16.gmra.mrb[252].mxu0 %vm292_vm3, %v252_v19 }
 0x202   :  { %v5423_v29 = vpop.f32.mrb[2].mxu1  ;;  %4046 = vmatprep.mubr.msk.bf16.mxu0 %vm4528_vm2, %v4526_v0 }
 0x203   :  { %v4119_v31 = vpop.f32.mrb[3].mxu1  ;;  %v5434_v34 = vpack.c.bf16 %v1297_v18, %v1296_v21 }
 0x204   :  { %v873_v28 = vpop.f32.mrb[148].mxu0 }
 0x205   :  { %4231 = vmatmul.mubr.msk.bf16.vlgmr.msra.gmra.mrb[108].mxu1 %vm1407_vm5, %v5267_v33  ;;  %v874_v35 = vadd.f32 %v5326_v27, %v873_v28  ;;  %v3940_v38 = vpop.f32.mrb[149].mxu0 }
 0x206   :  { %4267 = vmatpush3.bf16.msra.mxu1 %v2046_v32  ;;  %4234 = vmatprep.mubr.msk.bf16.mxu1 %vm4528_vm2, %v4526_v0  ;;  %v876_v40 = vpop.f32.mrb[150].mxu0 }
 0x207   :  { %v1298_v43 = vmax.f32 %v874_v35, 0.0  ;;  %v877_v44 = vadd.f32 %v5326_v27, %v876_v40  ;;  %v3941_v45 = vpop.f32.mrb[151].mxu0  ;;  %4304 = vmatprep.subr.bf16.mxu1 %v4526_v0 }
 0x208   :  { %v5443_v37 = vpop.f32.mrb[4].mxu1  ;;  %v164_v45 = vld [vmem:[%s6443_s0 + $0x448] sm:$0xff] }
 0x209   :  { %v4122_v46 = vpop.f32.mrb[5].mxu1  ;;  %v1299_v48 = vmax.f32 %v877_v44, 0.0  ;;  %4047 = vmatmul.mubr.msk.bf16.gmra.mrb[0].mxu0 %vm292_vm3, %v253_v26 }
 0x20a   :  { %v5446_v33 = vpop.f32.mrb[6].mxu1  ;;  %4050 = vmatprep.mubr.msk.bf16.mxu0 %vm4528_vm2, %v4526_v0 }
 0x20b   :  { %v4123_v51 = vpop.f32.mrb[7].mxu1  ;;  %v5456_v39 = vpack.c.bf16 %v1299_v48, %v1298_v43 }
 0x20c   :  { %v881_v54 = vpop.f32.mrb[152].mxu0 }
 0x20d   :  { %4235 = vmatmul.mubr.msk.bf16.gmra.mrb[112].mxu1 %vm1407_vm5, %v5285_v47  ;;  %v882_v56 = vadd.f32 %v5326_v27, %v881_v54  ;;  %v3944_v57 = vpop.f32.mrb[153].mxu0  ;;  %v159_v47 = vld [vmem:[%s6443_s0 + $0x420] sm:$0xff] }
 0x20e   :  { %4238 = vmatprep.mubr.msk.bf16.mxu1 %vm4528_vm2, %v4526_v0  ;;  %v884_v50 = vpop.f32.mrb[154].mxu0  ;;  %v255_v5 = vpack.c.bf16 %v160_v6, %v159_v47 }
 0x20f   :  { %v1300_v59 = vmax.f32 %v882_v56, 0.0  ;;  %v885_v61 = vadd.f32 %v5326_v27, %v884_v50  ;;  %v3945_v55 = vpop.f32.mrb[155].mxu0 }
 0x210   :  { %v5464_v53 = vpop.f32.mrb[8].mxu1 }
 0x211   :  { %v4126_v1 = vpop.f32.mrb[9].mxu1  ;;  %v1301_v52 = vmax.f32 %v885_v61, 0.0  ;;  %4051 = vmatmul.mubr.msk.bf16.gmra.mrb[4].mxu0 %vm292_vm3, %v254_v58 }
 0x212   :  { %v5467_v4 = vpop.f32.mrb[10].mxu1  ;;  %4054 = vmatprep.mubr.msk.bf16.mxu0 %vm4528_vm2, %v4526_v0 }
 0x213   :  { %v4127_v7 = vpop.f32.mrb[11].mxu1  ;;  %v5477_v8 = vpack.c.bf16 %v1301_v52, %v1300_v59  ;;  %v166_v52 = vld [vmem:[%s6443_s0 + $0x458] sm:$0xff] }
 0x214   :  { %v889_v63 = vpop.f32.mrb[156].mxu0 }
 0x215   :  { %4239 = vmatmul.mubr.msk.bf16.gmra.mrb[116].mxu1 %vm1407_vm5, %v5302_v60  ;;  %v890_v9 = vadd.f32 %v5326_v27, %v889_v63  ;;  %v3948_v11 = vpop.f32.mrb[157].mxu0  ;;  %v161_v60 = vld [vmem:[%s6443_s0 + $0x430] sm:$0xff] }
 0x216   :  { %4242 = vmatprep.mubr.msk.bf16.mxu1 %vm4528_vm2, %v4526_v0  ;;  %v892_v2 = vpop.f32.mrb[158].mxu0  ;;  %v256_v31 = vpack.c.bf16 %v162_v22, %v161_v60  ;;  %v168_v22 = vld [vmem:[%s6443_s0 + $0x468] sm:$0xff] }
 0x217   :  { %v1302_v15 = vmax.f32 %v890_v9, 0.0  ;;  %v893_v3 = vadd.f32 %v5326_v27, %v892_v2  ;;  %v3949_v17 = vpop.f32.mrb[159].mxu0 }
 0x218   :  { %v5485_v19 = vpop.f32.mrb[12].mxu1 }
 0x219   :  { %v4130_v20 = vpop.f32.mrb[13].mxu1  ;;  %v1303_v21 = vmax.f32 %v893_v3, 0.0  ;;  %4055 = vmatmul.mubr.msk.bf16.gmra.mrb[8].mxu0 %vm292_vm3, %v255_v5 }
 0x21a   :  { %v5488_v13 = vpop.f32.mrb[14].mxu1  ;;  %4058 = vmatprep.mubr.msk.bf16.mxu0 %vm4528_vm2, %v4526_v0 }
 0x21b   :  { %v4131_v14 = vpop.f32.mrb[15].mxu1  ;;  %v5498_v25 = vpack.c.bf16 %v1303_v21, %v1302_v15 }
 0x21c   :  { %v897_v18 = vpop.f32.mrb[160].mxu0 }
 0x21d   :  { %4243 = vmatmul.mubr.msk.bf16.gmra.mrb[120].mxu1 %vm1407_vm5, %v5319_v10  ;;  %v898_v30 = vadd.f32 %v5326_v27, %v897_v18  ;;  %v3952_v16 = vpop.f32.mrb[161].mxu0  ;;  %v163_v10 = vld [vmem:[%s6443_s0 + $0x440] sm:$0xff] }
 0x21e   :  { %4246 = vmatprep.mubr.msk.bf16.mxu1 %vm4528_vm2, %v4526_v0  ;;  %v900_v32 = vpop.f32.mrb[162].mxu0  ;;  %v257_v54 = vpack.c.bf16 %v164_v45, %v163_v10 }
 0x21f   :  { %v1304_v28 = vmax.f32 %v898_v30, 0.0  ;;  %v901_v35 = vadd.f32 %v5326_v27, %v900_v32  ;;  %v3953_v38 = vpop.f32.mrb[163].mxu0 }
 0x220   :  { %v5506_v26 = vpop.f32.mrb[16].mxu1 }
 0x221   :  { %v4134_v40 = vpop.f32.mrb[17].mxu1  ;;  %v1305_v43 = vmax.f32 %v901_v35, 0.0  ;;  %4059 = vmatmul.mubr.msk.bf16.gmra.mrb[12].mxu0 %vm292_vm3, %v256_v31 }
 0x222   :  { %v5509_v44 = vpop.f32.mrb[18].mxu1  ;;  %4062 = vmatprep.mubr.msk.bf16.mxu0 %vm4528_vm2, %v4526_v0 }
 0x223   :  { %v4135_v46 = vpop.f32.mrb[19].mxu1  ;;  %v5519_v48 = vpack.c.bf16 %v1305_v43, %v1304_v28 }
 0x224   :  { %v905_v42 = vpop.f32.mrb[164].mxu0 }
 0x225   :  { %4247 = vmatmul.mubr.msk.bf16.gmra.mrb[124].mxu1 %vm1407_vm5, %v5341_v23  ;;  %v906_v41 = vadd.f32 %v5326_v27, %v905_v42  ;;  %v3956_v51 = vpop.f32.mrb[165].mxu0  ;;  %v165_v23 = vld [vmem:[%s6443_s0 + $0x450] sm:$0xff]  ;;  %v170_v42 = vld [vmem:[%s6443_s0 + $0x478] sm:$0xff] }
 0x226   :  { %4250 = vmatprep.mubr.msk.bf16.mxu1 %vm4528_vm2, %v4526_v0  ;;  %v908_v56 = vpop.f32.mrb[166].mxu0  ;;  %v258_v11 = vpack.c.bf16 %v166_v52, %v165_v23 }
 0x227   :  { %v1306_v57 = vmax.f32 %v906_v41, 0.0  ;;  %v909_v58 = vadd.f32 %v5326_v27, %v908_v56  ;;  %v3957_v50 = vpop.f32.mrb[167].mxu0 }
 0x228   :  { %v5527_v59 = vpop.f32.mrb[20].mxu1 }
 0x229   :  { %v4138_v61 = vpop.f32.mrb[21].mxu1  ;;  %v1307_v55 = vmax.f32 %v909_v58, 0.0  ;;  %4063 = vmatmul.mubr.msk.bf16.gmra.mrb[16].mxu0 %vm292_vm3, %v257_v54 }
 0x22a   :  { %v5530_v1 = vpop.f32.mrb[22].mxu1  ;;  %4066 = vmatprep.mubr.msk.bf16.mxu0 %vm4528_vm2, %v4526_v0 }
 0x22b   :  { %v4139_v47 = vpop.f32.mrb[23].mxu1  ;;  %v5540_v6 = vpack.c.bf16 %v1307_v55, %v1306_v57 }
 0x22c   :  { %v913_v7 = vpop.f32.mrb[168].mxu0 }
 0x22d   :  { %4251 = vmatmul.mubr.msk.bf16.gmra.mrb[128].mxu1 %vm1407_vm5, %v5358_v36  ;;  %v914_v63 = vadd.f32 %v5326_v27, %v913_v7  ;;  %v3960_v9 = vpop.f32.mrb[169].mxu0  ;;  %v167_v36 = vld [vmem:[%s6443_s0 + $0x460] sm:$0xff] }
 0x22e   :  { %4254 = vmatprep.mubr.msk.bf16.mxu1 %vm4528_vm2, %v4526_v0  ;;  %v916_v5 = vpop.f32.mrb[170].mxu0  ;;  %v259_v32 = vpack.c.bf16 %v168_v22, %v167_v36  ;;  %v172_v9 = vld [vmem:[%s6443_s0 + $0x488] sm:$0xff] }
 0x22f   :  { %v1308_v2 = vmax.f32 %v914_v63, 0.0  ;;  %v917_v15 = vadd.f32 %v5326_v27, %v916_v5  ;;  %v3961_v3 = vpop.f32.mrb[171].mxu0 }
 0x230   :  { %v5548_v17 = vpop.f32.mrb[24].mxu1 }
 0x231   :  { %v4142_v20 = vpop.f32.mrb[25].mxu1  ;;  %v1309_v21 = vmax.f32 %v917_v15, 0.0  ;;  %4067 = vmatmul.mubr.msk.bf16.gmra.mrb[20].mxu0 %vm292_vm3, %v258_v11 }
 0x232   :  { %v5551_v60 = vpop.f32.mrb[26].mxu1  ;;  %4070 = vmatprep.mubr.msk.bf16.mxu0 %vm4528_vm2, %v4526_v0 }
 0x233   :  { %v4143_v14 = vpop.f32.mrb[27].mxu1  ;;  %v5561_v18 = vpack.c.bf16 %v1309_v21, %v1308_v2 }
 0x234   :  { %v921_v30 = vpop.f32.mrb[172].mxu0 }
 0x235   :  { %4255 = vmatmul.mubr.msk.bf16.gmra.mrb[132].mxu1 %vm1407_vm5, %v5375_v49  ;;  %v922_v16 = vadd.f32 %v5326_v27, %v921_v30  ;;  %v3964_v31 = vpop.f32.mrb[173].mxu0  ;;  %v169_v49 = vld [vmem:[%s6443_s0 + $0x470] sm:$0xff] }
 0x236   :  { %4258 = vmatprep.mubr.msk.bf16.mxu1 %vm4528_vm2, %v4526_v0  ;;  %v924_v28 = vpop.f32.mrb[174].mxu0  ;;  %v260_v58 = vpack.c.bf16 %v170_v42, %v169_v49 }
 0x237   :  { %v1310_v35 = vmax.f32 %v922_v16, 0.0  ;;  %v925_v38 = vadd.f32 %v5326_v27, %v924_v28  ;;  %v3965_v40 = vpop.f32.mrb[175].mxu0  ;;  %v3519_v16 = vld [vmem:[%s6444_s3 + $0x14] sm:$0xf] }
 0x238   :  { %v5569_v43 = vpop.f32.mrb[28].mxu1 }
 0x239   :  { %v4146_v10 = vpop.f32.mrb[29].mxu1  ;;  %v1311_v45 = vmax.f32 %v925_v38, 0.0  ;;  %4071 = vmatmul.mubr.msk.bf16.gmra.mrb[24].mxu0 %vm292_vm3, %v259_v32  ;;  %v174_v38 = vld [vmem:[%s6443_s0 + $0x498] sm:$0xff] }
 0x23a   :  { %v5572_v46 = vpop.f32.mrb[30].mxu1  ;;  %4074 = vmatprep.mubr.msk.bf16.mxu0 %vm4528_vm2, %v4526_v0  ;;  %v2210_v10 = vsel %vm1435_vm4, %v3519_v16, 0 }
 0x23b   :  { %v4147_v41 = vpop.f32.mrb[31].mxu1  ;;  %v5582_v51 = vpack.c.bf16 %v1311_v45, %v1310_v35  ;;  %v173_v35 = vld [vmem:[%s6443_s0 + $0x490] sm:$0xff] }
 0x23c   :  { %v929_v54 = vpop.f32.mrb[176].mxu0 }
 0x23d   :  { %4259 = vmatmul.mubr.msk.bf16.gmra.mrb[136].mxu1 %vm1407_vm5, %v5392_v62  ;;  %v930_v56 = vadd.f32 %v5326_v27, %v929_v54  ;;  %v3968_v57 = vpop.f32.mrb[177].mxu0  ;;  %v171_v62 = vld [vmem:[%s6443_s0 + $0x480] sm:$0xff]  ;;  %v262_v54 = vpack.c.bf16 %v174_v38, %v173_v35 }
 0x23e   :  { %4262 = vmatprep.mubr.msk.bf16.mxu1 %vm4528_vm2, %v4526_v0  ;;  %v932_v50 = vpop.f32.mrb[178].mxu0  ;;  %v261_v20 = vpack.c.bf16 %v172_v9, %v171_v62 }
 0x23f   :  { %v1312_v61 = vmax.f32 %v930_v56, 0.0  ;;  %v933_v55 = vadd.f32 %v5326_v27, %v932_v50  ;;  %v3969_v23 = vpop.f32.mrb[179].mxu0 }
 0x240   :  { %v5590_v52 = vpop.f32.mrb[32].mxu1 }
 0x241   :  { %v4150_v47 = vpop.f32.mrb[33].mxu1  ;;  %v1313_v7 = vmax.f32 %v933_v55, 0.0  ;;  %4075 = vmatmul.mubr.msk.bf16.gmra.mrb[28].mxu0 %vm292_vm3, %v260_v58 }
 0x242   :  { %v5593_v63 = vpop.f32.mrb[34].mxu1  ;;  %4078 = vmatprep.mubr.msk.bf16.mxu0 %vm4528_vm2, %v4526_v0  ;;  %v175_v47 = vld [vmem:[%s6443_s0 + $0x4a0] sm:$0xff] }
 0x243   :  { %v4151_v11 = vpop.f32.mrb[35].mxu1  ;;  %v5603_v5 = vpack.c.bf16 %v1313_v7, %v1312_v61  ;;  %v176_v7 = vld [vmem:[%s6443_s0 + $0x4a8] sm:$0xff] }
 0x244   :  { %v937_v2 = vpop.f32.mrb[180].mxu0 }
 0x245   :  { %4263 = vmatmul.mubr.msk.bf16.gmra.mrb[140].mxu1 %vm1407_vm5, %v5409_v12  ;;  %v938_v15 = vadd.f32 %v5326_v27, %v937_v2  ;;  %v3972_v3 = vpop.f32.mrb[181].mxu0 }
 0x246   :  { %4268 = vmatprep.mubr.msk.bf16.mxu1 %vm4528_vm2, %v4526_v0  ;;  %v940_v21 = vpop.f32.mrb[182].mxu0  ;;  %v263_v3 = vpack.c.bf16 %v176_v7, %v175_v47 }
 0x247   :  { %v1314_v36 = vmax.f32 %v938_v15, 0.0  ;;  %v941_v22 = vadd.f32 %v5326_v27, %v940_v21  ;;  %v3973_v14 = vpop.f32.mrb[183].mxu0 }
 0x248   :  { %v1608_v30 = vpop.f32.mrb[36].mxu1 }
 0x249   :  { %v5615_v31 = vadd.f32 %v1608_v30, %v5417_v24  ;;  %v4156_v12 = vpop.f32.mrb[37].mxu1  ;;  %v1315_v32 = vmax.f32 %v941_v22, 0.0  ;;  %4079 = vmatmul.mubr.msk.bf16.gmra.mrb[32].mxu0 %vm292_vm3, %v261_v20 }
 0x24a   :  { %v1611_v28 = vpop.f32.mrb[38].mxu1  ;;  %4082 = vmatprep.mubr.msk.bf16.mxu0 %vm4528_vm2, %v4526_v0  ;;  %v177_v12 = vld [vmem:[%s6443_s0 + $0x4b0] sm:$0xff] }
 0x24b   :  { %v5627_v40 = vadd.f32 %v1611_v28, %v5423_v29  ;;  %v4157_v24 = vpop.f32.mrb[39].mxu1  ;;  %v5630_v45 = vpack.c.bf16 %v1315_v32, %v1314_v36  ;;  %v178_v32 = vld [vmem:[%s6443_s0 + $0x4b8] sm:$0xff] }
 0x24c   :  { %v945_v49 = vpop.f32.mrb[184].mxu0 }
 0x24d   :  { %4269 = vmatmul.mubr.msk.bf16.vlgmr.msra.gmra.mrb[144].mxu1 %vm1407_vm5, %v5434_v34  ;;  %v946_v42 = vadd.f32 %v5326_v27, %v945_v49  ;;  %v3976_v41 = vpop.f32.mrb[185].mxu0  ;;  %v264_v49 = vpack.c.bf16 %v178_v32, %v177_v12 }
 0x24e   :  { %4305 = vmatpush3.bf16.msra.mxu1 %v2210_v10  ;;  %4272 = vmatprep.mubr.msk.bf16.mxu1 %vm4528_vm2, %v4526_v0  ;;  %v948_v56 = vpop.f32.mrb[186].mxu0 }
 0x24f   :  { %v1316_v29 = vmax.f32 %v946_v42, 0.0  ;;  %v949_v57 = vadd.f32 %v5326_v27, %v948_v56  ;;  %v3977_v58 = vpop.f32.mrb[187].mxu0  ;;  %4342 = vmatprep.subr.bf16.mxu1 %v4526_v0 }
 0x250   :  { %v1616_v50 = vpop.f32.mrb[40].mxu1 }
 0x251   :  { %v5640_v61 = vadd.f32 %v1616_v50, %v5443_v37  ;;  %v4160_v34 = vpop.f32.mrb[41].mxu1  ;;  %v1317_v55 = vmax.f32 %v949_v57, 0.0  ;;  %4083 = vmatmul.mubr.msk.bf16.gmra.mrb[36].mxu0 %vm292_vm3, %v262_v54  ;;  %v179_v50 = vld [vmem:[%s6443_s0 + $0x4c0] sm:$0xff] }
 0x252   :  { %v1619_v23 = vpop.f32.mrb[42].mxu1  ;;  %4086 = vmatprep.mubr.msk.bf16.mxu0 %vm4528_vm2, %v4526_v0  ;;  %v180_v34 = vld [vmem:[%s6443_s0 + $0x4c8] sm:$0xff] }
 0x253   :  { %v5652_v62 = vadd.f32 %v1619_v23, %v5446_v33  ;;  %v4161_v37 = vpop.f32.mrb[43].mxu1  ;;  %v5654_v9 = vpack.c.bf16 %v1317_v55, %v1316_v29 }
 0x254   :  { %v953_v11 = vpop.f32.mrb[188].mxu0 }
 0x255   :  { %4273 = vmatmul.mubr.msk.bf16.gmra.mrb[148].mxu1 %vm1407_vm5, %v5456_v39  ;;  %v954_v2 = vadd.f32 %v5326_v27, %v953_v11  ;;  %v3980_v15 = vpop.f32.mrb[189].mxu0  ;;  %v265_v11 = vpack.c.bf16 %v180_v34, %v179_v50 }
 0x256   :  { %4276 = vmatprep.mubr.msk.bf16.mxu1 %vm4528_vm2, %v4526_v0  ;;  %v956_v20 = vpop.f32.mrb[190].mxu0 }
 0x257   :  { %v1318_v21 = vmax.f32 %v954_v2, 0.0  ;;  %v957_v36 = vadd.f32 %v5326_v27, %v956_v20  ;;  %v3981_v33 = vpop.f32.mrb[191].mxu0 }
 0x258   :  { %v1624_v22 = vpop.f32.mrb[44].mxu1 }
 0x259   :  { %v5663_v14 = vadd.f32 %v1624_v22, %v5464_v53  ;;  %v4164_v30 = vpop.f32.mrb[45].mxu1  ;;  %v1319_v16 = vmax.f32 %v957_v36, 0.0  ;;  %4087 = vmatmul.mubr.msk.bf16.gmra.mrb[40].mxu0 %vm292_vm3, %v263_v3  ;;  %v181_v22 = vld [vmem:[%s6443_s0 + $0x4d0] sm:$0xff] }
 0x25a   :  { %v1627_v39 = vpop.f32.mrb[46].mxu1  ;;  %4090 = vmatprep.mubr.msk.bf16.mxu0 %vm4528_vm2, %v4526_v0  ;;  %v182_v30 = vld [vmem:[%s6443_s0 + $0x4d8] sm:$0xff] }
 0x25b   :  { %v5675_v28 = vadd.f32 %v1627_v39, %v5467_v4  ;;  %v4165_v53 = vpop.f32.mrb[47].mxu1  ;;  %v5677_v35 = vpack.c.bf16 %v1319_v16, %v1318_v21 }
 0x25c   :  { %v961_v38 = vpop.f32.mrb[192].mxu0 }
 0x25d   :  { %4277 = vmatmul.mubr.msk.bf16.gmra.mrb[152].mxu1 %vm1407_vm5, %v5477_v8  ;;  %v962_v24 = vadd.f32 %v5326_v27, %v961_v38  ;;  %v3984_v10 = vpop.f32.mrb[193].mxu0  ;;  %v266_v38 = vpack.c.bf16 %v182_v30, %v181_v22 }
 0x25e   :  { %4280 = vmatprep.mubr.msk.bf16.mxu1 %vm4528_vm2, %v4526_v0  ;;  %v964_v42 = vpop.f32.mrb[194].mxu0 }
 0x25f   :  { %v1320_v41 = vmax.f32 %v962_v24, 0.0  ;;  %v965_v54 = vadd.f32 %v5326_v27, %v964_v42  ;;  %v3985_v4 = vpop.f32.mrb[195].mxu0 }
 0x260   :  { %v1632_v56 = vpop.f32.mrb[48].mxu1 }
 0x261   :  { %v5686_v29 = vadd.f32 %v1632_v56, %v5485_v19  ;;  %v4168_v57 = vpop.f32.mrb[49].mxu1  ;;  %v1321_v58 = vmax.f32 %v965_v54, 0.0  ;;  %4091 = vmatmul.mubr.msk.bf16.gmra.mrb[44].mxu0 %vm292_vm3, %v264_v49  ;;  %v183_v56 = vld [vmem:[%s6443_s0 + $0x4e0] sm:$0xff] }
 0x262   :  { %v1635_v8 = vpop.f32.mrb[50].mxu1  ;;  %4094 = vmatprep.mubr.msk.bf16.mxu0 %vm4528_vm2, %v4526_v0  ;;  %v184_v57 = vld [vmem:[%s6443_s0 + $0x4e8] sm:$0xff] }
 0x263   :  { %v5698_v55 = vadd.f32 %v1635_v8, %v5488_v13  ;;  %v4169_v19 = vpop.f32.mrb[51].mxu1  ;;  %v5700_v23 = vpack.c.bf16 %v1321_v58, %v1320_v41 }
 0x264   :  { %v969_v47 = vpop.f32.mrb[196].mxu0 }
 0x265   :  { %4281 = vmatmul.mubr.msk.bf16.gmra.mrb[156].mxu1 %vm1407_vm5, %v5498_v25  ;;  %v970_v7 = vadd.f32 %v5326_v27, %v969_v47  ;;  %v3988_v37 = vpop.f32.mrb[197].mxu0  ;;  %v267_v47 = vpack.c.bf16 %v184_v57, %v183_v56 }
 0x266   :  { %4284 = vmatprep.mubr.msk.bf16.mxu1 %vm4528_vm2, %v4526_v0  ;;  %v972_v2 = vpop.f32.mrb[198].mxu0 }
 0x267   :  { %v1322_v15 = vmax.f32 %v970_v7, 0.0  ;;  %v973_v3 = vadd.f32 %v5326_v27, %v972_v2  ;;  %v3989_v13 = vpop.f32.mrb[199].mxu0 }
 0x268   :  { %v1640_v20 = vpop.f32.mrb[52].mxu1 }
 0x269   :  { %v4172_v21 = vpop.f32.mrb[53].mxu1  ;;  %v1323_v36 = vmax.f32 %v973_v3, 0.0  ;;  %4095 = vmatmul.mubr.msk.bf16.gmra.mrb[48].mxu0 %vm292_vm3, %v265_v11  ;;  %v5710_v33 = vadd.f32 %v1640_v20, %v5506_v26  ;;  %v185_v20 = vld [vmem:[%s6443_s0 + $0x4f0] sm:$0xff] }
 0x26a   :  { %v1643_v25 = vpop.f32.mrb[54].mxu1  ;;  %4098 = vmatprep.mubr.msk.bf16.mxu0 %vm4528_vm2, %v4526_v0  ;;  %v186_v21 = vld [vmem:[%s6443_s0 + $0x4f8] sm:$0xff] }
 0x26b   :  { %v4173_v16 = vpop.f32.mrb[55].mxu1  ;;  %v5720_v39 = vpack.c.bf16 %v1323_v36, %v1322_v15  ;;  %v5723_v12 = vadd.f32 %v1643_v25, %v5509_v44 }
 0x26c   :  { %v977_v26 = vpop.f32.mrb[200].mxu0 }
 0x26d   :  { %4285 = vmatmul.mubr.msk.bf16.gmra.mrb[160].mxu1 %vm1407_vm5, %v5519_v48  ;;  %v978_v32 = vadd.f32 %v5326_v27, %v977_v26  ;;  %v3992_v53 = vpop.f32.mrb[201].mxu0  ;;  %v268_v26 = vpack.c.bf16 %v186_v21, %v185_v20 }
 0x26e   :  { %4288 = vmatprep.mubr.msk.bf16.mxu1 %vm4528_vm2, %v4526_v0  ;;  %v980_v24 = vpop.f32.mrb[202].mxu0 }
 0x26f   :  { %v1324_v10 = vmax.f32 %v978_v32, 0.0  ;;  %v981_v49 = vadd.f32 %v5326_v27, %v980_v24  ;;  %v3993_v42 = vpop.f32.mrb[203].mxu0 }
 0x270   :  { %v1648_v41 = vpop.f32.mrb[56].mxu1 }
 0x271   :  { %v4176_v54 = vpop.f32.mrb[57].mxu1  ;;  %v1325_v44 = vmax.f32 %v981_v49, 0.0  ;;  %4099 = vmatmul.mubr.msk.bf16.gmra.mrb[52].mxu0 %vm292_vm3, %v266_v38  ;;  %v5733_v4 = vadd.f32 %v1648_v41, %v5527_v59  ;;  %v187_v41 = vld [vmem:[%s6443_s0 + $0x500] sm:$0xff] }
 0x272   :  { %v1651_v48 = vpop.f32.mrb[58].mxu1  ;;  %4102 = vmatprep.mubr.msk.bf16.mxu0 %vm4528_vm2, %v4526_v0  ;;  %v188_v54 = vld [vmem:[%s6443_s0 + $0x508] sm:$0xff] }
 0x273   :  { %v4177_v58 = vpop.f32.mrb[59].mxu1  ;;  %v5743_v8 = vpack.c.bf16 %v1325_v44, %v1324_v10  ;;  %v5746_v50 = vadd.f32 %v1651_v48, %v5530_v1 }
 0x274   :  { %v985_v59 = vpop.f32.mrb[204].mxu0 }
 0x275   :  { %4289 = vmatmul.mubr.msk.bf16.gmra.mrb[164].mxu1 %vm1407_vm5, %v5540_v6  ;;  %v986_v34 = vadd.f32 %v5326_v27, %v985_v59  ;;  %v3996_v19 = vpop.f32.mrb[205].mxu0  ;;  %v269_v59 = vpack.c.bf16 %v188_v54, %v187_v41 }
 0x276   :  { %4292 = vmatprep.mubr.msk.bf16.mxu1 %vm4528_vm2, %v4526_v0  ;;  %v988_v7 = vpop.f32.mrb[206].mxu0 }
 0x277   :  { %v1326_v37 = vmax.f32 %v986_v34, 0.0  ;;  %v989_v11 = vadd.f32 %v5326_v27, %v988_v7  ;;  %v3997_v2 = vpop.f32.mrb[207].mxu0 }
 0x278   :  { %v1656_v15 = vpop.f32.mrb[60].mxu1 }
 0x279   :  { %v4180_v3 = vpop.f32.mrb[61].mxu1  ;;  %v1327_v1 = vmax.f32 %v989_v11, 0.0  ;;  %4103 = vmatmul.mubr.msk.bf16.gmra.mrb[56].mxu0 %vm292_vm3, %v267_v47  ;;  %v5756_v13 = vadd.f32 %v1656_v15, %v5548_v17 }
 0x27a   :  { %v1659_v6 = vpop.f32.mrb[62].mxu1  ;;  %4106 = vmatprep.mubr.msk.bf16.mxu0 %vm4528_vm2, %v4526_v0 }
 0x27b   :  { %v4181_v36 = vpop.f32.mrb[63].mxu1  ;;  %v5766_v25 = vpack.c.bf16 %v1327_v1, %v1326_v37  ;;  %v5769_v22 = vadd.f32 %v1659_v6, %v5551_v60 }
 0x27c   :  { %v993_v17 = vpop.f32.mrb[208].mxu0 }
 0x27d   :  { %4293 = vmatmul.mubr.msk.bf16.gmra.mrb[168].mxu1 %vm1407_vm5, %v5561_v18  ;;  %v994_v30 = vadd.f32 %v5326_v27, %v993_v17  ;;  %v4000_v16 = vpop.f32.mrb[209].mxu0 }
 0x27e   :  { %4296 = vmatprep.mubr.msk.bf16.mxu1 %vm4528_vm2, %v4526_v0  ;;  %v996_v32 = vpop.f32.mrb[210].mxu0 }
 0x27f   :  { %v1328_v53 = vmax.f32 %v994_v30, 0.0  ;;  %v997_v38 = vadd.f32 %v5326_v27, %v996_v32  ;;  %v4001_v24 = vpop.f32.mrb[211].mxu0 }
 0x280   :  { %v1664_v10 = vpop.f32.mrb[64].mxu1 }
 0x281   :  { %v4184_v49 = vpop.f32.mrb[65].mxu1  ;;  %v1329_v60 = vmax.f32 %v997_v38, 0.0  ;;  %4107 = vmatmul.mubr.msk.bf16.gmra.mrb[60].mxu0 %vm292_vm3, %v268_v26  ;;  %v5779_v42 = vadd.f32 %v1664_v10, %v5569_v43 }
 0x282   :  { %v1667_v18 = vpop.f32.mrb[66].mxu1  ;;  %4110 = vmatprep.mubr.msk.bf16.mxu0 %vm4528_vm2, %v4526_v0 }
 0x283   :  { %v4185_v44 = vpop.f32.mrb[67].mxu1  ;;  %v5789_v48 = vpack.c.bf16 %v1329_v60, %v1328_v53  ;;  %v5792_v56 = vadd.f32 %v1667_v18, %v5572_v46 }
 0x284   :  { %v1001_v43 = vpop.f32.mrb[212].mxu0 }
 0x285   :  { %4297 = vmatmul.mubr.msk.bf16.gmra.mrb[172].mxu1 %vm1407_vm5, %v5582_v51  ;;  %v1002_v57 = vadd.f32 %v5326_v27, %v1001_v43  ;;  %v4004_v58 = vpop.f32.mrb[213].mxu0 }
 0x286   :  { %4300 = vmatprep.mubr.msk.bf16.mxu1 %vm4528_vm2, %v4526_v0  ;;  %v1004_v34 = vpop.f32.mrb[214].mxu0 }
 0x287   :  { %v1330_v19 = vmax.f32 %v1002_v57, 0.0  ;;  %v1005_v47 = vadd.f32 %v5326_v27, %v1004_v34  ;;  %v4005_v7 = vpop.f32.mrb[215].mxu0 }
 0x288   :  { %v1672_v37 = vpop.f32.mrb[68].mxu1 }
 0x289   :  { %v4188_v11 = vpop.f32.mrb[69].mxu1  ;;  %v1331_v46 = vmax.f32 %v1005_v47, 0.0  ;;  %4111 = vmatmul.mubr.msk.bf16.gmra.mrb[64].mxu0 %vm292_vm3, %v269_v59  ;;  %v5802_v2 = vadd.f32 %v1672_v37, %v5590_v52 }
 0x28a   :  { %v1675_v51 = vpop.f32.mrb[70].mxu1  ;;  %4464 = vmatprep.mubr.msk.bf16.mxu0 %vm4528_vm2, %v4526_v0 }
 0x28b   :  { %v4189_v15 = vpop.f32.mrb[71].mxu1  ;;  %v5806_v3 = vpack.c.bf16 %v1331_v46, %v1330_v19  ;;  %v5809_v1 = vadd.f32 %v1675_v51, %v5593_v63  ;;  %v3529_v63 = vld [vmem:[%s6444_s3 + $0x18] sm:$0xf] }
 0x28c   :  { %v1009_v6 = vpop.f32.mrb[216].mxu0  ;;  %v2374_v24 = vsel %vm1435_vm4, %v3529_v63, 0 }
 0x28d   :  { %4301 = vmatmul.mubr.msk.bf16.gmra.mrb[176].mxu1 %vm1407_vm5, %v5603_v5  ;;  %v1010_v20 = vadd.f32 %v5326_v27, %v1009_v6  ;;  %v4008_v21 = vpop.f32.mrb[217].mxu0 }
 0x28e   :  { %4306 = vmatprep.mubr.msk.bf16.mxu1 %vm4528_vm2, %v4526_v0  ;;  %v1012_v52 = vpop.f32.mrb[218].mxu0 }
 0x28f   :  { %v1332_v36 = vmax.f32 %v1010_v20, 0.0  ;;  %v1013_v17 = vadd.f32 %v5326_v27, %v1012_v52  ;;  %v4009_v30 = vpop.f32.mrb[219].mxu0 }
 0x290   :  { %v1754_v16 = vpop.f32.mrb[72].mxu1 }
 0x291   :  { %v4194_v26 = vpop.f32.mrb[73].mxu1  ;;  %v1333_v32 = vmax.f32 %v1013_v17, 0.0  ;;  %v5821_v5 = vadd.f32 %v1754_v16, %v5615_v31 }
 0x292   :  { %v1757_v53 = vpop.f32.mrb[74].mxu1 }
 0x293   :  { %v4195_v38 = vpop.f32.mrb[75].mxu1  ;;  %v5824_v10 = vpack.c.bf16 %v1333_v32, %v1332_v36  ;;  %v5827_v49 = vadd.f32 %v1757_v53, %v5627_v40 }
 0x294   :  { %v1017_v60 = vpop.f32.mrb[220].mxu0 }
 0x295   :  { %4307 = vmatmul.mubr.msk.bf16.vlgmr.msra.gmra.mrb[180].mxu1 %vm1407_vm5, %v5630_v45  ;;  %v1018_v18 = vadd.f32 %v5326_v27, %v1017_v60  ;;  %v4012_v41 = vpop.f32.mrb[221].mxu0 }
 0x296   :  { %4343 = vmatpush3.bf16.msra.mxu1 %v2374_v24  ;;  %4310 = vmatprep.mubr.msk.bf16.mxu1 %vm4528_vm2, %v4526_v0  ;;  %v1020_v31 = vpop.f32.mrb[222].mxu0 }
 0x297   :  { %v1334_v54 = vmax.f32 %v1018_v18, 0.0  ;;  %v1021_v44 = vadd.f32 %v5326_v27, %v1020_v31  ;;  %v4013_v43 = vpop.f32.mrb[223].mxu0  ;;  %4380 = vmatprep.subr.bf16.mxu1 %v4526_v0 }
 0x298   :  { %v1762_v40 = vpop.f32.mrb[76].mxu1 }
 0x299   :  { %v4198_v57 = vpop.f32.mrb[77].mxu1  ;;  %v1335_v58 = vmax.f32 %v1021_v44, 0.0  ;;  %v5837_v59 = vadd.f32 %v1762_v40, %v5640_v61 }
 0x29a   :  { %v1765_v45 = vpop.f32.mrb[78].mxu1 }
 0x29b   :  { %v4199_v34 = vpop.f32.mrb[79].mxu1  ;;  %v5839_v19 = vpack.c.bf16 %v1335_v58, %v1334_v54  ;;  %v5842_v47 = vadd.f32 %v1765_v45, %v5652_v62 }
 0x29c   :  { %v1025_v7 = vpop.f32.mrb[224].mxu0 }
 0x29d   :  { %4311 = vmatmul.mubr.msk.bf16.gmra.mrb[184].mxu1 %vm1407_vm5, %v5654_v9  ;;  %v1026_v37 = vadd.f32 %v5326_v27, %v1025_v7  ;;  %v4016_v11 = vpop.f32.mrb[225].mxu0 }
 0x29e   :  { %4314 = vmatprep.mubr.msk.bf16.mxu1 %vm4528_vm2, %v4526_v0  ;;  %v1028_v46 = vpop.f32.mrb[226].mxu0 }
 0x29f   :  { %v1336_v61 = vmax.f32 %v1026_v37, 0.0  ;;  %v1029_v51 = vadd.f32 %v5326_v27, %v1028_v46  ;;  %v4017_v15 = vpop.f32.mrb[227].mxu0  ;;  %v5863_v27 = vld [vmem:[%s6445_s2] ss:$0 sm:$0xff] }
 0x2a0   :  { %v1770_v6 = vpop.f32.mrb[80].mxu1 }
 0x2a1   :  { %v4202_v20 = vpop.f32.mrb[81].mxu1  ;;  %v1337_v21 = vmax.f32 %v1029_v51, 0.0  ;;  %v5851_v62 = vadd.f32 %v1770_v6, %v5663_v14 }
 0x2a2   :  { %v1773_v52 = vpop.f32.mrb[82].mxu1 }
 0x2a3   :  { %v4203_v36 = vpop.f32.mrb[83].mxu1  ;;  %v5853_v9 = vpack.c.bf16 %v1337_v21, %v1336_v61  ;;  %v5856_v17 = vadd.f32 %v1773_v52, %v5675_v28 }
 0x2a4   :  { %v1033_v30 = vpop.f32.mrb[228].mxu0 }
 0x2a5   :  { %4315 = vmatmul.mubr.msk.bf16.gmra.mrb[188].mxu1 %vm1407_vm5, %v5677_v35  ;;  %v1034_v16 = vadd.f32 %v5863_v27, %v1033_v30  ;;  %v4020_v14 = vpop.f32.mrb[229].mxu0 }
 0x2a6   :  { %4318 = vmatprep.mubr.msk.bf16.mxu1 %vm4528_vm2, %v4526_v0  ;;  %v1036_v63 = vpop.f32.mrb[230].mxu0 }
 0x2a7   :  { %v1338_v26 = vmax.f32 %v1034_v16, 0.0  ;;  %v1037_v28 = vadd.f32 %v5863_v27, %v1036_v63  ;;  %v4021_v32 = vpop.f32.mrb[231].mxu0 }
 0x2a8   :  { %v1778_v53 = vpop.f32.mrb[84].mxu1 }
 0x2a9   :  { %v4206_v38 = vpop.f32.mrb[85].mxu1  ;;  %v1339_v24 = vmax.f32 %v1037_v28, 0.0  ;;  %v5870_v35 = vadd.f32 %v1778_v53, %v5686_v29 }
 0x2aa   :  { %v1781_v60 = vpop.f32.mrb[86].mxu1 }
 0x2ab   :  { %v4207_v18 = vpop.f32.mrb[87].mxu1  ;;  %v5872_v41 = vpack.c.bf16 %v1339_v24, %v1338_v26  ;;  %v5875_v31 = vadd.f32 %v1781_v60, %v5698_v55 }
 0x2ac   :  { %v1041_v54 = vpop.f32.mrb[232].mxu0 }
 0x2ad   :  { %4319 = vmatmul.mubr.msk.bf16.gmra.mrb[192].mxu1 %vm1407_vm5, %v5700_v23  ;;  %v1042_v44 = vadd.f32 %v5863_v27, %v1041_v54  ;;  %v4024_v43 = vpop.f32.mrb[233].mxu0 }
 0x2ae   :  { %4322 = vmatprep.mubr.msk.bf16.mxu1 %vm4528_vm2, %v4526_v0  ;;  %v1044_v40 = vpop.f32.mrb[234].mxu0 }
 0x2af   :  { %v1340_v29 = vmax.f32 %v1042_v44, 0.0  ;;  %v1045_v57 = vadd.f32 %v5863_v27, %v1044_v40  ;;  %v4025_v58 = vpop.f32.mrb[235].mxu0 }
 0x2b0   :  { %v1786_v45 = vpop.f32.mrb[88].mxu1 }
 0x2b1   :  { %v5884_v34 = vadd.f32 %v1786_v45, %v5710_v33  ;;  %v4210_v55 = vpop.f32.mrb[89].mxu1  ;;  %v1341_v7 = vmax.f32 %v1045_v57, 0.0 }
 0x2b2   :  { %v1789_v37 = vpop.f32.mrb[90].mxu1 }
 0x2b3   :  { %v5887_v23 = vadd.f32 %v1789_v37, %v5723_v12  ;;  %v4211_v11 = vpop.f32.mrb[91].mxu1  ;;  %v5889_v46 = vpack.c.bf16 %v1341_v7, %v1340_v29 }
 0x2b4   :  { %v1049_v61 = vpop.f32.mrb[236].mxu0 }
 0x2b5   :  { %4323 = vmatmul.mubr.msk.bf16.gmra.mrb[196].mxu1 %vm1407_vm5, %v5720_v39  ;;  %v1050_v51 = vadd.f32 %v5863_v27, %v1049_v61  ;;  %v4028_v15 = vpop.f32.mrb[237].mxu0 }
 0x2b6   :  { %4326 = vmatprep.mubr.msk.bf16.mxu1 %vm4528_vm2, %v4526_v0  ;;  %v1052_v33 = vpop.f32.mrb[238].mxu0 }
 0x2b7   :  { %v1342_v6 = vmax.f32 %v1050_v51, 0.0  ;;  %v1053_v20 = vadd.f32 %v5863_v27, %v1052_v33  ;;  %v4029_v21 = vpop.f32.mrb[239].mxu0 }
 0x2b8   :  { %v1794_v12 = vpop.f32.mrb[92].mxu1 }
 0x2b9   :  { %v5898_v52 = vadd.f32 %v1794_v12, %v5733_v4  ;;  %v4214_v36 = vpop.f32.mrb[93].mxu1  ;;  %v1343_v30 = vmax.f32 %v1053_v20, 0.0 }
 0x2ba   :  { %v1797_v16 = vpop.f32.mrb[94].mxu1 }
 0x2bb   :  { %v5901_v39 = vadd.f32 %v1797_v16, %v5746_v50  ;;  %v4215_v14 = vpop.f32.mrb[95].mxu1  ;;  %v5903_v63 = vpack.c.bf16 %v1343_v30, %v1342_v6 }
 0x2bc   :  { %v1057_v26 = vpop.f32.mrb[240].mxu0 }
 0x2bd   :  { %4327 = vmatmul.mubr.msk.bf16.gmra.mrb[200].mxu1 %vm1407_vm5, %v5743_v8  ;;  %v1058_v28 = vadd.f32 %v5863_v27, %v1057_v26  ;;  %v4032_v32 = vpop.f32.mrb[241].mxu0 }
 0x2be   :  { %4330 = vmatprep.mubr.msk.bf16.mxu1 %vm4528_vm2, %v4526_v0  ;;  %v1060_v4 = vpop.f32.mrb[242].mxu0 }
 0x2bf   :  { %v1344_v53 = vmax.f32 %v1058_v28, 0.0  ;;  %v1061_v38 = vadd.f32 %v5863_v27, %v1060_v4  ;;  %v4033_v24 = vpop.f32.mrb[243].mxu0 }
 0x2c0   :  { %v1802_v50 = vpop.f32.mrb[96].mxu1 }
 0x2c1   :  { %v5912_v60 = vadd.f32 %v1802_v50, %v5756_v13  ;;  %v4218_v18 = vpop.f32.mrb[97].mxu1  ;;  %v1345_v54 = vmax.f32 %v1061_v38, 0.0 }
 0x2c2   :  { %v1805_v44 = vpop.f32.mrb[98].mxu1 }
 0x2c3   :  { %v5915_v8 = vadd.f32 %v1805_v44, %v5769_v22  ;;  %v4219_v43 = vpop.f32.mrb[99].mxu1  ;;  %v5917_v40 = vpack.c.bf16 %v1345_v54, %v1344_v53  ;;  %v3539_v44 = vld [vmem:[%s6444_s3 + $0x1c] sm:$0xf] }
 0x2c4   :  { %v1065_v29 = vpop.f32.mrb[244].mxu0 }
 0x2c5   :  { %4331 = vmatmul.mubr.msk.bf16.gmra.mrb[204].mxu1 %vm1407_vm5, %v5766_v25  ;;  %v1066_v57 = vadd.f32 %v5863_v27, %v1065_v29  ;;  %v4036_v58 = vpop.f32.mrb[245].mxu0 }
 0x2c6   :  { %4334 = vmatprep.mubr.msk.bf16.mxu1 %vm4528_vm2, %v4526_v0  ;;  %v1068_v13 = vpop.f32.mrb[246].mxu0 }
 0x2c7   :  { %v1346_v45 = vmax.f32 %v1066_v57, 0.0  ;;  %v1069_v55 = vadd.f32 %v5863_v27, %v1068_v13  ;;  %v4037_v7 = vpop.f32.mrb[247].mxu0 }
 0x2c8   :  { %v1810_v22 = vpop.f32.mrb[100].mxu1 }
 0x2c9   :  { %v5926_v37 = vadd.f32 %v1810_v22, %v5779_v42  ;;  %v4222_v11 = vpop.f32.mrb[101].mxu1  ;;  %v1347_v61 = vmax.f32 %v1069_v55, 0.0 }
 0x2ca   :  { %v1813_v51 = vpop.f32.mrb[102].mxu1 }
 0x2cb   :  { %v5929_v25 = vadd.f32 %v1813_v51, %v5792_v56  ;;  %v4223_v15 = vpop.f32.mrb[103].mxu1  ;;  %v5931_v33 = vpack.c.bf16 %v1347_v61, %v1346_v45  ;;  %v2538_v45 = vsel %vm1435_vm4, %v3539_v44, 0 }
 0x2cc   :  { %v1073_v6 = vpop.f32.mrb[248].mxu0 }
 0x2cd   :  { %4335 = vmatmul.mubr.msk.bf16.gmra.mrb[208].mxu1 %vm1407_vm5, %v5789_v48  ;;  %v1074_v20 = vadd.f32 %v5863_v27, %v1073_v6  ;;  %v4040_v21 = vpop.f32.mrb[249].mxu0 }
 0x2ce   :  { %4338 = vmatprep.mubr.msk.bf16.mxu1 %vm4528_vm2, %v4526_v0  ;;  %v1076_v42 = vpop.f32.mrb[250].mxu0 }
 0x2cf   :  { %v1348_v12 = vmax.f32 %v1074_v20, 0.0  ;;  %v1077_v36 = vadd.f32 %v5863_v27, %v1076_v42  ;;  %v4041_v30 = vpop.f32.mrb[251].mxu0 }
 0x2d0   :  { %v1818_v56 = vpop.f32.mrb[104].mxu1 }
 0x2d1   :  { %v5940_v16 = vadd.f32 %v1818_v56, %v5802_v2  ;;  %v4226_v14 = vpop.f32.mrb[105].mxu1  ;;  %v1349_v26 = vmax.f32 %v1077_v36, 0.0 }
 0x2d2   :  { %v1821_v28 = vpop.f32.mrb[106].mxu1 }
 0x2d3   :  { %v5943_v48 = vadd.f32 %v1821_v28, %v5809_v1  ;;  %v4227_v32 = vpop.f32.mrb[107].mxu1  ;;  %v5945_v4 = vpack.c.bf16 %v1349_v26, %v1348_v12 }
 0x2d4   :  { %v1081_v53 = vpop.f32.mrb[252].mxu0 }
 0x2d5   :  { %4339 = vmatmul.mubr.msk.bf16.gmra.mrb[212].mxu1 %vm1407_vm5, %v5806_v3  ;;  %v1082_v38 = vadd.f32 %v5863_v27, %v1081_v53  ;;  %v4044_v24 = vpop.f32.mrb[253].mxu0 }
 0x2d6   :  { %4344 = vmatprep.mubr.msk.bf16.mxu1 %vm4528_vm2, %v4526_v0  ;;  %v1084_v2 = vpop.f32.mrb[254].mxu0 }
 0x2d7   :  { %v1350_v50 = vmax.f32 %v1082_v38, 0.0  ;;  %v1085_v18 = vadd.f32 %v5863_v27, %v1084_v2  ;;  %v4045_v54 = vpop.f32.mrb[255].mxu0 }
 0x2d8   :  { %v1918_v1 = vpop.f32.mrb[108].mxu1 }
 0x2d9   :  { %v5957_v43 = vadd.f32 %v1918_v1, %v5821_v5  ;;  %v4232_v3 = vpop.f32.mrb[109].mxu1  ;;  %v1351_v29 = vmax.f32 %v1085_v18, 0.0 }
 0x2da   :  { %v1921_v57 = vpop.f32.mrb[110].mxu1 }
 0x2db   :  { %v5960_v58 = vadd.f32 %v1921_v57, %v5827_v49  ;;  %v4233_v13 = vpop.f32.mrb[111].mxu1  ;;  %v5963_v55 = vpack.c.bf16 %v1351_v29, %v1350_v50 }
 0x2dc   :  { %v1089_v7 = vpop.f32.mrb[0].mxu0 }
 0x2dd   :  { %4345 = vmatmul.mubr.msk.bf16.vlgmr.msra.gmra.mrb[216].mxu1 %vm1407_vm5, %v5824_v10  ;;  %v1090_v22 = vadd.f32 %v5863_v27, %v1089_v7  ;;  %v4048_v11 = vpop.f32.mrb[1].mxu0 }
 0x2de   :  { %4381 = vmatpush3.bf16.msra.mxu1 %v2538_v45  ;;  %4348 = vmatprep.mubr.msk.bf16.mxu1 %vm4528_vm2, %v4526_v0  ;;  %v1092_v5 = vpop.f32.mrb[2].mxu0 }
 0x2df   :  { %v1352_v61 = vmax.f32 %v1090_v22, 0.0  ;;  %v1093_v49 = vadd.f32 %v5863_v27, %v1092_v5  ;;  %v4049_v51 = vpop.f32.mrb[3].mxu0  ;;  %4418 = vmatprep.subr.bf16.mxu1 %v4526_v0 }
 0x2e0   :  { %v1926_v15 = vpop.f32.mrb[112].mxu1 }
 0x2e1   :  { %v5973_v6 = vadd.f32 %v1926_v15, %v5837_v59  ;;  %v4236_v20 = vpop.f32.mrb[113].mxu1  ;;  %v1353_v10 = vmax.f32 %v1093_v49, 0.0 }
 0x2e2   :  { %v1929_v21 = vpop.f32.mrb[114].mxu1 }
 0x2e3   :  { %v5976_v42 = vadd.f32 %v1929_v21, %v5842_v47  ;;  %v4237_v12 = vpop.f32.mrb[115].mxu1  ;;  %v5978_v36 = vpack.c.bf16 %v1353_v10, %v1352_v61 }
 0x2e4   :  { %v1097_v30 = vpop.f32.mrb[4].mxu0 }
 0x2e5   :  { %4349 = vmatmul.mubr.msk.bf16.gmra.mrb[220].mxu1 %vm1407_vm5, %v5839_v19  ;;  %v1098_v56 = vadd.f32 %v5863_v27, %v1097_v30  ;;  %v4052_v14 = vpop.f32.mrb[5].mxu0 }
 0x2e6   :  { %4352 = vmatprep.mubr.msk.bf16.mxu1 %vm4528_vm2, %v4526_v0  ;;  %v1100_v59 = vpop.f32.mrb[6].mxu0 }
 0x2e7   :  { %v1354_v26 = vmax.f32 %v1098_v56, 0.0  ;;  %v1101_v28 = vadd.f32 %v5863_v27, %v1100_v59  ;;  %v4053_v32 = vpop.f32.mrb[7].mxu0 }
 0x2e8   :  { %v1934_v47 = vpop.f32.mrb[116].mxu1 }
 0x2e9   :  { %v5987_v53 = vadd.f32 %v1934_v47, %v5851_v62  ;;  %v4240_v38 = vpop.f32.mrb[117].mxu1  ;;  %v1355_v24 = vmax.f32 %v1101_v28, 0.0 }
 0x2ea   :  { %v1937_v2 = vpop.f32.mrb[118].mxu1 }
 0x2eb   :  { %v5990_v19 = vadd.f32 %v1937_v2, %v5856_v17  ;;  %v4241_v50 = vpop.f32.mrb[119].mxu1  ;;  %v5992_v18 = vpack.c.bf16 %v1355_v24, %v1354_v26 }
 0x2ec   :  { %v1105_v54 = vpop.f32.mrb[8].mxu0 }
 0x2ed   :  { %4353 = vmatmul.mubr.msk.bf16.gmra.mrb[224].mxu1 %vm1407_vm5, %v5853_v9  ;;  %v1106_v1 = vadd.f32 %v5863_v27, %v1105_v54  ;;  %v4056_v44 = vpop.f32.mrb[9].mxu0 }
 0x2ee   :  { %4356 = vmatprep.mubr.msk.bf16.mxu1 %vm4528_vm2, %v4526_v0  ;;  %v1108_v62 = vpop.f32.mrb[10].mxu0 }
 0x2ef   :  { %v1356_v3 = vmax.f32 %v1106_v1, 0.0  ;;  %v1109_v29 = vadd.f32 %v5863_v27, %v1108_v62  ;;  %v4057_v57 = vpop.f32.mrb[11].mxu0 }
 0x2f0   :  { %v1942_v17 = vpop.f32.mrb[120].mxu1 }
 0x2f1   :  { %v6001_v13 = vadd.f32 %v1942_v17, %v5870_v35  ;;  %v4244_v45 = vpop.f32.mrb[121].mxu1  ;;  %v1357_v7 = vmax.f32 %v1109_v29, 0.0 }
 0x2f2   :  { %v1945_v22 = vpop.f32.mrb[122].mxu1 }
 0x2f3   :  { %v6004_v9 = vadd.f32 %v1945_v22, %v5875_v31  ;;  %v4245_v11 = vpop.f32.mrb[123].mxu1  ;;  %v6006_v5 = vpack.c.bf16 %v1357_v7, %v1356_v3 }
 0x2f4   :  { %v1113_v61 = vpop.f32.mrb[12].mxu0 }
 0x2f5   :  { %4357 = vmatmul.mubr.msk.bf16.gmra.mrb[228].mxu1 %vm1407_vm5, %v5872_v41  ;;  %v1114_v49 = vadd.f32 %v5863_v27, %v1113_v61  ;;  %v4060_v51 = vpop.f32.mrb[13].mxu0 }
 0x2f6   :  { %4360 = vmatprep.mubr.msk.bf16.mxu1 %vm4528_vm2, %v4526_v0  ;;  %v1116_v35 = vpop.f32.mrb[14].mxu0 }
 0x2f7   :  { %v1358_v15 = vmax.f32 %v1114_v49, 0.0  ;;  %v1117_v20 = vadd.f32 %v5863_v27, %v1116_v35  ;;  %v4061_v10 = vpop.f32.mrb[15].mxu0 }
 0x2f8   :  { %v1950_v31 = vpop.f32.mrb[124].mxu1 }
 0x2f9   :  { %v6015_v21 = vadd.f32 %v1950_v31, %v5884_v34  ;;  %v4248_v12 = vpop.f32.mrb[125].mxu1  ;;  %v1359_v30 = vmax.f32 %v1117_v20, 0.0 }
 0x2fa   :  { %v1953_v56 = vpop.f32.mrb[126].mxu1 }
 0x2fb   :  { %v6018_v41 = vadd.f32 %v1953_v56, %v5887_v23  ;;  %v4249_v14 = vpop.f32.mrb[127].mxu1  ;;  %v6020_v59 = vpack.c.bf16 %v1359_v30, %v1358_v15 }
 0x2fc   :  { %v1121_v26 = vpop.f32.mrb[16].mxu0 }
 0x2fd   :  { %4361 = vmatmul.mubr.msk.bf16.gmra.mrb[232].mxu1 %vm1407_vm5, %v5889_v46  ;;  %v1122_v28 = vadd.f32 %v5863_v27, %v1121_v26  ;;  %v4064_v32 = vpop.f32.mrb[17].mxu0 }
 0x2fe   :  { %4364 = vmatprep.mubr.msk.bf16.mxu1 %vm4528_vm2, %v4526_v0  ;;  %v1124_v34 = vpop.f32.mrb[18].mxu0 }
 0x2ff   :  { %v1360_v47 = vmax.f32 %v1122_v28, 0.0  ;;  %v1125_v38 = vadd.f32 %v5863_v27, %v1124_v34  ;;  %v4065_v24 = vpop.f32.mrb[19].mxu0 }
 0x300   :  { %v1958_v23 = vpop.f32.mrb[128].mxu1 }
 0x301   :  { %v6029_v2 = vadd.f32 %v1958_v23, %v5898_v52  ;;  %v4252_v50 = vpop.f32.mrb[129].mxu1  ;;  %v1361_v54 = vmax.f32 %v1125_v38, 0.0 }
 0x302   :  { %v1961_v1 = vpop.f32.mrb[130].mxu1 }
 0x303   :  { %v6032_v46 = vadd.f32 %v1961_v1, %v5901_v39  ;;  %v4253_v44 = vpop.f32.mrb[131].mxu1  ;;  %v6034_v62 = vpack.c.bf16 %v1361_v54, %v1360_v47 }
 0x304   :  { %v1129_v3 = vpop.f32.mrb[20].mxu0 }
 0x305   :  { %4365 = vmatmul.mubr.msk.bf16.gmra.mrb[236].mxu1 %vm1407_vm5, %v5903_v63  ;;  %v1130_v29 = vadd.f32 %v5863_v27, %v1129_v3  ;;  %v4068_v57 = vpop.f32.mrb[21].mxu0 }
 0x306   :  { %4368 = vmatprep.mubr.msk.bf16.mxu1 %vm4528_vm2, %v4526_v0  ;;  %v1132_v52 = vpop.f32.mrb[22].mxu0 }
 0x307   :  { %v1362_v17 = vmax.f32 %v1130_v29, 0.0  ;;  %v1133_v45 = vadd.f32 %v5863_v27, %v1132_v52  ;;  %v4069_v7 = vpop.f32.mrb[23].mxu0 }
 0x308   :  { %v1966_v39 = vpop.f32.mrb[132].mxu1 }
 0x309   :  { %v6043_v22 = vadd.f32 %v1966_v39, %v5912_v60  ;;  %v4256_v11 = vpop.f32.mrb[133].mxu1  ;;  %v1363_v61 = vmax.f32 %v1133_v45, 0.0 }
 0x30a   :  { %v1969_v49 = vpop.f32.mrb[134].mxu1 }
 0x30b   :  { %v6046_v63 = vadd.f32 %v1969_v49, %v5915_v8  ;;  %v4257_v51 = vpop.f32.mrb[135].mxu1  ;;  %v6048_v35 = vpack.c.bf16 %v1363_v61, %v1362_v17  ;;  %v3549_v49 = vld [vmem:[%s6444_s3 + $0x20] sm:$0xf] }
 0x30c   :  { %v1137_v15 = vpop.f32.mrb[24].mxu0 }
 0x30d   :  { %4369 = vmatmul.mubr.msk.bf16.gmra.mrb[240].mxu1 %vm1407_vm5, %v5917_v40  ;;  %v1138_v20 = vadd.f32 %v5863_v27, %v1137_v15  ;;  %v4072_v10 = vpop.f32.mrb[25].mxu0 }
 0x30e   :  { %4372 = vmatprep.mubr.msk.bf16.mxu1 %vm4528_vm2, %v4526_v0  ;;  %v1140_v60 = vpop.f32.mrb[26].mxu0 }
 0x30f   :  { %v1364_v31 = vmax.f32 %v1138_v20, 0.0  ;;  %v1141_v12 = vadd.f32 %v5863_v27, %v1140_v60  ;;  %v4073_v30 = vpop.f32.mrb[27].mxu0 }
 0x310   :  { %v1974_v8 = vpop.f32.mrb[136].mxu1 }
 0x311   :  { %v6057_v56 = vadd.f32 %v1974_v8, %v5926_v37  ;;  %v4260_v14 = vpop.f32.mrb[137].mxu1  ;;  %v1365_v26 = vmax.f32 %v1141_v12, 0.0 }
 0x312   :  { %v1977_v28 = vpop.f32.mrb[138].mxu1 }
 0x313   :  { %v6060_v40 = vadd.f32 %v1977_v28, %v5929_v25  ;;  %v4261_v32 = vpop.f32.mrb[139].mxu1  ;;  %v6062_v34 = vpack.c.bf16 %v1365_v26, %v1364_v31  ;;  %v2702_v31 = vsel %vm1435_vm4, %v3549_v49, 0 }
 0x314   :  { %v1145_v47 = vpop.f32.mrb[28].mxu0 }
 0x315   :  { %4373 = vmatmul.mubr.msk.bf16.gmra.mrb[244].mxu1 %vm1407_vm5, %v5931_v33  ;;  %v1146_v38 = vadd.f32 %v5863_v27, %v1145_v47  ;;  %v4076_v24 = vpop.f32.mrb[29].mxu0 }
 0x316   :  { %4376 = vmatprep.mubr.msk.bf16.mxu1 %vm4528_vm2, %v4526_v0  ;;  %v1148_v37 = vpop.f32.mrb[30].mxu0 }
 0x317   :  { %v1366_v23 = vmax.f32 %v1146_v38, 0.0  ;;  %v1149_v50 = vadd.f32 %v5863_v27, %v1148_v37  ;;  %v4077_v54 = vpop.f32.mrb[31].mxu0 }
 0x318   :  { %v1982_v25 = vpop.f32.mrb[140].mxu1 }
 0x319   :  { %v6071_v1 = vadd.f32 %v1982_v25, %v5940_v16  ;;  %v4264_v44 = vpop.f32.mrb[141].mxu1  ;;  %v1367_v3 = vmax.f32 %v1149_v50, 0.0 }
 0x31a   :  { %v1985_v29 = vpop.f32.mrb[142].mxu1 }
 0x31b   :  { %v6074_v33 = vadd.f32 %v1985_v29, %v5943_v48  ;;  %v4265_v57 = vpop.f32.mrb[143].mxu1  ;;  %v6076_v52 = vpack.c.bf16 %v1367_v3, %v1366_v23 }
 0x31c   :  { %v1153_v17 = vpop.f32.mrb[32].mxu0 }
 0x31d   :  { %4377 = vmatmul.mubr.msk.bf16.gmra.mrb[248].mxu1 %vm1407_vm5, %v5945_v4  ;;  %v1154_v45 = vadd.f32 %v5863_v27, %v1153_v17  ;;  %v4080_v7 = vpop.f32.mrb[33].mxu0 }
 0x31e   :  { %4382 = vmatprep.mubr.msk.bf16.mxu1 %vm4528_vm2, %v4526_v0  ;;  %v1156_v16 = vpop.f32.mrb[34].mxu0 }
 0x31f   :  { %v1368_v39 = vmax.f32 %v1154_v45, 0.0  ;;  %v1157_v11 = vadd.f32 %v5863_v27, %v1156_v16  ;;  %v4081_v61 = vpop.f32.mrb[35].mxu0 }
 0x320   :  { %v2082_v48 = vpop.f32.mrb[144].mxu1 }
 0x321   :  { %v6088_v51 = vadd.f32 %v2082_v48, %v5957_v43  ;;  %v4270_v4 = vpop.f32.mrb[145].mxu1  ;;  %v1369_v15 = vmax.f32 %v1157_v11, 0.0 }
 0x322   :  { %v2085_v20 = vpop.f32.mrb[146].mxu1 }
 0x323   :  { %v6091_v10 = vadd.f32 %v2085_v20, %v5960_v58  ;;  %v4271_v60 = vpop.f32.mrb[147].mxu1  ;;  %v6094_v12 = vpack.c.bf16 %v1369_v15, %v1368_v39 }
 0x324   :  { %v1161_v30 = vpop.f32.mrb[36].mxu0 }
 0x325   :  { %4383 = vmatmul.mubr.msk.bf16.vlgmr.msra.gmra.mrb[252].mxu1 %vm1407_vm5, %v5963_v55  ;;  %v1162_v8 = vadd.f32 %v5863_v27, %v1161_v30  ;;  %v4084_v14 = vpop.f32.mrb[37].mxu0 }
 0x326   :  { %4419 = vmatpush3.bf16.msra.mxu1 %v2702_v31  ;;  %4386 = vmatprep.mubr.msk.bf16.mxu1 %vm4528_vm2, %v4526_v0  ;;  %v1164_v43 = vpop.f32.mrb[38].mxu0 }
 0x327   :  { %v1370_v26 = vmax.f32 %v1162_v8, 0.0  ;;  %v1165_v58 = vadd.f32 %v5863_v27, %v1164_v43  ;;  %v4085_v28 = vpop.f32.mrb[39].mxu0  ;;  %4456 = vmatprep.subr.bf16.mxu1 %v4526_v0 }
 0x328   :  { %v2090_v32 = vpop.f32.mrb[148].mxu1 }
 0x329   :  { %v6104_v47 = vadd.f32 %v2090_v32, %v5973_v6  ;;  %v4274_v38 = vpop.f32.mrb[149].mxu1  ;;  %v1371_v55 = vmax.f32 %v1165_v58, 0.0 }
 0x32a   :  { %v2093_v24 = vpop.f32.mrb[150].mxu1 }
 0x32b   :  { %v6107_v37 = vadd.f32 %v2093_v24, %v5976_v42  ;;  %v4275_v23 = vpop.f32.mrb[151].mxu1  ;;  %v6109_v50 = vpack.c.bf16 %v1371_v55, %v1370_v26 }
 0x32c   :  { %v1169_v54 = vpop.f32.mrb[40].mxu0 }
 0x32d   :  { %4387 = vmatmul.mubr.msk.bf16.gmra.mrb[0].mxu1 %vm1407_vm5, %v5978_v36  ;;  %v1170_v25 = vadd.f32 %v5863_v27, %v1169_v54  ;;  %v4088_v44 = vpop.f32.mrb[41].mxu0 }
 0x32e   :  { %4390 = vmatprep.mubr.msk.bf16.mxu1 %vm4528_vm2, %v4526_v0  ;;  %v1172_v6 = vpop.f32.mrb[42].mxu0 }
 0x32f   :  { %v1372_v3 = vmax.f32 %v1170_v25, 0.0  ;;  %v1173_v29 = vadd.f32 %v5863_v27, %v1172_v6  ;;  %v4089_v57 = vpop.f32.mrb[43].mxu0 }
 0x330   :  { %v2098_v42 = vpop.f32.mrb[152].mxu1 }
 0x331   :  { %v6118_v17 = vadd.f32 %v2098_v42, %v5987_v53  ;;  %v4278_v45 = vpop.f32.mrb[153].mxu1  ;;  %v1373_v7 = vmax.f32 %v1173_v29, 0.0 }
 0x332   :  { %v2101_v16 = vpop.f32.mrb[154].mxu1 }
 0x333   :  { %v6121_v36 = vadd.f32 %v2101_v16, %v5990_v19  ;;  %v4279_v39 = vpop.f32.mrb[155].mxu1  ;;  %v6123_v11 = vpack.c.bf16 %v1373_v7, %v1372_v3 }
 0x334   :  { %v1177_v61 = vpop.f32.mrb[44].mxu0 }
 0x335   :  { %4391 = vmatmul.mubr.msk.bf16.gmra.mrb[4].mxu1 %vm1407_vm5, %v5992_v18  ;;  %v1178_v48 = vadd.f32 %v5863_v27, %v1177_v61  ;;  %v4092_v49 = vpop.f32.mrb[45].mxu0 }
 0x336   :  { %4394 = vmatprep.mubr.msk.bf16.mxu1 %vm4528_vm2, %v4526_v0  ;;  %v1180_v53 = vpop.f32.mrb[46].mxu0 }
 0x337   :  { %v1374_v4 = vmax.f32 %v1178_v48, 0.0  ;;  %v1181_v15 = vadd.f32 %v5863_v27, %v1180_v53  ;;  %v4093_v20 = vpop.f32.mrb[47].mxu0 }
 0x338   :  { %v2106_v19 = vpop.f32.mrb[156].mxu1 }
 0x339   :  { %v6132_v60 = vadd.f32 %v2106_v19, %v6001_v13  ;;  %v4282_v31 = vpop.f32.mrb[157].mxu1  ;;  %v1375_v30 = vmax.f32 %v1181_v15, 0.0 }
 0x33a   :  { %v2109_v8 = vpop.f32.mrb[158].mxu1 }
 0x33b   :  { %v6135_v18 = vadd.f32 %v2109_v8, %v6004_v9  ;;  %v4283_v14 = vpop.f32.mrb[159].mxu1  ;;  %v6137_v43 = vpack.c.bf16 %v1375_v30, %v1374_v4 }
 0x33c   :  { %v1185_v26 = vpop.f32.mrb[48].mxu0 }
 0x33d   :  { %4395 = vmatmul.mubr.msk.bf16.gmra.mrb[8].mxu1 %vm1407_vm5, %v6006_v5  ;;  %v1186_v58 = vadd.f32 %v5863_v27, %v1185_v26  ;;  %v4096_v28 = vpop.f32.mrb[49].mxu0 }
 0x33e   :  { %4398 = vmatprep.mubr.msk.bf16.mxu1 %vm4528_vm2, %v4526_v0  ;;  %v1188_v13 = vpop.f32.mrb[50].mxu0 }
 0x33f   :  { %v1376_v32 = vmax.f32 %v1186_v58, 0.0  ;;  %v1189_v38 = vadd.f32 %v5863_v27, %v1188_v13  ;;  %v4097_v55 = vpop.f32.mrb[51].mxu0 }
 0x340   :  { %v2114_v9 = vpop.f32.mrb[160].mxu1 }
 0x341   :  { %v6146_v24 = vadd.f32 %v2114_v9, %v6015_v21  ;;  %v4286_v23 = vpop.f32.mrb[161].mxu1  ;;  %v1377_v54 = vmax.f32 %v1189_v38, 0.0 }
 0x342   :  { %v2117_v25 = vpop.f32.mrb[162].mxu1 }
 0x343   :  { %v6149_v5 = vadd.f32 %v2117_v25, %v6018_v41  ;;  %v4287_v44 = vpop.f32.mrb[163].mxu1  ;;  %v6151_v6 = vpack.c.bf16 %v1377_v54, %v1376_v32 }
 0x344   :  { %v1193_v3 = vpop.f32.mrb[52].mxu0 }
 0x345   :  { %4399 = vmatmul.mubr.msk.bf16.gmra.mrb[12].mxu1 %vm1407_vm5, %v6020_v59  ;;  %v1194_v29 = vadd.f32 %v5863_v27, %v1193_v3  ;;  %v4100_v57 = vpop.f32.mrb[53].mxu0 }
 0x346   :  { %4402 = vmatprep.mubr.msk.bf16.mxu1 %vm4528_vm2, %v4526_v0  ;;  %v1196_v21 = vpop.f32.mrb[54].mxu0 }
 0x347   :  { %v1378_v42 = vmax.f32 %v1194_v29, 0.0  ;;  %v1197_v45 = vadd.f32 %v5863_v27, %v1196_v21  ;;  %v4101_v7 = vpop.f32.mrb[55].mxu0 }
 0x348   :  { %v2122_v41 = vpop.f32.mrb[164].mxu1 }
 0x349   :  { %v6160_v16 = vadd.f32 %v2122_v41, %v6029_v2  ;;  %v4290_v39 = vpop.f32.mrb[165].mxu1  ;;  %v1379_v61 = vmax.f32 %v1197_v45, 0.0 }
 0x34a   :  { %v2125_v48 = vpop.f32.mrb[166].mxu1 }
 0x34b   :  { %v6163_v59 = vadd.f32 %v2125_v48, %v6032_v46  ;;  %v4291_v49 = vpop.f32.mrb[167].mxu1  ;;  %v6165_v53 = vpack.c.bf16 %v1379_v61, %v1378_v42 }
 0x34c   :  { %v1201_v4 = vpop.f32.mrb[56].mxu0 }
 0x34d   :  { %4403 = vmatmul.mubr.msk.bf16.gmra.mrb[16].mxu1 %vm1407_vm5, %v6034_v62  ;;  %v1202_v15 = vadd.f32 %v5863_v27, %v1201_v4  ;;  %v4104_v20 = vpop.f32.mrb[57].mxu0 }
 0x34e   :  { %4406 = vmatprep.mubr.msk.bf16.mxu1 %vm4528_vm2, %v4526_v0  ;;  %v1204_v2 = vpop.f32.mrb[58].mxu0 }
 0x34f   :  { %v1380_v19 = vmax.f32 %v1202_v15, 0.0  ;;  %v1205_v31 = vadd.f32 %v5863_v27, %v1204_v2  ;;  %v4105_v30 = vpop.f32.mrb[59].mxu0 }
 0x350   :  { %v2130_v46 = vpop.f32.mrb[168].mxu1 }
 0x351   :  { %v6174_v8 = vadd.f32 %v2130_v46, %v6043_v22  ;;  %v4294_v14 = vpop.f32.mrb[169].mxu1  ;;  %v1381_v26 = vmax.f32 %v1205_v31, 0.0 }
 0x352   :  { %v2133_v58 = vpop.f32.mrb[170].mxu1 }
 0x353   :  { %v6177_v62 = vadd.f32 %v2133_v58, %v6046_v63  ;;  %v4295_v28 = vpop.f32.mrb[171].mxu1  ;;  %v6179_v13 = vpack.c.bf16 %v1381_v26, %v1380_v19 }
 0x354   :  { %v1209_v32 = vpop.f32.mrb[60].mxu0 }
 0x355   :  { %4407 = vmatmul.mubr.msk.bf16.gmra.mrb[20].mxu1 %vm1407_vm5, %v6048_v35  ;;  %v1210_v38 = vadd.f32 %v5863_v27, %v1209_v32  ;;  %v4108_v55 = vpop.f32.mrb[61].mxu0 }
 0x356   :  { %4410 = vmatprep.mubr.msk.bf16.mxu1 %vm4528_vm2, %v4526_v0  ;;  %v1212_v22 = vpop.f32.mrb[62].mxu0 }
 0x357   :  { %v1382_v9 = vmax.f32 %v1210_v38, 0.0  ;;  %v1213_v23 = vadd.f32 %v5863_v27, %v1212_v22  ;;  %v4109_v54 = vpop.f32.mrb[63].mxu0 }
 0x358   :  { %v2138_v63 = vpop.f32.mrb[172].mxu1 }
 0x359   :  { %v6188_v25 = vadd.f32 %v2138_v63, %v6057_v56  ;;  %v4298_v44 = vpop.f32.mrb[173].mxu1  ;;  %v1383_v3 = vmax.f32 %v1213_v23, 0.0 }
 0x35a   :  { %v2141_v29 = vpop.f32.mrb[174].mxu1 }
 0x35b   :  { %v6191_v35 = vadd.f32 %v2141_v29, %v6060_v40  ;;  %v4299_v57 = vpop.f32.mrb[175].mxu1  ;;  %v6193_v21 = vpack.c.bf16 %v1383_v3, %v1382_v9 }
 0x35c   :  { %v1217_v42 = vpop.f32.mrb[64].mxu0 }
 0x35d   :  { %4411 = vmatmul.mubr.msk.bf16.gmra.mrb[24].mxu1 %vm1407_vm5, %v6062_v34  ;;  %v1218_v45 = vadd.f32 %v5863_v27, %v1217_v42  ;;  %v4112_v7 = vpop.f32.mrb[65].mxu0 }
 0x35e   :  { %4414 = vmatprep.mubr.msk.bf16.mxu1 %vm4528_vm2, %v4526_v0  ;;  %v1220_v56 = vpop.f32.mrb[66].mxu0 }
 0x35f   :  { %v1384_v41 = vmax.f32 %v1218_v45, 0.0  ;;  %v1221_v39 = vadd.f32 %v5863_v27, %v1220_v56  ;;  %v4113_v61 = vpop.f32.mrb[67].mxu0 }
 0x360   :  { %v2146_v40 = vpop.f32.mrb[176].mxu1 }
 0x361   :  { %v6202_v48 = vadd.f32 %v2146_v40, %v6071_v1  ;;  %v4302_v49 = vpop.f32.mrb[177].mxu1  ;;  %v1385_v4 = vmax.f32 %v1221_v39, 0.0 }
 0x362   :  { %v2149_v15 = vpop.f32.mrb[178].mxu1 }
 0x363   :  { %v6205_v34 = vadd.f32 %v2149_v15, %v6074_v33  ;;  %v4303_v20 = vpop.f32.mrb[179].mxu1  ;;  %v6207_v2 = vpack.c.bf16 %v1385_v4, %v1384_v41 }
 0x365   :  { %4415 = vmatmul.mubr.msk.bf16.gmra.mrb[28].mxu1 %vm1407_vm5, %v6076_v52 }
 0x366   :  { %4420 = vmatprep.mubr.msk.bf16.mxu1 %vm4528_vm2, %v4526_v0 }
 0x368   :  { %v2246_v27 = vpop.f32.mrb[180].mxu1 }
 0x369   :  { %v6214_v19 = vadd.f32 %v2246_v27, %v6088_v51  ;;  %v4308_v1 = vpop.f32.mrb[181].mxu1 }
 0x36a   :  { %v2249_v31 = vpop.f32.mrb[182].mxu1 }
 0x36b   :  { %v6217_v30 = vadd.f32 %v2249_v31, %v6091_v10  ;;  %v4309_v33 = vpop.f32.mrb[183].mxu1 }
 0x36d   :  { %4421 = vmatmul.mubr.msk.bf16.vlgmr.msra.gmra.mrb[32].mxu1 %vm1407_vm5, %v6094_v12 }
 0x36e   :  { %4424 = vmatprep.mubr.msk.bf16.mxu1 %vm4528_vm2, %v4526_v0 }
 0x370   :  { %v2254_v52 = vpop.f32.mrb[184].mxu1 }
 0x371   :  { %v6224_v46 = vadd.f32 %v2254_v52, %v6104_v47  ;;  %v4312_v14 = vpop.f32.mrb[185].mxu1 }
 0x372   :  { %v2257_v26 = vpop.f32.mrb[186].mxu1 }
 0x373   :  { %v6227_v51 = vadd.f32 %v2257_v26, %v6107_v37  ;;  %v4313_v58 = vpop.f32.mrb[187].mxu1 }
 0x375   :  { %4425 = vmatmul.mubr.msk.bf16.gmra.mrb[36].mxu1 %vm1407_vm5, %v6109_v50 }
 0x376   :  { %4428 = vmatprep.mubr.msk.bf16.mxu1 %vm4528_vm2, %v4526_v0 }
 0x378   :  { %v2262_v10 = vpop.f32.mrb[188].mxu1 }
 0x379   :  { %v6234_v12 = vadd.f32 %v2262_v10, %v6118_v17  ;;  %v4316_v28 = vpop.f32.mrb[189].mxu1 }
 0x37a   :  { %v2265_v32 = vpop.f32.mrb[190].mxu1 }
 0x37b   :  { %v6237_v47 = vadd.f32 %v2265_v32, %v6121_v36  ;;  %v4317_v38 = vpop.f32.mrb[191].mxu1 }
 0x37d   :  { %4429 = vmatmul.mubr.msk.bf16.gmra.mrb[40].mxu1 %vm1407_vm5, %v6123_v11 }
 0x37e   :  { %4432 = vmatprep.mubr.msk.bf16.mxu1 %vm4528_vm2, %v4526_v0 }
 0x380   :  { %v2270_v37 = vpop.f32.mrb[192].mxu1 }
 0x381   :  { %v6244_v50 = vadd.f32 %v2270_v37, %v6132_v60  ;;  %v4320_v55 = vpop.f32.mrb[193].mxu1 }
 0x382   :  { %v2273_v22 = vpop.f32.mrb[194].mxu1 }
 0x383   :  { %v6247_v17 = vadd.f32 %v2273_v22, %v6135_v18  ;;  %v4321_v9 = vpop.f32.mrb[195].mxu1 }
 0x385   :  { %4433 = vmatmul.mubr.msk.bf16.gmra.mrb[44].mxu1 %vm1407_vm5, %v6137_v43 }
 0x386   :  { %4436 = vmatprep.mubr.msk.bf16.mxu1 %vm4528_vm2, %v4526_v0 }
 0x388   :  { %v2278_v36 = vpop.f32.mrb[196].mxu1 }
 0x389   :  { %v6254_v11 = vadd.f32 %v2278_v36, %v6146_v24  ;;  %v4324_v23 = vpop.f32.mrb[197].mxu1 }
 0x38a   :  { %v2281_v54 = vpop.f32.mrb[198].mxu1 }
 0x38b   :  { %v6257_v60 = vadd.f32 %v2281_v54, %v6149_v5  ;;  %v4325_v63 = vpop.f32.mrb[199].mxu1 }
 0x38d   :  { %4437 = vmatmul.mubr.msk.bf16.gmra.mrb[48].mxu1 %vm1407_vm5, %v6151_v6 }
 0x38e   :  { %4440 = vmatprep.mubr.msk.bf16.mxu1 %vm4528_vm2, %v4526_v0 }
 0x390   :  { %v2286_v18 = vpop.f32.mrb[200].mxu1 }
 0x391   :  { %v6264_v43 = vadd.f32 %v2286_v18, %v6160_v16  ;;  %v4328_v44 = vpop.f32.mrb[201].mxu1 }
 0x392   :  { %v2289_v3 = vpop.f32.mrb[202].mxu1 }
 0x393   :  { %v6267_v24 = vadd.f32 %v2289_v3, %v6163_v59  ;;  %v4329_v29 = vpop.f32.mrb[203].mxu1 }
 0x395   :  { %4441 = vmatmul.mubr.msk.bf16.gmra.mrb[52].mxu1 %vm1407_vm5, %v6165_v53 }
 0x396   :  { %4444 = vmatprep.mubr.msk.bf16.mxu1 %vm4528_vm2, %v4526_v0 }
 0x398   :  { %v2294_v5 = vpop.f32.mrb[204].mxu1 }
 0x399   :  { %v6274_v6 = vadd.f32 %v2294_v5, %v6174_v8  ;;  %v4332_v57 = vpop.f32.mrb[205].mxu1 }
 0x39a   :  { %v2297_v42 = vpop.f32.mrb[206].mxu1 }
 0x39b   :  { %v6277_v16 = vadd.f32 %v2297_v42, %v6177_v62  ;;  %v4333_v45 = vpop.f32.mrb[207].mxu1  ;;  %v4516_v62 = vld [vmem:[%s6446_s5 + $0x8] sm:$0xff]  }
 0x39c   :  { %4457 = vmatpush3.bf16.msra.mxu1 %v4516_v62 }
 0x39d   :  { %4445 = vmatmul.mubr.msk.bf16.gmra.mrb[56].mxu1 %vm1407_vm5, %v6179_v13  ;;  %4468 = vmatprep.subr.bf16.mxu1 %v4526_v0 }
 0x39e   :  { %4448 = vmatprep.mubr.msk.bf16.mxu1 %vm4528_vm2, %v4526_v0 }
 0x3a0   :  { %v2302_v59 = vpop.f32.mrb[208].mxu1 }
 0x3a1   :  { %v2331_v53 = vadd.f32 %v2302_v59, %v6188_v25  ;;  %v4336_v7 = vpop.f32.mrb[209].mxu1 }
 0x3a2   :  { %v2305_v56 = vpop.f32.mrb[210].mxu1 }
 0x3a3   :  { %v2332_v8 = vadd.f32 %v2305_v56, %v6191_v35  ;;  %v4337_v41 = vpop.f32.mrb[211].mxu1 }
 0x3a5   :  { %4449 = vmatmul.mubr.msk.bf16.gmra.mrb[60].mxu1 %vm1407_vm5, %v6193_v21 }
 0x3a6   :  { %4452 = vmatprep.mubr.msk.bf16.mxu1 %vm4528_vm2, %v4526_v0 }
 0x3a8   :  { %v2310_v13 = vpop.f32.mrb[212].mxu1 }
 0x3a9   :  { %v2333_v25 = vadd.f32 %v2310_v13, %v6202_v48  ;;  %v4340_v39 = vpop.f32.mrb[213].mxu1 }
 0x3aa   :  { %v2313_v61 = vpop.f32.mrb[214].mxu1 }
 0x3ab   :  { %v2334_v35 = vadd.f32 %v2313_v61, %v6205_v34  ;;  %v4341_v40 = vpop.f32.mrb[215].mxu1 }
 0x3ad   :  { %4453 = vmatmul.mubr.msk.bf16.gmra.mrb[64].mxu1 %vm1407_vm5, %v6207_v2 }
 0x3ae   :  { %4458 = vmatprep.mubr.msk.bf16.mxu1 %vm4528_vm2, %v4526_v0 }
 0x3b0   :  { %v2410_v21 = vpop.f32.mrb[216].mxu1 }
 0x3b1   :  { %v2481_v49 = vadd.f32 %v2410_v21, %v6214_v19  ;;  %v4346_v4 = vpop.f32.mrb[217].mxu1 }
 0x3b2   :  { %v2413_v15 = vpop.f32.mrb[218].mxu1 }
 0x3b3   :  { %v2482_v20 = vadd.f32 %v2413_v15, %v6217_v30  ;;  %v4347_v27 = vpop.f32.mrb[219].mxu1 }
 0x3b8   :  { %v2418_v48 = vpop.f32.mrb[220].mxu1 }
 0x3b9   :  { %v2483_v1 = vadd.f32 %v2418_v48, %v6224_v46  ;;  %v4350_v31 = vpop.f32.mrb[221].mxu1 }
 0x3ba   :  { %v2421_v34 = vpop.f32.mrb[222].mxu1 }
 0x3bb   :  { %v2484_v33 = vadd.f32 %v2421_v34, %v6227_v51  ;;  %v4351_v52 = vpop.f32.mrb[223].mxu1 }
 0x3c0   :  { %v2426_v2 = vpop.f32.mrb[224].mxu1 }
 0x3c1   :  { %v2485_v14 = vadd.f32 %v2426_v2, %v6234_v12  ;;  %v4354_v26 = vpop.f32.mrb[225].mxu1 }
 0x3c2   :  { %v2429_v58 = vpop.f32.mrb[226].mxu1 }
 0x3c3   :  { %v2486_v19 = vadd.f32 %v2429_v58, %v6237_v47  ;;  %v4355_v10 = vpop.f32.mrb[227].mxu1 }
 0x3c8   :  { %v2434_v28 = vpop.f32.mrb[228].mxu1 }
 0x3c9   :  { %v2487_v30 = vadd.f32 %v2434_v28, %v6244_v50  ;;  %v4358_v32 = vpop.f32.mrb[229].mxu1 }
 0x3ca   :  { %v2437_v38 = vpop.f32.mrb[230].mxu1 }
 0x3cb   :  { %v2488_v46 = vadd.f32 %v2437_v38, %v6247_v17  ;;  %v4359_v37 = vpop.f32.mrb[231].mxu1 }
 0x3d0   :  { %v2442_v55 = vpop.f32.mrb[232].mxu1 }
 0x3d1   :  { %v2489_v51 = vadd.f32 %v2442_v55, %v6254_v11  ;;  %v4362_v22 = vpop.f32.mrb[233].mxu1 }
 0x3d2   :  { %v2445_v9 = vpop.f32.mrb[234].mxu1 }
 0x3d3   :  { %v2490_v12 = vadd.f32 %v2445_v9, %v6257_v60  ;;  %v4363_v36 = vpop.f32.mrb[235].mxu1 }
 0x3d8   :  { %v2450_v23 = vpop.f32.mrb[236].mxu1 }
 0x3d9   :  { %v2491_v47 = vadd.f32 %v2450_v23, %v6264_v43  ;;  %v4366_v54 = vpop.f32.mrb[237].mxu1 }
 0x3da   :  { %v2453_v63 = vpop.f32.mrb[238].mxu1 }
 0x3db   :  { %v2492_v50 = vadd.f32 %v2453_v63, %v6267_v24  ;;  %v4367_v18 = vpop.f32.mrb[239].mxu1 }
 0x3e0   :  { %v2458_v44 = vpop.f32.mrb[240].mxu1 }
 0x3e1   :  { %v2493_v17 = vadd.f32 %v2458_v44, %v6274_v6  ;;  %v4370_v3 = vpop.f32.mrb[241].mxu1 }
 0x3e2   :  { %v2461_v29 = vpop.f32.mrb[242].mxu1 }
 0x3e3   :  { %v2494_v11 = vadd.f32 %v2461_v29, %v6277_v16  ;;  %v4371_v5 = vpop.f32.mrb[243].mxu1 }
 0x3e8   :  { %v2466_v57 = vpop.f32.mrb[244].mxu1 }
 0x3e9   :  { %v2495_v42 = vadd.f32 %v2466_v57, %v2331_v53  ;;  %v4374_v60 = vpop.f32.mrb[245].mxu1 }
 0x3ea   :  { %v2469_v45 = vpop.f32.mrb[246].mxu1 }
 0x3eb   :  { %v2496_v59 = vadd.f32 %v2469_v45, %v2332_v8  ;;  %v4375_v7 = vpop.f32.mrb[247].mxu1 }
 0x3f0   :  { %v2474_v43 = vpop.f32.mrb[248].mxu1 }
 0x3f1   :  { %v2497_v56 = vadd.f32 %v2474_v43, %v2333_v25  ;;  %v4378_v41 = vpop.f32.mrb[249].mxu1 }
 0x3f2   :  { %v2477_v62 = vpop.f32.mrb[250].mxu1 }
 0x3f3   :  { %v2498_v24 = vadd.f32 %v2477_v62, %v2334_v35  ;;  %v4379_v13 = vpop.f32.mrb[251].mxu1 }
 0x3f8   :  { %v2574_v39 = vpop.f32.mrb[252].mxu1 }
 0x3f9   :  { %v2645_v61 = vadd.f32 %v2574_v39, %v2481_v49  ;;  %v4384_v6 = vpop.f32.mrb[253].mxu1 }
 0x3fa   :  { %v2577_v40 = vpop.f32.mrb[254].mxu1 }
 0x3fb   :  { %v2646_v21 = vadd.f32 %v2577_v40, %v2482_v20  ;;  %v4385_v4 = vpop.f32.mrb[255].mxu1 }
 0x3fc   :  { %v4518_v4 = vld [vmem:[%s6446_s5 + $0x18] sm:$0xff]  }
 0x400   :  { %v2582_v16 = vpop.f32.mrb[0].mxu1 }
 0x401   :  { %v6313_v15 = vadd.f32 %v2582_v16, %v2483_v1  ;;  %v4388_v53 = vpop.f32.mrb[1].mxu1 }
 0x402   :  { %v2585_v27 = vpop.f32.mrb[2].mxu1 }
 0x403   :  { %v6315_v48 = vadd.f32 %v2585_v27, %v2484_v33  ;;  %v4389_v8 = vpop.f32.mrb[3].mxu1 }
 0x408   :  { %v2590_v31 = vpop.f32.mrb[4].mxu1 }
 0x409   :  { %v6317_v25 = vadd.f32 %v2590_v31, %v2485_v14  ;;  %v4392_v34 = vpop.f32.mrb[5].mxu1 }
 0x40a   :  { %v2593_v35 = vpop.f32.mrb[6].mxu1 }
 0x40b   :  { %v6319_v52 = vadd.f32 %v2593_v35, %v2486_v19  ;;  %v4393_v49 = vpop.f32.mrb[7].mxu1 }
 0x410   :  { %v2598_v2 = vpop.f32.mrb[8].mxu1 }
 0x411   :  { %v6321_v26 = vadd.f32 %v2598_v2, %v2487_v30  ;;  %v4396_v20 = vpop.f32.mrb[9].mxu1  ;;  %v4517_v2 = vld [vmem:[%s6446_s5 + $0x10] sm:$0xff]  }
 0x412   :  { %v2601_v58 = vpop.f32.mrb[10].mxu1 }
 0x413   :  { %v6323_v1 = vadd.f32 %v2601_v58, %v2488_v46  ;;  %v4397_v10 = vpop.f32.mrb[11].mxu1 }
 0x418   :  { %v2606_v28 = vpop.f32.mrb[12].mxu1 }
 0x419   :  { %v6325_v33 = vadd.f32 %v2606_v28, %v2489_v51  ;;  %v4400_v32 = vpop.f32.mrb[13].mxu1 }
 0x41a   :  { %v2609_v38 = vpop.f32.mrb[14].mxu1 }
 0x41b   :  { %v6327_v14 = vadd.f32 %v2609_v38, %v2490_v12  ;;  %v4401_v37 = vpop.f32.mrb[15].mxu1 }
 0x420   :  { %v2614_v55 = vpop.f32.mrb[16].mxu1 }
 0x421   :  { %v6329_v19 = vadd.f32 %v2614_v55, %v2491_v47  ;;  %v4404_v22 = vpop.f32.mrb[17].mxu1 }
 0x422   :  { %v2617_v9 = vpop.f32.mrb[18].mxu1 }
 0x423   :  { %v6331_v30 = vadd.f32 %v2617_v9, %v2492_v50  ;;  %v4405_v36 = vpop.f32.mrb[19].mxu1  ;;  %v4519_v9 = vld [vmem:[%s6446_s5 + $0x20] sm:$0xff]  }
 0x428   :  { %v2622_v23 = vpop.f32.mrb[20].mxu1 }
 0x429   :  { %v6333_v46 = vadd.f32 %v2622_v23, %v2493_v17  ;;  %v4408_v54 = vpop.f32.mrb[21].mxu1 }
 0x42a   :  { %v2625_v63 = vpop.f32.mrb[22].mxu1 }
 0x42b   :  { %v6335_v51 = vadd.f32 %v2625_v63, %v2494_v11  ;;  %v4409_v18 = vpop.f32.mrb[23].mxu1  ;;  %v6348_v11 = vld [vmem:[%s6447_s4] ss:$0 sm:$0xff] }
 0x430   :  { %v2630_v44 = vpop.f32.mrb[24].mxu1 }
 0x431   :  { %v6337_v12 = vadd.f32 %v2630_v44, %v2495_v42  ;;  %v4412_v3 = vpop.f32.mrb[25].mxu1 }
 0x432   :  { %v2633_v29 = vpop.f32.mrb[26].mxu1 }
 0x433   :  { %v6339_v47 = vadd.f32 %v2633_v29, %v2496_v59  ;;  %v4413_v5 = vpop.f32.mrb[27].mxu1 }
 0x438   :  { %v2638_v57 = vpop.f32.mrb[28].mxu1 }
 0x439   :  { %v6341_v50 = vadd.f32 %v2638_v57, %v2497_v56  ;;  %v4416_v60 = vpop.f32.mrb[29].mxu1  ;;  %v4520_v57 = vld [vmem:[%s6446_s5 + $0x28] sm:$0xff]  }
 0x43a   :  { %v2641_v45 = vpop.f32.mrb[30].mxu1 }
 0x43b   :  { %v6343_v17 = vadd.f32 %v2641_v45, %v2498_v24  ;;  %v4417_v7 = vpop.f32.mrb[31].mxu1 }
 0x440   :  { %v2738_v43 = vpop.f32.mrb[32].mxu1 }
 0x441   :  { %v2809_v42 = vadd.f32 %v2738_v43, %v2645_v61  ;;  %v4422_v41 = vpop.f32.mrb[33].mxu1 }
 0x442   :  { %v2741_v62 = vpop.f32.mrb[34].mxu1 }
 0x443   :  { %v2834_v59 = vadd.f32 %v6348_v11, %v2809_v42  ;;  %v2810_v13 = vadd.f32 %v2741_v62, %v2646_v21  ;;  %v4423_v39 = vpop.f32.mrb[35].mxu1 }
 0x444   :  { %v4521_v39 = vld [vmem:[%s6446_s5 + $0x30] sm:$0xff]  }
 0x445   :  { %v2835_v56 = vadd.f32 %v6348_v11, %v2810_v13  ;;  %v2852_v6 = vmax.f32 %v2834_v59, 0.0 }
 0x447   :  { %v2853_v40 = vmax.f32 %v2835_v56, 0.0 }
 0x448   :  { %v2746_v24 = vpop.f32.mrb[36].mxu1 }
 0x449   :  { %v2870_v16 = vpack.c.bf16 %v2853_v40, %v2852_v6  ;;  %v2811_v53 = vadd.f32 %v2746_v24, %v6313_v15  ;;  %v4426_v61 = vpop.f32.mrb[37].mxu1 }
 0x44a   :  { %v2749_v27 = vpop.f32.mrb[38].mxu1 }
 0x44b   :  { %v2836_v8 = vadd.f32 %v6348_v11, %v2811_v53  ;;  %v2812_v21 = vadd.f32 %v2749_v27, %v6315_v48  ;;  %v4427_v31 = vpop.f32.mrb[39].mxu1  ;;  %4465 = vmatmul.mubr.msk.bf16.vlgmr.msra.gmra.mrb[68].mxu0 %vm2883_vm6, %v2870_v16 }
 0x44c   :  { %4475 = vmatpush3.bf16.msra.mxu0 %v4518_v4  ;;  %4476 = vmatprep.mubr.msk.bf16.mxu0 %vm4528_vm2, %v4526_v0 }
 0x44d   :  { %v2837_v34 = vadd.f32 %v6348_v11, %v2812_v21  ;;  %4486 = vmatprep.subr.bf16.mxu0 %v4526_v0  ;;  %v2854_v35 = vmax.f32 %v2836_v8, 0.0  ;;  %v4522_v8 = vld [vmem:[%s6446_s5 + $0x38] sm:$0xff]  }
 0x44f   :  { %v2855_v49 = vmax.f32 %v2837_v34, 0.0 }
 0x450   :  { %v2754_v15 = vpop.f32.mrb[40].mxu1 }
 0x451   :  { %v2873_v20 = vpack.c.bf16 %v2855_v49, %v2854_v35  ;;  %v2813_v48 = vadd.f32 %v2754_v15, %v6317_v25  ;;  %v4430_v58 = vpop.f32.mrb[41].mxu1 }
 0x452   :  { %v2757_v10 = vpop.f32.mrb[42].mxu1 }
 0x453   :  { %v2838_v28 = vadd.f32 %v6348_v11, %v2813_v48  ;;  %v2814_v32 = vadd.f32 %v2757_v10, %v6319_v52  ;;  %v4431_v38 = vpop.f32.mrb[43].mxu1  ;;  %4459 = vmatmul.mubr.msk.bf16.vlgmr.msra.gmra.mrb[68].mxu1 %vm2883_vm6, %v2873_v20 }
 0x454   :  { %4469 = vmatpush3.bf16.msra.mxu1 %v4517_v2  ;;  %4470 = vmatprep.mubr.msk.bf16.mxu1 %vm4528_vm2, %v4526_v0 }
 0x455   :  { %v2839_v37 = vadd.f32 %v6348_v11, %v2814_v32  ;;  %4480 = vmatprep.subr.bf16.mxu1 %v4526_v0  ;;  %v2856_v55 = vmax.f32 %v2838_v28, 0.0 }
 0x457   :  { %v2857_v22 = vmax.f32 %v2839_v37, 0.0 }
 0x458   :  { %v2762_v25 = vpop.f32.mrb[44].mxu1 }
 0x459   :  { %v2978_v36 = vpack.c.bf16 %v2857_v22, %v2856_v55  ;;  %v2815_v52 = vadd.f32 %v2762_v25, %v6321_v26  ;;  %v4434_v23 = vpop.f32.mrb[45].mxu1 }
 0x45a   :  { %v2765_v54 = vpop.f32.mrb[46].mxu1 }
 0x45b   :  { %v2840_v63 = vadd.f32 %v6348_v11, %v2815_v52  ;;  %v2816_v18 = vadd.f32 %v2765_v54, %v6323_v1  ;;  %v4435_v44 = vpop.f32.mrb[47].mxu1  ;;  %4471 = vmatmul.mubr.msk.bf16.vlgmr.msra.gmra.mrb[72].mxu1 %vm2883_vm6, %v2978_v36 }
 0x45c   :  { %4481 = vmatpush3.bf16.msra.mxu1 %v4519_v9  ;;  %4482 = vmatprep.mubr.msk.bf16.mxu1 %vm4528_vm2, %v4526_v0 }
 0x45d   :  { %v2841_v3 = vadd.f32 %v6348_v11, %v2816_v18  ;;  %4492 = vmatprep.subr.bf16.mxu1 %v4526_v0  ;;  %v2858_v29 = vmax.f32 %v2840_v63, 0.0 }
 0x45f   :  { %v2859_v5 = vmax.f32 %v2841_v3, 0.0 }
 0x460   :  { %v2770_v26 = vpop.f32.mrb[48].mxu1 }
 0x461   :  { %v3034_v60 = vpack.c.bf16 %v2859_v5, %v2858_v29  ;;  %v2817_v1 = vadd.f32 %v2770_v26, %v6325_v33  ;;  %v4438_v45 = vpop.f32.mrb[49].mxu1 }
 0x462   :  { %v2773_v7 = vpop.f32.mrb[50].mxu1 }
 0x463   :  { %v2842_v43 = vadd.f32 %v6348_v11, %v2817_v1  ;;  %v2818_v42 = vadd.f32 %v2773_v7, %v6327_v14  ;;  %v4439_v41 = vpop.f32.mrb[51].mxu1  ;;  %4477 = vmatmul.mubr.msk.bf16.vlgmr.msra.gmra.mrb[72].mxu0 %vm2883_vm6, %v3034_v60 }
 0x464   :  { %4487 = vmatpush3.bf16.msra.mxu0 %v4520_v57  ;;  %4488 = vmatprep.mubr.msk.bf16.mxu0 %vm4528_vm2, %v4526_v0 }
 0x465   :  { %v2843_v62 = vadd.f32 %v6348_v11, %v2818_v42  ;;  %4498 = vmatprep.subr.bf16.mxu0 %v4526_v0  ;;  %v2860_v59 = vmax.f32 %v2842_v43, 0.0 }
 0x467   :  { %v2861_v13 = vmax.f32 %v2843_v62, 0.0 }
 0x468   :  { %v2778_v33 = vpop.f32.mrb[52].mxu1 }
 0x469   :  { %v3090_v56 = vpack.c.bf16 %v2861_v13, %v2860_v59  ;;  %v2819_v14 = vadd.f32 %v2778_v33, %v6329_v19  ;;  %v4442_v6 = vpop.f32.mrb[53].mxu1 }
 0x46a   :  { %v2781_v40 = vpop.f32.mrb[54].mxu1 }
 0x46b   :  { %v2844_v24 = vadd.f32 %v6348_v11, %v2819_v14  ;;  %v2820_v4 = vadd.f32 %v2781_v40, %v6331_v30  ;;  %v4443_v16 = vpop.f32.mrb[55].mxu1  ;;  %4483 = vmatmul.mubr.msk.bf16.vlgmr.msra.gmra.mrb[76].mxu1 %vm2883_vm6, %v3090_v56 }
 0x46c   :  { %4493 = vmatpush3.bf16.msra.mxu1 %v4521_v39  ;;  %4494 = vmatprep.mubr.msk.bf16.mxu1 %vm4528_vm2, %v4526_v0 }
 0x46d   :  { %v2845_v53 = vadd.f32 %v6348_v11, %v2820_v4  ;;  %4504 = vmatprep.subr.bf16.mxu1 %v4526_v0  ;;  %v2862_v61 = vmax.f32 %v2844_v24, 0.0 }
 0x46f   :  { %v2863_v27 = vmax.f32 %v2845_v53, 0.0 }
 0x470   :  { %v2786_v19 = vpop.f32.mrb[56].mxu1 }
 0x471   :  { %v3146_v21 = vpack.c.bf16 %v2863_v27, %v2862_v61  ;;  %v2821_v30 = vadd.f32 %v2786_v19, %v6333_v46  ;;  %v4446_v31 = vpop.f32.mrb[57].mxu1  ;;  %v4523_v46 = vld [vmem:[%s6446_s5 + $0x40] sm:$0xff]  }
 0x472   :  { %v2789_v34 = vpop.f32.mrb[58].mxu1 }
 0x473   :  { %v2846_v35 = vadd.f32 %v6348_v11, %v2821_v30  ;;  %v2822_v49 = vadd.f32 %v2789_v34, %v6335_v51  ;;  %v4447_v15 = vpop.f32.mrb[59].mxu1  ;;  %4489 = vmatmul.mubr.msk.bf16.vlgmr.msra.gmra.mrb[76].mxu0 %vm2883_vm6, %v3146_v21 }
 0x474   :  { %4499 = vmatpush3.bf16.msra.mxu0 %v4522_v8  ;;  %4500 = vmatprep.mubr.msk.bf16.mxu0 %vm4528_vm2, %v4526_v0 }
 0x475   :  { %v2847_v2 = vadd.f32 %v6348_v11, %v2822_v49  ;;  %v2864_v20 = vmax.f32 %v2846_v35, 0.0 }
 0x477   :  { %v2865_v48 = vmax.f32 %v2847_v2, 0.0 }
 0x478   :  { %v2794_v58 = vpop.f32.mrb[60].mxu1 }
 0x479   :  { %v3202_v10 = vpack.c.bf16 %v2865_v48, %v2864_v20  ;;  %v2823_v28 = vadd.f32 %v2794_v58, %v6337_v12  ;;  %v4450_v51 = vpop.f32.mrb[61].mxu1 }
 0x47a   :  { %v2797_v32 = vpop.f32.mrb[62].mxu1 }
 0x47b   :  { %v2848_v38 = vadd.f32 %v6348_v11, %v2823_v28  ;;  %v2824_v37 = vadd.f32 %v2797_v32, %v6339_v47  ;;  %v4451_v55 = vpop.f32.mrb[63].mxu1  ;;  %4495 = vmatmul.mubr.msk.bf16.vlgmr.msra.gmra.mrb[80].mxu1 %vm2883_vm6, %v3202_v10 }
 0x47c   :  { %4505 = vmatpush3.bf16.msra.mxu1 %v4523_v46  ;;  %4506 = vmatprep.mubr.msk.bf16.mxu1 %vm4528_vm2, %v4526_v0 }
 0x47d   :  { %v2849_v22 = vadd.f32 %v6348_v11, %v2824_v37  ;;  %v2866_v25 = vmax.f32 %v2848_v38, 0.0  ;;  %v3594_v37 = vld [vmem:[%s6448_s6] ss:$0 sm:$0xff] }
 0x47f   :  { %v2867_v9 = vmax.f32 %v2849_v22, 0.0 }
 0x480   :  { %v2802_v36 = vpop.f32.mrb[64].mxu1 }
 0x481   :  { %v3258_v52 = vpack.c.bf16 %v2867_v9, %v2866_v25  ;;  %v2825_v12 = vadd.f32 %v2802_v36, %v6341_v50  ;;  %v4454_v23 = vpop.f32.mrb[65].mxu1 }
 0x482   :  { %v2805_v54 = vpop.f32.mrb[66].mxu1 }
 0x483   :  { %v2850_v63 = vadd.f32 %v6348_v11, %v2825_v12  ;;  %v2826_v47 = vadd.f32 %v2805_v54, %v6343_v17  ;;  %v4455_v18 = vpop.f32.mrb[67].mxu1  ;;  %4501 = vmatmul.mubr.msk.bf16.vlgmr.msra.gmra.mrb[80].mxu0 %vm2883_vm6, %v3258_v52 }
 0x485   :  { %v2851_v44 = vadd.f32 %v6348_v11, %v2826_v47  ;;  %v2868_v0 = vmax.f32 %v2850_v63, 0.0 }
 0x487   :  { %v2869_v3 = vmax.f32 %v2851_v44, 0.0 }
 0x489   :  { %v3314_v29 = vpack.c.bf16 %v2869_v3, %v2868_v0 }
 0x48b   :  { %4507 = vmatmul.mubr.msk.bf16.vlgmr.msra.gmra.mrb[84].mxu1 %vm2883_vm6, %v3314_v29 }
 0x51e   :  { %v2971_v5 = vpop.f32.mrb[68].mxu0 }
 0x51f   :  { %v4466_v26 = vpop.f32.mrb[69].mxu0 }
 0x520   :  { %v2974_v57 = vpop.f32.mrb[70].mxu0 }
 0x521   :  { %v4467_v50 = vpop.f32.mrb[71].mxu0 }
 0x526   :  { %v2921_v60 = vpop.f32.mrb[68].mxu1 }
 0x527   :  { %v2972_v1 = vadd.f32 %v2971_v5, %v2921_v60  ;;  %v4460_v45 = vpop.f32.mrb[69].mxu1 }
 0x528   :  { %v2924_v7 = vpop.f32.mrb[70].mxu1 }
 0x529   :  { %v2975_v43 = vadd.f32 %v2974_v57, %v2924_v7  ;;  %v4461_v17 = vpop.f32.mrb[71].mxu1 }
 0x52e   :  { %v3025_v42 = vpop.f32.mrb[72].mxu1 }
 0x52f   :  { %v3032_v41 = vadd.f32 %v3025_v42, %v2972_v1  ;;  %v4472_v62 = vpop.f32.mrb[73].mxu1 }
 0x530   :  { %v3028_v59 = vpop.f32.mrb[74].mxu1 }
 0x531   :  { %v3033_v11 = vadd.f32 %v3028_v59, %v2975_v43  ;;  %v4473_v13 = vpop.f32.mrb[75].mxu1 }
 0x536   :  { %v3081_v33 = vpop.f32.mrb[72].mxu0 }
 0x537   :  { %v3088_v39 = vadd.f32 %v3081_v33, %v3032_v41  ;;  %v4478_v56 = vpop.f32.mrb[73].mxu0 }
 0x538   :  { %v3084_v14 = vpop.f32.mrb[74].mxu0 }
 0x539   :  { %v3089_v6 = vadd.f32 %v3084_v14, %v3033_v11  ;;  %v4479_v40 = vpop.f32.mrb[75].mxu0 }
 0x53e   :  { %v3137_v24 = vpop.f32.mrb[76].mxu1 }
 0x53f   :  { %v3144_v4 = vadd.f32 %v3137_v24, %v3088_v39  ;;  %v4484_v16 = vpop.f32.mrb[77].mxu1 }
 0x540   :  { %v3140_v53 = vpop.f32.mrb[78].mxu1 }
 0x541   :  { %v3145_v61 = vadd.f32 %v3140_v53, %v3089_v6  ;;  %v4485_v27 = vpop.f32.mrb[79].mxu1 }
 0x546   :  { %v3193_v19 = vpop.f32.mrb[76].mxu0 }
 0x547   :  { %v3200_v8 = vadd.f32 %v3193_v19, %v3144_v4  ;;  %v4490_v21 = vpop.f32.mrb[77].mxu0 }
 0x548   :  { %v3196_v30 = vpop.f32.mrb[78].mxu0 }
 0x549   :  { %v3201_v31 = vadd.f32 %v3196_v30, %v3145_v61  ;;  %v4491_v34 = vpop.f32.mrb[79].mxu0 }
 0x54e   :  { %v3249_v35 = vpop.f32.mrb[80].mxu1 }
 0x54f   :  { %v3256_v49 = vadd.f32 %v3249_v35, %v3200_v8  ;;  %v4496_v15 = vpop.f32.mrb[81].mxu1 }
 0x550   :  { %v3252_v2 = vpop.f32.mrb[82].mxu1 }
 0x551   :  { %v3257_v20 = vadd.f32 %v3252_v2, %v3201_v31  ;;  %v4497_v48 = vpop.f32.mrb[83].mxu1 }
 0x556   :  { %v3305_v58 = vpop.f32.mrb[80].mxu0 }
 0x557   :  { %v3312_v46 = vadd.f32 %v3305_v58, %v3256_v49  ;;  %v4502_v10 = vpop.f32.mrb[81].mxu0 }
 0x558   :  { %v3308_v28 = vpop.f32.mrb[82].mxu0 }
 0x559   :  { %v3313_v51 = vadd.f32 %v3308_v28, %v3257_v20  ;;  %v4503_v32 = vpop.f32.mrb[83].mxu0 }
 0x55e   :  { %v3361_v38 = vpop.f32.mrb[84].mxu1 }
 0x55f   :  { %v3368_v55 = vadd.f32 %v3361_v38, %v3312_v46  ;;  %v4508_v22 = vpop.f32.mrb[85].mxu1 }
 0x560   :  { %v3364_v25 = vpop.f32.mrb[86].mxu1 }
 0x561   :  { %v3377_v9 = vadd.f32 %v3594_v37, %v3368_v55  ;;  %v3369_v36 = vadd.f32 %v3364_v25, %v3313_v51  ;;  %v4509_v52 = vpop.f32.mrb[87].mxu1 }
 0x563   :  { %3380 = vst.msk [vmem:[%s6449_s7] sm:$0xff] %vm3379_vm7, %v3377_v9  ;;  %v3378_v12 = vadd.f32 %v3594_v37, %v3369_v36 }
 0x565   :  { %3381 = vst.msk [vmem:[%s6449_s7 + $0x8] sm:$0xff] %vm3379_vm7, %v3378_v12 }

// kernel: mcil_forward.6
= control target key start
LH: loop header
LB: loop body
LE: loop exit
PB: predicated region body
PF: predicated region fallthrough
CT: control target
= control target key end

     0   :  { %vm98_vm0 = vcmask 1044480   ;;  %vm99_vm1 = vcmask 1045504   ;;  %v867_v0 = vmov 0.0   ;;  %v868_v2 = vmov 65535   ;;  %s1108_s1 = inlined_call_operand.vmem [shape: bf16[27,8], index: 1, kind: input, shape index: {}]   ;;  %s1109_s0 = inlined_call_operand.vmem [shape: f32[144,27], index: 0, kind: input, shape index: {}]   ;;  %s1110_s3 = inlined_call_operand.vmem [shape: bf16[9,8,16], index: 3, kind: input, shape index: {}]   ;;  %s1111_s2 = inlined_call_operand.vmem [shape: f32[1,8], index: 2, kind: input, shape index: {}]   ;;  %s1112_s4 = inlined_call_operand.vmem [shape: f32[1,16], index: 4, kind: input, shape index: {}]   ;;  %s1113_s5 = inlined_call_operand.vmem [shape: f32[16,16], index: 5, kind: output, shape index: {}]  }
   0x1   :  { %768 = vmatprep.subr.bf16.mxu0 %v867_v0  ;;  %v865_v1 = vld [vmem:[%s1108_s1] sm:$0xff]   ;;  %v100_v3 = vsel %vm98_vm0, 4294967295, %v868_v2  ;;  %808 = vmatprep.subr.bf16.mxu1 %v867_v0  ;;  %v866_v4 = vld [vmem:[%s1108_s1 + $0x8] sm:$0x3f]   ;;  %vm869_vm2 = vmmov 0   ;;  %vm70_vm3 = vcmask 220160  }
   0x2   :  { %769 = vmatpush3.bf16.msra.mxu0 %v865_v1  ;;  %v101_v5 = vsel %vm99_vm1, %v100_v3, 0  ;;  %v21_v6 = vld [vmem:[%s1109_s0] sm:$0xff]  ;;  %v22_v7 = vld [vmem:[%s1109_s0 + $0x8] sm:$0xff]  ;;  %772 = vmatprep.mubr.msk.bf16.mxu0 %vm869_vm2, %v867_v0  ;;  %v23_v10 = vld [vmem:[%s1109_s0 + $0x10] sm:$0xff]  ;;  %vm237_vm4 = vcmask 1043456   ;;  %vm233_vm5 = vcmask 64512  }
   0x3   :  { %770 = vmatprep.subr.bf16.mxu0 %v867_v0  ;;  %v103_v8 = vand.u32 %v866_v4, %v101_v5  ;;  %810 = vmatprep.mubr.msk.bf16.mxu1 %vm869_vm2, %v867_v0  ;;  %v39_v9 = vpack.c.bf16 %v22_v7, %v21_v6  ;;  %v24_v11 = vld [vmem:[%s1109_s0 + $0x18] sm:$0xff]  ;;  %v25_v13 = vld [vmem:[%s1109_s0 + $0x20] sm:$0xff]  ;;  %v26_v14 = vld [vmem:[%s1109_s0 + $0x28] sm:$0xff]  ;;  %vm702_vm6 = vcmask 130048  }
   0x4   :  { %v40_v12 = vpack.c.bf16 %v24_v11, %v23_v10  ;;  %v41_v15 = vpack.c.bf16 %v26_v14, %v25_v13  ;;  %v27_v16 = vld [vmem:[%s1109_s0 + $0x30] sm:$0xff]  ;;  %v28_v17 = vld [vmem:[%s1109_s0 + $0x38] sm:$0xff]  ;;  %v29_v19 = vld [vmem:[%s1109_s0 + $0x40] sm:$0xff] }
   0x5   :  { %v42_v18 = vpack.c.bf16 %v28_v17, %v27_v16  ;;  %v30_v20 = vld [vmem:[%s1109_s0 + $0x48] sm:$0xff]  ;;  %v31_v22 = vld [vmem:[%s1109_s0 + $0x50] sm:$0xff]  ;;  %v32_v23 = vld [vmem:[%s1109_s0 + $0x58] sm:$0xff] }
   0x6   :  { %771 = vmatpush3.bf16.msra.mxu0 %v103_v8  ;;  %v43_v21 = vpack.c.bf16 %v30_v20, %v29_v19  ;;  %v44_v24 = vpack.c.bf16 %v32_v23, %v31_v22  ;;  %v33_v25 = vld [vmem:[%s1109_s0 + $0x60] sm:$0xff]  ;;  %v34_v26 = vld [vmem:[%s1109_s0 + $0x68] sm:$0xff]  ;;  %v35_v28 = vld [vmem:[%s1109_s0 + $0x70] sm:$0xff] }
   0x7   :  { %v45_v27 = vpack.c.bf16 %v34_v26, %v33_v25  ;;  %v36_v29 = vld [vmem:[%s1109_s0 + $0x78] sm:$0xff]  ;;  %v37_v31 = vld [vmem:[%s1109_s0 + $0x80] sm:$0xff]  ;;  %v38_v32 = vld [vmem:[%s1109_s0 + $0x88] sm:$0xff] }
   0x8   :  { %v46_v30 = vpack.c.bf16 %v36_v29, %v35_v28  ;;  %v47_v33 = vpack.c.bf16 %v38_v32, %v37_v31  ;;  %v721_v34 = vld [vmem:[%s1110_s3 + $0x4] sm:$0xf]  ;;  %v229_v36 = vld [vmem:[%s1110_s3] sm:$0xf]  ;;  %v724_v38 = vld [vmem:[%s1110_s3 + $0x8] sm:$0xf] }
   0x9   :  { %773 = vmatmul.mubr.msk.bf16.vlgmr.msra.gmra.mrb[0].mxu0 %vm70_vm3, %v39_v9  ;;  %v239_v35 = vsel %vm237_vm4, %v721_v34, 0  ;;  %v286_v37 = vsel %vm237_vm4, %v229_v36, 0  ;;  %v336_v39 = vsel %vm237_vm4, %v724_v38, 0  ;;  %v726_v40 = vld [vmem:[%s1110_s3 + $0xc] sm:$0xf] }
   0xa   :  { %776 = vmatprep.mubr.msk.bf16.mxu0 %vm869_vm2, %v867_v0  ;;  %809 = vmatpush3.bf16.msra.mxu1 %v239_v35  ;;  %v388_v41 = vsel %vm237_vm4, %v726_v40, 0  ;;  %v728_v42 = vld [vmem:[%s1110_s3 + $0x10] sm:$0xf]  ;;  %v730_v44 = vld [vmem:[%s1110_s3 + $0x14] sm:$0xf] }
   0xb   :  { %814 = vmatprep.subr.bf16.mxu1 %v867_v0  ;;  %v1013_v43 = vsel %vm237_vm4, %v728_v42, 0  ;;  %v1019_v45 = vsel %vm237_vm4, %v730_v44, 0  ;;  %v732_v46 = vld [vmem:[%s1110_s3 + $0x18] sm:$0xf]  ;;  %v734_v48 = vld [vmem:[%s1110_s3 + $0x1c] sm:$0xf] }
   0xc   :  { %v1025_v47 = vsel %vm237_vm4, %v732_v46, 0  ;;  %v1031_v49 = vsel %vm237_vm4, %v734_v48, 0  ;;  %v736_v50 = vld [vmem:[%s1110_s3 + $0x20] sm:$0xf] }
   0xd   :  { %v1037_v51 = vsel %vm237_vm4, %v736_v50, 0  ;;  %v1042_v52 = vld [vmem:[%s1111_s2] ss:$0 sm:$0xff] }
  0x11   :  { %777 = vmatmul.mubr.msk.bf16.gmra.mrb[4].mxu0 %vm70_vm3, %v40_v12 }
  0x12   :  { %780 = vmatprep.mubr.msk.bf16.mxu0 %vm869_vm2, %v867_v0 }
  0x19   :  { %781 = vmatmul.mubr.msk.bf16.gmra.mrb[8].mxu0 %vm70_vm3, %v41_v15 }
  0x1a   :  { %784 = vmatprep.mubr.msk.bf16.mxu0 %vm869_vm2, %v867_v0 }
  0x21   :  { %785 = vmatmul.mubr.msk.bf16.gmra.mrb[12].mxu0 %vm70_vm3, %v42_v18 }
  0x22   :  { %788 = vmatprep.mubr.msk.bf16.mxu0 %vm869_vm2, %v867_v0 }
  0x29   :  { %789 = vmatmul.mubr.msk.bf16.gmra.mrb[16].mxu0 %vm70_vm3, %v43_v21 }
  0x2a   :  { %792 = vmatprep.mubr.msk.bf16.mxu0 %vm869_vm2, %v867_v0 }
  0x31   :  { %793 = vmatmul.mubr.msk.bf16.gmra.mrb[20].mxu0 %vm70_vm3, %v44_v24 }
  0x32   :  { %796 = vmatprep.mubr.msk.bf16.mxu0 %vm869_vm2, %v867_v0 }
  0x39   :  { %797 = vmatmul.mubr.msk.bf16.gmra.mrb[24].mxu0 %vm70_vm3, %v45_v27 }
  0x3a   :  { %800 = vmatprep.mubr.msk.bf16.mxu0 %vm869_vm2, %v867_v0 }
  0x41   :  { %801 = vmatmul.mubr.msk.bf16.gmra.mrb[28].mxu0 %vm70_vm3, %v46_v30 }
  0x42   :  { %804 = vmatprep.mubr.msk.bf16.mxu0 %vm869_vm2, %v867_v0 }
  0x49   :  { %805 = vmatmul.mubr.msk.bf16.gmra.mrb[32].mxu0 %vm70_vm3, %v47_v33 }
  0xdc   :  { %v139_v53 = vpop.f32.mrb[0].mxu0 }
  0xdd   :  { %v140_v54 = vadd.f32 %v1042_v52, %v139_v53  ;;  %v774_v55 = vpop.f32.mrb[1].mxu0 }
  0xde   :  { %v142_v56 = vpop.f32.mrb[2].mxu0 }
  0xdf   :  { %v143_v57 = vadd.f32 %v1042_v52, %v142_v56  ;;  %v775_v58 = vpop.f32.mrb[3].mxu0  ;;  %v210_v59 = vmax.f32 %v140_v54, 0.0 }
  0xe1   :  { %v211_v60 = vmax.f32 %v143_v57, 0.0 }
  0xe3   :  { %v228_v61 = vpack.c.bf16 %v211_v60, %v210_v59 }
  0xe4   :  { %v147_v62 = vpop.f32.mrb[4].mxu0 }
  0xe5   :  { %v148_v63 = vadd.f32 %v1042_v52, %v147_v62  ;;  %v778_v1 = vpop.f32.mrb[5].mxu0 }
  0xe6   :  { %v150_v2 = vpop.f32.mrb[6].mxu0 }
  0xe7   :  { %v151_v3 = vadd.f32 %v1042_v52, %v150_v2  ;;  %v779_v4 = vpop.f32.mrb[7].mxu0  ;;  %v212_v5 = vmax.f32 %v148_v63, 0.0 }
  0xe9   :  { %v213_v6 = vmax.f32 %v151_v3, 0.0 }
  0xeb   :  { %v230_v7 = vpack.c.bf16 %v213_v6, %v212_v5 }
  0xec   :  { %v155_v8 = vpop.f32.mrb[8].mxu0 }
  0xed   :  { %811 = vmatmul.mubr.msk.bf16.vlgmr.msra.gmra.mrb[0].mxu1 %vm233_vm5, %v230_v7  ;;  %v156_v9 = vadd.f32 %v1042_v52, %v155_v8  ;;  %v782_v10 = vpop.f32.mrb[9].mxu0 }
  0xee   :  { %815 = vmatpush3.bf16.msra.mxu1 %v286_v37  ;;  %v158_v11 = vpop.f32.mrb[10].mxu0  ;;  %816 = vmatprep.mubr.msk.bf16.mxu1 %vm869_vm2, %v867_v0 }
  0xef   :  { %v214_v12 = vmax.f32 %v156_v9, 0.0  ;;  %v159_v13 = vadd.f32 %v1042_v52, %v158_v11  ;;  %v783_v14 = vpop.f32.mrb[11].mxu0  ;;  %820 = vmatprep.subr.bf16.mxu1 %v867_v0 }
  0xf1   :  { %v215_v15 = vmax.f32 %v159_v13, 0.0 }
  0xf3   :  { %v329_v16 = vpack.c.bf16 %v215_v15, %v214_v12 }
  0xf4   :  { %v163_v17 = vpop.f32.mrb[12].mxu0 }
  0xf5   :  { %817 = vmatmul.mubr.msk.bf16.vlgmr.msra.gmra.mrb[4].mxu1 %vm233_vm5, %v228_v61  ;;  %v164_v18 = vadd.f32 %v1042_v52, %v163_v17  ;;  %v786_v19 = vpop.f32.mrb[13].mxu0 }
  0xf6   :  { %821 = vmatpush3.bf16.msra.mxu1 %v336_v39  ;;  %v166_v20 = vpop.f32.mrb[14].mxu0  ;;  %822 = vmatprep.mubr.msk.bf16.mxu1 %vm869_vm2, %v867_v0 }
  0xf7   :  { %v216_v21 = vmax.f32 %v164_v18, 0.0  ;;  %v167_v22 = vadd.f32 %v1042_v52, %v166_v20  ;;  %v787_v23 = vpop.f32.mrb[15].mxu0  ;;  %826 = vmatprep.subr.bf16.mxu1 %v867_v0 }
  0xf9   :  { %v217_v24 = vmax.f32 %v167_v22, 0.0 }
  0xfb   :  { %v381_v25 = vpack.c.bf16 %v217_v24, %v216_v21 }
  0xfc   :  { %v171_v26 = vpop.f32.mrb[16].mxu0 }
  0xfd   :  { %823 = vmatmul.mubr.msk.bf16.vlgmr.msra.gmra.mrb[8].mxu1 %vm233_vm5, %v329_v16  ;;  %v172_v27 = vadd.f32 %v1042_v52, %v171_v26  ;;  %v790_v28 = vpop.f32.mrb[17].mxu0 }
  0xfe   :  { %827 = vmatpush3.bf16.msra.mxu1 %v388_v41  ;;  %v174_v29 = vpop.f32.mrb[18].mxu0  ;;  %828 = vmatprep.mubr.msk.bf16.mxu1 %vm869_vm2, %v867_v0 }
  0xff   :  { %v218_v30 = vmax.f32 %v172_v27, 0.0  ;;  %v175_v31 = vadd.f32 %v1042_v52, %v174_v29  ;;  %v791_v32 = vpop.f32.mrb[19].mxu0  ;;  %832 = vmatprep.subr.bf16.mxu1 %v867_v0 }
 0x101   :  { %v219_v33 = vmax.f32 %v175_v31, 0.0 }
 0x103   :  { %v433_v34 = vpack.c.bf16 %v219_v33, %v218_v30 }
 0x104   :  { %v179_v35 = vpop.f32.mrb[20].mxu0 }
 0x105   :  { %829 = vmatmul.mubr.msk.bf16.vlgmr.msra.gmra.mrb[12].mxu1 %vm233_vm5, %v381_v25  ;;  %v180_v36 = vadd.f32 %v1042_v52, %v179_v35  ;;  %v794_v37 = vpop.f32.mrb[21].mxu0 }
 0x106   :  { %833 = vmatpush3.bf16.msra.mxu1 %v1013_v43  ;;  %v182_v38 = vpop.f32.mrb[22].mxu0  ;;  %834 = vmatprep.mubr.msk.bf16.mxu1 %vm869_vm2, %v867_v0 }
 0x107   :  { %v220_v39 = vmax.f32 %v180_v36, 0.0  ;;  %v183_v40 = vadd.f32 %v1042_v52, %v182_v38  ;;  %v795_v41 = vpop.f32.mrb[23].mxu0  ;;  %838 = vmatprep.subr.bf16.mxu1 %v867_v0 }
 0x109   :  { %v221_v42 = vmax.f32 %v183_v40, 0.0 }
 0x10b   :  { %v485_v44 = vpack.c.bf16 %v221_v42, %v220_v39 }
 0x10c   :  { %v187_v46 = vpop.f32.mrb[24].mxu0 }
 0x10d   :  { %835 = vmatmul.mubr.msk.bf16.vlgmr.msra.gmra.mrb[16].mxu1 %vm233_vm5, %v433_v34  ;;  %v188_v48 = vadd.f32 %v1042_v52, %v187_v46  ;;  %v798_v50 = vpop.f32.mrb[25].mxu0 }
 0x10e   :  { %839 = vmatpush3.bf16.msra.mxu1 %v1019_v45  ;;  %v190_v43 = vpop.f32.mrb[26].mxu0  ;;  %840 = vmatprep.mubr.msk.bf16.mxu1 %vm869_vm2, %v867_v0 }
 0x10f   :  { %v222_v53 = vmax.f32 %v188_v48, 0.0  ;;  %v191_v54 = vadd.f32 %v1042_v52, %v190_v43  ;;  %v799_v55 = vpop.f32.mrb[27].mxu0  ;;  %844 = vmatprep.subr.bf16.mxu1 %v867_v0 }
 0x111   :  { %v223_v56 = vmax.f32 %v191_v54, 0.0 }
 0x113   :  { %v537_v57 = vpack.c.bf16 %v223_v56, %v222_v53 }
 0x114   :  { %v195_v58 = vpop.f32.mrb[28].mxu0 }
 0x115   :  { %841 = vmatmul.mubr.msk.bf16.vlgmr.msra.gmra.mrb[20].mxu1 %vm233_vm5, %v485_v44  ;;  %v196_v59 = vadd.f32 %v1042_v52, %v195_v58  ;;  %v802_v60 = vpop.f32.mrb[29].mxu0 }
 0x116   :  { %845 = vmatpush3.bf16.msra.mxu1 %v1025_v47  ;;  %v198_v45 = vpop.f32.mrb[30].mxu0  ;;  %846 = vmatprep.mubr.msk.bf16.mxu1 %vm869_vm2, %v867_v0 }
 0x117   :  { %v224_v61 = vmax.f32 %v196_v59, 0.0  ;;  %v199_v62 = vadd.f32 %v1042_v52, %v198_v45  ;;  %v803_v63 = vpop.f32.mrb[31].mxu0  ;;  %850 = vmatprep.subr.bf16.mxu1 %v867_v0  ;;  %v738_v59 = vld [vmem:[%s1112_s4] ss:$0 sm:$0xff] }
 0x119   :  { %v225_v1 = vmax.f32 %v199_v62, 0.0 }
 0x11b   :  { %v589_v2 = vpack.c.bf16 %v225_v1, %v224_v61 }
 0x11c   :  { %v203_v3 = vpop.f32.mrb[32].mxu0 }
 0x11d   :  { %847 = vmatmul.mubr.msk.bf16.vlgmr.msra.gmra.mrb[24].mxu1 %vm233_vm5, %v537_v57  ;;  %v204_v4 = vadd.f32 %v1042_v52, %v203_v3  ;;  %v806_v5 = vpop.f32.mrb[33].mxu0 }
 0x11e   :  { %851 = vmatpush3.bf16.msra.mxu1 %v1031_v49  ;;  %v206_v47 = vpop.f32.mrb[34].mxu0  ;;  %852 = vmatprep.mubr.msk.bf16.mxu1 %vm869_vm2, %v867_v0 }
 0x11f   :  { %v226_v6 = vmax.f32 %v204_v4, 0.0  ;;  %v207_v7 = vadd.f32 %v1042_v52, %v206_v47  ;;  %v807_v8 = vpop.f32.mrb[35].mxu0  ;;  %856 = vmatprep.subr.bf16.mxu1 %v867_v0 }
 0x121   :  { %v227_v9 = vmax.f32 %v207_v7, 0.0 }
 0x123   :  { %v641_v10 = vpack.c.bf16 %v227_v9, %v226_v6 }
 0x125   :  { %853 = vmatmul.mubr.msk.bf16.vlgmr.msra.gmra.mrb[28].mxu1 %vm233_vm5, %v589_v2 }
 0x126   :  { %857 = vmatpush3.bf16.msra.mxu1 %v1037_v51  ;;  %858 = vmatprep.mubr.msk.bf16.mxu1 %vm869_vm2, %v867_v0 }
 0x12d   :  { %859 = vmatmul.mubr.msk.bf16.vlgmr.msra.gmra.mrb[32].mxu1 %vm233_vm5, %v641_v10 }
 0x1c0   :  { %v275_v49 = vpop.f32.mrb[0].mxu1 }
 0x1c1   :  { %v812_v11 = vpop.f32.mrb[1].mxu1 }
 0x1c2   :  { %v278_v12 = vpop.f32.mrb[2].mxu1 }
 0x1c3   :  { %v813_v13 = vpop.f32.mrb[3].mxu1 }
 0x1c8   :  { %v322_v14 = vpop.f32.mrb[4].mxu1 }
 0x1c9   :  { %v323_v52 = vadd.f32 %v322_v14, %v275_v49  ;;  %v818_v15 = vpop.f32.mrb[5].mxu1 }
 0x1ca   :  { %v325_v16 = vpop.f32.mrb[6].mxu1 }
 0x1cb   :  { %v326_v17 = vadd.f32 %v325_v16, %v278_v12  ;;  %v819_v18 = vpop.f32.mrb[7].mxu1 }
 0x1d0   :  { %v372_v19 = vpop.f32.mrb[8].mxu1 }
 0x1d1   :  { %v379_v20 = vadd.f32 %v372_v19, %v323_v52  ;;  %v824_v21 = vpop.f32.mrb[9].mxu1 }
 0x1d2   :  { %v375_v22 = vpop.f32.mrb[10].mxu1 }
 0x1d3   :  { %v380_v51 = vadd.f32 %v375_v22, %v326_v17  ;;  %v825_v23 = vpop.f32.mrb[11].mxu1 }
 0x1d8   :  { %v424_v24 = vpop.f32.mrb[12].mxu1 }
 0x1d9   :  { %v431_v0 = vadd.f32 %v424_v24, %v379_v20  ;;  %v830_v25 = vpop.f32.mrb[13].mxu1 }
 0x1da   :  { %v427_v26 = vpop.f32.mrb[14].mxu1 }
 0x1db   :  { %v432_v27 = vadd.f32 %v427_v26, %v380_v51  ;;  %v831_v28 = vpop.f32.mrb[15].mxu1 }
 0x1e0   :  { %v476_v29 = vpop.f32.mrb[16].mxu1 }
 0x1e1   :  { %v483_v30 = vadd.f32 %v476_v29, %v431_v0  ;;  %v836_v31 = vpop.f32.mrb[17].mxu1 }
 0x1e2   :  { %v479_v32 = vpop.f32.mrb[18].mxu1 }
 0x1e3   :  { %v484_v33 = vadd.f32 %v479_v32, %v432_v27  ;;  %v837_v34 = vpop.f32.mrb[19].mxu1 }
 0x1e8   :  { %v528_v35 = vpop.f32.mrb[20].mxu1 }
 0x1e9   :  { %v535_v36 = vadd.f32 %v528_v35, %v483_v30  ;;  %v842_v37 = vpop.f32.mrb[21].mxu1 }
 0x1ea   :  { %v531_v38 = vpop.f32.mrb[22].mxu1 }
 0x1eb   :  { %v536_v39 = vadd.f32 %v531_v38, %v484_v33  ;;  %v843_v40 = vpop.f32.mrb[23].mxu1 }
 0x1f0   :  { %v580_v41 = vpop.f32.mrb[24].mxu1 }
 0x1f1   :  { %v587_v42 = vadd.f32 %v580_v41, %v535_v36  ;;  %v848_v44 = vpop.f32.mrb[25].mxu1 }
 0x1f2   :  { %v583_v46 = vpop.f32.mrb[26].mxu1 }
 0x1f3   :  { %v588_v48 = vadd.f32 %v583_v46, %v536_v39  ;;  %v849_v50 = vpop.f32.mrb[27].mxu1 }
 0x1f8   :  { %v632_v43 = vpop.f32.mrb[28].mxu1 }
 0x1f9   :  { %v639_v53 = vadd.f32 %v632_v43, %v587_v42  ;;  %v854_v54 = vpop.f32.mrb[29].mxu1 }
 0x1fa   :  { %v635_v55 = vpop.f32.mrb[30].mxu1 }
 0x1fb   :  { %v640_v56 = vadd.f32 %v635_v55, %v588_v48  ;;  %v855_v57 = vpop.f32.mrb[31].mxu1 }
 0x200   :  { %v684_v58 = vpop.f32.mrb[32].mxu1 }
 0x201   :  { %v691_v60 = vadd.f32 %v684_v58, %v639_v53  ;;  %v860_v45 = vpop.f32.mrb[33].mxu1 }
 0x202   :  { %v687_v61 = vpop.f32.mrb[34].mxu1 }
 0x203   :  { %v700_v62 = vadd.f32 %v738_v59, %v691_v60  ;;  %v692_v63 = vadd.f32 %v687_v61, %v640_v56  ;;  %v861_v1 = vpop.f32.mrb[35].mxu1 }
 0x205   :  { %703 = vst.msk [vmem:[%s1113_s5] sm:$0xff] %vm702_vm6, %v700_v62  ;;  %v701_v2 = vadd.f32 %v738_v59, %v692_v63 }
 0x207   :  { %704 = vst.msk [vmem:[%s1113_s5 + $0x8] sm:$0xff] %vm702_vm6, %v701_v2 }

// kernel: mcil_forward.7
= control target key start
LH: loop header
LB: loop body
LE: loop exit
PB: predicated region body
PF: predicated region fallthrough
CT: control target
= control target key end

     0   :  { %v1530_v0 = vmov 0.0   ;;  %vm1531_vm0 = vmmov 0   ;;  %vm100_vm1 = vcmask 392192   ;;  %vm198_vm2 = vcmask 261120   ;;  %s1532_s30 = smov 112   ;;  %s1535_s24 = smov 64   ;;  %s1875_s4 = inlined_call_operand.vmem [shape: bf16[48,32], index: 4, kind: input, shape index: {}]   ;;  %s1876_s0 = inlined_call_operand.vmem [shape: f32[16,48], index: 0, kind: input, shape index: {}]   ;;  %s1877_s6 = inlined_call_operand.vmem [shape: bf16[32,96], index: 6, kind: input, shape index: {}]   ;;  %s1878_s5 = inlined_call_operand.vmem [shape: f32[1,32], index: 5, kind: input, shape index: {}]   ;;  %s1879_s1 = inlined_call_operand.vmem [shape: f32[16,32], index: 1, kind: input, shape index: {}]   ;;  %s1880_s7 = inlined_call_operand.vmem [shape: f32[1,96], index: 7, kind: input, shape index: {}]   ;;  %s1881_s2 = inlined_call_operand.vmem [shape: f32[2,8,8], index: 2, kind: input, shape index: {}]   ;;  %s1882_s8 = inlined_call_operand.vmem [shape: bf16[32,32], index: 8, kind: input, shape index: {}]   ;;  %s1883_s9 = inlined_call_operand.vmem [shape: f32[1,32], index: 9, kind: input, shape index: {}]   ;;  %s1884_s12 = inlined_call_operand.vmem [shape: bf16[32,64], index: 12, kind: input, shape index: {}]   ;;  %s1885_s14 = inlined_call_operand.vmem [shape: bf16[64,32], index: 14, kind: input, shape index: {}]   ;;  %s1886_s10 = inlined_call_operand.vmem [shape: f32[1,32], index: 10, kind: input, shape index: {}]   ;;  %s1887_s11 = inlined_call_operand.vmem [shape: f32[1,32], index: 11, kind: input, shape index: {}]   ;;  %s1888_s13 = inlined_call_operand.vmem [shape: f32[1,64], index: 13, kind: input, shape index: {}]   ;;  %s1889_s15 = inlined_call_operand.vmem [shape: f32[1,32], index: 15, kind: input, shape index: {}]   ;;  %s1890_s18 = inlined_call_operand.vmem [shape: bf16[32,16], index: 18, kind: input, shape index: {}]   ;;  %s1891_s16 = inlined_call_operand.vmem [shape: f32[1,32], index: 16, kind: input, shape index: {}]   ;;  %s1892_s17 = inlined_call_operand.vmem [shape: f32[1,32], index: 17, kind: input, shape index: {}]   ;;  %s1893_s3 = inlined_call_operand.vmem [shape: f32[2,16], index: 3, kind: input, shape index: {}]   ;;  %s1894_s19 = inlined_call_operand.vmem [shape: f32[1,16], index: 19, kind: input, shape index: {}]   ;;  %s1895_s20 = inlined_call_operand.vmem [shape: f32[2,16], index: 20, kind: output, shape index: {}]  }
   0x1   :  { %1900 = sst [smem:[#allocation2_spill]] %s1875_s4  ;;  %1355 = vmatprep.subr.bf16.mxu0 %v1530_v0  ;;  %1361 = vmatprep.mubr.msk.bf16.mxu0 %vm1531_vm0, %v1530_v0  ;;  %v1272_v21 = vld [vmem:[%s1880_s7] ss:$0 sm:$0xff]  ;;  %s1533_s4 = smov 96   ;;  %vm247_vm3 = vcmask 130048   ;;  %vm452_vm4 = vcmask 64512  }
   0x2   :  { %1901 = sst [smem:[#allocation3_spill]] %s1876_s0  ;;  %s1905_s23 = sld [smem:[#allocation2_spill]]  ;;  %1365 = vmatprep.subr.bf16.mxu1 %v1530_v0  ;;  %1369 = vmatprep.mubr.msk.bf16.mxu1 %vm1531_vm0, %v1530_v0  ;;  %v149_v41 = vld [vmem:[%s1881_s2] sm:$0xff]  ;;  %v150_v63 = vld [vmem:[%s1881_s2 + $0x8] sm:$0xff]  ;;  %vm503_vm5 = vcmask 1043456   ;;  %vm1031_vm6 = vcmask 523264  }
   0x3   :  { %1902 = sst [smem:[#allocation4_spill]] %s1877_s6  ;;  %s1906_s28 = sld [smem:[#allocation3_spill]]  ;;  %vm1261_vm7 = vcmask 123904  }
   0x4   :  { %1903 = sst [smem:[#allocation5_spill]] %s1878_s5  ;;  %s1907_s21 = sld [smem:[#allocation4_spill]] }
   0x5   :  { %1904 = sst [smem:[#allocation6_spill]] %s1879_s1  ;;  %s1908_s6 = sld [smem:[#allocation5_spill]] }
   0x6   :  { %s1909_s26 = sld [smem:[#allocation6_spill]]  ;;  %s1536_s2 = smov 48  }
   0x8   :  { %v1491_v1 = vld [vmem:[%s1905_s23] sm:$0xff]   ;;  %v1492_v2 = vld [vmem:[%s1905_s23 + $0x8] sm:$0xff]   ;;  %v1493_v3 = vld [vmem:[%s1905_s23 + $0x10] sm:$0xff]  }
   0x9   :  { %1356 = vmatpush3.bf16.msra.mxu0 %v1491_v1  ;;  %v66_v4 = vld [vmem:[%s1906_s28] sm:$0xff]  ;;  %v67_v5 = vld [vmem:[%s1906_s28 + $0x8] sm:$0xff] }
   0xa   :  { %1357 = vmatprep.subr.bf16.mxu0 %v1530_v0  ;;  %v68_v6 = vpack.c.bf16 %v67_v5, %v66_v4  ;;  %v1494_v7 = vld [vmem:[%s1907_s21] sm:$0xff]   ;;  %v1495_v8 = vld [vmem:[%s1907_s21 + $0x8] sm:$0xff]   ;;  %s1534_s21 = smov 80  }
   0xb   :  { %1366 = vmatpush3.bf16.msra.mxu1 %v1494_v7  ;;  %v1267_v9 = vld [vmem:[%s1908_s6] ss:$0 sm:$0xff] }
   0xc   :  { %1367 = vmatprep.subr.bf16.mxu1 %v1530_v0  ;;  %v145_v13 = vld [vmem:[%s1909_s26] sm:$0xff]  ;;  %v146_v15 = vld [vmem:[%s1909_s26 + $0x8] sm:$0xff] }
   0xd   :  { %1358 = vmatpush3.bf16.msra.mxu0 %v1492_v2 }
   0xe   :  { %1359 = vmatprep.subr.bf16.mxu0 %v1530_v0 }
   0xf   :  { %1368 = vmatpush3.bf16.msra.mxu1 %v1495_v8 }
  0x10   :  { %1373 = vmatprep.subr.bf16.mxu1 %v1530_v0 }
  0x11   :  { %1360 = vmatpush3.bf16.msra.mxu0 %v1493_v3 }
  0x12   :  { %1379 = vmatprep.subr.bf16.mxu0 %v1530_v0 }
  0x14   :  { %1362 = vmatmul.mubr.msk.bf16.vlgmr.msra.gmra.mrb[0].mxu0 %vm100_vm1, %v68_v6 }
  0x15   :  { %1381 = vmatprep.mubr.msk.bf16.mxu0 %vm1531_vm0, %v1530_v0 }
  0xe7   :  { %v138_v10 = vpop.f32.mrb[0].mxu0 }
  0xe8   :  { %v139_v11 = vadd.f32 %v1267_v9, %v138_v10  ;;  %v1363_v12 = vpop.f32.mrb[1].mxu0 }
  0xe9   :  { %v141_v14 = vpop.f32.mrb[2].mxu0 }
  0xea   :  { %v142_v16 = vadd.f32 %v1267_v9, %v141_v14  ;;  %v1364_v17 = vpop.f32.mrb[3].mxu0  ;;  %v1686_v18 = vadd.f32 %v145_v13, %v139_v11 }
  0xec   :  { %v1688_v19 = vadd.f32 %v146_v15, %v142_v16 }
  0xee   :  { %v179_v20 = vpack.c.bf16 %v1688_v19, %v1686_v18 }
  0xf0   :  { %1370 = vmatmul.mubr.msk.bf16.vlgmr.msra.gmra.mrb[0].mxu1 %vm198_vm2, %v179_v20 }
  0xf1   :  { %1375 = vmatprep.mubr.msk.bf16.mxu1 %vm1531_vm0, %v1530_v0 }
 0x1c3   :  { %v236_v22 = vpop.f32.mrb[0].mxu1 }
 0x1c4   :  { %v237_v23 = vadd.f32 %v1272_v21, %v236_v22  ;;  %v1371_v24 = vpop.f32.mrb[1].mxu1 }
 0x1c5   :  { %v239_v25 = vpop.f32.mrb[2].mxu1 }
 0x1c6   :  { %v1698_v26 = vpack.c.bf16 %v237_v23, %v237_v23  ;;  %v240_v27 = vadd.f32 %v1272_v21, %v239_v25  ;;  %v1372_v28 = vpop.f32.mrb[3].mxu1 }
 0x1c8   :  { %296 = vrot.lane.b32.xlu1 %v1698_v26, %s1532_s30  ;;  %245 = vrot.lane.b32.xlu0 %v1698_v26, %s1533_s4  ;;  %v1702_v29 = vpack.c.bf16 %v240_v27, %v240_v27 }
 0x1cc   :  { %298 = vrot.lane.b32.xlu0 %v1698_v26, %s1534_s21  ;;  %350 = vrot.lane.b32.xlu1 %v1702_v29, %s1533_s4 }
 0x1d0   :  { %402 = vrot.lane.b32.xlu0 %v1702_v29, %s1534_s21  ;;  %400 = vrot.lane.b32.xlu1 %v1702_v29, %s1532_s30 }
 0x23a   :  { %v297_v30 = vpop.permute.xlu1 %296  ;;  %v246_v31 = vpop.permute.xlu0 %245 }
 0x23b   :  { %v252_v32 = vsel %vm247_vm3, %v246_v31, 0 }
 0x23c   :  { %1374 = vmatpush3.bf16.xpose.msra.mxu1 %v252_v32 }
 0x23d   :  { %1385 = vmatprep.subr.bf16.mxu1 %v1530_v0 }
 0x23e   :  { %v299_v33 = vpop.permute.xlu0 %298  ;;  %v351_v35 = vpop.permute.xlu1 %350 }
 0x23f   :  { %v304_v34 = vsel %vm247_vm3, %v299_v33, 0  ;;  %v356_v36 = vsel %vm247_vm3, %v351_v35, 0 }
 0x240   :  { %1380 = vmatpush3.bf16.xpose.msra.mxu0 %v304_v34 }
 0x241   :  { %1391 = vmatprep.subr.bf16.mxu0 %v1530_v0 }
 0x242   :  { %v403_v37 = vpop.permute.xlu0 %402  ;;  %v401_v39 = vpop.permute.xlu1 %400 }
 0x243   :  { %1376 = vmatmul.mubr.msk.bf16.vlgmr.msra.gmra.mrb[4].mxu1 %vm247_vm3, %v1698_v26  ;;  %v408_v38 = vsel %vm247_vm3, %v403_v37, 0 }
 0x244   :  { %1386 = vmatpush3.bf16.xpose.msra.mxu1 %v356_v36  ;;  %1387 = vmatprep.mubr.msk.bf16.mxu1 %vm1531_vm0, %v1530_v0 }
 0x245   :  { %1397 = vmatprep.subr.bf16.mxu1 %v1530_v0 }
 0x247   :  { %1382 = vmatmul.mubr.msk.bf16.vlgmr.msra.gmra.mrb[4].mxu0 %vm247_vm3, %v297_v30 }
 0x248   :  { %1392 = vmatpush3.bf16.xpose.msra.mxu0 %v408_v38  ;;  %1393 = vmatprep.mubr.msk.bf16.mxu0 %vm1531_vm0, %v1530_v0 }
 0x249   :  { %1403 = vmatprep.subr.bf16.mxu0 %v1530_v0 }
 0x24b   :  { %1388 = vmatmul.mubr.msk.bf16.vlgmr.msra.gmra.mrb[8].mxu1 %vm247_vm3, %v1702_v29 }
 0x24c   :  { %1399 = vmatprep.mubr.msk.bf16.mxu1 %vm1531_vm0, %v1530_v0 }
 0x24f   :  { %1394 = vmatmul.mubr.msk.bf16.vlgmr.msra.gmra.mrb[8].mxu0 %vm247_vm3, %v401_v39 }
 0x250   :  { %1405 = vmatprep.mubr.msk.bf16.mxu0 %vm1531_vm0, %v1530_v0 }
 0x316   :  { %v288_v40 = vpop.f32.mrb[4].mxu1 }
 0x317   :  { %v294_v42 = vmul.f32 0.25, %v288_v40  ;;  %v1377_v43 = vpop.f32.mrb[5].mxu1 }
 0x318   :  { %v291_v44 = vpop.f32.mrb[6].mxu1  ;;  %v1497_v43 = vld [vmem:[%s1882_s8 + $0x8] sm:$0xff]  }
 0x319   :  { %v1378_v45 = vpop.f32.mrb[7].mxu1  ;;  %v295_v46 = vadd.f32 %v294_v42, %v149_v41  ;;  %v1496_v42 = vld [vmem:[%s1882_s8] sm:$0xff]  }
 0x31a   :  { %v340_v47 = vpop.f32.mrb[4].mxu0 }
 0x31b   :  { %v346_v48 = vmul.f32 0.25, %v340_v47  ;;  %v1383_v49 = vpop.f32.mrb[5].mxu0  ;;  %v453_v50 = vsel %vm452_vm4, %v295_v46, -inf }
 0x31c   :  { %454 = vmax.xlane.f32.xlu0 %v453_v50  ;;  %v343_v51 = vpop.f32.mrb[6].mxu0 }
 0x31d   :  { %v1384_v52 = vpop.f32.mrb[7].mxu0  ;;  %v347_v53 = vadd.f32 %v346_v48, %v149_v41 }
 0x31e   :  { %v392_v54 = vpop.f32.mrb[8].mxu1 }
 0x31f   :  { %v1389_v55 = vpop.f32.mrb[9].mxu1  ;;  %v456_v56 = vsel %vm452_vm4, %v347_v53, -inf  ;;  %v398_v3 = vmul.f32 0.25, %v392_v54 }
 0x320   :  { %v395_v57 = vpop.f32.mrb[10].mxu1  ;;  %457 = vmax.xlane.f32.xlu1 %v456_v56 }
 0x321   :  { %v1390_v58 = vpop.f32.mrb[11].mxu1  ;;  %v399_v4 = vadd.f32 %v398_v3, %v150_v63 }
 0x322   :  { %v444_v59 = vpop.f32.mrb[8].mxu0 }
 0x323   :  { %v450_v60 = vmul.f32 0.25, %v444_v59  ;;  %v1395_v61 = vpop.f32.mrb[9].mxu0  ;;  %v459_v5 = vsel %vm452_vm4, %v399_v4, -inf }
 0x324   :  { %v447_v62 = vpop.f32.mrb[10].mxu0 }
 0x325   :  { %v1396_v1 = vpop.f32.mrb[11].mxu0  ;;  %v451_v2 = vadd.f32 %v450_v60, %v150_v63 }
 0x327   :  { %v462_v25 = vsel %vm452_vm4, %v451_v2, -inf }
 0x331   :  { %498 = vrot.lane.b32.xlu1 %v1698_v26, %s1535_s24 }
 0x355   :  { %460 = vmax.xlane.f32.xlu1 %v459_v5 }
 0x3a9   :  { %v455_v6 = vpop.xlane.xlu0 %454 }
 0x3aa   :  { %v465_v7 = vsub.f32 %v295_v46, %v455_v6  ;;  %v1290_v6 = vld [vmem:[%s1883_s9] ss:$0 sm:$0xff] }
 0x3ac   :  { %v469_v8 = vmul.f32 1.442695, %v465_v7 }
 0x3ad   :  { %v458_v9 = vpop.xlane.xlu1 %457 }
 0x3ae   :  { %1506 = vpow2.f32 %v469_v8  ;;  %v466_v10 = vsub.f32 %v347_v53, %v458_v9 }
 0x3b0   :  { %v471_v11 = vmul.f32 1.442695, %v466_v10 }
 0x3b1   :  { %v499_v12 = vpop.permute.xlu1 %498 }
 0x3b2   :  { %1508 = vpow2.f32 %v471_v11  ;;  %v505_v13 = vsel %vm503_vm5, %v499_v12, 0 }
 0x3b3   :  { %1398 = vmatpush3.bf16.msra.mxu1 %v505_v13 }
 0x3b4   :  { %1409 = vmatprep.subr.bf16.mxu1 %v1530_v0 }
 0x3b8   :  { %v1507_v14 = vpop.eup %1506 }
 0x3b9   :  { %v477_v15 = vsel %vm452_vm4, %v1507_v14, 0.0 }
 0x3ba   :  { %478 = vadd.xlane.f32.xlu0 %v477_v15 }
 0x3bc   :  { %v1509_v16 = vpop.eup %1508 }
 0x3bd   :  { %v480_v17 = vsel %vm452_vm4, %v1509_v16, 0.0 }
 0x3be   :  { %481 = vadd.xlane.f32.xlu0 %v480_v17 }
 0x3d4   :  { %549 = vrot.lane.b32.xlu0 %v1698_v26, %s1536_s2 }
 0x3e2   :  { %v461_v20 = vpop.xlane.xlu1 %460 }
 0x3e3   :  { %v467_v21 = vsub.f32 %v399_v4, %v461_v20 }
 0x3e5   :  { %v473_v22 = vmul.f32 1.442695, %v467_v21 }
 0x3e7   :  { %1510 = vpow2.f32 %v473_v22 }
 0x3f1   :  { %v1747_v23 = vpop.eup %1510 }
 0x3f2   :  { %v483_v24 = vsel %vm452_vm4, %v1747_v23, 0.0 }
 0x3f3   :  { %484 = vadd.xlane.f32.xlu1 %v483_v24  ;;  %463 = vmax.xlane.f32.xlu0 %v462_v25 }
 0x404   :  { %697 = vrot.lane.b32.xlu1 %v1702_v29, %s1535_s24 }
 0x447   :  { %v479_v27 = vpop.xlane.xlu0 %478 }
 0x448   :  { %1512 = vrcp.f32 %v479_v27 }
 0x44b   :  { %v482_v28 = vpop.xlane.xlu0 %481 }
 0x44c   :  { %1514 = vrcp.f32 %v482_v28 }
 0x44f   :  { %v550_v26 = vpop.permute.xlu0 %549 }
 0x450   :  { %v555_v30 = vsel %vm503_vm5, %v550_v26, 0 }
 0x451   :  { %1404 = vmatpush3.bf16.msra.mxu0 %v555_v30 }
 0x452   :  { %v1513_v31 = vpop.eup %1512  ;;  %1415 = vmatprep.subr.bf16.mxu0 %v1530_v0 }
 0x453   :  { %v493_v32 = vmul.f32 %v1513_v31, %v1507_v14 }
 0x455   :  { %v497_v33 = vpack.c.bf16 %v493_v32, %v493_v32 }
 0x456   :  { %v1515_v34 = vpop.eup %1514 }
 0x457   :  { %v494_v35 = vmul.f32 %v1515_v34, %v1509_v16  ;;  %1400 = vmatmul.mubr.msk.bf16.vlgmr.msra.gmra.mrb[12].mxu1 %vm452_vm4, %v497_v33 }
 0x458   :  { %1411 = vmatprep.mubr.msk.bf16.mxu1 %vm1531_vm0, %v1530_v0  ;;  %1410 = vmatpush3.bf16.msra.mxu1 %v1497_v43 }
 0x459   :  { %v548_v36 = vpack.c.bf16 %v494_v35, %v494_v35  ;;  %1421 = vmatprep.subr.bf16.mxu1 %v1530_v0 }
 0x45b   :  { %1406 = vmatmul.mubr.msk.bf16.vlgmr.msra.gmra.mrb[12].mxu0 %vm452_vm4, %v548_v36 }
 0x45c   :  { %1417 = vmatprep.mubr.msk.bf16.mxu0 %vm1531_vm0, %v1530_v0  ;;  %1416 = vmatpush3.bf16.msra.mxu0 %v1496_v42 }
 0x45d   :  { %1427 = vmatprep.subr.bf16.mxu0 %v1530_v0 }
 0x480   :  { %v464_v37 = vpop.xlane.xlu0 %463  ;;  %v485_v45 = vpop.xlane.xlu1 %484 }
 0x481   :  { %v468_v38 = vsub.f32 %v451_v2, %v464_v37 }
 0x483   :  { %v475_v39 = vmul.f32 1.442695, %v468_v38 }
 0x484   :  { %v698_v53 = vpop.permute.xlu1 %697 }
 0x485   :  { %1516 = vpow2.f32 %v475_v39  ;;  %v703_v60 = vsel %vm503_vm5, %v698_v53, 0 }
 0x48f   :  { %v1517_v40 = vpop.eup %1516 }
 0x490   :  { %v486_v41 = vsel %vm452_vm4, %v1517_v40, 0.0 }
 0x491   :  { %487 = vadd.xlane.f32.xlu0 %v486_v41 }
 0x4a7   :  { %747 = vrot.lane.b32.xlu0 %v1702_v29, %s1536_s2 }
 0x51e   :  { %v488_v44 = vpop.xlane.xlu0 %487 }
 0x51f   :  { %1518 = vrcp.f32 %v488_v44 }
 0x520   :  { %1520 = vrcp.f32 %v485_v45 }
 0x522   :  { %v748_v46 = vpop.permute.xlu0 %747 }
 0x523   :  { %v753_v51 = vsel %vm503_vm5, %v748_v46, 0 }
 0x529   :  { %v1519_v49 = vpop.eup %1518 }
 0x52a   :  { %v541_v29 = vpop.f32.mrb[12].mxu1  ;;  %v496_v55 = vmul.f32 %v1519_v49, %v1517_v40  ;;  %v1521_v58 = vpop.eup %1520  ;;  %v1499_v49 = vld [vmem:[%s1884_s12 + $0x8] sm:$0xff]  }
 0x52b   :  { %v547_v47 = vpack.c.bf16 %v541_v29, %v541_v29  ;;  %v1401_v48 = vpop.f32.mrb[13].mxu1  ;;  %v495_v62 = vmul.f32 %v1521_v58, %v1747_v23 }
 0x52c   :  { %v544_v50 = vpop.f32.mrb[14].mxu1  ;;  %v746_v63 = vpack.c.bf16 %v496_v55, %v496_v55  ;;  %v1498_v48 = vld [vmem:[%s1884_s12] sm:$0xff]  }
 0x52d   :  { %v1402_v52 = vpop.f32.mrb[15].mxu1  ;;  %1418 = vmatmul.mubr.msk.bf16.vlgmr.msra.gmra.mrb[16].mxu0 %vm247_vm3, %v547_v47  ;;  %v696_v1 = vpack.c.bf16 %v495_v62, %v495_v62  ;;  %v1501_v50 = vld [vmem:[%s1885_s14 + $0x8] sm:$0xff]  }
 0x52e   :  { %1428 = vmatpush3.bf16.msra.mxu0 %v753_v51  ;;  %v591_v54 = vpop.f32.mrb[12].mxu0  ;;  %1429 = vmatprep.mubr.msk.bf16.mxu0 %vm1531_vm0, %v1530_v0 }
 0x52f   :  { %v597_v56 = vpack.c.bf16 %v591_v54, %v591_v54  ;;  %v1407_v57 = vpop.f32.mrb[13].mxu0  ;;  %1439 = vmatprep.subr.bf16.mxu0 %v1530_v0 }
 0x530   :  { %v594_v59 = vpop.f32.mrb[14].mxu0 }
 0x531   :  { %v1408_v61 = vpop.f32.mrb[15].mxu0  ;;  %1412 = vmatmul.mubr.msk.bf16.vlgmr.msra.gmra.mrb[16].mxu1 %vm247_vm3, %v597_v56  ;;  %v1291_v59 = vld [vmem:[%s1886_s10] ss:$0 sm:$0xff] }
 0x532   :  { %1422 = vmatpush3.bf16.msra.mxu1 %v703_v60  ;;  %1423 = vmatprep.mubr.msk.bf16.mxu1 %vm1531_vm0, %v1530_v0 }
 0x533   :  { %1433 = vmatprep.subr.bf16.mxu1 %v1530_v0 }
 0x535   :  { %1430 = vmatmul.mubr.msk.bf16.vlgmr.msra.gmra.mrb[20].mxu0 %vm452_vm4, %v746_v63  ;;  %v1292_v63 = vld [vmem:[%s1887_s11] ss:$0 sm:$0xff] }
 0x536   :  { %1440 = vmatpush3.bf16.msra.mxu0 %v1496_v42  ;;  %1441 = vmatprep.mubr.msk.bf16.mxu0 %vm1531_vm0, %v1530_v0 }
 0x537   :  { %1453 = vmatprep.subr.bf16.mxu0 %v1530_v0 }
 0x539   :  { %1424 = vmatmul.mubr.msk.bf16.vlgmr.msra.gmra.mrb[20].mxu1 %vm452_vm4, %v696_v1 }
 0x53a   :  { %1434 = vmatpush3.bf16.msra.mxu1 %v1497_v43  ;;  %1435 = vmatprep.mubr.msk.bf16.mxu1 %vm1531_vm0, %v1530_v0 }
 0x53b   :  { %1445 = vmatprep.subr.bf16.mxu1 %v1530_v0 }
 0x600   :  { %v690_v2 = vpop.f32.mrb[16].mxu0 }
 0x601   :  { %v1419_v3 = vpop.f32.mrb[17].mxu0 }
 0x602   :  { %v693_v4 = vpop.f32.mrb[18].mxu0 }
 0x603   :  { %v1420_v5 = vpop.f32.mrb[19].mxu0 }
 0x604   :  { %v641_v7 = vpop.f32.mrb[16].mxu1  ;;  %v1502_v5 = vld [vmem:[%s1885_s14 + $0x10] sm:$0xff]  }
 0x605   :  { %v691_v8 = vadd.f32 %v690_v2, %v641_v7  ;;  %v1413_v9 = vpop.f32.mrb[17].mxu1  ;;  %v1293_v7 = vld [vmem:[%s1888_s13] ss:$0 sm:$0xff] }
 0x606   :  { %v644_v10 = vpop.f32.mrb[18].mxu1 }
 0x607   :  { %v888_v11 = vadd.f32 %v1290_v6, %v691_v8  ;;  %v1414_v12 = vpop.f32.mrb[19].mxu1 }
 0x608   :  { %v789_v13 = vpop.f32.mrb[20].mxu0 }
 0x609   :  { %v795_v14 = vpack.c.bf16 %v789_v13, %v789_v13  ;;  %v1431_v15 = vpop.f32.mrb[21].mxu0  ;;  %v890_v16 = vadd.f32 %v888_v11, %v1686_v18 }
 0x60a   :  { %v792_v17 = vpop.f32.mrb[22].mxu0 }
 0x60b   :  { %v1432_v20 = vpop.f32.mrb[23].mxu0  ;;  %1436 = vmatmul.mubr.msk.bf16.vlgmr.msra.gmra.mrb[24].mxu1 %vm247_vm3, %v795_v14  ;;  %v892_v21 = vsel %vm198_vm2, %v890_v16, 0.0  ;;  %v1297_v17 = vld [vmem:[%s1889_s15] ss:$0 sm:$0xff] }
 0x60c   :  { %v739_v22 = vpop.f32.mrb[20].mxu1  ;;  %893 = vadd.xlane.f32.xlu1 %v892_v21  ;;  %1449 = vmatprep.mubr.msk.bf16.mxu1 %vm1531_vm0, %v1530_v0 }
 0x60d   :  { %v745_v23 = vpack.c.bf16 %v739_v22, %v739_v22  ;;  %v1425_v24 = vpop.f32.mrb[21].mxu1  ;;  %1446 = vmatpush3.bf16.msra.mxu1 %v1498_v48 }
 0x60e   :  { %v742_v25 = vpop.f32.mrb[22].mxu1  ;;  %1447 = vmatprep.subr.bf16.mxu1 %v1530_v0 }
 0x60f   :  { %v1426_v27 = vpop.f32.mrb[23].mxu1  ;;  %1442 = vmatmul.mubr.msk.bf16.vlgmr.msra.gmra.mrb[24].mxu0 %vm247_vm3, %v745_v23 }
 0x610   :  { %1461 = vmatprep.mubr.msk.bf16.mxu0 %vm1531_vm0, %v1530_v0 }
 0x611   :  { %1448 = vmatpush3.bf16.msra.mxu1 %v1499_v49 }
 0x699   :  { %v894_v18 = vpop.xlane.xlu1 %893 }
 0x69a   :  { %v899_v28 = vmul.f32 0.03125, %v894_v18 }
 0x69c   :  { %v901_v26 = vsub.f32 %v890_v16, %v899_v28 }
 0x69e   :  { %v903_v30 = vmul.f32 %v901_v26, %v901_v26 }
 0x6a0   :  { %v905_v31 = vsel %vm198_vm2, %v903_v30, 0.0 }
 0x6a1   :  { %906 = vadd.xlane.f32.xlu1 %v905_v31 }
 0x6de   :  { %v833_v32 = vpop.f32.mrb[24].mxu1 }
 0x6df   :  { %v1437_v33 = vpop.f32.mrb[25].mxu1 }
 0x6e0   :  { %v836_v34 = vpop.f32.mrb[26].mxu1 }
 0x6e1   :  { %v1438_v35 = vpop.f32.mrb[27].mxu1 }
 0x6e2   :  { %v876_v36 = vpop.f32.mrb[24].mxu0 }
 0x6e3   :  { %v877_v37 = vadd.f32 %v876_v36, %v833_v32  ;;  %v1443_v38 = vpop.f32.mrb[25].mxu0 }
 0x6e4   :  { %v879_v39 = vpop.f32.mrb[26].mxu0 }
 0x6e5   :  { %v889_v40 = vadd.f32 %v1290_v6, %v877_v37  ;;  %v1444_v41 = vpop.f32.mrb[27].mxu0  ;;  %v1503_v6 = vld [vmem:[%s1885_s14 + $0x18] sm:$0xff]  }
 0x6e7   :  { %v891_v42 = vadd.f32 %v889_v40, %v1688_v19  ;;  %v1500_v19 = vld [vmem:[%s1885_s14] sm:$0xff]   ;;  %v1537_v40 = vmov 0.0|0.0  }
 0x6e8   :  { %1454 = vmatpush3.bf16.msra.mxu0 %v1500_v19  ;;  %1480 = vmatprep.subr.bf16.mxu1 %v1537_v40 }
 0x6e9   :  { %v895_v43 = vsel %vm198_vm2, %v891_v42, 0.0  ;;  %1455 = vmatprep.subr.bf16.mxu0 %v1530_v0 }
 0x6ea   :  { %896 = vadd.xlane.f32.xlu0 %v895_v43 }
 0x6ec   :  { %1456 = vmatpush3.bf16.msra.mxu0 %v1501_v50 }
 0x6ed   :  { %1457 = vmatprep.subr.bf16.mxu0 %v1530_v0 }
 0x6f0   :  { %1458 = vmatpush3.bf16.msra.mxu0 %v1502_v5 }
 0x6f1   :  { %1459 = vmatprep.subr.bf16.mxu0 %v1530_v0 }
 0x6f4   :  { %1460 = vmatpush3.bf16.msra.mxu0 %v1503_v6 }
 0x72e   :  { %v907_v51 = vpop.xlane.xlu1 %906 }
 0x72f   :  { %v911_v52 = vmul.f32 0.03125, %v907_v51  ;;  %v1304_v51 = vld [vmem:[%s1892_s17] ss:$0 sm:$0xff] }
 0x731   :  { %v913_v53 = vadd.f32 1e-05, %v911_v52 }
 0x733   :  { %1522 = vrsqrt.f32 %v913_v53 }
 0x73d   :  { %v1523_v57 = vpop.eup %1522 }
 0x73e   :  { %v917_v58 = vmul.f32 %v1523_v57, %v901_v26  ;;  %v1504_v57 = vld [vmem:[%s1890_s18] sm:$0xff]  }
 0x740   :  { %v925_v61 = vmul.f32 %v1291_v59, %v917_v58  ;;  %v1505_v58 = vld [vmem:[%s1890_s18 + $0x8] sm:$0xff]  }
 0x742   :  { %v933_v2 = vadd.f32 %v1292_v63, %v925_v61 }
 0x777   :  { %v897_v44 = vpop.xlane.xlu0 %896 }
 0x778   :  { %v900_v45 = vmul.f32 0.03125, %v897_v44 }
 0x77a   :  { %v902_v46 = vsub.f32 %v891_v42, %v900_v45 }
 0x77c   :  { %v904_v29 = vmul.f32 %v902_v46, %v902_v46 }
 0x77e   :  { %v908_v47 = vsel %vm198_vm2, %v904_v29, 0.0 }
 0x77f   :  { %909 = vadd.xlane.f32.xlu0 %v908_v47  ;;  %v1303_v47 = vld [vmem:[%s1891_s16] ss:$0 sm:$0xff] }
 0x80c   :  { %v910_v54 = vpop.xlane.xlu0 %909 }
 0x80d   :  { %v912_v55 = vmul.f32 0.03125, %v910_v54 }
 0x80f   :  { %v914_v56 = vadd.f32 1e-05, %v912_v55 }
 0x811   :  { %1524 = vrsqrt.f32 %v914_v56  ;;  %v1120_v56 = vld [vmem:[%s1893_s3] sm:$0x3] }
 0x81b   :  { %v1525_v60 = vpop.eup %1524 }
 0x81c   :  { %v918_v62 = vmul.f32 %v1525_v60, %v902_v46 }
 0x81e   :  { %v926_v1 = vmul.f32 %v1291_v59, %v918_v62  ;;  %v1306_v62 = vld [vmem:[%s1894_s19] ss:$0 sm:$0xff] }
 0x820   :  { %v934_v3 = vadd.f32 %v1292_v63, %v926_v1 }
 0x822   :  { %v935_v4 = vpack.c.bf16 %v934_v3, %v933_v2 }
 0x824   :  { %1450 = vmatmul.mubr.msk.bf16.vlgmr.msra.gmra.mrb[28].mxu1 %vm198_vm2, %v935_v4 }
 0x825   :  { %1469 = vmatprep.mubr.msk.f32.mxu1 %vm1531_vm0, %v1530_v0 }
 0x8f7   :  { %v991_v8 = vpop.f32.mrb[28].mxu1 }
 0x8f8   :  { %v992_v9 = vadd.f32 %v1293_v7, %v991_v8  ;;  %v1451_v10 = vpop.f32.mrb[29].mxu1 }
 0x8f9   :  { %v994_v11 = vpop.f32.mrb[30].mxu1 }
 0x8fa   :  { %v995_v12 = vadd.f32 %v1293_v7, %v994_v11  ;;  %v1452_v13 = vpop.f32.mrb[31].mxu1  ;;  %v998_v14 = vmax.f32 %v992_v9, 0.0 }
 0x8fc   :  { %v999_v15 = vmax.f32 %v995_v12, 0.0 }
 0x8fe   :  { %v1000_v16 = vpack.c.bf16 %v999_v15, %v998_v14 }
 0x900   :  { %1462 = vmatmul.mubr.msk.bf16.vlgmr.msra.gmra.mrb[28].mxu0 %vm1031_vm6, %v1000_v16 }
 0x9d3   :  { %v1069_v20 = vpop.f32.mrb[28].mxu0 }
 0x9d4   :  { %v1070_v21 = vadd.f32 %v1297_v17, %v1069_v20  ;;  %v1463_v22 = vpop.f32.mrb[29].mxu0 }
 0x9d5   :  { %v1072_v23 = vpop.f32.mrb[30].mxu0 }
 0x9d6   :  { %v1073_v24 = vadd.f32 %v1297_v17, %v1072_v23  ;;  %v1464_v25 = vpop.f32.mrb[31].mxu0  ;;  %v1076_v27 = vadd.f32 %v1070_v21, %v933_v2 }
 0x9d8   :  { %v1078_v18 = vsel %vm198_vm2, %v1076_v27, 0.0  ;;  %v1077_v28 = vadd.f32 %v1073_v24, %v934_v3 }
 0x9d9   :  { %1079 = vadd.xlane.f32.xlu1 %v1078_v18 }
 0x9da   :  { %v1081_v26 = vsel %vm198_vm2, %v1077_v28, 0.0 }
 0x9db   :  { %1082 = vadd.xlane.f32.xlu0 %v1081_v26 }
 0xa66   :  { %v1080_v30 = vpop.xlane.xlu1 %1079 }
 0xa67   :  { %v1084_v31 = vmul.f32 0.03125, %v1080_v30 }
 0xa68   :  { %v1083_v32 = vpop.xlane.xlu0 %1082 }
 0xa69   :  { %v1086_v33 = vsub.f32 %v1076_v27, %v1084_v31  ;;  %v1085_v34 = vmul.f32 0.03125, %v1083_v32 }
 0xa6b   :  { %v1087_v35 = vsub.f32 %v1077_v28, %v1085_v34  ;;  %v1088_v36 = vmul.f32 %v1086_v33, %v1086_v33 }
 0xa6d   :  { %v1090_v37 = vsel %vm198_vm2, %v1088_v36, 0.0  ;;  %v1089_v38 = vmul.f32 %v1087_v35, %v1087_v35 }
 0xa6e   :  { %1091 = vadd.xlane.f32.xlu1 %v1090_v37 }
 0xa6f   :  { %v1093_v39 = vsel %vm198_vm2, %v1089_v38, 0.0 }
 0xa70   :  { %1094 = vadd.xlane.f32.xlu0 %v1093_v39 }
 0xafb   :  { %v1092_v41 = vpop.xlane.xlu1 %1091 }
 0xafc   :  { %v1096_v42 = vmul.f32 0.03125, %v1092_v41 }
 0xafd   :  { %v1095_v43 = vpop.xlane.xlu0 %1094 }
 0xafe   :  { %v1098_v44 = vadd.f32 1e-05, %v1096_v42  ;;  %v1097_v45 = vmul.f32 0.03125, %v1095_v43 }
 0xb00   :  { %1526 = vrsqrt.f32 %v1098_v44  ;;  %v1099_v46 = vadd.f32 1e-05, %v1097_v45 }
 0xb02   :  { %1528 = vrsqrt.f32 %v1099_v46 }
 0xb0a   :  { %v1527_v29 = vpop.eup %1526 }
 0xb0b   :  { %v1102_v48 = vmul.f32 %v1527_v29, %v1086_v33 }
 0xb0c   :  { %v1529_v49 = vpop.eup %1528 }
 0xb0d   :  { %v1103_v19 = vmul.f32 %v1529_v49, %v1087_v35  ;;  %v1110_v50 = vmul.f32 %v1303_v47, %v1102_v48 }
 0xb0f   :  { %v1111_v52 = vmul.f32 %v1303_v47, %v1103_v19  ;;  %v1118_v53 = vadd.f32 %v1304_v51, %v1110_v50 }
 0xb11   :  { %v1119_v54 = vadd.f32 %v1304_v51, %v1111_v52 }
 0xb13   :  { %v1481_v55 = vpack.c.bf16 %v1119_v54, %v1118_v53 }
 0xb15   :  { %1482 = vmatpush3.bf16.msra.mxu1 %v1481_v55 }
 0xb16   :  { %1472 = vmatprep.subr.bf16.mxu1 %v1530_v0 }
 0xb18   :  { %1470 = vmatmul.mubr.msk.f32.vlgmr.msra.gmra.mrb[32].mxu1 %vm247_vm3, %v1120_v56 }
 0xb19   :  { %1473 = vmatpush3.bf16.msra.mxu1 %v1504_v57  ;;  %1476 = vmatprep.mubr.msk.bf16.mxu1 %vm1531_vm0, %v1530_v0 }
 0xb1a   :  { %1474 = vmatprep.subr.bf16.mxu1 %v1530_v0 }
 0xb1d   :  { %1475 = vmatpush3.bf16.msra.mxu1 %v1505_v58 }
 0xbeb   :  { %v1190_v59 = vpop.f32.mrb[32].mxu1 }
 0xbec   :  { %v1194_v60 = vpack.c.bf16 %v1190_v59, %v1190_v59  ;;  %v1471_v61 = vpop.f32.mrb[33].mxu1 }
 0xbee   :  { %1477 = vmatmul.mubr.msk.bf16.vlgmr.msra.gmra.mrb[36].mxu1 %vm198_vm2, %v1194_v60 }
 0xcc1   :  { %v1255_v63 = vpop.f32.mrb[36].mxu1 }
 0xcc2   :  { %v1256_v1 = vadd.f32 %v1306_v62, %v1255_v63  ;;  %v1478_v2 = vpop.f32.mrb[37].mxu1 }
 0xcc3   :  { %v1258_v3 = vpop.f32.mrb[38].mxu1 }
 0xcc4   :  { %1262 = vst.msk [vmem:[%s1895_s20] sm:$0x3] %vm1261_vm7, %v1256_v1  ;;  %v1479_v0 = vpop.f32.mrb[39].mxu1 }

// kernel: mcil_forward.8
= control target key start
LH: loop header
LB: loop body
LE: loop exit
PB: predicated region body
PF: predicated region fallthrough
CT: control target
= control target key end

     0   :  { %v933_v0 = vmov 0.0   ;;  %vm934_vm0 = vmmov 0   ;;  %vm126_vm1 = vcmask 785408   ;;  %vm195_vm2 = vcmask 261120   ;;  %s1204_s3 = inlined_call_operand.vmem [shape: bf16[96,32], index: 3, kind: input, shape index: {}]   ;;  %s1205_s0 = inlined_call_operand.vmem [shape: f32[2,96], index: 0, kind: input, shape index: {}]   ;;  %s1206_s5 = inlined_call_operand.vmem [shape: bf16[32,32], index: 5, kind: input, shape index: {}]   ;;  %s1207_s7 = inlined_call_operand.vmem [shape: bf16[32,16], index: 7, kind: input, shape index: {}]   ;;  %s1208_s4 = inlined_call_operand.vmem [shape: f32[1,32], index: 4, kind: input, shape index: {}]   ;;  %s1209_s9 = inlined_call_operand.vmem [shape: bf16[64,32], index: 9, kind: input, shape index: {}]   ;;  %s1210_s2 = inlined_call_operand.vmem [shape: f32[2,1], index: 2, kind: input, shape index: {}]   ;;  %s1211_s6 = inlined_call_operand.vmem [shape: f32[1,32], index: 6, kind: input, shape index: {}]   ;;  %s1212_s1 = inlined_call_operand.vmem [shape: f32[2,64], index: 1, kind: input, shape index: {}]   ;;  %s1213_s11 = inlined_call_operand.vmem [shape: bf16[32,32], index: 11, kind: input, shape index: {}]   ;;  %s1214_s13 = inlined_call_operand.vmem [shape: bf16[32,16], index: 13, kind: input, shape index: {}]   ;;  %s1215_s10 = inlined_call_operand.vmem [shape: f32[1,32], index: 10, kind: input, shape index: {}]   ;;  %s1216_s12 = inlined_call_operand.vmem [shape: f32[1,32], index: 12, kind: input, shape index: {}]   ;;  %s1217_s15 = inlined_call_operand.vmem [shape: bf16[16,32], index: 15, kind: input, shape index: {}]   ;;  %s1218_s17 = inlined_call_operand.vmem [shape: bf16[32,32], index: 17, kind: input, shape index: {}]   ;;  %s1219_s8 = inlined_call_operand.vmem [shape: f32[1,16], index: 8, kind: input, shape index: {}]   ;;  %s1220_s14 = inlined_call_operand.vmem [shape: f32[1,16], index: 14, kind: input, shape index: {}]   ;;  %s1221_s19 = inlined_call_operand.vmem [shape: bf16[32,16], index: 19, kind: input, shape index: {}]   ;;  %s1222_s16 = inlined_call_operand.vmem [shape: f32[1,32], index: 16, kind: input, shape index: {}]   ;;  %s1223_s18 = inlined_call_operand.vmem [shape: f32[1,32], index: 18, kind: input, shape index: {}]   ;;  %s1224_s20 = inlined_call_operand.vmem [shape: f32[1,16], index: 20, kind: input, shape index: {}]   ;;  %s1225_s21 = inlined_call_operand.vmem [shape: f32[2,32], index: 21, kind: output, shape index: {}]  }
   0x1   :  { %1230 = sst [smem:[#allocation2_spill]] %s1204_s3  ;;  %823 = vmatprep.subr.bf16.mxu0 %v933_v0  ;;  %835 = vmatprep.mubr.msk.bf16.mxu0 %vm934_vm0, %v933_v0  ;;  %v935_v21 = vmov 0   ;;  %v528_v22 = vld [vmem:[%s1210_s2] sm:$0x3]  ;;  %vm348_vm3 = vcmask 523264   ;;  %v925_v39 = vld [vmem:[%s1213_s11 + $0x8] sm:$0xff]  }
   0x2   :  { %1231 = sst [smem:[#allocation3_spill]] %s1205_s0  ;;  %s1236_s26 = sld [smem:[#allocation2_spill]]  ;;  %839 = vmatprep.subr.bf16.mxu1 %v933_v0  ;;  %843 = vmatprep.mubr.msk.bf16.mxu1 %vm934_vm0, %v933_v0  ;;  %v535_v23 = vsub.f32 1.0, %v528_v22  ;;  %v758_v24 = vld [vmem:[%s1211_s6] ss:$0 sm:$0xff]  ;;  %v927_v53 = vld [vmem:[%s1214_s13 + $0x8] sm:$0xff]  }
   0x3   :  { %1232 = sst [smem:[#allocation4_spill]] %s1206_s5  ;;  %s1237_s5 = sld [smem:[#allocation3_spill]]  ;;  %909 = vset.pattern.permute.xlu0 %v935_v21  ;;  %v307_v36 = vld [vmem:[%s1212_s1] sm:$0x3]  ;;  %vm559_vm4 = vcmask 130048   ;;  %vm744_vm5 = vcmask 254976  }
   0x4   :  { %1233 = sst [smem:[#allocation5_spill]] %s1207_s7  ;;  %s1238_s7 = sld [smem:[#allocation4_spill]]  ;;  %531 = vperm.xlu0 %909, %v528_v22   ;;  %v308_v37 = vpack.c.bf16 %v307_v36, %v307_v36  ;;  %v924_v38 = vld [vmem:[%s1213_s11] sm:$0xff]  }
   0x5   :  { %1234 = sst [smem:[#allocation6_spill]] %s1208_s4  ;;  %s1240_s22 = sld [smem:[#allocation5_spill]]  ;;  %v766_v44 = vld [vmem:[%s1215_s10] ss:$0 sm:$0xff] }
   0x6   :  { %1235 = sst [smem:[#allocation7_spill]] %s1209_s9  ;;  %s1239_s4 = sld [smem:[#allocation6_spill]]  ;;  %v926_v51 = vld [vmem:[%s1214_s13] sm:$0xff]  }
   0x7   :  { %s1241_s28 = sld [smem:[#allocation7_spill]]  ;;  %v772_v54 = vld [vmem:[%s1216_s12] ss:$0 sm:$0xff] }
   0x8   :  { %v910_v1 = vld [vmem:[%s1236_s26] sm:$0xff]   ;;  %v911_v2 = vld [vmem:[%s1236_s26 + $0x8] sm:$0xff]   ;;  %v912_v3 = vld [vmem:[%s1236_s26 + $0x10] sm:$0xff]   ;;  %538 = vperm.xlu0 %909, %v535_v23  }
   0x9   :  { %824 = vmatpush3.bf16.msra.mxu0 %v910_v1  ;;  %v913_v4 = vld [vmem:[%s1236_s26 + $0x18] sm:$0xff]   ;;  %v914_v5 = vld [vmem:[%s1236_s26 + $0x20] sm:$0xff]   ;;  %v915_v6 = vld [vmem:[%s1236_s26 + $0x28] sm:$0xff]  }
   0xa   :  { %825 = vmatprep.subr.bf16.mxu0 %v933_v0  ;;  %v69_v7 = vld [vmem:[%s1237_s5] sm:$0x3]  ;;  %v917_v10 = vld [vmem:[%s1238_s7 + $0x8] sm:$0xff]  }
   0xb   :  { %v70_v8 = vpack.c.bf16 %v69_v7, %v69_v7  ;;  %v916_v9 = vld [vmem:[%s1238_s7] sm:$0xff]   ;;  %v919_v20 = vld [vmem:[%s1240_s22 + $0x8] sm:$0xff]  }
   0xc   :  { %840 = vmatpush3.bf16.msra.mxu1 %v916_v9  ;;  %v750_v11 = vld [vmem:[%s1239_s4] ss:$0 sm:$0xff] }
   0xd   :  { %826 = vmatpush3.bf16.msra.mxu0 %v911_v2  ;;  %841 = vmatprep.subr.bf16.mxu1 %v933_v0  ;;  %v918_v18 = vld [vmem:[%s1240_s22] sm:$0xff]   ;;  %v921_v33 = vld [vmem:[%s1241_s28 + $0x8] sm:$0xff]   ;;  %v922_v34 = vld [vmem:[%s1241_s28 + $0x10] sm:$0xff]  }
   0xe   :  { %827 = vmatprep.subr.bf16.mxu0 %v933_v0  ;;  %v920_v31 = vld [vmem:[%s1241_s28] sm:$0xff]   ;;  %v923_v35 = vld [vmem:[%s1241_s28 + $0x18] sm:$0xff]  }
   0xf   :  { %v928_v62 = vld [vmem:[%s1217_s15] sm:$0xff]  }
  0x10   :  { %842 = vmatpush3.bf16.msra.mxu1 %v917_v10  ;;  %v929_v63 = vld [vmem:[%s1218_s17] sm:$0xff]  }
  0x11   :  { %828 = vmatpush3.bf16.msra.mxu0 %v912_v3  ;;  %847 = vmatprep.subr.bf16.mxu1 %v933_v0  ;;  %v762_v2 = vld [vmem:[%s1219_s8] ss:$0 sm:$0xff] }
  0x12   :  { %829 = vmatprep.subr.bf16.mxu0 %v933_v0  ;;  %v776_v3 = vld [vmem:[%s1220_s14] ss:$0 sm:$0xff] }
  0x15   :  { %830 = vmatpush3.bf16.msra.mxu0 %v913_v4 }
  0x16   :  { %831 = vmatprep.subr.bf16.mxu0 %v933_v0 }
  0x19   :  { %832 = vmatpush3.bf16.msra.mxu0 %v914_v5 }
  0x1a   :  { %833 = vmatprep.subr.bf16.mxu0 %v933_v0 }
  0x1d   :  { %834 = vmatpush3.bf16.msra.mxu0 %v915_v6 }
  0x1e   :  { %867 = vmatprep.subr.bf16.mxu0 %v933_v0 }
  0x20   :  { %836 = vmatmul.mubr.msk.bf16.vlgmr.msra.gmra.mrb[0].mxu0 %vm126_vm1, %v70_v8 }
  0x21   :  { %871 = vmatprep.mubr.msk.bf16.mxu0 %vm934_vm0, %v933_v0  ;;  %868 = vmatpush3.bf16.msra.mxu0 %v924_v38 }
  0x22   :  { %869 = vmatprep.subr.bf16.mxu0 %v933_v0 }
  0x25   :  { %870 = vmatpush3.bf16.msra.mxu0 %v925_v39 }
  0x26   :  { %875 = vmatprep.subr.bf16.mxu0 %v933_v0 }
  0x83   :  { %v532_v1 = vpop.permute.xlu0 %531 }
  0x87   :  { %v539_v5 = vpop.permute.xlu0 %538 }
  0xf3   :  { %v164_v12 = vpop.f32.mrb[0].mxu0 }
  0xf4   :  { %v165_v13 = vadd.f32 %v750_v11, %v164_v12  ;;  %v837_v14 = vpop.f32.mrb[1].mxu0 }
  0xf5   :  { %v167_v15 = vpop.f32.mrb[2].mxu0 }
  0xf6   :  { %v170_v16 = vmax.f32 %v165_v13, 0.0  ;;  %v838_v17 = vpop.f32.mrb[3].mxu0  ;;  %v930_v15 = vld [vmem:[%s1218_s17 + $0x8] sm:$0xff]  }
  0xf7   :  { %v780_v17 = vld [vmem:[%s1222_s16] ss:$0 sm:$0xff] }
  0xf8   :  { %v171_v19 = vpack.c.bf16 %v170_v16, %v170_v16  ;;  %v931_v16 = vld [vmem:[%s1221_s19] sm:$0xff]  }
  0xfa   :  { %844 = vmatmul.mubr.msk.bf16.vlgmr.msra.gmra.mrb[0].mxu1 %vm195_vm2, %v171_v19 }
  0xfb   :  { %848 = vmatpush3.bf16.msra.mxu1 %v918_v18  ;;  %851 = vmatprep.mubr.msk.bf16.mxu1 %vm934_vm0, %v933_v0 }
  0xfc   :  { %849 = vmatprep.subr.bf16.mxu1 %v933_v0 }
  0xff   :  { %850 = vmatpush3.bf16.msra.mxu1 %v919_v20 }
 0x100   :  { %855 = vmatprep.subr.bf16.mxu1 %v933_v0 }
 0x1cd   :  { %v233_v25 = vpop.f32.mrb[0].mxu1 }
 0x1ce   :  { %v234_v26 = vadd.f32 %v758_v24, %v233_v25  ;;  %v845_v27 = vpop.f32.mrb[1].mxu1  ;;  %v932_v25 = vld [vmem:[%s1221_s19 + $0x8] sm:$0xff]   ;;  %s936_s19 = smov 16  }
 0x1cf   :  { %v236_v28 = vpop.f32.mrb[2].mxu1 }
 0x1d0   :  { %v239_v29 = vmax.f32 %v234_v26, 0.0  ;;  %v846_v30 = vpop.f32.mrb[3].mxu1 }
 0x1d2   :  { %v240_v32 = vpack.c.bf16 %v239_v29, %v239_v29 }
 0x1d4   :  { %852 = vmatmul.mubr.msk.bf16.vlgmr.msra.gmra.mrb[4].mxu1 %vm195_vm2, %v240_v32 }
 0x1d5   :  { %856 = vmatpush3.bf16.msra.mxu1 %v920_v31  ;;  %863 = vmatprep.mubr.msk.bf16.mxu1 %vm934_vm0, %v933_v0 }
 0x1d6   :  { %857 = vmatprep.subr.bf16.mxu1 %v933_v0 }
 0x1d9   :  { %858 = vmatpush3.bf16.msra.mxu1 %v921_v33  ;;  %v787_v33 = vld [vmem:[%s1224_s20] ss:$0 sm:$0xff] }
 0x1da   :  { %859 = vmatprep.subr.bf16.mxu1 %v933_v0 }
 0x1dd   :  { %860 = vmatpush3.bf16.msra.mxu1 %v922_v34 }
 0x1de   :  { %861 = vmatprep.subr.bf16.mxu1 %v933_v0 }
 0x1e1   :  { %862 = vmatpush3.bf16.msra.mxu1 %v923_v35 }
 0x1e2   :  { %883 = vmatprep.subr.bf16.mxu1 %v933_v0 }
 0x1e4   :  { %864 = vmatmul.mubr.msk.bf16.vlgmr.msra.gmra.mrb[8].mxu1 %vm348_vm3, %v308_v37 }
 0x1e5   :  { %885 = vmatprep.mubr.msk.bf16.mxu1 %vm934_vm0, %v933_v0  ;;  %884 = vmatpush3.bf16.msra.mxu1 %v928_v62 }
 0x1e6   :  { %897 = vmatprep.subr.bf16.mxu1 %v933_v0 }
 0x2a7   :  { %v301_v40 = vpop.f32.mrb[4].mxu1 }
 0x2a8   :  { %v853_v41 = vpop.f32.mrb[5].mxu1  ;;  %v302_v4 = vadd.f32 %v762_v2, %v301_v40 }
 0x2a9   :  { %v304_v42 = vpop.f32.mrb[6].mxu1 }
 0x2aa   :  { %v854_v43 = vpop.f32.mrb[7].mxu1  ;;  %v541_v10 = vmul.f32 %v539_v5, %v302_v4 }
 0x2b7   :  { %v386_v45 = vpop.f32.mrb[8].mxu1 }
 0x2b8   :  { %v387_v46 = vadd.f32 %v766_v44, %v386_v45  ;;  %v865_v47 = vpop.f32.mrb[9].mxu1 }
 0x2b9   :  { %v389_v48 = vpop.f32.mrb[10].mxu1 }
 0x2ba   :  { %v392_v49 = vmax.f32 %v387_v46, 0.0  ;;  %v866_v50 = vpop.f32.mrb[11].mxu1 }
 0x2bc   :  { %v393_v52 = vpack.c.bf16 %v392_v49, %v392_v49 }
 0x2be   :  { %872 = vmatmul.mubr.msk.bf16.vlgmr.msra.gmra.mrb[4].mxu0 %vm195_vm2, %v393_v52 }
 0x2bf   :  { %876 = vmatpush3.bf16.msra.mxu0 %v926_v51  ;;  %879 = vmatprep.mubr.msk.bf16.mxu0 %vm934_vm0, %v933_v0 }
 0x2c0   :  { %877 = vmatprep.subr.bf16.mxu0 %v933_v0 }
 0x2c3   :  { %878 = vmatpush3.bf16.msra.mxu0 %v927_v53 }
 0x2c4   :  { %889 = vmatprep.subr.bf16.mxu0 %v933_v0 }
 0x391   :  { %v454_v55 = vpop.f32.mrb[4].mxu0 }
 0x392   :  { %v455_v56 = vadd.f32 %v772_v54, %v454_v55  ;;  %v873_v57 = vpop.f32.mrb[5].mxu0 }
 0x393   :  { %v457_v58 = vpop.f32.mrb[6].mxu0 }
 0x394   :  { %v460_v59 = vmax.f32 %v455_v56, 0.0  ;;  %v874_v60 = vpop.f32.mrb[7].mxu0 }
 0x396   :  { %v461_v61 = vpack.c.bf16 %v460_v59, %v460_v59 }
 0x398   :  { %880 = vmatmul.mubr.msk.bf16.vlgmr.msra.gmra.mrb[8].mxu0 %vm195_vm2, %v461_v61 }
 0x399   :  { %893 = vmatprep.mubr.msk.bf16.mxu0 %vm934_vm0, %v933_v0  ;;  %890 = vmatpush3.bf16.msra.mxu0 %v929_v63 }
 0x39a   :  { %891 = vmatprep.subr.bf16.mxu0 %v933_v0 }
 0x39d   :  { %892 = vmatpush3.bf16.msra.mxu0 %v930_v15 }
 0x46b   :  { %v522_v6 = vpop.f32.mrb[8].mxu0 }
 0x46c   :  { %v523_v7 = vadd.f32 %v776_v3, %v522_v6  ;;  %v881_v8 = vpop.f32.mrb[9].mxu0 }
 0x46d   :  { %v525_v9 = vpop.f32.mrb[10].mxu0 }
 0x46e   :  { %v534_v11 = vmul.f32 %v532_v1, %v523_v7  ;;  %v882_v12 = vpop.f32.mrb[11].mxu0 }
 0x470   :  { %v542_v13 = vadd.f32 %v541_v10, %v534_v11 }
 0x472   :  { %v543_v14 = vpack.c.bf16 %v542_v13, %v542_v13 }
 0x474   :  { %886 = vmatmul.mubr.msk.bf16.vlgmr.msra.gmra.mrb[12].mxu1 %vm559_vm4, %v543_v14 }
 0x475   :  { %901 = vmatprep.mubr.msk.bf16.mxu1 %vm934_vm0, %v933_v0  ;;  %898 = vmatpush3.bf16.msra.mxu1 %v931_v16 }
 0x476   :  { %899 = vmatprep.subr.bf16.mxu1 %v933_v0  ;;  %v783_v0 = vld [vmem:[%s1223_s18] ss:$0 sm:$0xff] }
 0x479   :  { %900 = vmatpush3.bf16.msra.mxu1 %v932_v25 }
 0x547   :  { %v597_v18 = vpop.f32.mrb[12].mxu1 }
 0x548   :  { %v598_v19 = vadd.f32 %v780_v17, %v597_v18  ;;  %v887_v20 = vpop.f32.mrb[13].mxu1 }
 0x549   :  { %v600_v21 = vpop.f32.mrb[14].mxu1 }
 0x54a   :  { %v603_v22 = vmax.f32 %v598_v19, 0.0  ;;  %v888_v23 = vpop.f32.mrb[15].mxu1 }
 0x54c   :  { %v604_v24 = vpack.c.bf16 %v603_v22, %v603_v22 }
 0x54e   :  { %894 = vmatmul.mubr.msk.bf16.vlgmr.msra.gmra.mrb[12].mxu0 %vm195_vm2, %v604_v24 }
 0x621   :  { %v665_v26 = vpop.f32.mrb[12].mxu0 }
 0x622   :  { %v666_v27 = vadd.f32 %v783_v0, %v665_v26  ;;  %v895_v28 = vpop.f32.mrb[13].mxu0 }
 0x623   :  { %v668_v29 = vpop.f32.mrb[14].mxu0 }
 0x624   :  { %v671_v30 = vmax.f32 %v666_v27, 0.0  ;;  %v896_v31 = vpop.f32.mrb[15].mxu0 }
 0x626   :  { %v672_v32 = vpack.c.bf16 %v671_v30, %v671_v30 }
 0x628   :  { %902 = vmatmul.mubr.msk.bf16.vlgmr.msra.gmra.mrb[16].mxu1 %vm195_vm2, %v672_v32 }
 0x6fb   :  { %v733_v34 = vpop.f32.mrb[16].mxu1 }
 0x6fc   :  { %v734_v35 = vadd.f32 %v787_v33, %v733_v34  ;;  %v903_v36 = vpop.f32.mrb[17].mxu1 }
 0x6fd   :  { %v736_v37 = vpop.f32.mrb[18].mxu1 }
 0x6fe   :  { %740 = vrot.lane.b32.xlu1 %v734_v35, %s936_s19  ;;  %v904_v38 = vpop.f32.mrb[19].mxu1 }
 0x770   :  { %v741_v39 = vpop.permute.xlu1 %740 }
 0x771   :  { %v743_v40 = vsel %vm559_vm4, %v542_v13, %v741_v39 }
 0x772   :  { %745 = vst.msk [vmem:[%s1225_s21] sm:$0x3] %vm744_vm5, %v743_v40 }

// kernel: mcil_forward.9
= control target key start
LH: loop header
LB: loop body
LE: loop exit
PB: predicated region body
PF: predicated region fallthrough
CT: control target
= control target key end

     0   :  { %v1465_v0 = vmov 0.0   ;;  %vm1466_vm0 = vmmov 0   ;;  %vm113_vm1 = vcmask 1043456   ;;  %vm109_vm2 = vcmask 588800   ;;  %s1469_s30 = smov 80   ;;  %s1470_s22 = smov 64   ;;  %s1810_s3 = inlined_call_operand.vmem [shape: bf16[72,32], index: 3, kind: input, shape index: {}]   ;;  %s1811_s0 = inlined_call_operand.vmem [shape: f32[16,72], index: 0, kind: input, shape index: {}]   ;;  %s1812_s5 = inlined_call_operand.vmem [shape: bf16[32,96], index: 5, kind: input, shape index: {}]   ;;  %s1813_s4 = inlined_call_operand.vmem [shape: f32[1,32], index: 4, kind: input, shape index: {}]   ;;  %s1814_s1 = inlined_call_operand.vmem [shape: f32[16,32], index: 1, kind: input, shape index: {}]   ;;  %s1815_s6 = inlined_call_operand.vmem [shape: f32[1,96], index: 6, kind: input, shape index: {}]   ;;  %s1816_s2 = inlined_call_operand.vmem [shape: f32[2,8,8], index: 2, kind: input, shape index: {}]   ;;  %s1817_s7 = inlined_call_operand.vmem [shape: bf16[32,32], index: 7, kind: input, shape index: {}]   ;;  %s1818_s8 = inlined_call_operand.vmem [shape: f32[1,32], index: 8, kind: input, shape index: {}]   ;;  %s1819_s11 = inlined_call_operand.vmem [shape: bf16[32,64], index: 11, kind: input, shape index: {}]   ;;  %s1820_s13 = inlined_call_operand.vmem [shape: bf16[64,32], index: 13, kind: input, shape index: {}]   ;;  %s1821_s9 = inlined_call_operand.vmem [shape: f32[1,32], index: 9, kind: input, shape index: {}]   ;;  %s1822_s10 = inlined_call_operand.vmem [shape: f32[1,32], index: 10, kind: input, shape index: {}]   ;;  %s1823_s12 = inlined_call_operand.vmem [shape: f32[1,64], index: 12, kind: input, shape index: {}]   ;;  %s1824_s14 = inlined_call_operand.vmem [shape: f32[1,32], index: 14, kind: input, shape index: {}]   ;;  %s1825_s17 = inlined_call_operand.vmem [shape: bf16[32,36], index: 17, kind: input, shape index: {}]   ;;  %s1826_s15 = inlined_call_operand.vmem [shape: f32[1,32], index: 15, kind: input, shape index: {}]   ;;  %s1827_s16 = inlined_call_operand.vmem [shape: f32[1,32], index: 16, kind: input, shape index: {}]   ;;  %s1828_s18 = inlined_call_operand.vmem [shape: f32[1,36], index: 18, kind: input, shape index: {}]   ;;  %s1829_s19 = inlined_call_operand.vmem [shape: f32[16,36], index: 19, kind: output, shape index: {}]  }
   0x1   :  { %1833 = sst [smem:[#allocation2_spill]] %s1810_s3  ;;  %1295 = vmatprep.subr.bf16.mxu0 %v1465_v0  ;;  %1305 = vmatprep.mubr.msk.bf16.mxu0 %vm1466_vm0, %v1465_v0  ;;  %v158_v16 = vld [vmem:[%s1814_s1] sm:$0xff]  ;;  %v159_v18 = vld [vmem:[%s1814_s1 + $0x8] sm:$0xff]  ;;  %vm211_vm3 = vcmask 261120   ;;  %s1467_s1 = smov 112   ;;  %vm260_vm4 = vcmask 130048  }
   0x2   :  { %1834 = sst [smem:[#allocation3_spill]] %s1811_s0  ;;  %s1837_s20 = sld [smem:[#allocation2_spill]]  ;;  %1309 = vmatprep.subr.bf16.mxu1 %v1465_v0  ;;  %1313 = vmatprep.mubr.msk.bf16.mxu1 %vm1466_vm0, %v1465_v0  ;;  %v1214_v24 = vld [vmem:[%s1815_s6] ss:$0 sm:$0xff]  ;;  %vm465_vm5 = vcmask 64512   ;;  %vm1043_vm6 = vcmask 523264  }
   0x3   :  { %1835 = sst [smem:[#allocation4_spill]] %s1812_s5  ;;  %s1838_s28 = sld [smem:[#allocation3_spill]]  ;;  %v162_v44 = vld [vmem:[%s1816_s2] sm:$0xff]  ;;  %vm1200_vm7 = vcmask 293888  }
   0x4   :  { %1836 = sst [smem:[#allocation5_spill]] %s1813_s4  ;;  %s1839_s21 = sld [smem:[#allocation4_spill]] }
   0x5   :  { %s1840_s24 = sld [smem:[#allocation5_spill]]  ;;  %s1468_s3 = smov 96  }
   0x8   :  { %v1424_v1 = vld [vmem:[%s1837_s20] sm:$0xff]   ;;  %v1425_v2 = vld [vmem:[%s1837_s20 + $0x8] sm:$0xff]   ;;  %v1426_v3 = vld [vmem:[%s1837_s20 + $0x10] sm:$0xff]  }
   0x9   :  { %1296 = vmatpush3.bf16.msra.mxu0 %v1424_v1  ;;  %v1427_v4 = vld [vmem:[%s1837_s20 + $0x18] sm:$0xff]   ;;  %v1428_v5 = vld [vmem:[%s1837_s20 + $0x20] ss:$0 sps:$4 sm:$0xff]   ;;  %v64_v7 = vld [vmem:[%s1838_s28 + $0x8] sm:$0xff] }
   0xa   :  { %1297 = vmatprep.subr.bf16.mxu0 %v1465_v0  ;;  %v63_v6 = vld [vmem:[%s1838_s28] sm:$0xff]  ;;  %v115_v8 = vsel %vm113_vm1, %v1428_v5, 0  ;;  %v1430_v11 = vld [vmem:[%s1839_s21 + $0x8] sm:$0xff]  }
   0xb   :  { %v65_v9 = vpack.c.bf16 %v64_v7, %v63_v6  ;;  %v1429_v10 = vld [vmem:[%s1839_s21] sm:$0xff]  }
   0xc   :  { %1310 = vmatpush3.bf16.msra.mxu1 %v1429_v10  ;;  %v1207_v12 = vld [vmem:[%s1840_s24] ss:$0 sm:$0xff] }
   0xd   :  { %1298 = vmatpush3.bf16.msra.mxu0 %v1425_v2  ;;  %1311 = vmatprep.subr.bf16.mxu1 %v1465_v0 }
   0xe   :  { %1299 = vmatprep.subr.bf16.mxu0 %v1465_v0 }
  0x10   :  { %1312 = vmatpush3.bf16.msra.mxu1 %v1430_v11 }
  0x11   :  { %1300 = vmatpush3.bf16.msra.mxu0 %v1426_v3  ;;  %1317 = vmatprep.subr.bf16.mxu1 %v1465_v0  ;;  %v163_v3 = vld [vmem:[%s1816_s2 + $0x8] sm:$0xff]  ;;  %s1471_s2 = smov 48  }
  0x12   :  { %1301 = vmatprep.subr.bf16.mxu0 %v1465_v0 }
  0x15   :  { %1302 = vmatpush3.bf16.msra.mxu0 %v1427_v4 }
  0x16   :  { %1303 = vmatprep.subr.bf16.mxu0 %v1465_v0 }
  0x19   :  { %1304 = vmatpush3.bf16.msra.mxu0 %v115_v8 }
  0x1a   :  { %1329 = vmatprep.subr.bf16.mxu0 %v1465_v0 }
  0x1c   :  { %1306 = vmatmul.mubr.msk.bf16.vlgmr.msra.gmra.mrb[0].mxu0 %vm109_vm2, %v65_v9 }
  0x1d   :  { %1331 = vmatprep.mubr.msk.bf16.mxu0 %vm1466_vm0, %v1465_v0 }
  0xef   :  { %v151_v13 = vpop.f32.mrb[0].mxu0 }
  0xf0   :  { %v152_v14 = vadd.f32 %v1207_v12, %v151_v13  ;;  %v1307_v15 = vpop.f32.mrb[1].mxu0 }
  0xf1   :  { %v154_v17 = vpop.f32.mrb[2].mxu0 }
  0xf2   :  { %v155_v19 = vadd.f32 %v1207_v12, %v154_v17  ;;  %v1308_v20 = vpop.f32.mrb[3].mxu0  ;;  %v1624_v21 = vadd.f32 %v158_v16, %v152_v14 }
  0xf4   :  { %v1626_v22 = vadd.f32 %v159_v18, %v155_v19 }
  0xf6   :  { %v192_v23 = vpack.c.bf16 %v1626_v22, %v1624_v21 }
  0xf8   :  { %1314 = vmatmul.mubr.msk.bf16.vlgmr.msra.gmra.mrb[0].mxu1 %vm211_vm3, %v192_v23 }
  0xf9   :  { %1319 = vmatprep.mubr.msk.bf16.mxu1 %vm1466_vm0, %v1465_v0 }
 0x1cb   :  { %v249_v25 = vpop.f32.mrb[0].mxu1 }
 0x1cc   :  { %v250_v26 = vadd.f32 %v1214_v24, %v249_v25  ;;  %v1315_v27 = vpop.f32.mrb[1].mxu1 }
 0x1cd   :  { %v252_v28 = vpop.f32.mrb[2].mxu1 }
 0x1ce   :  { %v1636_v29 = vpack.c.bf16 %v250_v26, %v250_v26  ;;  %v253_v30 = vadd.f32 %v1214_v24, %v252_v28  ;;  %v1316_v31 = vpop.f32.mrb[3].mxu1 }
 0x1d0   :  { %309 = vrot.lane.b32.xlu1 %v1636_v29, %s1467_s1  ;;  %258 = vrot.lane.b32.xlu0 %v1636_v29, %s1468_s3  ;;  %v1640_v32 = vpack.c.bf16 %v253_v30, %v253_v30 }
 0x1d4   :  { %311 = vrot.lane.b32.xlu0 %v1636_v29, %s1469_s30  ;;  %363 = vrot.lane.b32.xlu1 %v1640_v32, %s1468_s3 }
 0x1d8   :  { %415 = vrot.lane.b32.xlu0 %v1640_v32, %s1469_s30  ;;  %413 = vrot.lane.b32.xlu1 %v1640_v32, %s1467_s1 }
 0x242   :  { %v310_v33 = vpop.permute.xlu1 %309  ;;  %v259_v34 = vpop.permute.xlu0 %258 }
 0x243   :  { %v265_v35 = vsel %vm260_vm4, %v259_v34, 0 }
 0x244   :  { %1318 = vmatpush3.bf16.xpose.msra.mxu1 %v265_v35 }
 0x245   :  { %1323 = vmatprep.subr.bf16.mxu1 %v1465_v0 }
 0x246   :  { %v364_v36 = vpop.permute.xlu1 %363  ;;  %v312_v38 = vpop.permute.xlu0 %311 }
 0x247   :  { %v369_v37 = vsel %vm260_vm4, %v364_v36, 0  ;;  %v317_v39 = vsel %vm260_vm4, %v312_v38, 0 }
 0x248   :  { %1330 = vmatpush3.bf16.xpose.msra.mxu0 %v369_v37 }
 0x249   :  { %1341 = vmatprep.subr.bf16.mxu0 %v1465_v0 }
 0x24a   :  { %v416_v40 = vpop.permute.xlu0 %415  ;;  %v414_v42 = vpop.permute.xlu1 %413 }
 0x24b   :  { %1320 = vmatmul.mubr.msk.bf16.vlgmr.msra.gmra.mrb[4].mxu1 %vm260_vm4, %v1636_v29  ;;  %v421_v41 = vsel %vm260_vm4, %v416_v40, 0 }
 0x24c   :  { %1324 = vmatpush3.bf16.xpose.msra.mxu1 %v317_v39  ;;  %1325 = vmatprep.mubr.msk.bf16.mxu1 %vm1466_vm0, %v1465_v0 }
 0x24d   :  { %1335 = vmatprep.subr.bf16.mxu1 %v1465_v0 }
 0x24f   :  { %1332 = vmatmul.mubr.msk.bf16.vlgmr.msra.gmra.mrb[4].mxu0 %vm260_vm4, %v1640_v32 }
 0x250   :  { %1343 = vmatprep.mubr.msk.bf16.mxu0 %vm1466_vm0, %v1465_v0 }
 0x253   :  { %1326 = vmatmul.mubr.msk.bf16.vlgmr.msra.gmra.mrb[8].mxu1 %vm260_vm4, %v310_v33 }
 0x254   :  { %1336 = vmatpush3.bf16.xpose.msra.mxu1 %v421_v41  ;;  %1337 = vmatprep.mubr.msk.bf16.mxu1 %vm1466_vm0, %v1465_v0 }
 0x255   :  { %1347 = vmatprep.subr.bf16.mxu1 %v1465_v0 }
 0x25b   :  { %1338 = vmatmul.mubr.msk.bf16.vlgmr.msra.gmra.mrb[12].mxu1 %vm260_vm4, %v414_v42 }
 0x25c   :  { %1349 = vmatprep.mubr.msk.bf16.mxu1 %vm1466_vm0, %v1465_v0 }
 0x31e   :  { %v301_v43 = vpop.f32.mrb[4].mxu1 }
 0x31f   :  { %v307_v45 = vmul.f32 0.25, %v301_v43  ;;  %v1321_v46 = vpop.f32.mrb[5].mxu1 }
 0x320   :  { %v304_v47 = vpop.f32.mrb[6].mxu1  ;;  %v1432_v46 = vld [vmem:[%s1817_s7 + $0x8] sm:$0xff]  }
 0x321   :  { %v1322_v48 = vpop.f32.mrb[7].mxu1  ;;  %v308_v49 = vadd.f32 %v307_v45, %v162_v44  ;;  %v1431_v45 = vld [vmem:[%s1817_s7] sm:$0xff]  }
 0x322   :  { %v405_v50 = vpop.f32.mrb[4].mxu0 }
 0x323   :  { %v1333_v51 = vpop.f32.mrb[5].mxu0  ;;  %v466_v52 = vsel %vm465_vm5, %v308_v49, -inf  ;;  %v411_v6 = vmul.f32 0.25, %v405_v50 }
 0x324   :  { %467 = vmax.xlane.f32.xlu0 %v466_v52  ;;  %v408_v53 = vpop.f32.mrb[6].mxu0 }
 0x325   :  { %v1334_v54 = vpop.f32.mrb[7].mxu0  ;;  %v412_v7 = vadd.f32 %v411_v6, %v163_v3 }
 0x326   :  { %v353_v55 = vpop.f32.mrb[8].mxu1 }
 0x327   :  { %v359_v56 = vmul.f32 0.25, %v353_v55  ;;  %v1327_v57 = vpop.f32.mrb[9].mxu1  ;;  %v472_v8 = vsel %vm465_vm5, %v412_v7, -inf }
 0x328   :  { %v356_v58 = vpop.f32.mrb[10].mxu1 }
 0x329   :  { %v1328_v59 = vpop.f32.mrb[11].mxu1  ;;  %v360_v60 = vadd.f32 %v359_v56, %v162_v44 }
 0x32b   :  { %v469_v61 = vsel %vm465_vm5, %v360_v60, -inf }
 0x32c   :  { %470 = vmax.xlane.f32.xlu1 %v469_v61 }
 0x32e   :  { %v457_v62 = vpop.f32.mrb[12].mxu1 }
 0x32f   :  { %v463_v63 = vmul.f32 0.25, %v457_v62  ;;  %v1339_v1 = vpop.f32.mrb[13].mxu1 }
 0x330   :  { %v460_v2 = vpop.f32.mrb[14].mxu1 }
 0x331   :  { %v1340_v4 = vpop.f32.mrb[15].mxu1  ;;  %v464_v5 = vadd.f32 %v463_v63, %v163_v3 }
 0x333   :  { %v475_v27 = vsel %vm465_vm5, %v464_v5, -inf }
 0x33d   :  { %511 = vrot.lane.b32.xlu1 %v1636_v29, %s1470_s22 }
 0x361   :  { %473 = vmax.xlane.f32.xlu1 %v472_v8 }
 0x3b1   :  { %v468_v9 = vpop.xlane.xlu0 %467 }
 0x3b2   :  { %v478_v10 = vsub.f32 %v308_v49, %v468_v9  ;;  %v1232_v9 = vld [vmem:[%s1818_s8] ss:$0 sm:$0xff] }
 0x3b4   :  { %v482_v11 = vmul.f32 1.442695, %v478_v10 }
 0x3b6   :  { %1441 = vpow2.f32 %v482_v11 }
 0x3b9   :  { %v471_v12 = vpop.xlane.xlu1 %470 }
 0x3ba   :  { %v479_v13 = vsub.f32 %v360_v60, %v471_v12 }
 0x3bc   :  { %v484_v14 = vmul.f32 1.442695, %v479_v13 }
 0x3bd   :  { %v512_v15 = vpop.permute.xlu1 %511 }
 0x3be   :  { %1443 = vpow2.f32 %v484_v14  ;;  %v517_v16 = vsel %vm113_vm1, %v512_v15, 0 }
 0x3bf   :  { %1342 = vmatpush3.bf16.msra.mxu0 %v517_v16 }
 0x3c0   :  { %v1442_v17 = vpop.eup %1441  ;;  %1353 = vmatprep.subr.bf16.mxu0 %v1465_v0 }
 0x3c1   :  { %v490_v18 = vsel %vm465_vm5, %v1442_v17, 0.0 }
 0x3c2   :  { %491 = vadd.xlane.f32.xlu0 %v490_v18 }
 0x3c8   :  { %v1444_v19 = vpop.eup %1443 }
 0x3c9   :  { %v493_v20 = vsel %vm465_vm5, %v1444_v19, 0.0 }
 0x3ca   :  { %494 = vadd.xlane.f32.xlu0 %v493_v20 }
 0x3e0   :  { %561 = vrot.lane.b32.xlu0 %v1636_v29, %s1471_s2 }
 0x3ee   :  { %v474_v23 = vpop.xlane.xlu1 %473 }
 0x3ef   :  { %v480_v24 = vsub.f32 %v412_v7, %v474_v23 }
 0x3f1   :  { %v486_v25 = vmul.f32 1.442695, %v480_v24 }
 0x3f3   :  { %1445 = vpow2.f32 %v486_v25 }
 0x3fd   :  { %v1685_v26 = vpop.eup %1445 }
 0x3fe   :  { %v496_v28 = vsel %vm465_vm5, %v1685_v26, 0.0 }
 0x3ff   :  { %476 = vmax.xlane.f32.xlu0 %v475_v27  ;;  %497 = vadd.xlane.f32.xlu1 %v496_v28 }
 0x410   :  { %709 = vrot.lane.b32.xlu1 %v1640_v32, %s1470_s22 }
 0x44f   :  { %v492_v30 = vpop.xlane.xlu0 %491 }
 0x450   :  { %1447 = vrcp.f32 %v492_v30 }
 0x457   :  { %v495_v31 = vpop.xlane.xlu0 %494 }
 0x458   :  { %1449 = vrcp.f32 %v495_v31 }
 0x45a   :  { %v1448_v29 = vpop.eup %1447 }
 0x45b   :  { %v506_v33 = vmul.f32 %v1448_v29, %v1442_v17  ;;  %v562_v34 = vpop.permute.xlu0 %561 }
 0x45c   :  { %v567_v35 = vsel %vm113_vm1, %v562_v34, 0 }
 0x45d   :  { %1348 = vmatpush3.bf16.msra.mxu1 %v567_v35  ;;  %v510_v36 = vpack.c.bf16 %v506_v33, %v506_v33 }
 0x45e   :  { %1359 = vmatprep.subr.bf16.mxu1 %v1465_v0 }
 0x45f   :  { %1344 = vmatmul.mubr.msk.bf16.vlgmr.msra.gmra.mrb[8].mxu0 %vm465_vm5, %v510_v36 }
 0x460   :  { %1355 = vmatprep.mubr.msk.bf16.mxu0 %vm1466_vm0, %v1465_v0  ;;  %1354 = vmatpush3.bf16.msra.mxu0 %v1432_v46 }
 0x461   :  { %1365 = vmatprep.subr.bf16.mxu0 %v1465_v0 }
 0x462   :  { %v1450_v37 = vpop.eup %1449 }
 0x463   :  { %v507_v38 = vmul.f32 %v1450_v37, %v1444_v19 }
 0x465   :  { %v560_v39 = vpack.c.bf16 %v507_v38, %v507_v38 }
 0x467   :  { %1350 = vmatmul.mubr.msk.bf16.vlgmr.msra.gmra.mrb[16].mxu1 %vm465_vm5, %v560_v39 }
 0x468   :  { %1361 = vmatprep.mubr.msk.bf16.mxu1 %vm1466_vm0, %v1465_v0  ;;  %1360 = vmatpush3.bf16.msra.mxu1 %v1431_v45 }
 0x469   :  { %1371 = vmatprep.subr.bf16.mxu1 %v1465_v0 }
 0x48c   :  { %v477_v40 = vpop.xlane.xlu0 %476  ;;  %v498_v48 = vpop.xlane.xlu1 %497 }
 0x48d   :  { %v481_v41 = vsub.f32 %v464_v5, %v477_v40 }
 0x48f   :  { %v488_v42 = vmul.f32 1.442695, %v481_v41 }
 0x490   :  { %v710_v57 = vpop.permute.xlu1 %709 }
 0x491   :  { %1451 = vpow2.f32 %v488_v42  ;;  %v715_v1 = vsel %vm113_vm1, %v710_v57, 0 }
 0x49b   :  { %v1452_v43 = vpop.eup %1451 }
 0x49c   :  { %v499_v44 = vsel %vm465_vm5, %v1452_v43, 0.0 }
 0x49d   :  { %500 = vadd.xlane.f32.xlu0 %v499_v44 }
 0x4b3   :  { %759 = vrot.lane.b32.xlu0 %v1640_v32, %s1471_s2 }
 0x52a   :  { %v501_v47 = vpop.xlane.xlu0 %500 }
 0x52b   :  { %1453 = vrcp.f32 %v501_v47 }
 0x52c   :  { %1455 = vrcp.f32 %v498_v48 }
 0x52e   :  { %v760_v49 = vpop.permute.xlu0 %759 }
 0x52f   :  { %v765_v55 = vsel %vm113_vm1, %v760_v49, 0 }
 0x532   :  { %v553_v50 = vpop.f32.mrb[8].mxu0 }
 0x533   :  { %v559_v51 = vpack.c.bf16 %v553_v50, %v553_v50  ;;  %v1345_v52 = vpop.f32.mrb[9].mxu0 }
 0x534   :  { %v556_v53 = vpop.f32.mrb[10].mxu0  ;;  %v1433_v52 = vld [vmem:[%s1819_s11] sm:$0xff]  }
 0x535   :  { %v1454_v54 = vpop.eup %1453  ;;  %v1346_v32 = vpop.f32.mrb[11].mxu0  ;;  %1362 = vmatmul.mubr.msk.bf16.vlgmr.msra.gmra.mrb[20].mxu1 %vm260_vm4, %v559_v51  ;;  %v1434_v53 = vld [vmem:[%s1819_s11 + $0x8] sm:$0xff]  }
 0x536   :  { %1372 = vmatpush3.bf16.msra.mxu1 %v765_v55  ;;  %1373 = vmatprep.mubr.msk.bf16.mxu1 %vm1466_vm0, %v1465_v0  ;;  %v509_v56 = vmul.f32 %v1454_v54, %v1452_v43  ;;  %v1456_v62 = vpop.eup %1455  ;;  %v1436_v54 = vld [vmem:[%s1820_s13 + $0x8] sm:$0xff]  }
 0x537   :  { %1383 = vmatprep.subr.bf16.mxu1 %v1465_v0  ;;  %v508_v3 = vmul.f32 %v1456_v62, %v1685_v26  ;;  %v1233_v62 = vld [vmem:[%s1821_s9] ss:$0 sm:$0xff] }
 0x538   :  { %v758_v61 = vpack.c.bf16 %v509_v56, %v509_v56 }
 0x539   :  { %v708_v4 = vpack.c.bf16 %v508_v3, %v508_v3  ;;  %v1234_v3 = vld [vmem:[%s1822_s10] ss:$0 sm:$0xff] }
 0x53a   :  { %v603_v58 = vpop.f32.mrb[16].mxu1 }
 0x53b   :  { %v609_v59 = vpack.c.bf16 %v603_v58, %v603_v58  ;;  %v1351_v60 = vpop.f32.mrb[17].mxu1 }
 0x53c   :  { %v606_v63 = vpop.f32.mrb[18].mxu1 }
 0x53d   :  { %v1352_v2 = vpop.f32.mrb[19].mxu1  ;;  %1356 = vmatmul.mubr.msk.bf16.vlgmr.msra.gmra.mrb[12].mxu0 %vm260_vm4, %v609_v59  ;;  %1374 = vmatmul.mubr.msk.bf16.vlgmr.msra.gmra.mrb[24].mxu1 %vm465_vm5, %v758_v61 }
 0x53e   :  { %1366 = vmatpush3.bf16.msra.mxu0 %v715_v1  ;;  %1367 = vmatprep.mubr.msk.bf16.mxu0 %vm1466_vm0, %v1465_v0 }
 0x53f   :  { %1377 = vmatprep.subr.bf16.mxu0 %v1465_v0  ;;  %1384 = vmatpush3.bf16.msra.mxu1 %v1431_v45 }
 0x540   :  { %1385 = vmatprep.mubr.msk.bf16.mxu1 %vm1466_vm0, %v1465_v0  ;;  %1397 = vmatprep.subr.bf16.mxu1 %v1465_v0 }
 0x545   :  { %1368 = vmatmul.mubr.msk.bf16.vlgmr.msra.gmra.mrb[16].mxu0 %vm465_vm5, %v708_v4 }
 0x546   :  { %1378 = vmatpush3.bf16.msra.mxu0 %v1432_v46  ;;  %1379 = vmatprep.mubr.msk.bf16.mxu0 %vm1466_vm0, %v1465_v0 }
 0x547   :  { %1389 = vmatprep.subr.bf16.mxu0 %v1465_v0 }
 0x608   :  { %v702_v5 = vpop.f32.mrb[20].mxu1 }
 0x609   :  { %v1363_v6 = vpop.f32.mrb[21].mxu1 }
 0x60a   :  { %v705_v7 = vpop.f32.mrb[22].mxu1 }
 0x60b   :  { %v1364_v8 = vpop.f32.mrb[23].mxu1 }
 0x60c   :  { %v1437_v8 = vld [vmem:[%s1820_s13 + $0x10] sm:$0xff]  }
 0x610   :  { %v653_v10 = vpop.f32.mrb[12].mxu0  ;;  %v801_v11 = vpop.f32.mrb[24].mxu1 }
 0x611   :  { %v703_v12 = vadd.f32 %v702_v5, %v653_v10  ;;  %v807_v13 = vpack.c.bf16 %v801_v11, %v801_v11  ;;  %v1357_v14 = vpop.f32.mrb[13].mxu0  ;;  %v1375_v15 = vpop.f32.mrb[25].mxu1  ;;  %v1235_v10 = vld [vmem:[%s1823_s12] ss:$0 sm:$0xff] }
 0x612   :  { %v656_v16 = vpop.f32.mrb[14].mxu0  ;;  %v804_v17 = vpop.f32.mrb[26].mxu1 }
 0x613   :  { %v900_v18 = vadd.f32 %v1232_v9, %v703_v12  ;;  %v1358_v19 = vpop.f32.mrb[15].mxu0  ;;  %v1376_v20 = vpop.f32.mrb[27].mxu1  ;;  %1380 = vmatmul.mubr.msk.bf16.vlgmr.msra.gmra.mrb[20].mxu0 %vm260_vm4, %v807_v13 }
 0x614   :  { %1393 = vmatprep.mubr.msk.bf16.mxu0 %vm1466_vm0, %v1465_v0  ;;  %1390 = vmatpush3.bf16.msra.mxu0 %v1433_v52  ;;  %v1239_v20 = vld [vmem:[%s1824_s14] ss:$0 sm:$0xff] }
 0x615   :  { %v902_v23 = vadd.f32 %v900_v18, %v1624_v21  ;;  %1391 = vmatprep.subr.bf16.mxu0 %v1465_v0  ;;  %v1245_v52 = vld [vmem:[%s1826_s15] ss:$0 sm:$0xff] }
 0x617   :  { %v904_v24 = vsel %vm211_vm3, %v902_v23, 0.0 }
 0x618   :  { %905 = vadd.xlane.f32.xlu1 %v904_v24  ;;  %v751_v25 = vpop.f32.mrb[16].mxu0  ;;  %1392 = vmatpush3.bf16.msra.mxu0 %v1434_v53 }
 0x619   :  { %v757_v26 = vpack.c.bf16 %v751_v25, %v751_v25  ;;  %v1369_v27 = vpop.f32.mrb[17].mxu0  ;;  %1409 = vmatprep.subr.bf16.mxu0 %v1465_v0 }
 0x61a   :  { %v754_v28 = vpop.f32.mrb[18].mxu0 }
 0x61b   :  { %v1370_v30 = vpop.f32.mrb[19].mxu0  ;;  %1386 = vmatmul.mubr.msk.bf16.vlgmr.msra.gmra.mrb[28].mxu1 %vm260_vm4, %v757_v26 }
 0x61c   :  { %1405 = vmatprep.mubr.msk.bf16.mxu1 %vm1466_vm0, %v1465_v0 }
 0x6a5   :  { %v906_v31 = vpop.xlane.xlu1 %905 }
 0x6a6   :  { %v911_v29 = vmul.f32 0.03125, %v906_v31 }
 0x6a8   :  { %v913_v33 = vsub.f32 %v902_v23, %v911_v29 }
 0x6aa   :  { %v915_v34 = vmul.f32 %v913_v33, %v913_v33 }
 0x6ac   :  { %v917_v35 = vsel %vm211_vm3, %v915_v34, 0.0 }
 0x6ad   :  { %918 = vadd.xlane.f32.xlu1 %v917_v35 }
 0x6e6   :  { %v845_v21 = vpop.f32.mrb[20].mxu0 }
 0x6e7   :  { %v1381_v36 = vpop.f32.mrb[21].mxu0 }
 0x6e8   :  { %v848_v37 = vpop.f32.mrb[22].mxu0 }
 0x6e9   :  { %v1382_v38 = vpop.f32.mrb[23].mxu0 }
 0x6ee   :  { %v888_v39 = vpop.f32.mrb[28].mxu1 }
 0x6ef   :  { %v889_v40 = vadd.f32 %v888_v39, %v845_v21  ;;  %v1387_v41 = vpop.f32.mrb[29].mxu1 }
 0x6f0   :  { %v891_v42 = vpop.f32.mrb[30].mxu1 }
 0x6f1   :  { %v901_v43 = vadd.f32 %v1232_v9, %v889_v40  ;;  %v1388_v44 = vpop.f32.mrb[31].mxu1  ;;  %v1438_v9 = vld [vmem:[%s1820_s13 + $0x18] sm:$0xff]  }
 0x6f2   :  { %v1440_v44 = vld [vmem:[%s1825_s17 + $0x8] sm:$0xff]  }
 0x6f3   :  { %v903_v45 = vadd.f32 %v901_v43, %v1626_v22  ;;  %v1435_v22 = vld [vmem:[%s1820_s13] sm:$0xff]  }
 0x6f4   :  { %1398 = vmatpush3.bf16.msra.mxu1 %v1435_v22  ;;  %v1439_v43 = vld [vmem:[%s1825_s17] sm:$0xff]  }
 0x6f5   :  { %v907_v46 = vsel %vm211_vm3, %v903_v45, 0.0  ;;  %1399 = vmatprep.subr.bf16.mxu1 %v1465_v0 }
 0x6f6   :  { %908 = vadd.xlane.f32.xlu0 %v907_v46 }
 0x6f8   :  { %1400 = vmatpush3.bf16.msra.mxu1 %v1436_v54 }
 0x6f9   :  { %1401 = vmatprep.subr.bf16.mxu1 %v1465_v0 }
 0x6fc   :  { %1402 = vmatpush3.bf16.msra.mxu1 %v1437_v8 }
 0x6fd   :  { %1403 = vmatprep.subr.bf16.mxu1 %v1465_v0 }
 0x700   :  { %1404 = vmatpush3.bf16.msra.mxu1 %v1438_v9 }
 0x73a   :  { %v919_v55 = vpop.xlane.xlu1 %918 }
 0x73b   :  { %v923_v32 = vmul.f32 0.03125, %v919_v55 }
 0x73d   :  { %v925_v56 = vadd.f32 1e-05, %v923_v32 }
 0x73f   :  { %1457 = vrsqrt.f32 %v925_v56 }
 0x749   :  { %v1458_v60 = vpop.eup %1457 }
 0x74a   :  { %v929_v61 = vmul.f32 %v1458_v60, %v913_v33 }
 0x74c   :  { %v937_v1 = vmul.f32 %v1233_v62, %v929_v61 }
 0x74e   :  { %v945_v5 = vadd.f32 %v1234_v3, %v937_v1 }
 0x783   :  { %v909_v47 = vpop.xlane.xlu0 %908 }
 0x784   :  { %v912_v48 = vmul.f32 0.03125, %v909_v47 }
 0x786   :  { %v914_v49 = vsub.f32 %v903_v45, %v912_v48 }
 0x788   :  { %v916_v50 = vmul.f32 %v914_v49, %v914_v49 }
 0x78a   :  { %v920_v51 = vsel %vm211_vm3, %v916_v50, 0.0 }
 0x78b   :  { %921 = vadd.xlane.f32.xlu0 %v920_v51 }
 0x818   :  { %v922_v57 = vpop.xlane.xlu0 %921 }
 0x819   :  { %v924_v58 = vmul.f32 0.03125, %v922_v57 }
 0x81b   :  { %v926_v59 = vadd.f32 1e-05, %v924_v58 }
 0x81d   :  { %1459 = vrsqrt.f32 %v926_v59  ;;  %v1247_v59 = vld [vmem:[%s1828_s18] ss:$0 sm:$0xff] }
 0x827   :  { %v1460_v63 = vpop.eup %1459 }
 0x828   :  { %v930_v2 = vmul.f32 %v1460_v63, %v914_v49 }
 0x82a   :  { %v938_v4 = vmul.f32 %v1233_v62, %v930_v2 }
 0x82c   :  { %v946_v6 = vadd.f32 %v1234_v3, %v938_v4 }
 0x82e   :  { %v947_v7 = vpack.c.bf16 %v946_v6, %v945_v5 }
 0x830   :  { %1394 = vmatmul.mubr.msk.bf16.vlgmr.msra.gmra.mrb[24].mxu0 %vm211_vm3, %v947_v7 }
 0x831   :  { %1413 = vmatprep.mubr.msk.bf16.mxu0 %vm1466_vm0, %v1465_v0  ;;  %1410 = vmatpush3.bf16.msra.mxu0 %v1439_v43 }
 0x832   :  { %1411 = vmatprep.subr.bf16.mxu0 %v1465_v0  ;;  %v1246_v0 = vld [vmem:[%s1827_s16] ss:$0 sm:$0xff] }
 0x835   :  { %1412 = vmatpush3.bf16.msra.mxu0 %v1440_v44 }
 0x903   :  { %v1003_v11 = vpop.f32.mrb[24].mxu0 }
 0x904   :  { %v1004_v12 = vadd.f32 %v1235_v10, %v1003_v11  ;;  %v1395_v13 = vpop.f32.mrb[25].mxu0 }
 0x905   :  { %v1006_v14 = vpop.f32.mrb[26].mxu0 }
 0x906   :  { %v1007_v15 = vadd.f32 %v1235_v10, %v1006_v14  ;;  %v1396_v16 = vpop.f32.mrb[27].mxu0  ;;  %v1010_v17 = vmax.f32 %v1004_v12, 0.0 }
 0x908   :  { %v1011_v18 = vmax.f32 %v1007_v15, 0.0 }
 0x90a   :  { %v1012_v19 = vpack.c.bf16 %v1011_v18, %v1010_v17 }
 0x90c   :  { %1406 = vmatmul.mubr.msk.bf16.vlgmr.msra.gmra.mrb[32].mxu1 %vm1043_vm6, %v1012_v19 }
 0x9df   :  { %v1081_v23 = vpop.f32.mrb[32].mxu1 }
 0x9e0   :  { %v1082_v24 = vadd.f32 %v1239_v20, %v1081_v23  ;;  %v1407_v25 = vpop.f32.mrb[33].mxu1 }
 0x9e1   :  { %v1084_v26 = vpop.f32.mrb[34].mxu1 }
 0x9e2   :  { %v1085_v27 = vadd.f32 %v1239_v20, %v1084_v26  ;;  %v1408_v28 = vpop.f32.mrb[35].mxu1  ;;  %v1088_v30 = vadd.f32 %v1082_v24, %v945_v5 }
 0x9e4   :  { %v1090_v31 = vsel %vm211_vm3, %v1088_v30, 0.0  ;;  %v1089_v29 = vadd.f32 %v1085_v27, %v946_v6 }
 0x9e5   :  { %1091 = vadd.xlane.f32.xlu1 %v1090_v31 }
 0x9e6   :  { %v1093_v33 = vsel %vm211_vm3, %v1089_v29, 0.0 }
 0x9e7   :  { %1094 = vadd.xlane.f32.xlu0 %v1093_v33 }
 0xa72   :  { %v1092_v34 = vpop.xlane.xlu1 %1091 }
 0xa73   :  { %v1096_v35 = vmul.f32 0.03125, %v1092_v34 }
 0xa74   :  { %v1095_v21 = vpop.xlane.xlu0 %1094 }
 0xa75   :  { %v1098_v36 = vsub.f32 %v1088_v30, %v1096_v35  ;;  %v1097_v37 = vmul.f32 0.03125, %v1095_v21 }
 0xa77   :  { %v1099_v38 = vsub.f32 %v1089_v29, %v1097_v37  ;;  %v1100_v39 = vmul.f32 %v1098_v36, %v1098_v36 }
 0xa79   :  { %v1102_v40 = vsel %vm211_vm3, %v1100_v39, 0.0  ;;  %v1101_v41 = vmul.f32 %v1099_v38, %v1099_v38 }
 0xa7a   :  { %1103 = vadd.xlane.f32.xlu1 %v1102_v40 }
 0xa7b   :  { %v1105_v42 = vsel %vm211_vm3, %v1101_v41, 0.0 }
 0xa7c   :  { %1106 = vadd.xlane.f32.xlu0 %v1105_v42 }
 0xb07   :  { %v1104_v45 = vpop.xlane.xlu1 %1103 }
 0xb08   :  { %v1108_v46 = vmul.f32 0.03125, %v1104_v45 }
 0xb09   :  { %v1107_v47 = vpop.xlane.xlu0 %1106 }
 0xb0a   :  { %v1110_v48 = vadd.f32 1e-05, %v1108_v46  ;;  %v1109_v49 = vmul.f32 0.03125, %v1107_v47 }
 0xb0c   :  { %1461 = vrsqrt.f32 %v1110_v48  ;;  %v1111_v50 = vadd.f32 1e-05, %v1109_v49 }
 0xb0e   :  { %1463 = vrsqrt.f32 %v1111_v50 }
 0xb16   :  { %v1462_v51 = vpop.eup %1461 }
 0xb17   :  { %v1114_v53 = vmul.f32 %v1462_v51, %v1098_v36 }
 0xb18   :  { %v1464_v22 = vpop.eup %1463 }
 0xb19   :  { %v1122_v54 = vmul.f32 %v1245_v52, %v1114_v53  ;;  %v1115_v55 = vmul.f32 %v1464_v22, %v1099_v38 }
 0xb1b   :  { %v1123_v32 = vmul.f32 %v1245_v52, %v1115_v55  ;;  %v1130_v56 = vadd.f32 %v1246_v0, %v1122_v54 }
 0xb1d   :  { %v1131_v57 = vadd.f32 %v1246_v0, %v1123_v32 }
 0xb1f   :  { %v1132_v58 = vpack.c.bf16 %v1131_v57, %v1130_v56 }
 0xb21   :  { %1414 = vmatmul.mubr.msk.bf16.vlgmr.msra.gmra.mrb[28].mxu0 %vm211_vm3, %v1132_v58 }
 0xbf4   :  { %v1193_v60 = vpop.f32.mrb[28].mxu0 }
 0xbf5   :  { %v1194_v61 = vadd.f32 %v1247_v59, %v1193_v60  ;;  %v1415_v62 = vpop.f32.mrb[29].mxu0 }
 0xbf6   :  { %v1196_v63 = vpop.f32.mrb[30].mxu0 }
 0xbf7   :  { %1201 = vst.msk [vmem:[%s1829_s19] sm:$0xff] %vm1200_vm7, %v1194_v61  ;;  %v1197_v1 = vadd.f32 %v1247_v59, %v1196_v63  ;;  %v1416_v2 = vpop.f32.mrb[31].mxu0 }
 0xbf9   :  { %1202 = vst.msk [vmem:[%s1829_s19 + $0x8] sm:$0xff] %vm1200_vm7, %v1197_v1 }

</bundles_post_ra>
